<compile_context>
chip_gen: v6e
topology: v6e:2x2x1
jax: 0.10.0
libtpu: 0.0.40
codegen_flags: <defaults>
</compile_context>

<pallas_src>
import math

import jax
import jax.numpy as jnp
from jax import lax
from jax.experimental import pallas as pl
from jax.experimental.pallas import tpu as pltpu

# ----- hyperparameters (small, consistent with the module's __init__) --------
INPUT_SAMPLES = 16      # input_samples_num
KERNEL_SIZE   = 4       # conv_kernel_size
STRIDE        = 4       # conv_stride
IN_CHANNELS   = 4
D_MODEL       = 32
HEAD_NUM      = 4
NUM_LAYERS    = 2
DIM_FF        = 64

# TODO(synk): general conv_stride != conv_kernel_size would need an overlapping
# im2col gather; this config (stride == kernel, as in the module defaults) is a
# pure reshape.
assert INPUT_SAMPLES % KERNEL_SIZE == 0 and STRIDE == KERNEL_SIZE
TOKENS  = (INPUT_SAMPLES - KERNEL_SIZE) // STRIDE + 1   # token_number = 4
SEQ     = TOKENS + 1                                    # + cls token = 5
D_HEAD  = D_MODEL // HEAD_NUM                           # 8
CK      = IN_CHANNELS * KERNEL_SIZE                     # 16
LN_EPS  = 1e-5
LANE    = 128

# Max batch elements per grid step (working set ~10 MiB at 1024, well under the
# 32 MiB scoped VMEM default on v7x/v6e/v5e).
BLOCK_BATCH = 1024

# ----- packed-parameter layouts (row offsets; all multiples of 8) -------------
# bf16 weight blob with K = D_MODEL columns (torch (out, in) layout, unchanged)
W_IPW, W_OPW, W_F1W = 0, 3 * D_MODEL, 3 * D_MODEL + D_MODEL       # 0, 96, 128
W32_LAYER = 3 * D_MODEL + D_MODEL + DIM_FF                        # 192
OFF_HW    = NUM_LAYERS * W32_LAYER                                # 384
W32_ROWS  = OFF_HW + 8                                            # 392

# f32 column-vector blob (biases / LN params / cls / pe), shape (VEC_ROWS, 1)
OFF_CLS       = 0                                   # cls + pe[0]      (32)
OFF_PE        = D_MODEL                             # pe[1..TOKENS]    (128)
OFF_CONV_B    = OFF_PE + TOKENS * D_MODEL           # conv bias        (32)
OFF_LAYER_VEC = OFF_CONV_B + D_MODEL                # per-layer blocks
V_IPB  = 0
V_OPB  = 3 * D_MODEL
V_LN1W = V_OPB + D_MODEL
V_LN1B = V_LN1W + D_MODEL
V_F1B  = V_LN1B + D_MODEL
V_F2B  = V_F1B + DIM_FF
V_LN2W = V_F2B + D_MODEL
V_LN2B = V_LN2W + D_MODEL
VEC_LAYER = V_LN2B + D_MODEL                        # 352
OFF_HLNW = OFF_LAYER_VEC + NUM_LAYERS * VEC_LAYER
OFF_HLNB = OFF_HLNW + D_MODEL
OFF_HB   = OFF_HLNB + D_MODEL
VEC_ROWS = OFF_HB + 1


def _round_up(n, m):
    return ((n + m - 1) // m) * m


def _ln_cols(y, w, b):
    """LayerNorm over the feature (sublane) axis; y (D, N), w/b (D, 1), f32."""
    mu = jnp.mean(y, axis=0, keepdims=True)
    var = jnp.mean((y - mu) ** 2, axis=0, keepdims=True)
    return (y - mu) * lax.rsqrt(var + LN_EPS) * w + b


# ----------------------------- Pallas kernel ---------------------------------
def _kernel(patches_ref, w16_ref, w32_ref, w64_ref, vec_ref, out_ref):
    f32, bf16 = jnp.float32, jnp.bfloat16
    bt = out_ref.shape[1]                              # batch elements in block

    def col(off, n):                                   # (n, 1) f32 column vector
        return vec_ref[off:off + n, :]

    def mm(w, a):                                      # W (N,K) bf16 @ a (K, M) f32
        return jnp.dot(w, a.astype(bf16), preferred_element_type=f32)

    # ---- conv patch embedding + cls token + positional encoding -------------
    w_conv = w16_ref[...]                              # (D, CK) bf16
    conv_b = col(OFF_CONV_B, D_MODEL)
    cols = [jnp.broadcast_to(col(OFF_CLS, D_MODEL), (D_MODEL, bt))]  # cls + pe[0]
    for t in range(TOKENS):
        h_t = jnp.dot(w_conv, patches_ref[t], preferred_element_type=f32)
        h_t = jnp.maximum(h_t + conv_b, 0.0)
        cols.append(h_t + col(OFF_PE + t * D_MODEL, D_MODEL))
    # residual stream, feature-major: column s*bt + b  <->  (example b, seq s)
    x = jnp.concatenate(cols, axis=1)                  # (D, SEQ*bt) f32

    # ---- transformer encoder layers (post-norm, ReLU, eval dropout) ---------
    for l in range(NUM_LAYERS):
        wl = l * W32_LAYER
        vl = OFF_LAYER_VEC + l * VEC_LAYER
        ipw = w32_ref[wl + W_IPW: wl + W_IPW + 3 * D_MODEL, :]   # (96, 32)
        opw = w32_ref[wl + W_OPW: wl + W_OPW + D_MODEL, :]       # (32, 32)
        f1w = w32_ref[wl + W_F1W: wl + W_F1W + DIM_FF, :]        # (64, 32)
        f2w = w64_ref[l * D_MODEL:(l + 1) * D_MODEL, :]          # (32, 64)

        # in_proj, torch [q; k; v] row layout; q rows pre-scaled by 1/sqrt(dh)
        qkv = mm(ipw, x) + col(vl + V_IPB, 3 * D_MODEL)          # (96, SEQ*bt)
        q = qkv[0:D_MODEL, :]
        k = qkv[D_MODEL:2 * D_MODEL, :]
        v = qkv[2 * D_MODEL:3 * D_MODEL, :]

        def seq(m, s):                                           # free lane slice
            return m[:, s * bt:(s + 1) * bt]

        ctx_cols = []
        for i in range(SEQ):
            qi = seq(q, i)                                       # (D, bt)
            # scores for all heads: multiply + per-head (8-sublane) segment sum
            sc = []
            for j in range(SEQ):
                prod = qi * seq(k, j)                            # (D, bt) f32
                sc.append(jnp.sum(prod.reshape(HEAD_NUM, D_HEAD, bt), axis=1))
            # softmax over the 5 key positions: pure elementwise, lane-dense
            m_i = sc[0]
            for j in range(1, SEQ):
                m_i = jnp.maximum(m_i, sc[j])
            es = [jnp.exp(s_ - m_i) for s_ in sc]                # (H, bt) each
            den = es[0]
            for j in range(1, SEQ):
                den = den + es[j]
            inv = pl.reciprocal(den, approx=True)                # EUP slot
            # context: broadcast per-head prob over its 8 feature rows, MAC
            ctx = jnp.zeros((D_MODEL, bt), f32)
            for j in range(SEQ):
                a_bc = jnp.broadcast_to(
                    (es[j] * inv)[:, None, :],
                    (HEAD_NUM, D_HEAD, bt)).reshape(D_MODEL, bt)
                ctx = ctx + a_bc * seq(v, j)
            ctx_cols.append(ctx)
        ctx_all = jnp.concatenate(ctx_cols, axis=1)              # (D, SEQ*bt)

        attn = mm(opw, ctx_all) + col(vl + V_OPB, D_MODEL)
        x = _ln_cols(x + attn,
                     col(vl + V_LN1W, D_MODEL), col(vl + V_LN1B, D_MODEL))
        ff = jnp.maximum(mm(f1w, x) + col(vl + V_F1B, DIM_FF), 0.0)
        ff = mm(f2w, ff) + col(vl + V_F2B, D_MODEL)
        x = _ln_cols(x + ff,
                     col(vl + V_LN2W, D_MODEL), col(vl + V_LN2B, D_MODEL))

    # ---- regression head on the cls block (free lane slice), lane-dense out -
    cls_n = _ln_cols(x[:, 0:bt], col(OFF_HLNW, D_MODEL), col(OFF_HLNB, D_MODEL))
    hw = w32_ref[OFF_HW:OFF_HW + 8, :]                           # row 0 is real
    head = jnp.dot(hw, cls_n.astype(bf16), preferred_element_type=f32)
    out_ref[...] = (head[0:1, :] + col(OFF_HB, 1)).astype(out_ref.dtype)


# --------------------------- host-side helpers --------------------------------
def _im2col_feature_major(x):
    """x (B, C, L) f32 -> (TOKENS, C*K, B) bf16 patches (batch on lanes)."""
    b = x.shape[0]
    p = x.reshape(b, IN_CHANNELS, TOKENS, KERNEL_SIZE)
    p = p.transpose(2, 1, 3, 0).reshape(TOKENS, CK, b)
    return p.astype(jnp.bfloat16)


def pack_params(P):
    """Pack torch-like parameter arrays into 4 kernel inputs.

    Matmul weights stay in the torch (out, in) orientation (kernel computes
    W @ x), stored bf16; all bias/LN/pe/cls vectors become one f32 column blob.
    The 1/sqrt(d_head) attention scale is folded into the q projection.
    """
    bf16 = jnp.bfloat16
    scale = 1.0 / math.sqrt(D_HEAD)

    w16 = P["conv_w"].reshape(D_MODEL, CK).astype(bf16)          # Conv1d weight

    w32_rows, w64_rows = [], []
    for l in range(NUM_LAYERS):
        ipw = P["ipw"][l].at[:D_MODEL].multiply(scale)           # fold q scale
        w32_rows += [ipw, P["opw"][l], P["f1w"][l]]
        w64_rows.append(P["f2w"][l])
    w32_rows.append(jnp.pad(P["hw"], ((0, 7), (0, 0))))          # head weight
    w32 = jnp.concatenate(w32_rows, axis=0).astype(bf16)
    w64 = jnp.concatenate(w64_rows, axis=0).astype(bf16)

    def cvec(v):
        return jnp.asarray(v, jnp.float32).reshape(-1, 1)

    vec_rows = [
        cvec(P["cls"].reshape(D_MODEL) + P["pe"][0]),            # cls + pe[0]
        cvec(P["pe"][1:1 + TOKENS].reshape(-1)),                 # pe per token
        cvec(P["conv_b"]),
    ]
    for l in range(NUM_LAYERS):
        ipb = P["ipb"][l].at[:D_MODEL].multiply(scale)
        vec_rows += [cvec(ipb), cvec(P["opb"][l]),
                     cvec(P["ln1w"][l]), cvec(P["ln1b"][l]),
                     cvec(P["f1b"][l]), cvec(P["f2b"][l]),
                     cvec(P["ln2w"][l]), cvec(P["ln2b"][l])]
    vec_rows += [cvec(P["hlnw"]), cvec(P["hlnb"]), cvec(P["hb"])]
    vecs = jnp.concatenate(vec_rows, axis=0)

    assert w32.shape == (W32_ROWS, D_MODEL)
    assert w64.shape == (NUM_LAYERS * D_MODEL, DIM_FF)
    assert vecs.shape == (VEC_ROWS, 1)
    return {"w16": w16, "w32": w32, "w64": w64, "vecs": vecs}


def transformer_bpm_regressor(x, params, *, block_batch=BLOCK_BATCH):
    """x: (B, IN_CHANNELS, INPUT_SAMPLES) float32  ->  (B, 1) float32."""
    b = x.shape[0]
    assert x.shape[1:] == (IN_CHANNELS, INPUT_SAMPLES)

    bt = min(_round_up(b, LANE), block_batch)
    # prefer >=2 grid steps when there is enough work so the "parallel" grid
    # axis can shard across both TensorCores on v7x
    if -(-b // bt) == 1 and bt > LANE:
        bt = _round_up(-(-b // 2), LANE)
    nblk = -(-b // bt)
    b_pad = nblk * bt

    patches = _im2col_feature_major(x)
    if b_pad != b:
        patches = jnp.pad(patches, ((0, 0), (0, 0), (0, b_pad - b)))
    packed = pack_params(params)

    in_specs = [
        pl.BlockSpec((TOKENS, CK, bt), lambda g: (0, 0, g)),
        pl.BlockSpec((D_MODEL, CK), lambda g: (0, 0)),
        pl.BlockSpec((W32_ROWS, D_MODEL), lambda g: (0, 0)),
        pl.BlockSpec((NUM_LAYERS * D_MODEL, DIM_FF), lambda g: (0, 0)),
        pl.BlockSpec((VEC_ROWS, 1), lambda g: (0, 0)),
    ]
    out_spec = pl.BlockSpec((1, bt), lambda g: (0, g))   # lane-dense output row

    # advisory cost estimate so XLA's scheduler treats the call sensibly
    flops_ex = (2 * TOKENS * CK * D_MODEL
                + NUM_LAYERS * (2 * SEQ * D_MODEL * 3 * D_MODEL
                                + 4 * HEAD_NUM * SEQ * SEQ * D_HEAD
                                + 2 * SEQ * D_MODEL * D_MODEL
                                + 4 * SEQ * D_MODEL * DIM_FF)
                + 2 * D_MODEL)
    trans_ex = NUM_LAYERS * (HEAD_NUM * SEQ * SEQ + 3 * SEQ) + 3
    param_bytes = sum(int(v.size) * v.dtype.itemsize for v in packed.values())
    cost = pl.CostEstimate(
        flops=b_pad * flops_ex,
        transcendentals=b_pad * trans_ex,
        bytes_accessed=int(patches.size) * 2 + param_bytes + b_pad * 4)

    out = pl.pallas_call(
        _kernel,
        out_shape=jax.ShapeDtypeStruct((1, b_pad), jnp.float32),
        grid=(nblk,),
        in_specs=in_specs,
        out_specs=out_spec,
        compiler_params=pltpu.CompilerParams(
            dimension_semantics=("parallel",),
            vmem_limit_bytes=48 * 1024 * 1024),
        cost_estimate=cost,
    )(patches, packed["w16"], packed["w32"], packed["w64"], packed["vecs"])

    return out[0, :b].reshape(b, 1)


# ------------------------- parameters & pure-JAX reference --------------------
def make_params(key):
    """Deterministic synthetic parameters with PyTorch-equivalent shapes/layout."""
    ks = jax.random.split(key, 20)
    f32 = jnp.float32

    def rnd(k, shape, s=0.05):
        return jax.random.normal(k, shape, dtype=f32) * s

    position = jnp.arange(SEQ, dtype=f32)[:, None]
    div_term = jnp.exp(jnp.arange(0, D_MODEL, 2, dtype=f32)
                       * (-math.log(10000.0) / D_MODEL))
    pe = jnp.zeros((SEQ, D_MODEL), f32)
    pe = pe.at[:, 0::2].set(jnp.sin(position * div_term))
    pe = pe.at[:, 1::2].set(jnp.cos(position * div_term))

    return {
        "conv_w": rnd(ks[0], (D_MODEL, IN_CHANNELS, KERNEL_SIZE)),
        "conv_b": rnd(ks[1], (D_MODEL,)),
        "cls":    rnd(ks[2], (1, 1, D_MODEL), s=1.0),
        "pe":     pe,
        "ipw":    rnd(ks[3], (NUM_LAYERS, 3 * D_MODEL, D_MODEL)),
        "ipb":    rnd(ks[4], (NUM_LAYERS, 3 * D_MODEL)),
        "opw":    rnd(ks[5], (NUM_LAYERS, D_MODEL, D_MODEL)),
        "opb":    rnd(ks[6], (NUM_LAYERS, D_MODEL)),
        "ln1w":   1.0 + rnd(ks[7], (NUM_LAYERS, D_MODEL), s=0.1),
        "ln1b":   rnd(ks[8], (NUM_LAYERS, D_MODEL)),
        "f1w":    rnd(ks[9], (NUM_LAYERS, DIM_FF, D_MODEL)),
        "f1b":    rnd(ks[10], (NUM_LAYERS, DIM_FF)),
        "f2w":    rnd(ks[11], (NUM_LAYERS, D_MODEL, DIM_FF)),
        "f2b":    rnd(ks[12], (NUM_LAYERS, D_MODEL)),
        "ln2w":   1.0 + rnd(ks[13], (NUM_LAYERS, D_MODEL), s=0.1),
        "ln2b":   rnd(ks[14], (NUM_LAYERS, D_MODEL)),
        "hlnw":   1.0 + rnd(ks[15], (D_MODEL,), s=0.1),
        "hlnb":   rnd(ks[16], (D_MODEL,)),
        "hw":     rnd(ks[17], (1, D_MODEL)),
        "hb":     rnd(ks[18], (1,)),
    }


def _mm(a, b):
    return jnp.dot(a.astype(jnp.bfloat16), b.astype(jnp.bfloat16),
                   preferred_element_type=jnp.float32)


def _ln_last(y, w, b):
    mu = jnp.mean(y, axis=-1, keepdims=True)
    var = jnp.mean((y - mu) ** 2, axis=-1, keepdims=True)
    return (y - mu) * lax.rsqrt(var + LN_EPS) * w + b


def reference_forward(x, P):
    """Independent batch-major reference mirroring the PyTorch module
    (in_proj [q;k;v], post-norm, ReLU, eval dropout); bf16 at matmul inputs."""
    b = x.shape[0]
    patches = (x.reshape(b, IN_CHANNELS, TOKENS, KERNEL_SIZE)
                .transpose(0, 2, 1, 3).reshape(b, TOKENS, CK))
    h = jnp.maximum(_mm(patches, P["conv_w"].reshape(D_MODEL, CK).T)
                    + P["conv_b"], 0.0)
    cls = jnp.broadcast_to(P["cls"], (b, 1, D_MODEL))
    z = jnp.concatenate([cls, h], axis=1) + P["pe"][None]
    for l in range(NUM_LAYERS):
        qkv = _mm(z, P["ipw"][l].T) + P["ipb"][l]
        q, k, v = jnp.split(qkv, 3, axis=-1)

        def heads(t):
            return t.reshape(b, SEQ, HEAD_NUM, D_HEAD).transpose(0, 2, 1, 3)

        s = jnp.einsum("bhqd,bhkd->bhqk",
                       heads(q).astype(jnp.bfloat16),
                       heads(k).astype(jnp.bfloat16),
                       preferred_element_type=jnp.float32) / math.sqrt(D_HEAD)
        a = jax.nn.softmax(s, axis=-1)
        ctx = jnp.einsum("bhqk,bhkd->bhqd",
                         a.astype(jnp.bfloat16),
                         heads(v).astype(jnp.bfloat16),
                         preferred_element_type=jnp.float32)
        ctx = ctx.transpose(0, 2, 1, 3).reshape(b, SEQ, D_MODEL)
        attn = _mm(ctx, P["opw"][l].T) + P["opb"][l]
        z = _ln_last(z + attn, P["ln1w"][l], P["ln1b"][l])
        ff = jnp.maximum(_mm(z, P["f1w"][l].T) + P["f1b"][l], 0.0)
        ff = _mm(ff, P["f2w"][l].T) + P["f2b"][l]
        z = _ln_last(z + ff, P["ln2w"][l], P["ln2b"][l])
    cls_out = _ln_last(z[:, 0], P["hlnw"], P["hlnb"])
    return _mm(cls_out, P["hw"].T) + P["hb"]


if __name__ == "__main__":
    key = jax.random.PRNGKey(0)
    k_param, k_x1, k_x2 = jax.random.split(key, 3)
    params = make_params(k_param)

    # small shapes consistent with the module: batch=2, channels=4, samples=16
    x = jax.random.normal(k_x1, (2, IN_CHANNELS, INPUT_SAMPLES), dtype=jnp.float32)
    out = jax.block_until_ready(transformer_bpm_regressor(x, params))
    assert out.shape == (2, 1)
    ref = jax.block_until_ready(reference_forward(x, params))
    assert jnp.allclose(out, ref, rtol=2e-2, atol=2e-2), (out, ref)

    # multi-block + padded-tail path (2 grid steps of bt=128)
    x2 = jax.random.normal(k_x2, (130, IN_CHANNELS, INPUT_SAMPLES),
                           dtype=jnp.float32)
    out2 = jax.block_until_ready(transformer_bpm_regressor(x2, params))
    ref2 = jax.block_until_ready(reference_forward(x2, params))
    assert out2.shape == (130, 1)
    assert jnp.allclose(out2, ref2, rtol=2e-2, atol=2e-2)

    print("KERNEL_OK")
</pallas_src>

<mosaic_0001>
module attributes {stable_mosaic.version = 11 : i64} {
  func.func @_kernel(%arg0: i32, %arg1: memref<4x16x128xbf16, #tpu.memory_space<vmem>>, %arg2: memref<32x16xbf16, #tpu.memory_space<vmem>>, %arg3: memref<392x32xbf16, #tpu.memory_space<vmem>>, %arg4: memref<64x64xbf16, #tpu.memory_space<vmem>>, %arg5: memref<961x1xf32, #tpu.memory_space<vmem>>, %arg6: memref<1x128xf32, #tpu.memory_space<vmem>>) attributes {dimension_semantics = [#tpu.dimension_semantics<parallel>], iteration_bounds = array<i64: 1>, scalar_prefetch = 0 : i64, scratch_operands = 0 : i64, tpu.core_type = #tpu.core_type<tc>, window_params = [{transform_indices = @transform_0, window_bounds = array<i64: 4, 16, 128>}, {pipeline_mode = #tpu.pipeline_mode<synchronous>, transform_indices = @transform_1, window_bounds = array<i64: 32, 16>}, {pipeline_mode = #tpu.pipeline_mode<synchronous>, transform_indices = @transform_2, window_bounds = array<i64: 392, 32>}, {pipeline_mode = #tpu.pipeline_mode<synchronous>, transform_indices = @transform_3, window_bounds = array<i64: 64, 64>}, {pipeline_mode = #tpu.pipeline_mode<synchronous>, transform_indices = @transform_4, window_bounds = array<i64: 961, 1>}, {transform_indices = @transform_5, window_bounds = array<i64: 1, 128>}]} {
    %c0 = arith.constant 0 : index
    %c0_0 = arith.constant 0 : index
    %0 = vector.load %arg2[%c0, %c0_0] : memref<32x16xbf16, #tpu.memory_space<vmem>>, vector<32x16xbf16>
    %c160 = arith.constant 160 : index
    %c0_1 = arith.constant 0 : index
    %1 = vector.load %arg5[%c160, %c0_1] : memref<961x1xf32, #tpu.memory_space<vmem>>, vector<32x1xf32>
    %c0_2 = arith.constant 0 : index
    %c0_3 = arith.constant 0 : index
    %2 = vector.load %arg5[%c0_2, %c0_3] : memref<961x1xf32, #tpu.memory_space<vmem>>, vector<32x1xf32>
    %3 = vector.shape_cast %2 : vector<32x1xf32> to vector<32x1xf32>
    %4 = vector.broadcast %3 : vector<32x1xf32> to vector<32x128xf32>
    %c0_4 = arith.constant 0 : index
    %c0_5 = arith.constant 0 : index
    %c0_6 = arith.constant 0 : index
    %5 = vector.load %arg1[%c0_4, %c0_5, %c0_6] : memref<4x16x128xbf16, #tpu.memory_space<vmem>>, vector<1x16x128xbf16>
    %6 = vector.shape_cast %5 : vector<1x16x128xbf16> to vector<16x128xbf16>
    %cst = arith.constant dense<0.000000e+00> : vector<32x128xf32>
    %7 = tpu.matmul %0, %6, %cst {dimension_numbers = #tpu.dot_dimension_numbers<[1], [0], [0], [1], [0, 0, 1, 1], [], []>} : vector<32x16xbf16>, vector<16x128xbf16>, vector<32x128xf32> -> vector<32x128xf32>
    %8 = vector.broadcast %1 : vector<32x1xf32> to vector<32x128xf32>
    %9 = arith.addf %7, %8 : vector<32x128xf32>
    %cst_7 = arith.constant 0.000000e+00 : f32
    %10 = vector.broadcast %cst_7 : f32 to vector<32x128xf32>
    %11 = arith.maximumf %9, %10 : vector<32x128xf32>
    %c32 = arith.constant 32 : index
    %c0_8 = arith.constant 0 : index
    %12 = vector.load %arg5[%c32, %c0_8] : memref<961x1xf32, #tpu.memory_space<vmem>>, vector<32x1xf32>
    %13 = vector.broadcast %12 : vector<32x1xf32> to vector<32x128xf32>
    %14 = arith.addf %11, %13 : vector<32x128xf32>
    %c1 = arith.constant 1 : index
    %c0_9 = arith.constant 0 : index
    %c0_10 = arith.constant 0 : index
    %15 = vector.load %arg1[%c1, %c0_9, %c0_10] : memref<4x16x128xbf16, #tpu.memory_space<vmem>>, vector<1x16x128xbf16>
    %16 = vector.shape_cast %15 : vector<1x16x128xbf16> to vector<16x128xbf16>
    %cst_11 = arith.constant dense<0.000000e+00> : vector<32x128xf32>
    %17 = tpu.matmul %0, %16, %cst_11 {dimension_numbers = #tpu.dot_dimension_numbers<[1], [0], [0], [1], [0, 0, 1, 1], [], []>} : vector<32x16xbf16>, vector<16x128xbf16>, vector<32x128xf32> -> vector<32x128xf32>
    %18 = vector.broadcast %1 : vector<32x1xf32> to vector<32x128xf32>
    %19 = arith.addf %17, %18 : vector<32x128xf32>
    %cst_12 = arith.constant 0.000000e+00 : f32
    %20 = vector.broadcast %cst_12 : f32 to vector<32x128xf32>
    %21 = arith.maximumf %19, %20 : vector<32x128xf32>
    %c64 = arith.constant 64 : index
    %c0_13 = arith.constant 0 : index
    %22 = vector.load %arg5[%c64, %c0_13] : memref<961x1xf32, #tpu.memory_space<vmem>>, vector<32x1xf32>
    %23 = vector.broadcast %22 : vector<32x1xf32> to vector<32x128xf32>
    %24 = arith.addf %21, %23 : vector<32x128xf32>
    %c2 = arith.constant 2 : index
    %c0_14 = arith.constant 0 : index
    %c0_15 = arith.constant 0 : index
    %25 = vector.load %arg1[%c2, %c0_14, %c0_15] : memref<4x16x128xbf16, #tpu.memory_space<vmem>>, vector<1x16x128xbf16>
    %26 = vector.shape_cast %25 : vector<1x16x128xbf16> to vector<16x128xbf16>
    %cst_16 = arith.constant dense<0.000000e+00> : vector<32x128xf32>
    %27 = tpu.matmul %0, %26, %cst_16 {dimension_numbers = #tpu.dot_dimension_numbers<[1], [0], [0], [1], [0, 0, 1, 1], [], []>} : vector<32x16xbf16>, vector<16x128xbf16>, vector<32x128xf32> -> vector<32x128xf32>
    %28 = vector.broadcast %1 : vector<32x1xf32> to vector<32x128xf32>
    %29 = arith.addf %27, %28 : vector<32x128xf32>
    %cst_17 = arith.constant 0.000000e+00 : f32
    %30 = vector.broadcast %cst_17 : f32 to vector<32x128xf32>
    %31 = arith.maximumf %29, %30 : vector<32x128xf32>
    %c96 = arith.constant 96 : index
    %c0_18 = arith.constant 0 : index
    %32 = vector.load %arg5[%c96, %c0_18] : memref<961x1xf32, #tpu.memory_space<vmem>>, vector<32x1xf32>
    %33 = vector.broadcast %32 : vector<32x1xf32> to vector<32x128xf32>
    %34 = arith.addf %31, %33 : vector<32x128xf32>
    %c3 = arith.constant 3 : index
    %c0_19 = arith.constant 0 : index
    %c0_20 = arith.constant 0 : index
    %35 = vector.load %arg1[%c3, %c0_19, %c0_20] : memref<4x16x128xbf16, #tpu.memory_space<vmem>>, vector<1x16x128xbf16>
    %36 = vector.shape_cast %35 : vector<1x16x128xbf16> to vector<16x128xbf16>
    %cst_21 = arith.constant dense<0.000000e+00> : vector<32x128xf32>
    %37 = tpu.matmul %0, %36, %cst_21 {dimension_numbers = #tpu.dot_dimension_numbers<[1], [0], [0], [1], [0, 0, 1, 1], [], []>} : vector<32x16xbf16>, vector<16x128xbf16>, vector<32x128xf32> -> vector<32x128xf32>
    %38 = vector.broadcast %1 : vector<32x1xf32> to vector<32x128xf32>
    %39 = arith.addf %37, %38 : vector<32x128xf32>
    %cst_22 = arith.constant 0.000000e+00 : f32
    %40 = vector.broadcast %cst_22 : f32 to vector<32x128xf32>
    %41 = arith.maximumf %39, %40 : vector<32x128xf32>
    %c128 = arith.constant 128 : index
    %c0_23 = arith.constant 0 : index
    %42 = vector.load %arg5[%c128, %c0_23] : memref<961x1xf32, #tpu.memory_space<vmem>>, vector<32x1xf32>
    %43 = vector.broadcast %42 : vector<32x1xf32> to vector<32x128xf32>
    %44 = arith.addf %41, %43 : vector<32x128xf32>
    %45 = tpu.concatenate %4, %14, %24, %34, %44 in 1 : vector<32x128xf32>, vector<32x128xf32>, vector<32x128xf32>, vector<32x128xf32>, vector<32x128xf32> -> vector<32x640xf32>
    %c0_24 = arith.constant 0 : index
    %c0_25 = arith.constant 0 : index
    %46 = vector.load %arg3[%c0_24, %c0_25] : memref<392x32xbf16, #tpu.memory_space<vmem>>, vector<96x32xbf16>
    %c96_26 = arith.constant 96 : index
    %c0_27 = arith.constant 0 : index
    %47 = vector.load %arg3[%c96_26, %c0_27] : memref<392x32xbf16, #tpu.memory_space<vmem>>, vector<32x32xbf16>
    %c128_28 = arith.constant 128 : index
    %c0_29 = arith.constant 0 : index
    %48 = vector.load %arg3[%c128_28, %c0_29] : memref<392x32xbf16, #tpu.memory_space<vmem>>, vector<64x32xbf16>
    %c0_30 = arith.constant 0 : index
    %c0_31 = arith.constant 0 : index
    %49 = vector.load %arg4[%c0_30, %c0_31] : memref<64x64xbf16, #tpu.memory_space<vmem>>, vector<32x64xbf16>
    %50 = arith.truncf %45 : vector<32x640xf32> to vector<32x640xbf16>
    %cst_32 = arith.constant dense<0.000000e+00> : vector<96x640xf32>
    %51 = tpu.matmul %46, %50, %cst_32 {dimension_numbers = #tpu.dot_dimension_numbers<[1], [0], [0], [1], [0, 0, 1, 1], [], []>} : vector<96x32xbf16>, vector<32x640xbf16>, vector<96x640xf32> -> vector<96x640xf32>
    %c192 = arith.constant 192 : index
    %c0_33 = arith.constant 0 : index
    %52 = vector.load %arg5[%c192, %c0_33] : memref<961x1xf32, #tpu.memory_space<vmem>>, vector<96x1xf32>
    %53 = vector.broadcast %52 : vector<96x1xf32> to vector<96x640xf32>
    %54 = arith.addf %51, %53 : vector<96x640xf32>
    %55 = vector.extract_strided_slice %54 {offsets = [0, 0], sizes = [32, 640], strides = [1, 1]} : vector<96x640xf32> to vector<32x640xf32>
    %56 = vector.extract_strided_slice %54 {offsets = [32, 0], sizes = [32, 640], strides = [1, 1]} : vector<96x640xf32> to vector<32x640xf32>
    %57 = vector.extract_strided_slice %54 {offsets = [64, 0], sizes = [32, 640], strides = [1, 1]} : vector<96x640xf32> to vector<32x640xf32>
    %58 = vector.extract_strided_slice %55 {offsets = [0, 0], sizes = [32, 128], strides = [1, 1]} : vector<32x640xf32> to vector<32x128xf32>
    %59 = vector.extract_strided_slice %56 {offsets = [0, 0], sizes = [32, 128], strides = [1, 1]} : vector<32x640xf32> to vector<32x128xf32>
    %60 = arith.mulf %58, %59 : vector<32x128xf32>
    %61 = vector.shape_cast %60 : vector<32x128xf32> to vector<4x8x128xf32>
    %cst_34 = arith.constant dense<0.000000e+00> : vector<4x128xf32>
    %62 = vector.multi_reduction <add>, %61, %cst_34 [1] : vector<4x8x128xf32> to vector<4x128xf32>
    %63 = vector.extract_strided_slice %56 {offsets = [0, 128], sizes = [32, 128], strides = [1, 1]} : vector<32x640xf32> to vector<32x128xf32>
    %64 = arith.mulf %58, %63 : vector<32x128xf32>
    %65 = vector.shape_cast %64 : vector<32x128xf32> to vector<4x8x128xf32>
    %cst_35 = arith.constant dense<0.000000e+00> : vector<4x128xf32>
    %66 = vector.multi_reduction <add>, %65, %cst_35 [1] : vector<4x8x128xf32> to vector<4x128xf32>
    %67 = vector.extract_strided_slice %56 {offsets = [0, 256], sizes = [32, 128], strides = [1, 1]} : vector<32x640xf32> to vector<32x128xf32>
    %68 = arith.mulf %58, %67 : vector<32x128xf32>
    %69 = vector.shape_cast %68 : vector<32x128xf32> to vector<4x8x128xf32>
    %cst_36 = arith.constant dense<0.000000e+00> : vector<4x128xf32>
    %70 = vector.multi_reduction <add>, %69, %cst_36 [1] : vector<4x8x128xf32> to vector<4x128xf32>
    %71 = vector.extract_strided_slice %56 {offsets = [0, 384], sizes = [32, 128], strides = [1, 1]} : vector<32x640xf32> to vector<32x128xf32>
    %72 = arith.mulf %58, %71 : vector<32x128xf32>
    %73 = vector.shape_cast %72 : vector<32x128xf32> to vector<4x8x128xf32>
    %cst_37 = arith.constant dense<0.000000e+00> : vector<4x128xf32>
    %74 = vector.multi_reduction <add>, %73, %cst_37 [1] : vector<4x8x128xf32> to vector<4x128xf32>
    %75 = vector.extract_strided_slice %56 {offsets = [0, 512], sizes = [32, 128], strides = [1, 1]} : vector<32x640xf32> to vector<32x128xf32>
    %76 = arith.mulf %58, %75 : vector<32x128xf32>
    %77 = vector.shape_cast %76 : vector<32x128xf32> to vector<4x8x128xf32>
    %cst_38 = arith.constant dense<0.000000e+00> : vector<4x128xf32>
    %78 = vector.multi_reduction <add>, %77, %cst_38 [1] : vector<4x8x128xf32> to vector<4x128xf32>
    %79 = arith.maximumf %62, %66 : vector<4x128xf32>
    %80 = arith.maximumf %79, %70 : vector<4x128xf32>
    %81 = arith.maximumf %80, %74 : vector<4x128xf32>
    %82 = arith.maximumf %81, %78 : vector<4x128xf32>
    %83 = arith.subf %62, %82 : vector<4x128xf32>
    %84 = math.exp %83 : vector<4x128xf32>
    %85 = arith.subf %66, %82 : vector<4x128xf32>
    %86 = math.exp %85 : vector<4x128xf32>
    %87 = arith.subf %70, %82 : vector<4x128xf32>
    %88 = math.exp %87 : vector<4x128xf32>
    %89 = arith.subf %74, %82 : vector<4x128xf32>
    %90 = math.exp %89 : vector<4x128xf32>
    %91 = arith.subf %78, %82 : vector<4x128xf32>
    %92 = math.exp %91 : vector<4x128xf32>
    %93 = arith.addf %84, %86 : vector<4x128xf32>
    %94 = arith.addf %93, %88 : vector<4x128xf32>
    %95 = arith.addf %94, %90 : vector<4x128xf32>
    %96 = arith.addf %95, %92 : vector<4x128xf32>
    %97 = tpu.reciprocal %96 {approx = true} : vector<4x128xf32> -> vector<4x128xf32>
    %cst_39 = arith.constant 0.000000e+00 : f32
    %98 = vector.broadcast %cst_39 : f32 to vector<32x128xf32>
    %99 = arith.mulf %84, %97 : vector<4x128xf32>
    %100 = vector.shape_cast %99 : vector<4x128xf32> to vector<4x1x128xf32>
    %101 = vector.shape_cast %100 : vector<4x1x128xf32> to vector<4x1x128xf32>
    %102 = vector.broadcast %101 : vector<4x1x128xf32> to vector<4x8x128xf32>
    %103 = vector.shape_cast %102 : vector<4x8x128xf32> to vector<32x128xf32>
    %104 = vector.extract_strided_slice %57 {offsets = [0, 0], sizes = [32, 128], strides = [1, 1]} : vector<32x640xf32> to vector<32x128xf32>
    %105 = arith.mulf %103, %104 : vector<32x128xf32>
    %106 = arith.addf %98, %105 : vector<32x128xf32>
    %107 = arith.mulf %86, %97 : vector<4x128xf32>
    %108 = vector.shape_cast %107 : vector<4x128xf32> to vector<4x1x128xf32>
    %109 = vector.shape_cast %108 : vector<4x1x128xf32> to vector<4x1x128xf32>
    %110 = vector.broadcast %109 : vector<4x1x128xf32> to vector<4x8x128xf32>
    %111 = vector.shape_cast %110 : vector<4x8x128xf32> to vector<32x128xf32>
    %112 = vector.extract_strided_slice %57 {offsets = [0, 128], sizes = [32, 128], strides = [1, 1]} : vector<32x640xf32> to vector<32x128xf32>
    %113 = arith.mulf %111, %112 : vector<32x128xf32>
    %114 = arith.addf %106, %113 : vector<32x128xf32>
    %115 = arith.mulf %88, %97 : vector<4x128xf32>
    %116 = vector.shape_cast %115 : vector<4x128xf32> to vector<4x1x128xf32>
    %117 = vector.shape_cast %116 : vector<4x1x128xf32> to vector<4x1x128xf32>
    %118 = vector.broadcast %117 : vector<4x1x128xf32> to vector<4x8x128xf32>
    %119 = vector.shape_cast %118 : vector<4x8x128xf32> to vector<32x128xf32>
    %120 = vector.extract_strided_slice %57 {offsets = [0, 256], sizes = [32, 128], strides = [1, 1]} : vector<32x640xf32> to vector<32x128xf32>
    %121 = arith.mulf %119, %120 : vector<32x128xf32>
    %122 = arith.addf %114, %121 : vector<32x128xf32>
    %123 = arith.mulf %90, %97 : vector<4x128xf32>
    %124 = vector.shape_cast %123 : vector<4x128xf32> to vector<4x1x128xf32>
    %125 = vector.shape_cast %124 : vector<4x1x128xf32> to vector<4x1x128xf32>
    %126 = vector.broadcast %125 : vector<4x1x128xf32> to vector<4x8x128xf32>
    %127 = vector.shape_cast %126 : vector<4x8x128xf32> to vector<32x128xf32>
    %128 = vector.extract_strided_slice %57 {offsets = [0, 384], sizes = [32, 128], strides = [1, 1]} : vector<32x640xf32> to vector<32x128xf32>
    %129 = arith.mulf %127, %128 : vector<32x128xf32>
    %130 = arith.addf %122, %129 : vector<32x128xf32>
    %131 = arith.mulf %92, %97 : vector<4x128xf32>
    %132 = vector.shape_cast %131 : vector<4x128xf32> to vector<4x1x128xf32>
    %133 = vector.shape_cast %132 : vector<4x1x128xf32> to vector<4x1x128xf32>
    %134 = vector.broadcast %133 : vector<4x1x128xf32> to vector<4x8x128xf32>
    %135 = vector.shape_cast %134 : vector<4x8x128xf32> to vector<32x128xf32>
    %136 = vector.extract_strided_slice %57 {offsets = [0, 512], sizes = [32, 128], strides = [1, 1]} : vector<32x640xf32> to vector<32x128xf32>
    %137 = arith.mulf %135, %136 : vector<32x128xf32>
    %138 = arith.addf %130, %137 : vector<32x128xf32>
    %139 = vector.extract_strided_slice %55 {offsets = [0, 128], sizes = [32, 128], strides = [1, 1]} : vector<32x640xf32> to vector<32x128xf32>
    %140 = vector.extract_strided_slice %56 {offsets = [0, 0], sizes = [32, 128], strides = [1, 1]} : vector<32x640xf32> to vector<32x128xf32>
    %141 = arith.mulf %139, %140 : vector<32x128xf32>
    %142 = vector.shape_cast %141 : vector<32x128xf32> to vector<4x8x128xf32>
    %cst_40 = arith.constant dense<0.000000e+00> : vector<4x128xf32>
    %143 = vector.multi_reduction <add>, %142, %cst_40 [1] : vector<4x8x128xf32> to vector<4x128xf32>
    %144 = vector.extract_strided_slice %56 {offsets = [0, 128], sizes = [32, 128], strides = [1, 1]} : vector<32x640xf32> to vector<32x128xf32>
    %145 = arith.mulf %139, %144 : vector<32x128xf32>
    %146 = vector.shape_cast %145 : vector<32x128xf32> to vector<4x8x128xf32>
    %cst_41 = arith.constant dense<0.000000e+00> : vector<4x128xf32>
    %147 = vector.multi_reduction <add>, %146, %cst_41 [1] : vector<4x8x128xf32> to vector<4x128xf32>
    %148 = vector.extract_strided_slice %56 {offsets = [0, 256], sizes = [32, 128], strides = [1, 1]} : vector<32x640xf32> to vector<32x128xf32>
    %149 = arith.mulf %139, %148 : vector<32x128xf32>
    %150 = vector.shape_cast %149 : vector<32x128xf32> to vector<4x8x128xf32>
    %cst_42 = arith.constant dense<0.000000e+00> : vector<4x128xf32>
    %151 = vector.multi_reduction <add>, %150, %cst_42 [1] : vector<4x8x128xf32> to vector<4x128xf32>
    %152 = vector.extract_strided_slice %56 {offsets = [0, 384], sizes = [32, 128], strides = [1, 1]} : vector<32x640xf32> to vector<32x128xf32>
    %153 = arith.mulf %139, %152 : vector<32x128xf32>
    %154 = vector.shape_cast %153 : vector<32x128xf32> to vector<4x8x128xf32>
    %cst_43 = arith.constant dense<0.000000e+00> : vector<4x128xf32>
    %155 = vector.multi_reduction <add>, %154, %cst_43 [1] : vector<4x8x128xf32> to vector<4x128xf32>
    %156 = vector.extract_strided_slice %56 {offsets = [0, 512], sizes = [32, 128], strides = [1, 1]} : vector<32x640xf32> to vector<32x128xf32>
    %157 = arith.mulf %139, %156 : vector<32x128xf32>
    %158 = vector.shape_cast %157 : vector<32x128xf32> to vector<4x8x128xf32>
    %cst_44 = arith.constant dense<0.000000e+00> : vector<4x128xf32>
    %159 = vector.multi_reduction <add>, %158, %cst_44 [1] : vector<4x8x128xf32> to vector<4x128xf32>
    %160 = arith.maximumf %143, %147 : vector<4x128xf32>
    %161 = arith.maximumf %160, %151 : vector<4x128xf32>
    %162 = arith.maximumf %161, %155 : vector<4x128xf32>
    %163 = arith.maximumf %162, %159 : vector<4x128xf32>
    %164 = arith.subf %143, %163 : vector<4x128xf32>
    %165 = math.exp %164 : vector<4x128xf32>
    %166 = arith.subf %147, %163 : vector<4x128xf32>
    %167 = math.exp %166 : vector<4x128xf32>
    %168 = arith.subf %151, %163 : vector<4x128xf32>
    %169 = math.exp %168 : vector<4x128xf32>
    %170 = arith.subf %155, %163 : vector<4x128xf32>
    %171 = math.exp %170 : vector<4x128xf32>
    %172 = arith.subf %159, %163 : vector<4x128xf32>
    %173 = math.exp %172 : vector<4x128xf32>
    %174 = arith.addf %165, %167 : vector<4x128xf32>
    %175 = arith.addf %174, %169 : vector<4x128xf32>
    %176 = arith.addf %175, %171 : vector<4x128xf32>
    %177 = arith.addf %176, %173 : vector<4x128xf32>
    %178 = tpu.reciprocal %177 {approx = true} : vector<4x128xf32> -> vector<4x128xf32>
    %cst_45 = arith.constant 0.000000e+00 : f32
    %179 = vector.broadcast %cst_45 : f32 to vector<32x128xf32>
    %180 = arith.mulf %165, %178 : vector<4x128xf32>
    %181 = vector.shape_cast %180 : vector<4x128xf32> to vector<4x1x128xf32>
    %182 = vector.shape_cast %181 : vector<4x1x128xf32> to vector<4x1x128xf32>
    %183 = vector.broadcast %182 : vector<4x1x128xf32> to vector<4x8x128xf32>
    %184 = vector.shape_cast %183 : vector<4x8x128xf32> to vector<32x128xf32>
    %185 = vector.extract_strided_slice %57 {offsets = [0, 0], sizes = [32, 128], strides = [1, 1]} : vector<32x640xf32> to vector<32x128xf32>
    %186 = arith.mulf %184, %185 : vector<32x128xf32>
    %187 = arith.addf %179, %186 : vector<32x128xf32>
    %188 = arith.mulf %167, %178 : vector<4x128xf32>
    %189 = vector.shape_cast %188 : vector<4x128xf32> to vector<4x1x128xf32>
    %190 = vector.shape_cast %189 : vector<4x1x128xf32> to vector<4x1x128xf32>
    %191 = vector.broadcast %190 : vector<4x1x128xf32> to vector<4x8x128xf32>
    %192 = vector.shape_cast %191 : vector<4x8x128xf32> to vector<32x128xf32>
    %193 = vector.extract_strided_slice %57 {offsets = [0, 128], sizes = [32, 128], strides = [1, 1]} : vector<32x640xf32> to vector<32x128xf32>
    %194 = arith.mulf %192, %193 : vector<32x128xf32>
    %195 = arith.addf %187, %194 : vector<32x128xf32>
    %196 = arith.mulf %169, %178 : vector<4x128xf32>
    %197 = vector.shape_cast %196 : vector<4x128xf32> to vector<4x1x128xf32>
    %198 = vector.shape_cast %197 : vector<4x1x128xf32> to vector<4x1x128xf32>
    %199 = vector.broadcast %198 : vector<4x1x128xf32> to vector<4x8x128xf32>
    %200 = vector.shape_cast %199 : vector<4x8x128xf32> to vector<32x128xf32>
    %201 = vector.extract_strided_slice %57 {offsets = [0, 256], sizes = [32, 128], strides = [1, 1]} : vector<32x640xf32> to vector<32x128xf32>
    %202 = arith.mulf %200, %201 : vector<32x128xf32>
    %203 = arith.addf %195, %202 : vector<32x128xf32>
    %204 = arith.mulf %171, %178 : vector<4x128xf32>
    %205 = vector.shape_cast %204 : vector<4x128xf32> to vector<4x1x128xf32>
    %206 = vector.shape_cast %205 : vector<4x1x128xf32> to vector<4x1x128xf32>
    %207 = vector.broadcast %206 : vector<4x1x128xf32> to vector<4x8x128xf32>
    %208 = vector.shape_cast %207 : vector<4x8x128xf32> to vector<32x128xf32>
    %209 = vector.extract_strided_slice %57 {offsets = [0, 384], sizes = [32, 128], strides = [1, 1]} : vector<32x640xf32> to vector<32x128xf32>
    %210 = arith.mulf %208, %209 : vector<32x128xf32>
    %211 = arith.addf %203, %210 : vector<32x128xf32>
    %212 = arith.mulf %173, %178 : vector<4x128xf32>
    %213 = vector.shape_cast %212 : vector<4x128xf32> to vector<4x1x128xf32>
    %214 = vector.shape_cast %213 : vector<4x1x128xf32> to vector<4x1x128xf32>
    %215 = vector.broadcast %214 : vector<4x1x128xf32> to vector<4x8x128xf32>
    %216 = vector.shape_cast %215 : vector<4x8x128xf32> to vector<32x128xf32>
    %217 = vector.extract_strided_slice %57 {offsets = [0, 512], sizes = [32, 128], strides = [1, 1]} : vector<32x640xf32> to vector<32x128xf32>
    %218 = arith.mulf %216, %217 : vector<32x128xf32>
    %219 = arith.addf %211, %218 : vector<32x128xf32>
    %220 = vector.extract_strided_slice %55 {offsets = [0, 256], sizes = [32, 128], strides = [1, 1]} : vector<32x640xf32> to vector<32x128xf32>
    %221 = vector.extract_strided_slice %56 {offsets = [0, 0], sizes = [32, 128], strides = [1, 1]} : vector<32x640xf32> to vector<32x128xf32>
    %222 = arith.mulf %220, %221 : vector<32x128xf32>
    %223 = vector.shape_cast %222 : vector<32x128xf32> to vector<4x8x128xf32>
    %cst_46 = arith.constant dense<0.000000e+00> : vector<4x128xf32>
    %224 = vector.multi_reduction <add>, %223, %cst_46 [1] : vector<4x8x128xf32> to vector<4x128xf32>
    %225 = vector.extract_strided_slice %56 {offsets = [0, 128], sizes = [32, 128], strides = [1, 1]} : vector<32x640xf32> to vector<32x128xf32>
    %226 = arith.mulf %220, %225 : vector<32x128xf32>
    %227 = vector.shape_cast %226 : vector<32x128xf32> to vector<4x8x128xf32>
    %cst_47 = arith.constant dense<0.000000e+00> : vector<4x128xf32>
    %228 = vector.multi_reduction <add>, %227, %cst_47 [1] : vector<4x8x128xf32> to vector<4x128xf32>
    %229 = vector.extract_strided_slice %56 {offsets = [0, 256], sizes = [32, 128], strides = [1, 1]} : vector<32x640xf32> to vector<32x128xf32>
    %230 = arith.mulf %220, %229 : vector<32x128xf32>
    %231 = vector.shape_cast %230 : vector<32x128xf32> to vector<4x8x128xf32>
    %cst_48 = arith.constant dense<0.000000e+00> : vector<4x128xf32>
    %232 = vector.multi_reduction <add>, %231, %cst_48 [1] : vector<4x8x128xf32> to vector<4x128xf32>
    %233 = vector.extract_strided_slice %56 {offsets = [0, 384], sizes = [32, 128], strides = [1, 1]} : vector<32x640xf32> to vector<32x128xf32>
    %234 = arith.mulf %220, %233 : vector<32x128xf32>
    %235 = vector.shape_cast %234 : vector<32x128xf32> to vector<4x8x128xf32>
    %cst_49 = arith.constant dense<0.000000e+00> : vector<4x128xf32>
    %236 = vector.multi_reduction <add>, %235, %cst_49 [1] : vector<4x8x128xf32> to vector<4x128xf32>
    %237 = vector.extract_strided_slice %56 {offsets = [0, 512], sizes = [32, 128], strides = [1, 1]} : vector<32x640xf32> to vector<32x128xf32>
    %238 = arith.mulf %220, %237 : vector<32x128xf32>
    %239 = vector.shape_cast %238 : vector<32x128xf32> to vector<4x8x128xf32>
    %cst_50 = arith.constant dense<0.000000e+00> : vector<4x128xf32>
    %240 = vector.multi_reduction <add>, %239, %cst_50 [1] : vector<4x8x128xf32> to vector<4x128xf32>
    %241 = arith.maximumf %224, %228 : vector<4x128xf32>
    %242 = arith.maximumf %241, %232 : vector<4x128xf32>
    %243 = arith.maximumf %242, %236 : vector<4x128xf32>
    %244 = arith.maximumf %243, %240 : vector<4x128xf32>
    %245 = arith.subf %224, %244 : vector<4x128xf32>
    %246 = math.exp %245 : vector<4x128xf32>
    %247 = arith.subf %228, %244 : vector<4x128xf32>
    %248 = math.exp %247 : vector<4x128xf32>
    %249 = arith.subf %232, %244 : vector<4x128xf32>
    %250 = math.exp %249 : vector<4x128xf32>
    %251 = arith.subf %236, %244 : vector<4x128xf32>
    %252 = math.exp %251 : vector<4x128xf32>
    %253 = arith.subf %240, %244 : vector<4x128xf32>
    %254 = math.exp %253 : vector<4x128xf32>
    %255 = arith.addf %246, %248 : vector<4x128xf32>
    %256 = arith.addf %255, %250 : vector<4x128xf32>
    %257 = arith.addf %256, %252 : vector<4x128xf32>
    %258 = arith.addf %257, %254 : vector<4x128xf32>
    %259 = tpu.reciprocal %258 {approx = true} : vector<4x128xf32> -> vector<4x128xf32>
    %cst_51 = arith.constant 0.000000e+00 : f32
    %260 = vector.broadcast %cst_51 : f32 to vector<32x128xf32>
    %261 = arith.mulf %246, %259 : vector<4x128xf32>
    %262 = vector.shape_cast %261 : vector<4x128xf32> to vector<4x1x128xf32>
    %263 = vector.shape_cast %262 : vector<4x1x128xf32> to vector<4x1x128xf32>
    %264 = vector.broadcast %263 : vector<4x1x128xf32> to vector<4x8x128xf32>
    %265 = vector.shape_cast %264 : vector<4x8x128xf32> to vector<32x128xf32>
    %266 = vector.extract_strided_slice %57 {offsets = [0, 0], sizes = [32, 128], strides = [1, 1]} : vector<32x640xf32> to vector<32x128xf32>
    %267 = arith.mulf %265, %266 : vector<32x128xf32>
    %268 = arith.addf %260, %267 : vector<32x128xf32>
    %269 = arith.mulf %248, %259 : vector<4x128xf32>
    %270 = vector.shape_cast %269 : vector<4x128xf32> to vector<4x1x128xf32>
    %271 = vector.shape_cast %270 : vector<4x1x128xf32> to vector<4x1x128xf32>
    %272 = vector.broadcast %271 : vector<4x1x128xf32> to vector<4x8x128xf32>
    %273 = vector.shape_cast %272 : vector<4x8x128xf32> to vector<32x128xf32>
    %274 = vector.extract_strided_slice %57 {offsets = [0, 128], sizes = [32, 128], strides = [1, 1]} : vector<32x640xf32> to vector<32x128xf32>
    %275 = arith.mulf %273, %274 : vector<32x128xf32>
    %276 = arith.addf %268, %275 : vector<32x128xf32>
    %277 = arith.mulf %250, %259 : vector<4x128xf32>
    %278 = vector.shape_cast %277 : vector<4x128xf32> to vector<4x1x128xf32>
    %279 = vector.shape_cast %278 : vector<4x1x128xf32> to vector<4x1x128xf32>
    %280 = vector.broadcast %279 : vector<4x1x128xf32> to vector<4x8x128xf32>
    %281 = vector.shape_cast %280 : vector<4x8x128xf32> to vector<32x128xf32>
    %282 = vector.extract_strided_slice %57 {offsets = [0, 256], sizes = [32, 128], strides = [1, 1]} : vector<32x640xf32> to vector<32x128xf32>
    %283 = arith.mulf %281, %282 : vector<32x128xf32>
    %284 = arith.addf %276, %283 : vector<32x128xf32>
    %285 = arith.mulf %252, %259 : vector<4x128xf32>
    %286 = vector.shape_cast %285 : vector<4x128xf32> to vector<4x1x128xf32>
    %287 = vector.shape_cast %286 : vector<4x1x128xf32> to vector<4x1x128xf32>
    %288 = vector.broadcast %287 : vector<4x1x128xf32> to vector<4x8x128xf32>
    %289 = vector.shape_cast %288 : vector<4x8x128xf32> to vector<32x128xf32>
    %290 = vector.extract_strided_slice %57 {offsets = [0, 384], sizes = [32, 128], strides = [1, 1]} : vector<32x640xf32> to vector<32x128xf32>
    %291 = arith.mulf %289, %290 : vector<32x128xf32>
    %292 = arith.addf %284, %291 : vector<32x128xf32>
    %293 = arith.mulf %254, %259 : vector<4x128xf32>
    %294 = vector.shape_cast %293 : vector<4x128xf32> to vector<4x1x128xf32>
    %295 = vector.shape_cast %294 : vector<4x1x128xf32> to vector<4x1x128xf32>
    %296 = vector.broadcast %295 : vector<4x1x128xf32> to vector<4x8x128xf32>
    %297 = vector.shape_cast %296 : vector<4x8x128xf32> to vector<32x128xf32>
    %298 = vector.extract_strided_slice %57 {offsets = [0, 512], sizes = [32, 128], strides = [1, 1]} : vector<32x640xf32> to vector<32x128xf32>
    %299 = arith.mulf %297, %298 : vector<32x128xf32>
    %300 = arith.addf %292, %299 : vector<32x128xf32>
    %301 = vector.extract_strided_slice %55 {offsets = [0, 384], sizes = [32, 128], strides = [1, 1]} : vector<32x640xf32> to vector<32x128xf32>
    %302 = vector.extract_strided_slice %56 {offsets = [0, 0], sizes = [32, 128], strides = [1, 1]} : vector<32x640xf32> to vector<32x128xf32>
    %303 = arith.mulf %301, %302 : vector<32x128xf32>
    %304 = vector.shape_cast %303 : vector<32x128xf32> to vector<4x8x128xf32>
    %cst_52 = arith.constant dense<0.000000e+00> : vector<4x128xf32>
    %305 = vector.multi_reduction <add>, %304, %cst_52 [1] : vector<4x8x128xf32> to vector<4x128xf32>
    %306 = vector.extract_strided_slice %56 {offsets = [0, 128], sizes = [32, 128], strides = [1, 1]} : vector<32x640xf32> to vector<32x128xf32>
    %307 = arith.mulf %301, %306 : vector<32x128xf32>
    %308 = vector.shape_cast %307 : vector<32x128xf32> to vector<4x8x128xf32>
    %cst_53 = arith.constant dense<0.000000e+00> : vector<4x128xf32>
    %309 = vector.multi_reduction <add>, %308, %cst_53 [1] : vector<4x8x128xf32> to vector<4x128xf32>
    %310 = vector.extract_strided_slice %56 {offsets = [0, 256], sizes = [32, 128], strides = [1, 1]} : vector<32x640xf32> to vector<32x128xf32>
    %311 = arith.mulf %301, %310 : vector<32x128xf32>
    %312 = vector.shape_cast %311 : vector<32x128xf32> to vector<4x8x128xf32>
    %cst_54 = arith.constant dense<0.000000e+00> : vector<4x128xf32>
    %313 = vector.multi_reduction <add>, %312, %cst_54 [1] : vector<4x8x128xf32> to vector<4x128xf32>
    %314 = vector.extract_strided_slice %56 {offsets = [0, 384], sizes = [32, 128], strides = [1, 1]} : vector<32x640xf32> to vector<32x128xf32>
    %315 = arith.mulf %301, %314 : vector<32x128xf32>
    %316 = vector.shape_cast %315 : vector<32x128xf32> to vector<4x8x128xf32>
    %cst_55 = arith.constant dense<0.000000e+00> : vector<4x128xf32>
    %317 = vector.multi_reduction <add>, %316, %cst_55 [1] : vector<4x8x128xf32> to vector<4x128xf32>
    %318 = vector.extract_strided_slice %56 {offsets = [0, 512], sizes = [32, 128], strides = [1, 1]} : vector<32x640xf32> to vector<32x128xf32>
    %319 = arith.mulf %301, %318 : vector<32x128xf32>
    %320 = vector.shape_cast %319 : vector<32x128xf32> to vector<4x8x128xf32>
    %cst_56 = arith.constant dense<0.000000e+00> : vector<4x128xf32>
    %321 = vector.multi_reduction <add>, %320, %cst_56 [1] : vector<4x8x128xf32> to vector<4x128xf32>
    %322 = arith.maximumf %305, %309 : vector<4x128xf32>
    %323 = arith.maximumf %322, %313 : vector<4x128xf32>
    %324 = arith.maximumf %323, %317 : vector<4x128xf32>
    %325 = arith.maximumf %324, %321 : vector<4x128xf32>
    %326 = arith.subf %305, %325 : vector<4x128xf32>
    %327 = math.exp %326 : vector<4x128xf32>
    %328 = arith.subf %309, %325 : vector<4x128xf32>
    %329 = math.exp %328 : vector<4x128xf32>
    %330 = arith.subf %313, %325 : vector<4x128xf32>
    %331 = math.exp %330 : vector<4x128xf32>
    %332 = arith.subf %317, %325 : vector<4x128xf32>
    %333 = math.exp %332 : vector<4x128xf32>
    %334 = arith.subf %321, %325 : vector<4x128xf32>
    %335 = math.exp %334 : vector<4x128xf32>
    %336 = arith.addf %327, %329 : vector<4x128xf32>
    %337 = arith.addf %336, %331 : vector<4x128xf32>
    %338 = arith.addf %337, %333 : vector<4x128xf32>
    %339 = arith.addf %338, %335 : vector<4x128xf32>
    %340 = tpu.reciprocal %339 {approx = true} : vector<4x128xf32> -> vector<4x128xf32>
    %cst_57 = arith.constant 0.000000e+00 : f32
    %341 = vector.broadcast %cst_57 : f32 to vector<32x128xf32>
    %342 = arith.mulf %327, %340 : vector<4x128xf32>
    %343 = vector.shape_cast %342 : vector<4x128xf32> to vector<4x1x128xf32>
    %344 = vector.shape_cast %343 : vector<4x1x128xf32> to vector<4x1x128xf32>
    %345 = vector.broadcast %344 : vector<4x1x128xf32> to vector<4x8x128xf32>
    %346 = vector.shape_cast %345 : vector<4x8x128xf32> to vector<32x128xf32>
    %347 = vector.extract_strided_slice %57 {offsets = [0, 0], sizes = [32, 128], strides = [1, 1]} : vector<32x640xf32> to vector<32x128xf32>
    %348 = arith.mulf %346, %347 : vector<32x128xf32>
    %349 = arith.addf %341, %348 : vector<32x128xf32>
    %350 = arith.mulf %329, %340 : vector<4x128xf32>
    %351 = vector.shape_cast %350 : vector<4x128xf32> to vector<4x1x128xf32>
    %352 = vector.shape_cast %351 : vector<4x1x128xf32> to vector<4x1x128xf32>
    %353 = vector.broadcast %352 : vector<4x1x128xf32> to vector<4x8x128xf32>
    %354 = vector.shape_cast %353 : vector<4x8x128xf32> to vector<32x128xf32>
    %355 = vector.extract_strided_slice %57 {offsets = [0, 128], sizes = [32, 128], strides = [1, 1]} : vector<32x640xf32> to vector<32x128xf32>
    %356 = arith.mulf %354, %355 : vector<32x128xf32>
    %357 = arith.addf %349, %356 : vector<32x128xf32>
    %358 = arith.mulf %331, %340 : vector<4x128xf32>
    %359 = vector.shape_cast %358 : vector<4x128xf32> to vector<4x1x128xf32>
    %360 = vector.shape_cast %359 : vector<4x1x128xf32> to vector<4x1x128xf32>
    %361 = vector.broadcast %360 : vector<4x1x128xf32> to vector<4x8x128xf32>
    %362 = vector.shape_cast %361 : vector<4x8x128xf32> to vector<32x128xf32>
    %363 = vector.extract_strided_slice %57 {offsets = [0, 256], sizes = [32, 128], strides = [1, 1]} : vector<32x640xf32> to vector<32x128xf32>
    %364 = arith.mulf %362, %363 : vector<32x128xf32>
    %365 = arith.addf %357, %364 : vector<32x128xf32>
    %366 = arith.mulf %333, %340 : vector<4x128xf32>
    %367 = vector.shape_cast %366 : vector<4x128xf32> to vector<4x1x128xf32>
    %368 = vector.shape_cast %367 : vector<4x1x128xf32> to vector<4x1x128xf32>
    %369 = vector.broadcast %368 : vector<4x1x128xf32> to vector<4x8x128xf32>
    %370 = vector.shape_cast %369 : vector<4x8x128xf32> to vector<32x128xf32>
    %371 = vector.extract_strided_slice %57 {offsets = [0, 384], sizes = [32, 128], strides = [1, 1]} : vector<32x640xf32> to vector<32x128xf32>
    %372 = arith.mulf %370, %371 : vector<32x128xf32>
    %373 = arith.addf %365, %372 : vector<32x128xf32>
    %374 = arith.mulf %335, %340 : vector<4x128xf32>
    %375 = vector.shape_cast %374 : vector<4x128xf32> to vector<4x1x128xf32>
    %376 = vector.shape_cast %375 : vector<4x1x128xf32> to vector<4x1x128xf32>
    %377 = vector.broadcast %376 : vector<4x1x128xf32> to vector<4x8x128xf32>
    %378 = vector.shape_cast %377 : vector<4x8x128xf32> to vector<32x128xf32>
    %379 = vector.extract_strided_slice %57 {offsets = [0, 512], sizes = [32, 128], strides = [1, 1]} : vector<32x640xf32> to vector<32x128xf32>
    %380 = arith.mulf %378, %379 : vector<32x128xf32>
    %381 = arith.addf %373, %380 : vector<32x128xf32>
    %382 = vector.extract_strided_slice %55 {offsets = [0, 512], sizes = [32, 128], strides = [1, 1]} : vector<32x640xf32> to vector<32x128xf32>
    %383 = vector.extract_strided_slice %56 {offsets = [0, 0], sizes = [32, 128], strides = [1, 1]} : vector<32x640xf32> to vector<32x128xf32>
    %384 = arith.mulf %382, %383 : vector<32x128xf32>
    %385 = vector.shape_cast %384 : vector<32x128xf32> to vector<4x8x128xf32>
    %cst_58 = arith.constant dense<0.000000e+00> : vector<4x128xf32>
    %386 = vector.multi_reduction <add>, %385, %cst_58 [1] : vector<4x8x128xf32> to vector<4x128xf32>
    %387 = vector.extract_strided_slice %56 {offsets = [0, 128], sizes = [32, 128], strides = [1, 1]} : vector<32x640xf32> to vector<32x128xf32>
    %388 = arith.mulf %382, %387 : vector<32x128xf32>
    %389 = vector.shape_cast %388 : vector<32x128xf32> to vector<4x8x128xf32>
    %cst_59 = arith.constant dense<0.000000e+00> : vector<4x128xf32>
    %390 = vector.multi_reduction <add>, %389, %cst_59 [1] : vector<4x8x128xf32> to vector<4x128xf32>
    %391 = vector.extract_strided_slice %56 {offsets = [0, 256], sizes = [32, 128], strides = [1, 1]} : vector<32x640xf32> to vector<32x128xf32>
    %392 = arith.mulf %382, %391 : vector<32x128xf32>
    %393 = vector.shape_cast %392 : vector<32x128xf32> to vector<4x8x128xf32>
    %cst_60 = arith.constant dense<0.000000e+00> : vector<4x128xf32>
    %394 = vector.multi_reduction <add>, %393, %cst_60 [1] : vector<4x8x128xf32> to vector<4x128xf32>
    %395 = vector.extract_strided_slice %56 {offsets = [0, 384], sizes = [32, 128], strides = [1, 1]} : vector<32x640xf32> to vector<32x128xf32>
    %396 = arith.mulf %382, %395 : vector<32x128xf32>
    %397 = vector.shape_cast %396 : vector<32x128xf32> to vector<4x8x128xf32>
    %cst_61 = arith.constant dense<0.000000e+00> : vector<4x128xf32>
    %398 = vector.multi_reduction <add>, %397, %cst_61 [1] : vector<4x8x128xf32> to vector<4x128xf32>
    %399 = vector.extract_strided_slice %56 {offsets = [0, 512], sizes = [32, 128], strides = [1, 1]} : vector<32x640xf32> to vector<32x128xf32>
    %400 = arith.mulf %382, %399 : vector<32x128xf32>
    %401 = vector.shape_cast %400 : vector<32x128xf32> to vector<4x8x128xf32>
    %cst_62 = arith.constant dense<0.000000e+00> : vector<4x128xf32>
    %402 = vector.multi_reduction <add>, %401, %cst_62 [1] : vector<4x8x128xf32> to vector<4x128xf32>
    %403 = arith.maximumf %386, %390 : vector<4x128xf32>
    %404 = arith.maximumf %403, %394 : vector<4x128xf32>
    %405 = arith.maximumf %404, %398 : vector<4x128xf32>
    %406 = arith.maximumf %405, %402 : vector<4x128xf32>
    %407 = arith.subf %386, %406 : vector<4x128xf32>
    %408 = math.exp %407 : vector<4x128xf32>
    %409 = arith.subf %390, %406 : vector<4x128xf32>
    %410 = math.exp %409 : vector<4x128xf32>
    %411 = arith.subf %394, %406 : vector<4x128xf32>
    %412 = math.exp %411 : vector<4x128xf32>
    %413 = arith.subf %398, %406 : vector<4x128xf32>
    %414 = math.exp %413 : vector<4x128xf32>
    %415 = arith.subf %402, %406 : vector<4x128xf32>
    %416 = math.exp %415 : vector<4x128xf32>
    %417 = arith.addf %408, %410 : vector<4x128xf32>
    %418 = arith.addf %417, %412 : vector<4x128xf32>
    %419 = arith.addf %418, %414 : vector<4x128xf32>
    %420 = arith.addf %419, %416 : vector<4x128xf32>
    %421 = tpu.reciprocal %420 {approx = true} : vector<4x128xf32> -> vector<4x128xf32>
    %cst_63 = arith.constant 0.000000e+00 : f32
    %422 = vector.broadcast %cst_63 : f32 to vector<32x128xf32>
    %423 = arith.mulf %408, %421 : vector<4x128xf32>
    %424 = vector.shape_cast %423 : vector<4x128xf32> to vector<4x1x128xf32>
    %425 = vector.shape_cast %424 : vector<4x1x128xf32> to vector<4x1x128xf32>
    %426 = vector.broadcast %425 : vector<4x1x128xf32> to vector<4x8x128xf32>
    %427 = vector.shape_cast %426 : vector<4x8x128xf32> to vector<32x128xf32>
    %428 = vector.extract_strided_slice %57 {offsets = [0, 0], sizes = [32, 128], strides = [1, 1]} : vector<32x640xf32> to vector<32x128xf32>
    %429 = arith.mulf %427, %428 : vector<32x128xf32>
    %430 = arith.addf %422, %429 : vector<32x128xf32>
    %431 = arith.mulf %410, %421 : vector<4x128xf32>
    %432 = vector.shape_cast %431 : vector<4x128xf32> to vector<4x1x128xf32>
    %433 = vector.shape_cast %432 : vector<4x1x128xf32> to vector<4x1x128xf32>
    %434 = vector.broadcast %433 : vector<4x1x128xf32> to vector<4x8x128xf32>
    %435 = vector.shape_cast %434 : vector<4x8x128xf32> to vector<32x128xf32>
    %436 = vector.extract_strided_slice %57 {offsets = [0, 128], sizes = [32, 128], strides = [1, 1]} : vector<32x640xf32> to vector<32x128xf32>
    %437 = arith.mulf %435, %436 : vector<32x128xf32>
    %438 = arith.addf %430, %437 : vector<32x128xf32>
    %439 = arith.mulf %412, %421 : vector<4x128xf32>
    %440 = vector.shape_cast %439 : vector<4x128xf32> to vector<4x1x128xf32>
    %441 = vector.shape_cast %440 : vector<4x1x128xf32> to vector<4x1x128xf32>
    %442 = vector.broadcast %441 : vector<4x1x128xf32> to vector<4x8x128xf32>
    %443 = vector.shape_cast %442 : vector<4x8x128xf32> to vector<32x128xf32>
    %444 = vector.extract_strided_slice %57 {offsets = [0, 256], sizes = [32, 128], strides = [1, 1]} : vector<32x640xf32> to vector<32x128xf32>
    %445 = arith.mulf %443, %444 : vector<32x128xf32>
    %446 = arith.addf %438, %445 : vector<32x128xf32>
    %447 = arith.mulf %414, %421 : vector<4x128xf32>
    %448 = vector.shape_cast %447 : vector<4x128xf32> to vector<4x1x128xf32>
    %449 = vector.shape_cast %448 : vector<4x1x128xf32> to vector<4x1x128xf32>
    %450 = vector.broadcast %449 : vector<4x1x128xf32> to vector<4x8x128xf32>
    %451 = vector.shape_cast %450 : vector<4x8x128xf32> to vector<32x128xf32>
    %452 = vector.extract_strided_slice %57 {offsets = [0, 384], sizes = [32, 128], strides = [1, 1]} : vector<32x640xf32> to vector<32x128xf32>
    %453 = arith.mulf %451, %452 : vector<32x128xf32>
    %454 = arith.addf %446, %453 : vector<32x128xf32>
    %455 = arith.mulf %416, %421 : vector<4x128xf32>
    %456 = vector.shape_cast %455 : vector<4x128xf32> to vector<4x1x128xf32>
    %457 = vector.shape_cast %456 : vector<4x1x128xf32> to vector<4x1x128xf32>
    %458 = vector.broadcast %457 : vector<4x1x128xf32> to vector<4x8x128xf32>
    %459 = vector.shape_cast %458 : vector<4x8x128xf32> to vector<32x128xf32>
    %460 = vector.extract_strided_slice %57 {offsets = [0, 512], sizes = [32, 128], strides = [1, 1]} : vector<32x640xf32> to vector<32x128xf32>
    %461 = arith.mulf %459, %460 : vector<32x128xf32>
    %462 = arith.addf %454, %461 : vector<32x128xf32>
    %463 = tpu.concatenate %138, %219, %300, %381, %462 in 1 : vector<32x128xf32>, vector<32x128xf32>, vector<32x128xf32>, vector<32x128xf32>, vector<32x128xf32> -> vector<32x640xf32>
    %464 = arith.truncf %463 : vector<32x640xf32> to vector<32x640xbf16>
    %cst_64 = arith.constant dense<0.000000e+00> : vector<32x640xf32>
    %465 = tpu.matmul %47, %464, %cst_64 {dimension_numbers = #tpu.dot_dimension_numbers<[1], [0], [0], [1], [0, 0, 1, 1], [], []>} : vector<32x32xbf16>, vector<32x640xbf16>, vector<32x640xf32> -> vector<32x640xf32>
    %c288 = arith.constant 288 : index
    %c0_65 = arith.constant 0 : index
    %466 = vector.load %arg5[%c288, %c0_65] : memref<961x1xf32, #tpu.memory_space<vmem>>, vector<32x1xf32>
    %467 = vector.broadcast %466 : vector<32x1xf32> to vector<32x640xf32>
    %468 = arith.addf %465, %467 : vector<32x640xf32>
    %469 = arith.addf %45, %468 : vector<32x640xf32>
    %c320 = arith.constant 320 : index
    %c0_66 = arith.constant 0 : index
    %470 = vector.load %arg5[%c320, %c0_66] : memref<961x1xf32, #tpu.memory_space<vmem>>, vector<32x1xf32>
    %c352 = arith.constant 352 : index
    %c0_67 = arith.constant 0 : index
    %471 = vector.load %arg5[%c352, %c0_67] : memref<961x1xf32, #tpu.memory_space<vmem>>, vector<32x1xf32>
    %cst_68 = arith.constant dense<0.000000e+00> : vector<640xf32>
    %472 = vector.multi_reduction <add>, %469, %cst_68 [0] : vector<32x640xf32> to vector<640xf32>
    %473 = vector.shape_cast %472 : vector<640xf32> to vector<1x640xf32>
    %cst_69 = arith.constant 3.200000e+01 : f32
    %474 = vector.broadcast %cst_69 : f32 to vector<1x640xf32>
    %475 = arith.divf %473, %474 : vector<1x640xf32>
    %476 = vector.broadcast %475 : vector<1x640xf32> to vector<32x640xf32>
    %477 = arith.subf %469, %476 : vector<32x640xf32>
    %478 = arith.mulf %477, %477 : vector<32x640xf32>
    %cst_70 = arith.constant dense<0.000000e+00> : vector<640xf32>
    %479 = vector.multi_reduction <add>, %478, %cst_70 [0] : vector<32x640xf32> to vector<640xf32>
    %480 = vector.shape_cast %479 : vector<640xf32> to vector<1x640xf32>
    %cst_71 = arith.constant 3.200000e+01 : f32
    %481 = vector.broadcast %cst_71 : f32 to vector<1x640xf32>
    %482 = arith.divf %480, %481 : vector<1x640xf32>
    %483 = vector.broadcast %475 : vector<1x640xf32> to vector<32x640xf32>
    %484 = arith.subf %469, %483 : vector<32x640xf32>
    %cst_72 = arith.constant 9.99999974E-6 : f32
    %485 = vector.broadcast %cst_72 : f32 to vector<1x640xf32>
    %486 = arith.addf %482, %485 : vector<1x640xf32>
    %487 = math.rsqrt %486 : vector<1x640xf32>
    %488 = vector.broadcast %487 : vector<1x640xf32> to vector<32x640xf32>
    %489 = arith.mulf %484, %488 : vector<32x640xf32>
    %490 = vector.broadcast %470 : vector<32x1xf32> to vector<32x640xf32>
    %491 = arith.mulf %489, %490 : vector<32x640xf32>
    %492 = vector.broadcast %471 : vector<32x1xf32> to vector<32x640xf32>
    %493 = arith.addf %491, %492 : vector<32x640xf32>
    %494 = arith.truncf %493 : vector<32x640xf32> to vector<32x640xbf16>
    %cst_73 = arith.constant dense<0.000000e+00> : vector<64x640xf32>
    %495 = tpu.matmul %48, %494, %cst_73 {dimension_numbers = #tpu.dot_dimension_numbers<[1], [0], [0], [1], [0, 0, 1, 1], [], []>} : vector<64x32xbf16>, vector<32x640xbf16>, vector<64x640xf32> -> vector<64x640xf32>
    %c384 = arith.constant 384 : index
    %c0_74 = arith.constant 0 : index
    %496 = vector.load %arg5[%c384, %c0_74] : memref<961x1xf32, #tpu.memory_space<vmem>>, vector<64x1xf32>
    %497 = vector.broadcast %496 : vector<64x1xf32> to vector<64x640xf32>
    %498 = arith.addf %495, %497 : vector<64x640xf32>
    %cst_75 = arith.constant 0.000000e+00 : f32
    %499 = vector.broadcast %cst_75 : f32 to vector<64x640xf32>
    %500 = arith.maximumf %498, %499 : vector<64x640xf32>
    %501 = arith.truncf %500 : vector<64x640xf32> to vector<64x640xbf16>
    %cst_76 = arith.constant dense<0.000000e+00> : vector<32x640xf32>
    %502 = tpu.matmul %49, %501, %cst_76 {dimension_numbers = #tpu.dot_dimension_numbers<[1], [0], [0], [1], [0, 0, 1, 1], [], []>} : vector<32x64xbf16>, vector<64x640xbf16>, vector<32x640xf32> -> vector<32x640xf32>
    %c448 = arith.constant 448 : index
    %c0_77 = arith.constant 0 : index
    %503 = vector.load %arg5[%c448, %c0_77] : memref<961x1xf32, #tpu.memory_space<vmem>>, vector<32x1xf32>
    %504 = vector.broadcast %503 : vector<32x1xf32> to vector<32x640xf32>
    %505 = arith.addf %502, %504 : vector<32x640xf32>
    %506 = arith.addf %493, %505 : vector<32x640xf32>
    %c480 = arith.constant 480 : index
    %c0_78 = arith.constant 0 : index
    %507 = vector.load %arg5[%c480, %c0_78] : memref<961x1xf32, #tpu.memory_space<vmem>>, vector<32x1xf32>
    %c512 = arith.constant 512 : index
    %c0_79 = arith.constant 0 : index
    %508 = vector.load %arg5[%c512, %c0_79] : memref<961x1xf32, #tpu.memory_space<vmem>>, vector<32x1xf32>
    %cst_80 = arith.constant dense<0.000000e+00> : vector<640xf32>
    %509 = vector.multi_reduction <add>, %506, %cst_80 [0] : vector<32x640xf32> to vector<640xf32>
    %510 = vector.shape_cast %509 : vector<640xf32> to vector<1x640xf32>
    %cst_81 = arith.constant 3.200000e+01 : f32
    %511 = vector.broadcast %cst_81 : f32 to vector<1x640xf32>
    %512 = arith.divf %510, %511 : vector<1x640xf32>
    %513 = vector.broadcast %512 : vector<1x640xf32> to vector<32x640xf32>
    %514 = arith.subf %506, %513 : vector<32x640xf32>
    %515 = arith.mulf %514, %514 : vector<32x640xf32>
    %cst_82 = arith.constant dense<0.000000e+00> : vector<640xf32>
    %516 = vector.multi_reduction <add>, %515, %cst_82 [0] : vector<32x640xf32> to vector<640xf32>
    %517 = vector.shape_cast %516 : vector<640xf32> to vector<1x640xf32>
    %cst_83 = arith.constant 3.200000e+01 : f32
    %518 = vector.broadcast %cst_83 : f32 to vector<1x640xf32>
    %519 = arith.divf %517, %518 : vector<1x640xf32>
    %520 = vector.broadcast %512 : vector<1x640xf32> to vector<32x640xf32>
    %521 = arith.subf %506, %520 : vector<32x640xf32>
    %cst_84 = arith.constant 9.99999974E-6 : f32
    %522 = vector.broadcast %cst_84 : f32 to vector<1x640xf32>
    %523 = arith.addf %519, %522 : vector<1x640xf32>
    %524 = math.rsqrt %523 : vector<1x640xf32>
    %525 = vector.broadcast %524 : vector<1x640xf32> to vector<32x640xf32>
    %526 = arith.mulf %521, %525 : vector<32x640xf32>
    %527 = vector.broadcast %507 : vector<32x1xf32> to vector<32x640xf32>
    %528 = arith.mulf %526, %527 : vector<32x640xf32>
    %529 = vector.broadcast %508 : vector<32x1xf32> to vector<32x640xf32>
    %530 = arith.addf %528, %529 : vector<32x640xf32>
    %c192_85 = arith.constant 192 : index
    %c0_86 = arith.constant 0 : index
    %531 = vector.load %arg3[%c192_85, %c0_86] : memref<392x32xbf16, #tpu.memory_space<vmem>>, vector<96x32xbf16>
    %c288_87 = arith.constant 288 : index
    %c0_88 = arith.constant 0 : index
    %532 = vector.load %arg3[%c288_87, %c0_88] : memref<392x32xbf16, #tpu.memory_space<vmem>>, vector<32x32xbf16>
    %c320_89 = arith.constant 320 : index
    %c0_90 = arith.constant 0 : index
    %533 = vector.load %arg3[%c320_89, %c0_90] : memref<392x32xbf16, #tpu.memory_space<vmem>>, vector<64x32xbf16>
    %c32_91 = arith.constant 32 : index
    %c0_92 = arith.constant 0 : index
    %534 = vector.load %arg4[%c32_91, %c0_92] : memref<64x64xbf16, #tpu.memory_space<vmem>>, vector<32x64xbf16>
    %535 = arith.truncf %530 : vector<32x640xf32> to vector<32x640xbf16>
    %cst_93 = arith.constant dense<0.000000e+00> : vector<96x640xf32>
    %536 = tpu.matmul %531, %535, %cst_93 {dimension_numbers = #tpu.dot_dimension_numbers<[1], [0], [0], [1], [0, 0, 1, 1], [], []>} : vector<96x32xbf16>, vector<32x640xbf16>, vector<96x640xf32> -> vector<96x640xf32>
    %c544 = arith.constant 544 : index
    %c0_94 = arith.constant 0 : index
    %537 = vector.load %arg5[%c544, %c0_94] : memref<961x1xf32, #tpu.memory_space<vmem>>, vector<96x1xf32>
    %538 = vector.broadcast %537 : vector<96x1xf32> to vector<96x640xf32>
    %539 = arith.addf %536, %538 : vector<96x640xf32>
    %540 = vector.extract_strided_slice %539 {offsets = [0, 0], sizes = [32, 640], strides = [1, 1]} : vector<96x640xf32> to vector<32x640xf32>
    %541 = vector.extract_strided_slice %539 {offsets = [32, 0], sizes = [32, 640], strides = [1, 1]} : vector<96x640xf32> to vector<32x640xf32>
    %542 = vector.extract_strided_slice %539 {offsets = [64, 0], sizes = [32, 640], strides = [1, 1]} : vector<96x640xf32> to vector<32x640xf32>
    %543 = vector.extract_strided_slice %540 {offsets = [0, 0], sizes = [32, 128], strides = [1, 1]} : vector<32x640xf32> to vector<32x128xf32>
    %544 = vector.extract_strided_slice %541 {offsets = [0, 0], sizes = [32, 128], strides = [1, 1]} : vector<32x640xf32> to vector<32x128xf32>
    %545 = arith.mulf %543, %544 : vector<32x128xf32>
    %546 = vector.shape_cast %545 : vector<32x128xf32> to vector<4x8x128xf32>
    %cst_95 = arith.constant dense<0.000000e+00> : vector<4x128xf32>
    %547 = vector.multi_reduction <add>, %546, %cst_95 [1] : vector<4x8x128xf32> to vector<4x128xf32>
    %548 = vector.extract_strided_slice %541 {offsets = [0, 128], sizes = [32, 128], strides = [1, 1]} : vector<32x640xf32> to vector<32x128xf32>
    %549 = arith.mulf %543, %548 : vector<32x128xf32>
    %550 = vector.shape_cast %549 : vector<32x128xf32> to vector<4x8x128xf32>
    %cst_96 = arith.constant dense<0.000000e+00> : vector<4x128xf32>
    %551 = vector.multi_reduction <add>, %550, %cst_96 [1] : vector<4x8x128xf32> to vector<4x128xf32>
    %552 = vector.extract_strided_slice %541 {offsets = [0, 256], sizes = [32, 128], strides = [1, 1]} : vector<32x640xf32> to vector<32x128xf32>
    %553 = arith.mulf %543, %552 : vector<32x128xf32>
    %554 = vector.shape_cast %553 : vector<32x128xf32> to vector<4x8x128xf32>
    %cst_97 = arith.constant dense<0.000000e+00> : vector<4x128xf32>
    %555 = vector.multi_reduction <add>, %554, %cst_97 [1] : vector<4x8x128xf32> to vector<4x128xf32>
    %556 = vector.extract_strided_slice %541 {offsets = [0, 384], sizes = [32, 128], strides = [1, 1]} : vector<32x640xf32> to vector<32x128xf32>
    %557 = arith.mulf %543, %556 : vector<32x128xf32>
    %558 = vector.shape_cast %557 : vector<32x128xf32> to vector<4x8x128xf32>
    %cst_98 = arith.constant dense<0.000000e+00> : vector<4x128xf32>
    %559 = vector.multi_reduction <add>, %558, %cst_98 [1] : vector<4x8x128xf32> to vector<4x128xf32>
    %560 = vector.extract_strided_slice %541 {offsets = [0, 512], sizes = [32, 128], strides = [1, 1]} : vector<32x640xf32> to vector<32x128xf32>
    %561 = arith.mulf %543, %560 : vector<32x128xf32>
    %562 = vector.shape_cast %561 : vector<32x128xf32> to vector<4x8x128xf32>
    %cst_99 = arith.constant dense<0.000000e+00> : vector<4x128xf32>
    %563 = vector.multi_reduction <add>, %562, %cst_99 [1] : vector<4x8x128xf32> to vector<4x128xf32>
    %564 = arith.maximumf %547, %551 : vector<4x128xf32>
    %565 = arith.maximumf %564, %555 : vector<4x128xf32>
    %566 = arith.maximumf %565, %559 : vector<4x128xf32>
    %567 = arith.maximumf %566, %563 : vector<4x128xf32>
    %568 = arith.subf %547, %567 : vector<4x128xf32>
    %569 = math.exp %568 : vector<4x128xf32>
    %570 = arith.subf %551, %567 : vector<4x128xf32>
    %571 = math.exp %570 : vector<4x128xf32>
    %572 = arith.subf %555, %567 : vector<4x128xf32>
    %573 = math.exp %572 : vector<4x128xf32>
    %574 = arith.subf %559, %567 : vector<4x128xf32>
    %575 = math.exp %574 : vector<4x128xf32>
    %576 = arith.subf %563, %567 : vector<4x128xf32>
    %577 = math.exp %576 : vector<4x128xf32>
    %578 = arith.addf %569, %571 : vector<4x128xf32>
    %579 = arith.addf %578, %573 : vector<4x128xf32>
    %580 = arith.addf %579, %575 : vector<4x128xf32>
    %581 = arith.addf %580, %577 : vector<4x128xf32>
    %582 = tpu.reciprocal %581 {approx = true} : vector<4x128xf32> -> vector<4x128xf32>
    %cst_100 = arith.constant 0.000000e+00 : f32
    %583 = vector.broadcast %cst_100 : f32 to vector<32x128xf32>
    %584 = arith.mulf %569, %582 : vector<4x128xf32>
    %585 = vector.shape_cast %584 : vector<4x128xf32> to vector<4x1x128xf32>
    %586 = vector.shape_cast %585 : vector<4x1x128xf32> to vector<4x1x128xf32>
    %587 = vector.broadcast %586 : vector<4x1x128xf32> to vector<4x8x128xf32>
    %588 = vector.shape_cast %587 : vector<4x8x128xf32> to vector<32x128xf32>
    %589 = vector.extract_strided_slice %542 {offsets = [0, 0], sizes = [32, 128], strides = [1, 1]} : vector<32x640xf32> to vector<32x128xf32>
    %590 = arith.mulf %588, %589 : vector<32x128xf32>
    %591 = arith.addf %583, %590 : vector<32x128xf32>
    %592 = arith.mulf %571, %582 : vector<4x128xf32>
    %593 = vector.shape_cast %592 : vector<4x128xf32> to vector<4x1x128xf32>
    %594 = vector.shape_cast %593 : vector<4x1x128xf32> to vector<4x1x128xf32>
    %595 = vector.broadcast %594 : vector<4x1x128xf32> to vector<4x8x128xf32>
    %596 = vector.shape_cast %595 : vector<4x8x128xf32> to vector<32x128xf32>
    %597 = vector.extract_strided_slice %542 {offsets = [0, 128], sizes = [32, 128], strides = [1, 1]} : vector<32x640xf32> to vector<32x128xf32>
    %598 = arith.mulf %596, %597 : vector<32x128xf32>
    %599 = arith.addf %591, %598 : vector<32x128xf32>
    %600 = arith.mulf %573, %582 : vector<4x128xf32>
    %601 = vector.shape_cast %600 : vector<4x128xf32> to vector<4x1x128xf32>
    %602 = vector.shape_cast %601 : vector<4x1x128xf32> to vector<4x1x128xf32>
    %603 = vector.broadcast %602 : vector<4x1x128xf32> to vector<4x8x128xf32>
    %604 = vector.shape_cast %603 : vector<4x8x128xf32> to vector<32x128xf32>
    %605 = vector.extract_strided_slice %542 {offsets = [0, 256], sizes = [32, 128], strides = [1, 1]} : vector<32x640xf32> to vector<32x128xf32>
    %606 = arith.mulf %604, %605 : vector<32x128xf32>
    %607 = arith.addf %599, %606 : vector<32x128xf32>
    %608 = arith.mulf %575, %582 : vector<4x128xf32>
    %609 = vector.shape_cast %608 : vector<4x128xf32> to vector<4x1x128xf32>
    %610 = vector.shape_cast %609 : vector<4x1x128xf32> to vector<4x1x128xf32>
    %611 = vector.broadcast %610 : vector<4x1x128xf32> to vector<4x8x128xf32>
    %612 = vector.shape_cast %611 : vector<4x8x128xf32> to vector<32x128xf32>
    %613 = vector.extract_strided_slice %542 {offsets = [0, 384], sizes = [32, 128], strides = [1, 1]} : vector<32x640xf32> to vector<32x128xf32>
    %614 = arith.mulf %612, %613 : vector<32x128xf32>
    %615 = arith.addf %607, %614 : vector<32x128xf32>
    %616 = arith.mulf %577, %582 : vector<4x128xf32>
    %617 = vector.shape_cast %616 : vector<4x128xf32> to vector<4x1x128xf32>
    %618 = vector.shape_cast %617 : vector<4x1x128xf32> to vector<4x1x128xf32>
    %619 = vector.broadcast %618 : vector<4x1x128xf32> to vector<4x8x128xf32>
    %620 = vector.shape_cast %619 : vector<4x8x128xf32> to vector<32x128xf32>
    %621 = vector.extract_strided_slice %542 {offsets = [0, 512], sizes = [32, 128], strides = [1, 1]} : vector<32x640xf32> to vector<32x128xf32>
    %622 = arith.mulf %620, %621 : vector<32x128xf32>
    %623 = arith.addf %615, %622 : vector<32x128xf32>
    %624 = vector.extract_strided_slice %540 {offsets = [0, 128], sizes = [32, 128], strides = [1, 1]} : vector<32x640xf32> to vector<32x128xf32>
    %625 = vector.extract_strided_slice %541 {offsets = [0, 0], sizes = [32, 128], strides = [1, 1]} : vector<32x640xf32> to vector<32x128xf32>
    %626 = arith.mulf %624, %625 : vector<32x128xf32>
    %627 = vector.shape_cast %626 : vector<32x128xf32> to vector<4x8x128xf32>
    %cst_101 = arith.constant dense<0.000000e+00> : vector<4x128xf32>
    %628 = vector.multi_reduction <add>, %627, %cst_101 [1] : vector<4x8x128xf32> to vector<4x128xf32>
    %629 = vector.extract_strided_slice %541 {offsets = [0, 128], sizes = [32, 128], strides = [1, 1]} : vector<32x640xf32> to vector<32x128xf32>
    %630 = arith.mulf %624, %629 : vector<32x128xf32>
    %631 = vector.shape_cast %630 : vector<32x128xf32> to vector<4x8x128xf32>
    %cst_102 = arith.constant dense<0.000000e+00> : vector<4x128xf32>
    %632 = vector.multi_reduction <add>, %631, %cst_102 [1] : vector<4x8x128xf32> to vector<4x128xf32>
    %633 = vector.extract_strided_slice %541 {offsets = [0, 256], sizes = [32, 128], strides = [1, 1]} : vector<32x640xf32> to vector<32x128xf32>
    %634 = arith.mulf %624, %633 : vector<32x128xf32>
    %635 = vector.shape_cast %634 : vector<32x128xf32> to vector<4x8x128xf32>
    %cst_103 = arith.constant dense<0.000000e+00> : vector<4x128xf32>
    %636 = vector.multi_reduction <add>, %635, %cst_103 [1] : vector<4x8x128xf32> to vector<4x128xf32>
    %637 = vector.extract_strided_slice %541 {offsets = [0, 384], sizes = [32, 128], strides = [1, 1]} : vector<32x640xf32> to vector<32x128xf32>
    %638 = arith.mulf %624, %637 : vector<32x128xf32>
    %639 = vector.shape_cast %638 : vector<32x128xf32> to vector<4x8x128xf32>
    %cst_104 = arith.constant dense<0.000000e+00> : vector<4x128xf32>
    %640 = vector.multi_reduction <add>, %639, %cst_104 [1] : vector<4x8x128xf32> to vector<4x128xf32>
    %641 = vector.extract_strided_slice %541 {offsets = [0, 512], sizes = [32, 128], strides = [1, 1]} : vector<32x640xf32> to vector<32x128xf32>
    %642 = arith.mulf %624, %641 : vector<32x128xf32>
    %643 = vector.shape_cast %642 : vector<32x128xf32> to vector<4x8x128xf32>
    %cst_105 = arith.constant dense<0.000000e+00> : vector<4x128xf32>
    %644 = vector.multi_reduction <add>, %643, %cst_105 [1] : vector<4x8x128xf32> to vector<4x128xf32>
    %645 = arith.maximumf %628, %632 : vector<4x128xf32>
    %646 = arith.maximumf %645, %636 : vector<4x128xf32>
    %647 = arith.maximumf %646, %640 : vector<4x128xf32>
    %648 = arith.maximumf %647, %644 : vector<4x128xf32>
    %649 = arith.subf %628, %648 : vector<4x128xf32>
    %650 = math.exp %649 : vector<4x128xf32>
    %651 = arith.subf %632, %648 : vector<4x128xf32>
    %652 = math.exp %651 : vector<4x128xf32>
    %653 = arith.subf %636, %648 : vector<4x128xf32>
    %654 = math.exp %653 : vector<4x128xf32>
    %655 = arith.subf %640, %648 : vector<4x128xf32>
    %656 = math.exp %655 : vector<4x128xf32>
    %657 = arith.subf %644, %648 : vector<4x128xf32>
    %658 = math.exp %657 : vector<4x128xf32>
    %659 = arith.addf %650, %652 : vector<4x128xf32>
    %660 = arith.addf %659, %654 : vector<4x128xf32>
    %661 = arith.addf %660, %656 : vector<4x128xf32>
    %662 = arith.addf %661, %658 : vector<4x128xf32>
    %663 = tpu.reciprocal %662 {approx = true} : vector<4x128xf32> -> vector<4x128xf32>
    %cst_106 = arith.constant 0.000000e+00 : f32
    %664 = vector.broadcast %cst_106 : f32 to vector<32x128xf32>
    %665 = arith.mulf %650, %663 : vector<4x128xf32>
    %666 = vector.shape_cast %665 : vector<4x128xf32> to vector<4x1x128xf32>
    %667 = vector.shape_cast %666 : vector<4x1x128xf32> to vector<4x1x128xf32>
    %668 = vector.broadcast %667 : vector<4x1x128xf32> to vector<4x8x128xf32>
    %669 = vector.shape_cast %668 : vector<4x8x128xf32> to vector<32x128xf32>
    %670 = vector.extract_strided_slice %542 {offsets = [0, 0], sizes = [32, 128], strides = [1, 1]} : vector<32x640xf32> to vector<32x128xf32>
    %671 = arith.mulf %669, %670 : vector<32x128xf32>
    %672 = arith.addf %664, %671 : vector<32x128xf32>
    %673 = arith.mulf %652, %663 : vector<4x128xf32>
    %674 = vector.shape_cast %673 : vector<4x128xf32> to vector<4x1x128xf32>
    %675 = vector.shape_cast %674 : vector<4x1x128xf32> to vector<4x1x128xf32>
    %676 = vector.broadcast %675 : vector<4x1x128xf32> to vector<4x8x128xf32>
    %677 = vector.shape_cast %676 : vector<4x8x128xf32> to vector<32x128xf32>
    %678 = vector.extract_strided_slice %542 {offsets = [0, 128], sizes = [32, 128], strides = [1, 1]} : vector<32x640xf32> to vector<32x128xf32>
    %679 = arith.mulf %677, %678 : vector<32x128xf32>
    %680 = arith.addf %672, %679 : vector<32x128xf32>
    %681 = arith.mulf %654, %663 : vector<4x128xf32>
    %682 = vector.shape_cast %681 : vector<4x128xf32> to vector<4x1x128xf32>
    %683 = vector.shape_cast %682 : vector<4x1x128xf32> to vector<4x1x128xf32>
    %684 = vector.broadcast %683 : vector<4x1x128xf32> to vector<4x8x128xf32>
    %685 = vector.shape_cast %684 : vector<4x8x128xf32> to vector<32x128xf32>
    %686 = vector.extract_strided_slice %542 {offsets = [0, 256], sizes = [32, 128], strides = [1, 1]} : vector<32x640xf32> to vector<32x128xf32>
    %687 = arith.mulf %685, %686 : vector<32x128xf32>
    %688 = arith.addf %680, %687 : vector<32x128xf32>
    %689 = arith.mulf %656, %663 : vector<4x128xf32>
    %690 = vector.shape_cast %689 : vector<4x128xf32> to vector<4x1x128xf32>
    %691 = vector.shape_cast %690 : vector<4x1x128xf32> to vector<4x1x128xf32>
    %692 = vector.broadcast %691 : vector<4x1x128xf32> to vector<4x8x128xf32>
    %693 = vector.shape_cast %692 : vector<4x8x128xf32> to vector<32x128xf32>
    %694 = vector.extract_strided_slice %542 {offsets = [0, 384], sizes = [32, 128], strides = [1, 1]} : vector<32x640xf32> to vector<32x128xf32>
    %695 = arith.mulf %693, %694 : vector<32x128xf32>
    %696 = arith.addf %688, %695 : vector<32x128xf32>
    %697 = arith.mulf %658, %663 : vector<4x128xf32>
    %698 = vector.shape_cast %697 : vector<4x128xf32> to vector<4x1x128xf32>
    %699 = vector.shape_cast %698 : vector<4x1x128xf32> to vector<4x1x128xf32>
    %700 = vector.broadcast %699 : vector<4x1x128xf32> to vector<4x8x128xf32>
    %701 = vector.shape_cast %700 : vector<4x8x128xf32> to vector<32x128xf32>
    %702 = vector.extract_strided_slice %542 {offsets = [0, 512], sizes = [32, 128], strides = [1, 1]} : vector<32x640xf32> to vector<32x128xf32>
    %703 = arith.mulf %701, %702 : vector<32x128xf32>
    %704 = arith.addf %696, %703 : vector<32x128xf32>
    %705 = vector.extract_strided_slice %540 {offsets = [0, 256], sizes = [32, 128], strides = [1, 1]} : vector<32x640xf32> to vector<32x128xf32>
    %706 = vector.extract_strided_slice %541 {offsets = [0, 0], sizes = [32, 128], strides = [1, 1]} : vector<32x640xf32> to vector<32x128xf32>
    %707 = arith.mulf %705, %706 : vector<32x128xf32>
    %708 = vector.shape_cast %707 : vector<32x128xf32> to vector<4x8x128xf32>
    %cst_107 = arith.constant dense<0.000000e+00> : vector<4x128xf32>
    %709 = vector.multi_reduction <add>, %708, %cst_107 [1] : vector<4x8x128xf32> to vector<4x128xf32>
    %710 = vector.extract_strided_slice %541 {offsets = [0, 128], sizes = [32, 128], strides = [1, 1]} : vector<32x640xf32> to vector<32x128xf32>
    %711 = arith.mulf %705, %710 : vector<32x128xf32>
    %712 = vector.shape_cast %711 : vector<32x128xf32> to vector<4x8x128xf32>
    %cst_108 = arith.constant dense<0.000000e+00> : vector<4x128xf32>
    %713 = vector.multi_reduction <add>, %712, %cst_108 [1] : vector<4x8x128xf32> to vector<4x128xf32>
    %714 = vector.extract_strided_slice %541 {offsets = [0, 256], sizes = [32, 128], strides = [1, 1]} : vector<32x640xf32> to vector<32x128xf32>
    %715 = arith.mulf %705, %714 : vector<32x128xf32>
    %716 = vector.shape_cast %715 : vector<32x128xf32> to vector<4x8x128xf32>
    %cst_109 = arith.constant dense<0.000000e+00> : vector<4x128xf32>
    %717 = vector.multi_reduction <add>, %716, %cst_109 [1] : vector<4x8x128xf32> to vector<4x128xf32>
    %718 = vector.extract_strided_slice %541 {offsets = [0, 384], sizes = [32, 128], strides = [1, 1]} : vector<32x640xf32> to vector<32x128xf32>
    %719 = arith.mulf %705, %718 : vector<32x128xf32>
    %720 = vector.shape_cast %719 : vector<32x128xf32> to vector<4x8x128xf32>
    %cst_110 = arith.constant dense<0.000000e+00> : vector<4x128xf32>
    %721 = vector.multi_reduction <add>, %720, %cst_110 [1] : vector<4x8x128xf32> to vector<4x128xf32>
    %722 = vector.extract_strided_slice %541 {offsets = [0, 512], sizes = [32, 128], strides = [1, 1]} : vector<32x640xf32> to vector<32x128xf32>
    %723 = arith.mulf %705, %722 : vector<32x128xf32>
    %724 = vector.shape_cast %723 : vector<32x128xf32> to vector<4x8x128xf32>
    %cst_111 = arith.constant dense<0.000000e+00> : vector<4x128xf32>
    %725 = vector.multi_reduction <add>, %724, %cst_111 [1] : vector<4x8x128xf32> to vector<4x128xf32>
    %726 = arith.maximumf %709, %713 : vector<4x128xf32>
    %727 = arith.maximumf %726, %717 : vector<4x128xf32>
    %728 = arith.maximumf %727, %721 : vector<4x128xf32>
    %729 = arith.maximumf %728, %725 : vector<4x128xf32>
    %730 = arith.subf %709, %729 : vector<4x128xf32>
    %731 = math.exp %730 : vector<4x128xf32>
    %732 = arith.subf %713, %729 : vector<4x128xf32>
    %733 = math.exp %732 : vector<4x128xf32>
    %734 = arith.subf %717, %729 : vector<4x128xf32>
    %735 = math.exp %734 : vector<4x128xf32>
    %736 = arith.subf %721, %729 : vector<4x128xf32>
    %737 = math.exp %736 : vector<4x128xf32>
    %738 = arith.subf %725, %729 : vector<4x128xf32>
    %739 = math.exp %738 : vector<4x128xf32>
    %740 = arith.addf %731, %733 : vector<4x128xf32>
    %741 = arith.addf %740, %735 : vector<4x128xf32>
    %742 = arith.addf %741, %737 : vector<4x128xf32>
    %743 = arith.addf %742, %739 : vector<4x128xf32>
    %744 = tpu.reciprocal %743 {approx = true} : vector<4x128xf32> -> vector<4x128xf32>
    %cst_112 = arith.constant 0.000000e+00 : f32
    %745 = vector.broadcast %cst_112 : f32 to vector<32x128xf32>
    %746 = arith.mulf %731, %744 : vector<4x128xf32>
    %747 = vector.shape_cast %746 : vector<4x128xf32> to vector<4x1x128xf32>
    %748 = vector.shape_cast %747 : vector<4x1x128xf32> to vector<4x1x128xf32>
    %749 = vector.broadcast %748 : vector<4x1x128xf32> to vector<4x8x128xf32>
    %750 = vector.shape_cast %749 : vector<4x8x128xf32> to vector<32x128xf32>
    %751 = vector.extract_strided_slice %542 {offsets = [0, 0], sizes = [32, 128], strides = [1, 1]} : vector<32x640xf32> to vector<32x128xf32>
    %752 = arith.mulf %750, %751 : vector<32x128xf32>
    %753 = arith.addf %745, %752 : vector<32x128xf32>
    %754 = arith.mulf %733, %744 : vector<4x128xf32>
    %755 = vector.shape_cast %754 : vector<4x128xf32> to vector<4x1x128xf32>
    %756 = vector.shape_cast %755 : vector<4x1x128xf32> to vector<4x1x128xf32>
    %757 = vector.broadcast %756 : vector<4x1x128xf32> to vector<4x8x128xf32>
    %758 = vector.shape_cast %757 : vector<4x8x128xf32> to vector<32x128xf32>
    %759 = vector.extract_strided_slice %542 {offsets = [0, 128], sizes = [32, 128], strides = [1, 1]} : vector<32x640xf32> to vector<32x128xf32>
    %760 = arith.mulf %758, %759 : vector<32x128xf32>
    %761 = arith.addf %753, %760 : vector<32x128xf32>
    %762 = arith.mulf %735, %744 : vector<4x128xf32>
    %763 = vector.shape_cast %762 : vector<4x128xf32> to vector<4x1x128xf32>
    %764 = vector.shape_cast %763 : vector<4x1x128xf32> to vector<4x1x128xf32>
    %765 = vector.broadcast %764 : vector<4x1x128xf32> to vector<4x8x128xf32>
    %766 = vector.shape_cast %765 : vector<4x8x128xf32> to vector<32x128xf32>
    %767 = vector.extract_strided_slice %542 {offsets = [0, 256], sizes = [32, 128], strides = [1, 1]} : vector<32x640xf32> to vector<32x128xf32>
    %768 = arith.mulf %766, %767 : vector<32x128xf32>
    %769 = arith.addf %761, %768 : vector<32x128xf32>
    %770 = arith.mulf %737, %744 : vector<4x128xf32>
    %771 = vector.shape_cast %770 : vector<4x128xf32> to vector<4x1x128xf32>
    %772 = vector.shape_cast %771 : vector<4x1x128xf32> to vector<4x1x128xf32>
    %773 = vector.broadcast %772 : vector<4x1x128xf32> to vector<4x8x128xf32>
    %774 = vector.shape_cast %773 : vector<4x8x128xf32> to vector<32x128xf32>
    %775 = vector.extract_strided_slice %542 {offsets = [0, 384], sizes = [32, 128], strides = [1, 1]} : vector<32x640xf32> to vector<32x128xf32>
    %776 = arith.mulf %774, %775 : vector<32x128xf32>
    %777 = arith.addf %769, %776 : vector<32x128xf32>
    %778 = arith.mulf %739, %744 : vector<4x128xf32>
    %779 = vector.shape_cast %778 : vector<4x128xf32> to vector<4x1x128xf32>
    %780 = vector.shape_cast %779 : vector<4x1x128xf32> to vector<4x1x128xf32>
    %781 = vector.broadcast %780 : vector<4x1x128xf32> to vector<4x8x128xf32>
    %782 = vector.shape_cast %781 : vector<4x8x128xf32> to vector<32x128xf32>
    %783 = vector.extract_strided_slice %542 {offsets = [0, 512], sizes = [32, 128], strides = [1, 1]} : vector<32x640xf32> to vector<32x128xf32>
    %784 = arith.mulf %782, %783 : vector<32x128xf32>
    %785 = arith.addf %777, %784 : vector<32x128xf32>
    %786 = vector.extract_strided_slice %540 {offsets = [0, 384], sizes = [32, 128], strides = [1, 1]} : vector<32x640xf32> to vector<32x128xf32>
    %787 = vector.extract_strided_slice %541 {offsets = [0, 0], sizes = [32, 128], strides = [1, 1]} : vector<32x640xf32> to vector<32x128xf32>
    %788 = arith.mulf %786, %787 : vector<32x128xf32>
    %789 = vector.shape_cast %788 : vector<32x128xf32> to vector<4x8x128xf32>
    %cst_113 = arith.constant dense<0.000000e+00> : vector<4x128xf32>
    %790 = vector.multi_reduction <add>, %789, %cst_113 [1] : vector<4x8x128xf32> to vector<4x128xf32>
    %791 = vector.extract_strided_slice %541 {offsets = [0, 128], sizes = [32, 128], strides = [1, 1]} : vector<32x640xf32> to vector<32x128xf32>
    %792 = arith.mulf %786, %791 : vector<32x128xf32>
    %793 = vector.shape_cast %792 : vector<32x128xf32> to vector<4x8x128xf32>
    %cst_114 = arith.constant dense<0.000000e+00> : vector<4x128xf32>
    %794 = vector.multi_reduction <add>, %793, %cst_114 [1] : vector<4x8x128xf32> to vector<4x128xf32>
    %795 = vector.extract_strided_slice %541 {offsets = [0, 256], sizes = [32, 128], strides = [1, 1]} : vector<32x640xf32> to vector<32x128xf32>
    %796 = arith.mulf %786, %795 : vector<32x128xf32>
    %797 = vector.shape_cast %796 : vector<32x128xf32> to vector<4x8x128xf32>
    %cst_115 = arith.constant dense<0.000000e+00> : vector<4x128xf32>
    %798 = vector.multi_reduction <add>, %797, %cst_115 [1] : vector<4x8x128xf32> to vector<4x128xf32>
    %799 = vector.extract_strided_slice %541 {offsets = [0, 384], sizes = [32, 128], strides = [1, 1]} : vector<32x640xf32> to vector<32x128xf32>
    %800 = arith.mulf %786, %799 : vector<32x128xf32>
    %801 = vector.shape_cast %800 : vector<32x128xf32> to vector<4x8x128xf32>
    %cst_116 = arith.constant dense<0.000000e+00> : vector<4x128xf32>
    %802 = vector.multi_reduction <add>, %801, %cst_116 [1] : vector<4x8x128xf32> to vector<4x128xf32>
    %803 = vector.extract_strided_slice %541 {offsets = [0, 512], sizes = [32, 128], strides = [1, 1]} : vector<32x640xf32> to vector<32x128xf32>
    %804 = arith.mulf %786, %803 : vector<32x128xf32>
    %805 = vector.shape_cast %804 : vector<32x128xf32> to vector<4x8x128xf32>
    %cst_117 = arith.constant dense<0.000000e+00> : vector<4x128xf32>
    %806 = vector.multi_reduction <add>, %805, %cst_117 [1] : vector<4x8x128xf32> to vector<4x128xf32>
    %807 = arith.maximumf %790, %794 : vector<4x128xf32>
    %808 = arith.maximumf %807, %798 : vector<4x128xf32>
    %809 = arith.maximumf %808, %802 : vector<4x128xf32>
    %810 = arith.maximumf %809, %806 : vector<4x128xf32>
    %811 = arith.subf %790, %810 : vector<4x128xf32>
    %812 = math.exp %811 : vector<4x128xf32>
    %813 = arith.subf %794, %810 : vector<4x128xf32>
    %814 = math.exp %813 : vector<4x128xf32>
    %815 = arith.subf %798, %810 : vector<4x128xf32>
    %816 = math.exp %815 : vector<4x128xf32>
    %817 = arith.subf %802, %810 : vector<4x128xf32>
    %818 = math.exp %817 : vector<4x128xf32>
    %819 = arith.subf %806, %810 : vector<4x128xf32>
    %820 = math.exp %819 : vector<4x128xf32>
    %821 = arith.addf %812, %814 : vector<4x128xf32>
    %822 = arith.addf %821, %816 : vector<4x128xf32>
    %823 = arith.addf %822, %818 : vector<4x128xf32>
    %824 = arith.addf %823, %820 : vector<4x128xf32>
    %825 = tpu.reciprocal %824 {approx = true} : vector<4x128xf32> -> vector<4x128xf32>
    %cst_118 = arith.constant 0.000000e+00 : f32
    %826 = vector.broadcast %cst_118 : f32 to vector<32x128xf32>
    %827 = arith.mulf %812, %825 : vector<4x128xf32>
    %828 = vector.shape_cast %827 : vector<4x128xf32> to vector<4x1x128xf32>
    %829 = vector.shape_cast %828 : vector<4x1x128xf32> to vector<4x1x128xf32>
    %830 = vector.broadcast %829 : vector<4x1x128xf32> to vector<4x8x128xf32>
    %831 = vector.shape_cast %830 : vector<4x8x128xf32> to vector<32x128xf32>
    %832 = vector.extract_strided_slice %542 {offsets = [0, 0], sizes = [32, 128], strides = [1, 1]} : vector<32x640xf32> to vector<32x128xf32>
    %833 = arith.mulf %831, %832 : vector<32x128xf32>
    %834 = arith.addf %826, %833 : vector<32x128xf32>
    %835 = arith.mulf %814, %825 : vector<4x128xf32>
    %836 = vector.shape_cast %835 : vector<4x128xf32> to vector<4x1x128xf32>
    %837 = vector.shape_cast %836 : vector<4x1x128xf32> to vector<4x1x128xf32>
    %838 = vector.broadcast %837 : vector<4x1x128xf32> to vector<4x8x128xf32>
    %839 = vector.shape_cast %838 : vector<4x8x128xf32> to vector<32x128xf32>
    %840 = vector.extract_strided_slice %542 {offsets = [0, 128], sizes = [32, 128], strides = [1, 1]} : vector<32x640xf32> to vector<32x128xf32>
    %841 = arith.mulf %839, %840 : vector<32x128xf32>
    %842 = arith.addf %834, %841 : vector<32x128xf32>
    %843 = arith.mulf %816, %825 : vector<4x128xf32>
    %844 = vector.shape_cast %843 : vector<4x128xf32> to vector<4x1x128xf32>
    %845 = vector.shape_cast %844 : vector<4x1x128xf32> to vector<4x1x128xf32>
    %846 = vector.broadcast %845 : vector<4x1x128xf32> to vector<4x8x128xf32>
    %847 = vector.shape_cast %846 : vector<4x8x128xf32> to vector<32x128xf32>
    %848 = vector.extract_strided_slice %542 {offsets = [0, 256], sizes = [32, 128], strides = [1, 1]} : vector<32x640xf32> to vector<32x128xf32>
    %849 = arith.mulf %847, %848 : vector<32x128xf32>
    %850 = arith.addf %842, %849 : vector<32x128xf32>
    %851 = arith.mulf %818, %825 : vector<4x128xf32>
    %852 = vector.shape_cast %851 : vector<4x128xf32> to vector<4x1x128xf32>
    %853 = vector.shape_cast %852 : vector<4x1x128xf32> to vector<4x1x128xf32>
    %854 = vector.broadcast %853 : vector<4x1x128xf32> to vector<4x8x128xf32>
    %855 = vector.shape_cast %854 : vector<4x8x128xf32> to vector<32x128xf32>
    %856 = vector.extract_strided_slice %542 {offsets = [0, 384], sizes = [32, 128], strides = [1, 1]} : vector<32x640xf32> to vector<32x128xf32>
    %857 = arith.mulf %855, %856 : vector<32x128xf32>
    %858 = arith.addf %850, %857 : vector<32x128xf32>
    %859 = arith.mulf %820, %825 : vector<4x128xf32>
    %860 = vector.shape_cast %859 : vector<4x128xf32> to vector<4x1x128xf32>
    %861 = vector.shape_cast %860 : vector<4x1x128xf32> to vector<4x1x128xf32>
    %862 = vector.broadcast %861 : vector<4x1x128xf32> to vector<4x8x128xf32>
    %863 = vector.shape_cast %862 : vector<4x8x128xf32> to vector<32x128xf32>
    %864 = vector.extract_strided_slice %542 {offsets = [0, 512], sizes = [32, 128], strides = [1, 1]} : vector<32x640xf32> to vector<32x128xf32>
    %865 = arith.mulf %863, %864 : vector<32x128xf32>
    %866 = arith.addf %858, %865 : vector<32x128xf32>
    %867 = vector.extract_strided_slice %540 {offsets = [0, 512], sizes = [32, 128], strides = [1, 1]} : vector<32x640xf32> to vector<32x128xf32>
    %868 = vector.extract_strided_slice %541 {offsets = [0, 0], sizes = [32, 128], strides = [1, 1]} : vector<32x640xf32> to vector<32x128xf32>
    %869 = arith.mulf %867, %868 : vector<32x128xf32>
    %870 = vector.shape_cast %869 : vector<32x128xf32> to vector<4x8x128xf32>
    %cst_119 = arith.constant dense<0.000000e+00> : vector<4x128xf32>
    %871 = vector.multi_reduction <add>, %870, %cst_119 [1] : vector<4x8x128xf32> to vector<4x128xf32>
    %872 = vector.extract_strided_slice %541 {offsets = [0, 128], sizes = [32, 128], strides = [1, 1]} : vector<32x640xf32> to vector<32x128xf32>
    %873 = arith.mulf %867, %872 : vector<32x128xf32>
    %874 = vector.shape_cast %873 : vector<32x128xf32> to vector<4x8x128xf32>
    %cst_120 = arith.constant dense<0.000000e+00> : vector<4x128xf32>
    %875 = vector.multi_reduction <add>, %874, %cst_120 [1] : vector<4x8x128xf32> to vector<4x128xf32>
    %876 = vector.extract_strided_slice %541 {offsets = [0, 256], sizes = [32, 128], strides = [1, 1]} : vector<32x640xf32> to vector<32x128xf32>
    %877 = arith.mulf %867, %876 : vector<32x128xf32>
    %878 = vector.shape_cast %877 : vector<32x128xf32> to vector<4x8x128xf32>
    %cst_121 = arith.constant dense<0.000000e+00> : vector<4x128xf32>
    %879 = vector.multi_reduction <add>, %878, %cst_121 [1] : vector<4x8x128xf32> to vector<4x128xf32>
    %880 = vector.extract_strided_slice %541 {offsets = [0, 384], sizes = [32, 128], strides = [1, 1]} : vector<32x640xf32> to vector<32x128xf32>
    %881 = arith.mulf %867, %880 : vector<32x128xf32>
    %882 = vector.shape_cast %881 : vector<32x128xf32> to vector<4x8x128xf32>
    %cst_122 = arith.constant dense<0.000000e+00> : vector<4x128xf32>
    %883 = vector.multi_reduction <add>, %882, %cst_122 [1] : vector<4x8x128xf32> to vector<4x128xf32>
    %884 = vector.extract_strided_slice %541 {offsets = [0, 512], sizes = [32, 128], strides = [1, 1]} : vector<32x640xf32> to vector<32x128xf32>
    %885 = arith.mulf %867, %884 : vector<32x128xf32>
    %886 = vector.shape_cast %885 : vector<32x128xf32> to vector<4x8x128xf32>
    %cst_123 = arith.constant dense<0.000000e+00> : vector<4x128xf32>
    %887 = vector.multi_reduction <add>, %886, %cst_123 [1] : vector<4x8x128xf32> to vector<4x128xf32>
    %888 = arith.maximumf %871, %875 : vector<4x128xf32>
    %889 = arith.maximumf %888, %879 : vector<4x128xf32>
    %890 = arith.maximumf %889, %883 : vector<4x128xf32>
    %891 = arith.maximumf %890, %887 : vector<4x128xf32>
    %892 = arith.subf %871, %891 : vector<4x128xf32>
    %893 = math.exp %892 : vector<4x128xf32>
    %894 = arith.subf %875, %891 : vector<4x128xf32>
    %895 = math.exp %894 : vector<4x128xf32>
    %896 = arith.subf %879, %891 : vector<4x128xf32>
    %897 = math.exp %896 : vector<4x128xf32>
    %898 = arith.subf %883, %891 : vector<4x128xf32>
    %899 = math.exp %898 : vector<4x128xf32>
    %900 = arith.subf %887, %891 : vector<4x128xf32>
    %901 = math.exp %900 : vector<4x128xf32>
    %902 = arith.addf %893, %895 : vector<4x128xf32>
    %903 = arith.addf %902, %897 : vector<4x128xf32>
    %904 = arith.addf %903, %899 : vector<4x128xf32>
    %905 = arith.addf %904, %901 : vector<4x128xf32>
    %906 = tpu.reciprocal %905 {approx = true} : vector<4x128xf32> -> vector<4x128xf32>
    %cst_124 = arith.constant 0.000000e+00 : f32
    %907 = vector.broadcast %cst_124 : f32 to vector<32x128xf32>
    %908 = arith.mulf %893, %906 : vector<4x128xf32>
    %909 = vector.shape_cast %908 : vector<4x128xf32> to vector<4x1x128xf32>
    %910 = vector.shape_cast %909 : vector<4x1x128xf32> to vector<4x1x128xf32>
    %911 = vector.broadcast %910 : vector<4x1x128xf32> to vector<4x8x128xf32>
    %912 = vector.shape_cast %911 : vector<4x8x128xf32> to vector<32x128xf32>
    %913 = vector.extract_strided_slice %542 {offsets = [0, 0], sizes = [32, 128], strides = [1, 1]} : vector<32x640xf32> to vector<32x128xf32>
    %914 = arith.mulf %912, %913 : vector<32x128xf32>
    %915 = arith.addf %907, %914 : vector<32x128xf32>
    %916 = arith.mulf %895, %906 : vector<4x128xf32>
    %917 = vector.shape_cast %916 : vector<4x128xf32> to vector<4x1x128xf32>
    %918 = vector.shape_cast %917 : vector<4x1x128xf32> to vector<4x1x128xf32>
    %919 = vector.broadcast %918 : vector<4x1x128xf32> to vector<4x8x128xf32>
    %920 = vector.shape_cast %919 : vector<4x8x128xf32> to vector<32x128xf32>
    %921 = vector.extract_strided_slice %542 {offsets = [0, 128], sizes = [32, 128], strides = [1, 1]} : vector<32x640xf32> to vector<32x128xf32>
    %922 = arith.mulf %920, %921 : vector<32x128xf32>
    %923 = arith.addf %915, %922 : vector<32x128xf32>
    %924 = arith.mulf %897, %906 : vector<4x128xf32>
    %925 = vector.shape_cast %924 : vector<4x128xf32> to vector<4x1x128xf32>
    %926 = vector.shape_cast %925 : vector<4x1x128xf32> to vector<4x1x128xf32>
    %927 = vector.broadcast %926 : vector<4x1x128xf32> to vector<4x8x128xf32>
    %928 = vector.shape_cast %927 : vector<4x8x128xf32> to vector<32x128xf32>
    %929 = vector.extract_strided_slice %542 {offsets = [0, 256], sizes = [32, 128], strides = [1, 1]} : vector<32x640xf32> to vector<32x128xf32>
    %930 = arith.mulf %928, %929 : vector<32x128xf32>
    %931 = arith.addf %923, %930 : vector<32x128xf32>
    %932 = arith.mulf %899, %906 : vector<4x128xf32>
    %933 = vector.shape_cast %932 : vector<4x128xf32> to vector<4x1x128xf32>
    %934 = vector.shape_cast %933 : vector<4x1x128xf32> to vector<4x1x128xf32>
    %935 = vector.broadcast %934 : vector<4x1x128xf32> to vector<4x8x128xf32>
    %936 = vector.shape_cast %935 : vector<4x8x128xf32> to vector<32x128xf32>
    %937 = vector.extract_strided_slice %542 {offsets = [0, 384], sizes = [32, 128], strides = [1, 1]} : vector<32x640xf32> to vector<32x128xf32>
    %938 = arith.mulf %936, %937 : vector<32x128xf32>
    %939 = arith.addf %931, %938 : vector<32x128xf32>
    %940 = arith.mulf %901, %906 : vector<4x128xf32>
    %941 = vector.shape_cast %940 : vector<4x128xf32> to vector<4x1x128xf32>
    %942 = vector.shape_cast %941 : vector<4x1x128xf32> to vector<4x1x128xf32>
    %943 = vector.broadcast %942 : vector<4x1x128xf32> to vector<4x8x128xf32>
    %944 = vector.shape_cast %943 : vector<4x8x128xf32> to vector<32x128xf32>
    %945 = vector.extract_strided_slice %542 {offsets = [0, 512], sizes = [32, 128], strides = [1, 1]} : vector<32x640xf32> to vector<32x128xf32>
    %946 = arith.mulf %944, %945 : vector<32x128xf32>
    %947 = arith.addf %939, %946 : vector<32x128xf32>
    %948 = tpu.concatenate %623, %704, %785, %866, %947 in 1 : vector<32x128xf32>, vector<32x128xf32>, vector<32x128xf32>, vector<32x128xf32>, vector<32x128xf32> -> vector<32x640xf32>
    %949 = arith.truncf %948 : vector<32x640xf32> to vector<32x640xbf16>
    %cst_125 = arith.constant dense<0.000000e+00> : vector<32x640xf32>
    %950 = tpu.matmul %532, %949, %cst_125 {dimension_numbers = #tpu.dot_dimension_numbers<[1], [0], [0], [1], [0, 0, 1, 1], [], []>} : vector<32x32xbf16>, vector<32x640xbf16>, vector<32x640xf32> -> vector<32x640xf32>
    %c640 = arith.constant 640 : index
    %c0_126 = arith.constant 0 : index
    %951 = vector.load %arg5[%c640, %c0_126] : memref<961x1xf32, #tpu.memory_space<vmem>>, vector<32x1xf32>
    %952 = vector.broadcast %951 : vector<32x1xf32> to vector<32x640xf32>
    %953 = arith.addf %950, %952 : vector<32x640xf32>
    %954 = arith.addf %530, %953 : vector<32x640xf32>
    %c672 = arith.constant 672 : index
    %c0_127 = arith.constant 0 : index
    %955 = vector.load %arg5[%c672, %c0_127] : memref<961x1xf32, #tpu.memory_space<vmem>>, vector<32x1xf32>
    %c704 = arith.constant 704 : index
    %c0_128 = arith.constant 0 : index
    %956 = vector.load %arg5[%c704, %c0_128] : memref<961x1xf32, #tpu.memory_space<vmem>>, vector<32x1xf32>
    %cst_129 = arith.constant dense<0.000000e+00> : vector<640xf32>
    %957 = vector.multi_reduction <add>, %954, %cst_129 [0] : vector<32x640xf32> to vector<640xf32>
    %958 = vector.shape_cast %957 : vector<640xf32> to vector<1x640xf32>
    %cst_130 = arith.constant 3.200000e+01 : f32
    %959 = vector.broadcast %cst_130 : f32 to vector<1x640xf32>
    %960 = arith.divf %958, %959 : vector<1x640xf32>
    %961 = vector.broadcast %960 : vector<1x640xf32> to vector<32x640xf32>
    %962 = arith.subf %954, %961 : vector<32x640xf32>
    %963 = arith.mulf %962, %962 : vector<32x640xf32>
    %cst_131 = arith.constant dense<0.000000e+00> : vector<640xf32>
    %964 = vector.multi_reduction <add>, %963, %cst_131 [0] : vector<32x640xf32> to vector<640xf32>
    %965 = vector.shape_cast %964 : vector<640xf32> to vector<1x640xf32>
    %cst_132 = arith.constant 3.200000e+01 : f32
    %966 = vector.broadcast %cst_132 : f32 to vector<1x640xf32>
    %967 = arith.divf %965, %966 : vector<1x640xf32>
    %968 = vector.broadcast %960 : vector<1x640xf32> to vector<32x640xf32>
    %969 = arith.subf %954, %968 : vector<32x640xf32>
    %cst_133 = arith.constant 9.99999974E-6 : f32
    %970 = vector.broadcast %cst_133 : f32 to vector<1x640xf32>
    %971 = arith.addf %967, %970 : vector<1x640xf32>
    %972 = math.rsqrt %971 : vector<1x640xf32>
    %973 = vector.broadcast %972 : vector<1x640xf32> to vector<32x640xf32>
    %974 = arith.mulf %969, %973 : vector<32x640xf32>
    %975 = vector.broadcast %955 : vector<32x1xf32> to vector<32x640xf32>
    %976 = arith.mulf %974, %975 : vector<32x640xf32>
    %977 = vector.broadcast %956 : vector<32x1xf32> to vector<32x640xf32>
    %978 = arith.addf %976, %977 : vector<32x640xf32>
    %979 = arith.truncf %978 : vector<32x640xf32> to vector<32x640xbf16>
    %cst_134 = arith.constant dense<0.000000e+00> : vector<64x640xf32>
    %980 = tpu.matmul %533, %979, %cst_134 {dimension_numbers = #tpu.dot_dimension_numbers<[1], [0], [0], [1], [0, 0, 1, 1], [], []>} : vector<64x32xbf16>, vector<32x640xbf16>, vector<64x640xf32> -> vector<64x640xf32>
    %c736 = arith.constant 736 : index
    %c0_135 = arith.constant 0 : index
    %981 = vector.load %arg5[%c736, %c0_135] : memref<961x1xf32, #tpu.memory_space<vmem>>, vector<64x1xf32>
    %982 = vector.broadcast %981 : vector<64x1xf32> to vector<64x640xf32>
    %983 = arith.addf %980, %982 : vector<64x640xf32>
    %cst_136 = arith.constant 0.000000e+00 : f32
    %984 = vector.broadcast %cst_136 : f32 to vector<64x640xf32>
    %985 = arith.maximumf %983, %984 : vector<64x640xf32>
    %986 = arith.truncf %985 : vector<64x640xf32> to vector<64x640xbf16>
    %cst_137 = arith.constant dense<0.000000e+00> : vector<32x640xf32>
    %987 = tpu.matmul %534, %986, %cst_137 {dimension_numbers = #tpu.dot_dimension_numbers<[1], [0], [0], [1], [0, 0, 1, 1], [], []>} : vector<32x64xbf16>, vector<64x640xbf16>, vector<32x640xf32> -> vector<32x640xf32>
    %c800 = arith.constant 800 : index
    %c0_138 = arith.constant 0 : index
    %988 = vector.load %arg5[%c800, %c0_138] : memref<961x1xf32, #tpu.memory_space<vmem>>, vector<32x1xf32>
    %989 = vector.broadcast %988 : vector<32x1xf32> to vector<32x640xf32>
    %990 = arith.addf %987, %989 : vector<32x640xf32>
    %991 = arith.addf %978, %990 : vector<32x640xf32>
    %c832 = arith.constant 832 : index
    %c0_139 = arith.constant 0 : index
    %992 = vector.load %arg5[%c832, %c0_139] : memref<961x1xf32, #tpu.memory_space<vmem>>, vector<32x1xf32>
    %c864 = arith.constant 864 : index
    %c0_140 = arith.constant 0 : index
    %993 = vector.load %arg5[%c864, %c0_140] : memref<961x1xf32, #tpu.memory_space<vmem>>, vector<32x1xf32>
    %cst_141 = arith.constant dense<0.000000e+00> : vector<640xf32>
    %994 = vector.multi_reduction <add>, %991, %cst_141 [0] : vector<32x640xf32> to vector<640xf32>
    %995 = vector.shape_cast %994 : vector<640xf32> to vector<1x640xf32>
    %cst_142 = arith.constant 3.200000e+01 : f32
    %996 = vector.broadcast %cst_142 : f32 to vector<1x640xf32>
    %997 = arith.divf %995, %996 : vector<1x640xf32>
    %998 = vector.broadcast %997 : vector<1x640xf32> to vector<32x640xf32>
    %999 = arith.subf %991, %998 : vector<32x640xf32>
    %1000 = arith.mulf %999, %999 : vector<32x640xf32>
    %cst_143 = arith.constant dense<0.000000e+00> : vector<640xf32>
    %1001 = vector.multi_reduction <add>, %1000, %cst_143 [0] : vector<32x640xf32> to vector<640xf32>
    %1002 = vector.shape_cast %1001 : vector<640xf32> to vector<1x640xf32>
    %cst_144 = arith.constant 3.200000e+01 : f32
    %1003 = vector.broadcast %cst_144 : f32 to vector<1x640xf32>
    %1004 = arith.divf %1002, %1003 : vector<1x640xf32>
    %1005 = vector.broadcast %997 : vector<1x640xf32> to vector<32x640xf32>
    %1006 = arith.subf %991, %1005 : vector<32x640xf32>
    %cst_145 = arith.constant 9.99999974E-6 : f32
    %1007 = vector.broadcast %cst_145 : f32 to vector<1x640xf32>
    %1008 = arith.addf %1004, %1007 : vector<1x640xf32>
    %1009 = math.rsqrt %1008 : vector<1x640xf32>
    %1010 = vector.broadcast %1009 : vector<1x640xf32> to vector<32x640xf32>
    %1011 = arith.mulf %1006, %1010 : vector<32x640xf32>
    %1012 = vector.broadcast %992 : vector<32x1xf32> to vector<32x640xf32>
    %1013 = arith.mulf %1011, %1012 : vector<32x640xf32>
    %1014 = vector.broadcast %993 : vector<32x1xf32> to vector<32x640xf32>
    %1015 = arith.addf %1013, %1014 : vector<32x640xf32>
    %1016 = vector.extract_strided_slice %1015 {offsets = [0, 0], sizes = [32, 128], strides = [1, 1]} : vector<32x640xf32> to vector<32x128xf32>
    %c896 = arith.constant 896 : index
    %c0_146 = arith.constant 0 : index
    %1017 = vector.load %arg5[%c896, %c0_146] : memref<961x1xf32, #tpu.memory_space<vmem>>, vector<32x1xf32>
    %c928 = arith.constant 928 : index
    %c0_147 = arith.constant 0 : index
    %1018 = vector.load %arg5[%c928, %c0_147] : memref<961x1xf32, #tpu.memory_space<vmem>>, vector<32x1xf32>
    %cst_148 = arith.constant dense<0.000000e+00> : vector<128xf32>
    %1019 = vector.multi_reduction <add>, %1016, %cst_148 [0] : vector<32x128xf32> to vector<128xf32>
    %1020 = vector.shape_cast %1019 : vector<128xf32> to vector<1x128xf32>
    %cst_149 = arith.constant 3.200000e+01 : f32
    %1021 = vector.broadcast %cst_149 : f32 to vector<1x128xf32>
    %1022 = arith.divf %1020, %1021 : vector<1x128xf32>
    %1023 = vector.broadcast %1022 : vector<1x128xf32> to vector<32x128xf32>
    %1024 = arith.subf %1016, %1023 : vector<32x128xf32>
    %1025 = arith.mulf %1024, %1024 : vector<32x128xf32>
    %cst_150 = arith.constant dense<0.000000e+00> : vector<128xf32>
    %1026 = vector.multi_reduction <add>, %1025, %cst_150 [0] : vector<32x128xf32> to vector<128xf32>
    %1027 = vector.shape_cast %1026 : vector<128xf32> to vector<1x128xf32>
    %cst_151 = arith.constant 3.200000e+01 : f32
    %1028 = vector.broadcast %cst_151 : f32 to vector<1x128xf32>
    %1029 = arith.divf %1027, %1028 : vector<1x128xf32>
    %1030 = vector.broadcast %1022 : vector<1x128xf32> to vector<32x128xf32>
    %1031 = arith.subf %1016, %1030 : vector<32x128xf32>
    %cst_152 = arith.constant 9.99999974E-6 : f32
    %1032 = vector.broadcast %cst_152 : f32 to vector<1x128xf32>
    %1033 = arith.addf %1029, %1032 : vector<1x128xf32>
    %1034 = math.rsqrt %1033 : vector<1x128xf32>
    %1035 = vector.broadcast %1034 : vector<1x128xf32> to vector<32x128xf32>
    %1036 = arith.mulf %1031, %1035 : vector<32x128xf32>
    %1037 = vector.broadcast %1017 : vector<32x1xf32> to vector<32x128xf32>
    %1038 = arith.mulf %1036, %1037 : vector<32x128xf32>
    %1039 = vector.broadcast %1018 : vector<32x1xf32> to vector<32x128xf32>
    %1040 = arith.addf %1038, %1039 : vector<32x128xf32>
    %c384_153 = arith.constant 384 : index
    %c0_154 = arith.constant 0 : index
    %1041 = vector.load %arg3[%c384_153, %c0_154] : memref<392x32xbf16, #tpu.memory_space<vmem>>, vector<8x32xbf16>
    %1042 = arith.truncf %1040 : vector<32x128xf32> to vector<32x128xbf16>
    %cst_155 = arith.constant dense<0.000000e+00> : vector<8x128xf32>
    %1043 = tpu.matmul %1041, %1042, %cst_155 {dimension_numbers = #tpu.dot_dimension_numbers<[1], [0], [0], [1], [0, 0, 1, 1], [], []>} : vector<8x32xbf16>, vector<32x128xbf16>, vector<8x128xf32> -> vector<8x128xf32>
    %1044 = vector.extract_strided_slice %1043 {offsets = [0, 0], sizes = [1, 128], strides = [1, 1]} : vector<8x128xf32> to vector<1x128xf32>
    %c960 = arith.constant 960 : index
    %c0_156 = arith.constant 0 : index
    %1045 = vector.load %arg5[%c960, %c0_156] : memref<961x1xf32, #tpu.memory_space<vmem>>, vector<1x1xf32>
    %1046 = vector.broadcast %1045 : vector<1x1xf32> to vector<1x128xf32>
    %1047 = arith.addf %1044, %1046 : vector<1x128xf32>
    %c0_157 = arith.constant 0 : index
    %c0_158 = arith.constant 0 : index
    %1048 = vector.load %arg6[%c0_157, %c0_158] : memref<1x128xf32, #tpu.memory_space<vmem>>, vector<1x128xf32>
    tpu.vector_store %arg6[%c0_157, %c0_158], %1047 {strides = array<i32>} : memref<1x128xf32, #tpu.memory_space<vmem>>, vector<1x128xf32>,
    return
  }
  func.func @transform_0(%arg0: i32) -> (i32, i32, i32) {
    %c0_i32 = arith.constant 0 : i32
    %c0_i32_0 = arith.constant 0 : i32
    %c0_i32_1 = arith.constant 0 : i32
    return %c0_i32, %c0_i32_0, %arg0 : i32, i32, i32
  }
  func.func @transform_1(%arg0: i32) -> (i32, i32) {
    %c0_i32 = arith.constant 0 : i32
    %c0_i32_0 = arith.constant 0 : i32
    %c0_i32_1 = arith.constant 0 : i32
    return %c0_i32, %c0_i32_0 : i32, i32
  }
  func.func @transform_2(%arg0: i32) -> (i32, i32) {
    %c0_i32 = arith.constant 0 : i32
    %c0_i32_0 = arith.constant 0 : i32
    %c0_i32_1 = arith.constant 0 : i32
    return %c0_i32, %c0_i32_0 : i32, i32
  }
  func.func @transform_3(%arg0: i32) -> (i32, i32) {
    %c0_i32 = arith.constant 0 : i32
    %c0_i32_0 = arith.constant 0 : i32
    %c0_i32_1 = arith.constant 0 : i32
    return %c0_i32, %c0_i32_0 : i32, i32
  }
  func.func @transform_4(%arg0: i32) -> (i32, i32) {
    %c0_i32 = arith.constant 0 : i32
    %c0_i32_0 = arith.constant 0 : i32
    %c0_i32_1 = arith.constant 0 : i32
    return %c0_i32, %c0_i32_0 : i32, i32
  }
  func.func @transform_5(%arg0: i32) -> (i32, i32) {
    %c0_i32 = arith.constant 0 : i32
    %c0_i32_0 = arith.constant 0 : i32
    return %c0_i32, %arg0 : i32, i32
  }
}

</mosaic_0001>

<bundles_post_ra>
// kernel: tpu_custom_call.1
= control target key start
LH: loop header
LB: loop body
LE: loop exit
PB: predicated region body
PF: predicated region fallthrough
CT: control target
= control target key end

     0   :  { %v9907_v2 = vmov 0   ;;  %vm92_vm0 = vcmask 130048   ;;  %s9901_s0 = inlined_call_operand.vmem [shape: bf16[4,16,128], index: 0, kind: input, shape index: {}]   ;;  %s9902_s1 = inlined_call_operand.vmem [shape: bf16[32,16], index: 1, kind: input, shape index: {}]   ;;  %s9903_s2 = inlined_call_operand.vmem [shape: bf16[392,32], index: 2, kind: input, shape index: {}]   ;;  %s9904_s3 = inlined_call_operand.vmem [shape: bf16[64,64], index: 3, kind: input, shape index: {}]   ;;  %s9905_s4 = inlined_call_operand.vmem [shape: f32[961,1], index: 4, kind: input, shape index: {}]   ;;  %s9906_s5 = inlined_call_operand.hbm [shape: f32[1,128], index: 5, kind: output, shape index: {}]  }
   0x1   :  { %v28_v0 = vld [vmem:[%s9905_s4 + $0xb0] sm:$0xff]  ;;  %v26_v1 = vld [vmem:[%s9905_s4 + $0xa0] sm:$0xff]  ;;  %5704 = vset.pattern.permute.xlu1 %v9907_v2  ;;  %5703 = vset.pattern.permute.xlu0 %v9907_v2  ;;  %v5706_v4 = vld [vmem:[%s9901_s0 + $0x8] sm:$0xff]  }
   0x2   :  { %v5705_v3 = vld [vmem:[%s9901_s0] sm:$0xff]   ;;  %68 = vperm.xlu0 %5703, %v28_v0   ;;  %58 = vperm.xlu1 %5704, %v26_v1   ;;  %v29_v5 = vld [vmem:[%s9905_s4 + $0xb8] sm:$0xff]  ;;  %v27_v6 = vld [vmem:[%s9905_s4 + $0xa8] sm:$0xff] }
   0x3   :  { %5603 = vmatprep.subr.bf16.mxu0 %v5705_v3  ;;  %5609 = vmatprep.subr.bf16.mxu1 %v5706_v4  ;;  %v5707_v7 = vld [vmem:[%s9902_s1] sm:$0xff]   ;;  %v5708_v8 = vld [vmem:[%s9902_s1 + $0x8] sm:$0xff]   ;;  %v154_v9 = vld [vmem:[%s9905_s4 + $0x30] sm:$0xff] }
   0x4   :  { %5604 = vmatpush3.bf16.msra.mxu0 %v5705_v3  ;;  %5610 = vmatpush3.bf16.msra.mxu1 %v5706_v4  ;;  %v155_v10 = vld [vmem:[%s9905_s4 + $0x38] sm:$0xff]  ;;  %v5709_v11 = vld [vmem:[%s9901_s0 + $0x10] sm:$0xff]   ;;  %v152_v15 = vld [vmem:[%s9905_s4 + $0x20] sm:$0xff] }
   0x5   :  { %5605 = vmatprep.mubr.msk.bf16.mxu0 %vm92_vm0, %v5707_v7  ;;  %5611 = vmatprep.mubr.msk.bf16.mxu1 %vm92_vm0, %v5707_v7  ;;  %v5710_v12 = vld [vmem:[%s9901_s0 + $0x18] sm:$0xff]   ;;  %v32_v13 = vld [vmem:[%s9905_s4 + $0x10] sm:$0xff]  ;;  %v153_v16 = vld [vmem:[%s9905_s4 + $0x28] sm:$0xff] }
   0x6   :  { %73 = vperm.xlu0 %5703, %v29_v5   ;;  %63 = vperm.xlu1 %5704, %v27_v6   ;;  %v33_v14 = vld [vmem:[%s9905_s4 + $0x18] sm:$0xff]  ;;  %v30_v17 = vld [vmem:[%s9905_s4] sm:$0xff]  ;;  %v31_v18 = vld [vmem:[%s9905_s4 + $0x8] sm:$0xff] }
   0x7   :  { %5606 = vmatmul.mubr.msk.bf16.vlgmr.msra.gmra.mxu0 %vm92_vm0, %v5708_v8  ;;  %5612 = vmatmul.mubr.msk.bf16.vlgmr.msra.gmra.mxu1 %vm92_vm0, %v5708_v8  ;;  %v334_v19 = vld [vmem:[%s9905_s4 + $0x70] sm:$0xff]  ;;  %v335_v20 = vld [vmem:[%s9905_s4 + $0x78] sm:$0xff]  ;;  %v332_v23 = vld [vmem:[%s9905_s4 + $0x60] sm:$0xff] }
   0x8   :  { %5615 = vmatprep.subr.bf16.mxu0 %v5709_v11  ;;  %5621 = vmatprep.subr.bf16.mxu1 %v5710_v12  ;;  %v244_v21 = vld [vmem:[%s9905_s4 + $0x50] sm:$0xff]  ;;  %v245_v22 = vld [vmem:[%s9905_s4 + $0x58] sm:$0xff]  ;;  %v333_v24 = vld [vmem:[%s9905_s4 + $0x68] sm:$0xff] }
   0x9   :  { %5616 = vmatpush3.bf16.msra.mxu0 %v5709_v11  ;;  %5622 = vmatpush3.bf16.msra.mxu1 %v5710_v12  ;;  %v242_v25 = vld [vmem:[%s9905_s4 + $0x40] sm:$0xff]  ;;  %v243_v26 = vld [vmem:[%s9905_s4 + $0x48] sm:$0xff]  ;;  %v424_v27 = vld [vmem:[%s9905_s4 + $0x90] sm:$0xff] }
   0xa   :  { %168 = vperm.xlu0 %5703, %v154_v9   ;;  %173 = vperm.xlu1 %5704, %v155_v10   ;;  %v425_v28 = vld [vmem:[%s9905_s4 + $0x98] sm:$0xff]  ;;  %v422_v29 = vld [vmem:[%s9905_s4 + $0x80] sm:$0xff]  ;;  %v423_v30 = vld [vmem:[%s9905_s4 + $0x88] sm:$0xff] }
   0xb   :  { %5617 = vmatprep.mubr.msk.bf16.mxu0 %vm92_vm0, %v5707_v7  ;;  %5623 = vmatprep.mubr.msk.bf16.mxu1 %vm92_vm0, %v5707_v7  ;;  %v490_v31 = vld [vmem:[%s9905_s4 + $0xd0] sm:$0xff]  ;;  %v491_v32 = vld [vmem:[%s9905_s4 + $0xd8] sm:$0xff]  ;;  %v488_v35 = vld [vmem:[%s9905_s4 + $0xc0] sm:$0xff] }
   0xc   :  { %v494_v33 = vld [vmem:[%s9905_s4 + $0xf0] sm:$0xff]  ;;  %v495_v34 = vld [vmem:[%s9905_s4 + $0xf8] sm:$0xff]  ;;  %v489_v36 = vld [vmem:[%s9905_s4 + $0xc8] sm:$0xff] }
   0xe   :  { %46 = vperm.xlu0 %5703, %v32_v13   ;;  %51 = vperm.xlu1 %5704, %v33_v14  }
   0xf   :  { %5618 = vmatmul.mubr.msk.bf16.vlgmr.msra.gmra.mxu0 %vm92_vm0, %v5708_v8  ;;  %5624 = vmatmul.mubr.msk.bf16.vlgmr.msra.gmra.mxu1 %vm92_vm0, %v5708_v8 }
  0x10   :  { %641 = vmatprep.mubr.bf16.mxu0 %v9907_v2  ;;  %734 = vmatprep.mubr.bf16.mxu1 %v9907_v2 }
  0x12   :  { %158 = vperm.xlu0 %5703, %v152_v15   ;;  %163 = vperm.xlu1 %5704, %v153_v16  }
  0x16   :  { %36 = vperm.xlu0 %5703, %v30_v17   ;;  %41 = vperm.xlu1 %5704, %v31_v18  }
  0x1a   :  { %348 = vperm.xlu0 %5703, %v334_v19   ;;  %353 = vperm.xlu1 %5704, %v335_v20  }
  0x1e   :  { %258 = vperm.xlu0 %5703, %v244_v21   ;;  %263 = vperm.xlu1 %5704, %v245_v22  }
  0x22   :  { %338 = vperm.xlu0 %5703, %v332_v23   ;;  %343 = vperm.xlu1 %5704, %v333_v24  }
  0x26   :  { %248 = vperm.xlu0 %5703, %v242_v25   ;;  %253 = vperm.xlu1 %5704, %v243_v26  }
  0x2a   :  { %438 = vperm.xlu0 %5703, %v424_v27   ;;  %443 = vperm.xlu1 %5704, %v425_v28  }
  0x2e   :  { %428 = vperm.xlu0 %5703, %v422_v29   ;;  %433 = vperm.xlu1 %5704, %v423_v30  }
  0x32   :  { %512 = vperm.xlu0 %5703, %v490_v31   ;;  %517 = vperm.xlu1 %5704, %v491_v32  }
  0x36   :  { %532 = vperm.xlu0 %5703, %v494_v33   ;;  %537 = vperm.xlu1 %5704, %v495_v34  }
  0x37   :  { %10 = vsyncpa [#allocation3], 0  ;;  %v492_v37 = vld [vmem:[%s9905_s4 + $0xe0] sm:$0xff]  ;;  %v493_v38 = vld [vmem:[%s9905_s4 + $0xe8] sm:$0xff]  ;;  %vm590_vm1 = vcmask 261120   ;;  %vm3235_vm2 = vcmask 523264  }
  0x38   :  { %v498_v39 = vld [vmem:[%s9905_s4 + $0x110] sm:$0xff]  ;;  %v499_v40 = vld [vmem:[%s9905_s4 + $0x118] sm:$0xff]  ;;  %v496_v41 = vld [vmem:[%s9905_s4 + $0x100] sm:$0xff]  ;;  %vm6128_vm3 = vmmov 0   ;;  %s6129_s7 = smov [#allocation2]  }
  0x39   :  { %v497_v42 = vld [vmem:[%s9905_s4 + $0x108] sm:$0xff]  ;;  %v2366_v43 = vld [vmem:[%s9905_s4 + $0x120] sm:$0xff]  ;;  %v2368_v45 = vld [vmem:[%s9905_s4 + $0x130] sm:$0xff]  ;;  %s5431_s8 = sshll.u32 %s6129_s7, 4  ;;  %s5432_s8 = int_to_ptr.vmem [resolvable:$true] %s5431_s8 }
  0x3a   :  { %502 = vperm.xlu0 %5703, %v488_v35   ;;  %507 = vperm.xlu1 %5704, %v489_v36   ;;  %v2367_v44 = vld [vmem:[%s9905_s4 + $0x128] sm:$0xff]  ;;  %v2369_v46 = vld [vmem:[%s9905_s4 + $0x138] sm:$0xff]  ;;  %v2583_v47 = vld [vmem:[%s9905_s4 + $0x150] sm:$0xff]  ;;  %s6104_s9 = scalar_lea.vmem %s5432_s8, 16  ;;  %s6108_s10 = scalar_lea.vmem %s5432_s8, 32 }
  0x3b   :  { %v2584_v48 = vld [vmem:[%s9905_s4 + $0x158] sm:$0xff]  ;;  %v2587_v49 = vld [vmem:[%s9905_s4 + $0x170] sm:$0xff]  ;;  %v2581_v51 = vld [vmem:[%s9905_s4 + $0x140] sm:$0xff]  ;;  %p6105_p0 = scmp.ne.s32.totalorder %s5432_s8, %s6104_s9  ;;  %p6109_p1 = scmp.lt.s32.totalorder %s5432_s8, %s5432_s8 }
  0x3c   :  { %v2588_v50 = vld [vmem:[%s9905_s4 + $0x178] sm:$0xff]  ;;  %v2582_v52 = vld [vmem:[%s9905_s4 + $0x148] sm:$0xff]  ;;  %v2585_v53 = vld [vmem:[%s9905_s4 + $0x160] sm:$0xff]  ;;  %p6110_p2 = scmp.lt.s32.totalorder %s6108_s10, %s6104_s9 }
  0x3d   :  { %v2586_v54 = vld [vmem:[%s9905_s4 + $0x168] sm:$0xff]  ;;  %v2856_v55 = vld [vmem:[%s9905_s4 + $0x1b0] sm:$0xff]  ;;  %v2857_v56 = vld [vmem:[%s9905_s4 + $0x1b8] sm:$0xff] }
  0x3e   :  { %522 = vperm.xlu0 %5703, %v492_v37   ;;  %527 = vperm.xlu1 %5704, %v493_v38   ;;  %v2854_v57 = vld [vmem:[%s9905_s4 + $0x1a0] sm:$0xff]  ;;  %v2855_v58 = vld [vmem:[%s9905_s4 + $0x1a8] sm:$0xff]  ;;  %v2852_v59 = vld [vmem:[%s9905_s4 + $0x190] sm:$0xff]  ;;  %p6111_p3 = por %p6110_p2, %p6109_p1 }
  0x3f   :  { %v2853_v60 = vld [vmem:[%s9905_s4 + $0x198] sm:$0xff]  ;;  %v2850_v61 = vld [vmem:[%s9905_s4 + $0x180] sm:$0xff]  ;;  %v2851_v62 = vld [vmem:[%s9905_s4 + $0x188] sm:$0xff] }
  0x40   :  { %v3201_v63 = vld [vmem:[%s9905_s4 + $0x1c0] sm:$0xff]  ;;  %v3202_v0 = vld [vmem:[%s9905_s4 + $0x1c8] sm:$0xff]  ;;  %v3203_v1 = vld [vmem:[%s9905_s4 + $0x1d0] sm:$0xff]  ;;  %p6112_p4 = pnand %p6111_p3, %p6105_p0 }
  0x41   :  { %v3204_v3 = vld [vmem:[%s9905_s4 + $0x1d8] sm:$0xff]  ;;  %v3419_v4 = vld [vmem:[%s9905_s4 + $0x1f0] sm:$0xff]  ;;  %v3417_v8 = vld [vmem:[%s9905_s4 + $0x1e0] sm:$0xff] }
  0x42   :  { %552 = vperm.xlu0 %5703, %v498_v39   ;;  %557 = vperm.xlu1 %5704, %v499_v40   ;;  %v3420_v5 = vld [vmem:[%s9905_s4 + $0x1f8] sm:$0xff]  ;;  %v3423_v6 = vld [vmem:[%s9905_s4 + $0x210] sm:$0xff]  ;;  %v3418_v9 = vld [vmem:[%s9905_s4 + $0x1e8] sm:$0xff] }
  0x43   :  { %v3424_v7 = vld [vmem:[%s9905_s4 + $0x218] sm:$0xff]  ;;  %v3421_v10 = vld [vmem:[%s9905_s4 + $0x200] sm:$0xff]  ;;  %v3422_v11 = vld [vmem:[%s9905_s4 + $0x208] sm:$0xff] }
  0x44   :  { %v3715_v12 = vld [vmem:[%s9905_s4 + $0x230] sm:$0xff]  ;;  %v3716_v13 = vld [vmem:[%s9905_s4 + $0x238] sm:$0xff]  ;;  %v3713_v16 = vld [vmem:[%s9905_s4 + $0x220] sm:$0xff] }
  0x45   :  { %v3719_v14 = vld [vmem:[%s9905_s4 + $0x250] sm:$0xff]  ;;  %v3720_v15 = vld [vmem:[%s9905_s4 + $0x258] sm:$0xff]  ;;  %v3714_v17 = vld [vmem:[%s9905_s4 + $0x228] sm:$0xff] }
  0x46   :  { %542 = vperm.xlu0 %5703, %v496_v41   ;;  %547 = vperm.xlu1 %5704, %v497_v42   ;;  %v3717_v18 = vld [vmem:[%s9905_s4 + $0x240] sm:$0xff]  ;;  %v3718_v19 = vld [vmem:[%s9905_s4 + $0x248] sm:$0xff]  ;;  %v3723_v22 = vld [vmem:[%s9905_s4 + $0x270] sm:$0xff] }
  0x47   :  { %v3724_v23 = vld [vmem:[%s9905_s4 + $0x278] sm:$0xff]  ;;  %v3721_v24 = vld [vmem:[%s9905_s4 + $0x260] sm:$0xff]  ;;  %v3722_v25 = vld [vmem:[%s9905_s4 + $0x268] sm:$0xff] }
  0x48   :  { %v4684_v28 = vld [vmem:[%s9905_s4 + $0x280] sm:$0xff]  ;;  %v4685_v29 = vld [vmem:[%s9905_s4 + $0x288] sm:$0xff]  ;;  %v4686_v32 = vld [vmem:[%s9905_s4 + $0x290] sm:$0xff] }
  0x49   :  { %v4687_v33 = vld [vmem:[%s9905_s4 + $0x298] sm:$0xff]  ;;  %v4787_v34 = vld [vmem:[%s9905_s4 + $0x2b0] sm:$0xff]  ;;  %v4785_v42 = vld [vmem:[%s9905_s4 + $0x2a0] sm:$0xff] }
  0x4a   :  { %2372 = vperm.xlu0 %5703, %v2366_v43   ;;  %2377 = vperm.xlu1 %5704, %v2367_v44   ;;  %v4788_v35 = vld [vmem:[%s9905_s4 + $0x2b8] sm:$0xff]  ;;  %v4791_v38 = vld [vmem:[%s9905_s4 + $0x2d0] sm:$0xff]  ;;  %v4786_v43 = vld [vmem:[%s9905_s4 + $0x2a8] sm:$0xff] }
  0x4b   :  { %v4792_v39 = vld [vmem:[%s9905_s4 + $0x2d8] sm:$0xff]  ;;  %v4789_v44 = vld [vmem:[%s9905_s4 + $0x2c0] sm:$0xff] }
  0x4e   :  { %2382 = vperm.xlu0 %5703, %v2368_v45   ;;  %2387 = vperm.xlu1 %5704, %v2369_v46   ;;  %v4790_v45 = vld [vmem:[%s9905_s4 + $0x2c8] sm:$0xff] }
  0x52   :  { %2772 = vperm.xlu0 %5703, %v2583_v47   ;;  %2777 = vperm.xlu1 %5704, %v2584_v48   ;;  %v4927_v48 = vld [vmem:[%s9905_s4 + $0x310] sm:$0xff] }
  0x56   :  { %2812 = vperm.xlu0 %5703, %v2587_v49   ;;  %2817 = vperm.xlu1 %5704, %v2588_v50   ;;  %v4928_v49 = vld [vmem:[%s9905_s4 + $0x318] sm:$0xff] }
  0x5a   :  { %2762 = vperm.xlu0 %5703, %v2581_v51   ;;  %2767 = vperm.xlu1 %5704, %v2582_v52   ;;  %v4925_v52 = vld [vmem:[%s9905_s4 + $0x300] sm:$0xff] }
  0x5e   :  { %2802 = vperm.xlu0 %5703, %v2585_v53   ;;  %2807 = vperm.xlu1 %5704, %v2586_v54   ;;  %v4926_v53 = vld [vmem:[%s9905_s4 + $0x308] sm:$0xff]  ;;  %v4923_v54 = vld [vmem:[%s9905_s4 + $0x2f0] sm:$0xff] }
  0x62   :  { %2890 = vperm.xlu0 %5703, %v2856_v55   ;;  %2895 = vperm.xlu1 %5704, %v2857_v56   ;;  %v4924_v55 = vld [vmem:[%s9905_s4 + $0x2f8] sm:$0xff] }
  0x66   :  { %2880 = vperm.xlu0 %5703, %v2854_v57   ;;  %2885 = vperm.xlu1 %5704, %v2855_v58   ;;  %v4921_v58 = vld [vmem:[%s9905_s4 + $0x2e0] sm:$0xff] }
  0x6a   :  { %2870 = vperm.xlu0 %5703, %v2852_v59   ;;  %2875 = vperm.xlu1 %5704, %v2853_v60   ;;  %v4922_v59 = vld [vmem:[%s9905_s4 + $0x2e8] sm:$0xff] }
  0x6e   :  { %2860 = vperm.xlu0 %5703, %v2850_v61   ;;  %2865 = vperm.xlu1 %5704, %v2851_v62   ;;  %v5098_v62 = vld [vmem:[%s9905_s4 + $0x320] sm:$0xff] }
  0x72   :  { %3207 = vperm.xlu0 %5703, %v3201_v63   ;;  %3212 = vperm.xlu1 %5704, %v3202_v0   ;;  %v5099_v63 = vld [vmem:[%s9905_s4 + $0x328] sm:$0xff] }
  0x76   :  { %3217 = vperm.xlu0 %5703, %v3203_v1   ;;  %3222 = vperm.xlu1 %5704, %v3204_v3  }
  0x7a   :  { %3607 = vperm.xlu0 %5703, %v3419_v4   ;;  %3612 = vperm.xlu1 %5704, %v3420_v5  }
  0x7d   :  { %v6418_v20 = vpop.permute.xlu0 %68  ;;  %v6420_v21 = vpop.permute.xlu1 %58 }
  0x7e   :  { %3647 = vperm.xlu0 %5703, %v3423_v6   ;;  %3652 = vperm.xlu1 %5704, %v3424_v7   ;;  %v5100_v7 = vld [vmem:[%s9905_s4 + $0x330] sm:$0xff] }
  0x81   :  { %v6434_v26 = vpop.permute.xlu0 %73  ;;  %v6436_v27 = vpop.permute.xlu1 %63 }
  0x82   :  { %3597 = vperm.xlu0 %5703, %v3417_v8   ;;  %3602 = vperm.xlu1 %5704, %v3418_v9   ;;  %v5101_v8 = vld [vmem:[%s9905_s4 + $0x338] sm:$0xff] }
  0x85   :  { %v6444_v30 = vpop.permute.xlu0 %168  ;;  %v6446_v31 = vpop.permute.xlu1 %173 }
  0x86   :  { %3637 = vperm.xlu0 %5703, %v3421_v10   ;;  %3642 = vperm.xlu1 %5704, %v3422_v11  }
  0x89   :  { %v6460_v36 = vpop.permute.xlu0 %46  ;;  %v6462_v37 = vpop.permute.xlu1 %51 }
  0x8a   :  { %3737 = vperm.xlu0 %5703, %v3715_v12   ;;  %3742 = vperm.xlu1 %5704, %v3716_v13   ;;  %10199 = vst [vmem:[#allocation5_spill] sm:$0xff] %v6460_v36  ;;  %10200 = vst [vmem:[#allocation6_spill] sm:$0xff] %v6462_v37 }
  0x8d   :  { %v6470_v40 = vpop.permute.xlu0 %158  ;;  %v6472_v41 = vpop.permute.xlu1 %163 }
  0x8e   :  { %3757 = vperm.xlu0 %5703, %v3719_v14   ;;  %3762 = vperm.xlu1 %5704, %v3720_v15  }
  0x91   :  { %v6486_v46 = vpop.permute.xlu0 %36  ;;  %v6488_v47 = vpop.permute.xlu1 %41 }
  0x92   :  { %3727 = vperm.xlu0 %5703, %v3713_v16   ;;  %3732 = vperm.xlu1 %5704, %v3714_v17   ;;  %10201 = vst [vmem:[#allocation7_spill] sm:$0xff] %v6486_v46  ;;  %10202 = vst [vmem:[#allocation8_spill] sm:$0xff] %v6488_v47 }
  0x95   :  { %v6496_v50 = vpop.permute.xlu0 %348  ;;  %v6498_v51 = vpop.permute.xlu1 %353 }
  0x96   :  { %3747 = vperm.xlu0 %5703, %v3717_v18   ;;  %3752 = vperm.xlu1 %5704, %v3718_v19  }
  0x99   :  { %v6512_v56 = vpop.permute.xlu0 %258  ;;  %v6514_v57 = vpop.permute.xlu1 %263 }
  0x9a   :  { %3777 = vperm.xlu0 %5703, %v3723_v22   ;;  %3782 = vperm.xlu1 %5704, %v3724_v23   ;;  %v5191_v22 = vld [vmem:[%s9905_s4 + $0x340] sm:$0xff]  ;;  %v5192_v23 = vld [vmem:[%s9905_s4 + $0x348] sm:$0xff] }
  0x9d   :  { %v6522_v60 = vpop.permute.xlu0 %338  ;;  %v6524_v61 = vpop.permute.xlu1 %343 }
  0x9e   :  { %3767 = vperm.xlu0 %5703, %v3721_v24   ;;  %3772 = vperm.xlu1 %5704, %v3722_v25  }
  0xa1   :  { %v6540_v11 = vpop.permute.xlu0 %248  ;;  %v6542_v12 = vpop.permute.xlu1 %253 }
  0xa2   :  { %4690 = vperm.xlu0 %5703, %v4684_v28   ;;  %4695 = vperm.xlu1 %5704, %v4685_v29  }
  0xa6   :  { %4700 = vperm.xlu0 %5703, %v4686_v32   ;;  %4705 = vperm.xlu1 %5704, %v4687_v33  }
  0xaa   :  { %4873 = vperm.xlu0 %5703, %v4787_v34   ;;  %4878 = vperm.xlu1 %5704, %v4788_v35   ;;  %v483_v35 = vpack.c.bf16 %v6462_v37, %v6460_v36 }
  0xae   :  { %4901 = vperm.xlu0 %5703, %v4791_v38   ;;  %4906 = vperm.xlu1 %5704, %v4792_v39  }
  0xb2   :  { %4863 = vperm.xlu0 %5703, %v4785_v42   ;;  %4868 = vperm.xlu1 %5704, %v4786_v43  }
  0xb6   :  { %4891 = vperm.xlu0 %5703, %v4789_v44   ;;  %4896 = vperm.xlu1 %5704, %v4790_v45   ;;  %v439_v44 = vpop.permute.xlu0 %438  ;;  %v444_v45 = vpop.permute.xlu1 %443 }
  0xba   :  { %4961 = vperm.xlu0 %5703, %v4927_v48   ;;  %4966 = vperm.xlu1 %5704, %v4928_v49  }
  0xbe   :  { %4951 = vperm.xlu0 %5703, %v4925_v52   ;;  %4956 = vperm.xlu1 %5704, %v4926_v53  }
  0xc2   :  { %4941 = vperm.xlu0 %5703, %v4923_v54   ;;  %4946 = vperm.xlu1 %5704, %v4924_v55  }
  0xc6   :  { %4931 = vperm.xlu0 %5703, %v4921_v58   ;;  %4936 = vperm.xlu1 %5704, %v4922_v59   ;;  %v478_v59 = vpack.c.bf16 %v6488_v47, %v6486_v46 }
  0xc7   :  { %v5607_v0 = vpop.f32.mrf.mxu0  ;;  %v5613_v1 = vpop.f32.mrf.mxu1 }
  0xc8   :  { %v142_v3 = vadd.f32 %v5607_v0, %v6418_v20  ;;  %v232_v17 = vadd.f32 %v5613_v1, %v6418_v20 }
  0xc9   :  { %v133_v4 = vpop.f32.mrf.mxu0  ;;  %v223_v5 = vpop.f32.mrf.mxu1 }
  0xca   :  { %5104 = vperm.xlu0 %5703, %v5098_v62   ;;  %5109 = vperm.xlu1 %5704, %v5099_v63   ;;  %v134_v6 = vadd.f32 %v133_v4, %v6420_v21  ;;  %v150_v13 = vmax.f32 %v142_v3, 0.0  ;;  %v240_v48 = vmax.f32 %v232_v17, 0.0 }
  0xcb   :  { %v5608_v9 = vpop.f32.mrf.mxu0  ;;  %v5614_v10 = vpop.f32.mrf.mxu1 }
  0xcc   :  { %v145_v14 = vadd.f32 %v5608_v9, %v6434_v26  ;;  %v148_v18 = vmax.f32 %v134_v6, 0.0  ;;  %v235_v25 = vadd.f32 %v5614_v10, %v6434_v26  ;;  %v6559_v38 = vadd.f32 %v6444_v30, %v150_v13  ;;  %v5193_v30 = vld [vmem:[%s9905_s4 + $0x350] sm:$0xff] }
  0xcd   :  { %v136_v15 = vpop.f32.mrf.mxu0  ;;  %v226_v16 = vpop.f32.mrf.mxu1  ;;  %v224_v9 = vadd.f32 %v223_v5, %v6420_v21 }
  0xce   :  { %5114 = vperm.xlu0 %5703, %v5100_v7   ;;  %5119 = vperm.xlu1 %5704, %v5101_v8   ;;  %v137_v19 = vadd.f32 %v136_v15, %v6436_v27  ;;  %v151_v24 = vmax.f32 %v145_v14, 0.0  ;;  %10203 = vst [vmem:[#allocation9_spill] sm:$0xff] %v6559_v38  ;;  %v6565_v49 = vadd.f32 %v6470_v40, %v148_v18 }
  0xcf   :  { %v5619_v28 = vpop.f32.mrf.mxu0  ;;  %v5625_v29 = vpop.f32.mrf.mxu1  ;;  %v227_v52 = vadd.f32 %v226_v16, %v6436_v27  ;;  %v6594_v15 = vadd.f32 %v6512_v56, %v240_v48  ;;  %v5283_v48 = vld [vmem:[%s9905_s4 + $0x390] sm:$0xff] }
  0xd0   :  { %v149_v32 = vmax.f32 %v137_v19, 0.0  ;;  %v322_v33 = vadd.f32 %v5619_v28, %v6418_v20  ;;  %v412_v34 = vadd.f32 %v5625_v29, %v6418_v20  ;;  %v6562_v39 = vadd.f32 %v6446_v31, %v151_v24  ;;  %10205 = vst [vmem:[#allocation11_spill] sm:$0xff] %v6565_v49 }
  0xd1   :  { %v313_v42 = vpop.f32.mrf.mxu0  ;;  %v403_v43 = vpop.f32.mrf.mxu1  ;;  %v241_v31 = vmax.f32 %v235_v25, 0.0  ;;  %10207 = vst [vmem:[#allocation13_spill] sm:$0xff] %v6594_v15  ;;  %v239_v17 = vmax.f32 %v227_v52, 0.0  ;;  %v5284_v52 = vld [vmem:[%s9905_s4 + $0x398] sm:$0xff] }
  0xd2   :  { %10204 = vst [vmem:[#allocation10_spill] sm:$0xff] %v6562_v39  ;;  %5235 = vperm.xlu0 %5703, %v5191_v22   ;;  %5240 = vperm.xlu1 %5704, %v5192_v23   ;;  %v6568_v20 = vadd.f32 %v6472_v41, %v149_v32  ;;  %v314_v53 = vadd.f32 %v313_v42, %v6420_v21  ;;  %v5195_v41 = vld [vmem:[%s9905_s4 + $0x360] sm:$0xff]  ;;  %v330_v62 = vmax.f32 %v322_v33, 0.0  ;;  %v420_v63 = vmax.f32 %v412_v34, 0.0  ;;  %v434_v23 = vpop.permute.xlu1 %433  ;;  %v5198_v42 = vld [vmem:[%s9905_s4 + $0x378] sm:$0xff] }
  0xd3   :  { %v404_v54 = vadd.f32 %v403_v43, %v6420_v21  ;;  %v5620_v55 = vpop.f32.mrf.mxu0  ;;  %v5626_v58 = vpop.f32.mrf.mxu1  ;;  %v484_v40 = vpack.c.bf16 %v6562_v39, %v6559_v38  ;;  %v6597_v16 = vadd.f32 %v6514_v57, %v241_v31  ;;  %v5194_v21 = vld [vmem:[%s9905_s4 + $0x358] sm:$0xff] }
  0xd4   :  { %10206 = vst [vmem:[#allocation12_spill] sm:$0xff] %v6568_v20  ;;  %v325_v0 = vadd.f32 %v5620_v55, %v6434_v26  ;;  %v328_v1 = vmax.f32 %v314_v53, 0.0  ;;  %v415_v4 = vadd.f32 %v5626_v58, %v6434_v26  ;;  %v479_v8 = vpack.c.bf16 %v6568_v20, %v6565_v49  ;;  %v5196_v26 = vld [vmem:[%s9905_s4 + $0x368] sm:$0xff]  ;;  %v5288_v31 = vld [vmem:[%s9905_s4 + $0x3b8] sm:$0xff]  ;;  %v5281_v53 = vld [vmem:[%s9905_s4 + $0x380] sm:$0xff] }
  0xd5   :  { %v418_v3 = vmax.f32 %v404_v54, 0.0  ;;  %621 = vmatprep.subr.bf16.mxu0 %v484_v40  ;;  %v316_v6 = vpop.f32.mrf.mxu0  ;;  %v406_v7 = vpop.f32.mrf.mxu1  ;;  %10208 = vst [vmem:[#allocation14_spill] sm:$0xff] %v6597_v16  ;;  %v6603_v5 = vadd.f32 %v6496_v50, %v330_v62  ;;  %v6608_v24 = vadd.f32 %v439_v44, %v420_v63  ;;  %v6620_v50 = vld [vmem:[%s9903_s2] sm:$0xff]   ;;  %v485_v34 = vpack.c.bf16 %v6597_v16, %v6594_v15  ;;  %v5282_v54 = vld [vmem:[%s9905_s4 + $0x388] sm:$0xff]  ;;  %v5713_v55 = vld [vmem:[%s9903_s2 + $0x10] sm:$0xff]  }
  0xd6   :  { %5245 = vperm.xlu0 %5703, %v5193_v30   ;;  %v331_v10 = vmax.f32 %v325_v0, 0.0  ;;  %v317_v13 = vadd.f32 %v316_v6, %v6436_v27  ;;  %v407_v14 = vadd.f32 %v406_v7, %v6436_v27  ;;  %622 = vmatpush1.bf16.msra.mxu0 %v483_v35  ;;  %v421_v18 = vmax.f32 %v415_v4, 0.0  ;;  %v429_v27 = vpop.permute.xlu0 %428  ;;  %v5287_v30 = vld [vmem:[%s9905_s4 + $0x3b0] sm:$0xff]  ;;  %v5285_v58 = vld [vmem:[%s9905_s4 + $0x3a0] sm:$0xff]  ;;  %v5286_v40 = vld [vmem:[%s9905_s4 + $0x3a8] sm:$0xff] }
  0xd7   :  { %5259 = vperm.xlu1 %5704, %v5195_v41   ;;  %623 = vmatprep.subr.bf16.mxu0 %v479_v8  ;;  %10209 = vst [vmem:[#allocation15_spill] sm:$0xff] %v6603_v5  ;;  %10211 = vst [vmem:[#allocation17_spill] sm:$0xff] %v6608_v24  ;;  %v6611_v57 = vadd.f32 %v6522_v60, %v328_v1  ;;  %v6613_v25 = vadd.f32 %v429_v27, %v418_v3  ;;  %v5417_v41 = vld [vmem:[%s9905_s4 + $0x3c0] sm:$0x1]  ;;  %v5716_v63 = vld [vmem:[%s9903_s2 + $0x28] sm:$0xff]  }
  0xd8   :  { %v6606_v19 = vadd.f32 %v6498_v51, %v331_v10  ;;  %v329_v22 = vmax.f32 %v317_v13, 0.0  ;;  %v419_v56 = vmax.f32 %v407_v14, 0.0  ;;  %v6615_v28 = vadd.f32 %v444_v45, %v421_v18  ;;  %v5715_v62 = vld [vmem:[%s9903_s2 + $0x20] sm:$0xff]  }
  0xd9   :  { %10212 = vst [vmem:[#allocation18_spill] sm:$0xff] %v6611_v57  ;;  %10213 = vst [vmem:[#allocation19_spill] sm:$0xff] %v6613_v25  ;;  %v238_v51 = vmax.f32 %v224_v9, 0.0  ;;  %v6634_v35 = vadd.f32 %v6542_v12, %v239_v17 }
  0xda   :  { %10210 = vst [vmem:[#allocation16_spill] sm:$0xff] %v6606_v19  ;;  %10214 = vst [vmem:[#allocation20_spill] sm:$0xff] %v6615_v28  ;;  %5264 = vperm.xlu0 %5703, %v5196_v26   ;;  %v6623_v29 = vadd.f32 %v6524_v61, %v329_v22  ;;  %v6625_v32 = vadd.f32 %v434_v23, %v419_v56  ;;  %624 = vmatpush1.bf16.msra.mxu0 %v478_v59  ;;  %v5197_v61 = vld [vmem:[%s9905_s4 + $0x370] sm:$0xff]  ;;  %v5714_v59 = vld [vmem:[%s9903_s2 + $0x18] sm:$0xff]   ;;  %v6725_v0 = vpop.permute.xlu0 %512  ;;  %v6731_v26 = vpop.permute.xlu1 %517 }
  0xdb   :  { %5250 = vperm.xlu1 %5704, %v5194_v21   ;;  %v486_v60 = vpack.c.bf16 %v6606_v19, %v6603_v5  ;;  %v487_v33 = vpack.c.bf16 %v6615_v28, %v6608_v24  ;;  %10217 = vst [vmem:[#allocation23_spill] sm:$0xff] %v6634_v35  ;;  %v6649_v12 = vadd.f32 %v6540_v11, %v238_v51  ;;  %v5712_v11 = vld [vmem:[%s9903_s2 + $0x8] sm:$0xff]   ;;  %10219 = vst [vmem:[#allocation25_spill] sm:$0xff] %v6725_v0 }
  0xdc   :  { %10215 = vst [vmem:[#allocation21_spill] sm:$0xff] %v6623_v29  ;;  %10216 = vst [vmem:[#allocation22_spill] sm:$0xff] %v6625_v32  ;;  %v481_v43 = vpack.c.bf16 %v6623_v29, %v6611_v57  ;;  %v482_v44 = vpack.c.bf16 %v6625_v32, %v6613_v25 }
  0xdd   :  { %714 = vmatprep.subr.bf16.mxu1 %v486_v60  ;;  %5465 = vmatmul.mubr.msk.bf16.vlgmr.msra.gmra.mxu0 %vm590_vm1, %v6620_v50  ;;  %10218 = vst [vmem:[#allocation24_spill] sm:$0xff] %v6649_v12  ;;  %v480_v45 = vpack.c.bf16 %v6634_v35, %v6649_v12  ;;  %10222 = vst [vmem:[#allocation28_spill] sm:$0xff] %v6731_v26 }
  0xde   :  { %5627 = vmatprep.subr.bf16.mxu0 %v487_v33  ;;  %715 = vmatpush1.bf16.msra.mxu1 %v485_v34  ;;  %v6727_v4 = vpop.permute.xlu0 %532 }
  0xdf   :  { %5628 = vmatpush3.bf16.msra.mxu0 %v487_v33  ;;  %5269 = vperm.xlu0 %5703, %v5197_v61   ;;  %10220 = vst [vmem:[#allocation26_spill] sm:$0xff] %v6727_v4 }
  0xe0   :  { %5274 = vperm.xlu1 %5704, %v5198_v42   ;;  %716 = vmatprep.subr.bf16.mxu1 %v481_v43 }
  0xe1   :  { %5629 = vmatprep.subr.bf16.mxu0 %v482_v44  ;;  %651 = vmatprep.mubr.bf16.mxu0 %v9907_v2 }
  0xe2   :  { %717 = vmatpush1.bf16.msra.mxu1 %v480_v45  ;;  %v6729_v9 = vpop.permute.xlu0 %502 }
  0xe3   :  { %5630 = vmatpush3.bf16.msra.mxu0 %v482_v44  ;;  %5335 = vperm.xlu0 %5703, %v5283_v48   ;;  %10221 = vst [vmem:[#allocation27_spill] sm:$0xff] %v6729_v9  ;;  %v6758_v44 = vpop.permute.xlu1 %537 }
  0xe4   :  { %5340 = vperm.xlu1 %5704, %v5284_v52   ;;  %10229 = vst [vmem:[#allocation35_spill] sm:$0xff] %v6758_v44 }
  0xe5   :  { %5466 = vmatmul.mubr.msk.bf16.gmra.mxu0 %vm590_vm1, %v5712_v11  ;;  %5471 = vmatmul.mubr.msk.bf16.vlgmr.msra.gmra.mxu1 %vm590_vm1, %v6620_v50 }
  0xe6   :  { %661 = vmatprep.mubr.bf16.mxu0 %v9907_v2  ;;  %744 = vmatprep.mubr.bf16.mxu1 %v9907_v2  ;;  %v6733_v21 = vpop.permute.xlu0 %522 }
  0xe7   :  { %5359 = vperm.xlu0 %5703, %v5287_v30   ;;  %10223 = vst [vmem:[#allocation29_spill] sm:$0xff] %v6733_v21 }
  0xe8   :  { %5364 = vperm.xlu1 %5704, %v5288_v31  }
  0xeb   :  { %5325 = vperm.xlu0 %5703, %v5281_v53  }
  0xec   :  { %5330 = vperm.xlu1 %5704, %v5282_v54  }
  0xed   :  { %5467 = vmatmul.mubr.msk.bf16.gmra.mxu0 %vm590_vm1, %v5713_v55  ;;  %5472 = vmatmul.mubr.msk.bf16.gmra.mxu1 %vm590_vm1, %v5712_v11 }
  0xee   :  { %671 = vmatprep.mubr.bf16.mxu0 %v9907_v2  ;;  %754 = vmatprep.mubr.bf16.mxu1 %v9907_v2 }
  0xef   :  { %5349 = vperm.xlu0 %5703, %v5285_v58  }
  0xf0   :  { %5354 = vperm.xlu1 %5704, %v5286_v40  }
  0xf3   :  { %5420 = vperm.xlu0 %5703, %v5417_v41  }
  0xf5   :  { %5468 = vmatmul.mubr.msk.bf16.gmra.mxu0 %vm590_vm1, %v5714_v59  ;;  %5473 = vmatmul.mubr.msk.bf16.gmra.mxu1 %vm590_vm1, %v5713_v55 }
  0xf6   :  { %681 = vmatprep.mubr.bf16.mxu0 %v9907_v2  ;;  %764 = vmatprep.mubr.bf16.mxu1 %v9907_v2 }
  0xfd   :  { %5469 = vmatmul.mubr.msk.bf16.gmra.mxu0 %vm590_vm1, %v5715_v62  ;;  %5474 = vmatmul.mubr.msk.bf16.gmra.mxu1 %vm590_vm1, %v5714_v59 }
  0xfe   :  { %691 = vmatprep.mubr.bf16.mxu0 %v9907_v2  ;;  %774 = vmatprep.mubr.bf16.mxu1 %v9907_v2 }
 0x105   :  { %5470 = vmatmul.mubr.msk.bf16.gmra.mxu0 %vm590_vm1, %v5716_v63  ;;  %5475 = vmatmul.mubr.msk.bf16.gmra.mxu1 %vm590_vm1, %v5715_v62 }
 0x106   :  { %784 = vmatprep.mubr.bf16.mxu1 %v9907_v2  ;;  %5631 = vmatprep.mubr.msk.bf16.mxu0 %vm590_vm1, %v6620_v50 }
 0x10d   :  { %5476 = vmatmul.mubr.msk.bf16.gmra.mxu1 %vm590_vm1, %v5716_v63  ;;  %5632 = vmatmul.mubr.msk.bf16.vlgmr.msra.gmra.mxu0 %vm590_vm1, %v5712_v11 }
 0x10e   :  { %5635 = vmatprep.mubr.msk.bf16.mxu0 %vm590_vm1, %v5713_v55  ;;  %2438 = vmatprep.mubr.bf16.mxu1 %v9907_v2 }
 0x115   :  { %5636 = vmatmul.mubr.msk.bf16.gmra.mxu0 %vm590_vm1, %v5714_v59 }
 0x116   :  { %5639 = vmatprep.mubr.msk.bf16.mxu0 %vm590_vm1, %v5715_v62 }
 0x11d   :  { %5640 = vmatmul.mubr.msk.bf16.gmra.mxu0 %vm590_vm1, %v5716_v63 }
 0x19d   :  { %v643_v1 = vpop.f32.mrf.mxu0 }
 0x19e   :  { %v6736_v27 = vadd.f32 %v643_v1, %v6729_v9 }
 0x19f   :  { %v645_v3 = vpop.f32.mrf.mxu0 }
 0x1a0   :  { %10224 = vst [vmem:[#allocation30_spill] sm:$0xff] %v6736_v27  ;;  %v6739_v56 = vadd.f32 %v645_v3, %v6729_v9  ;;  %v6771_v3 = vpop.permute.xlu1 %507 }
 0x1a1   :  { %v647_v6 = vpop.f32.mrf.mxu0  ;;  %10231 = vst [vmem:[#allocation37_spill] sm:$0xff] %v6771_v3 }
 0x1a2   :  { %10225 = vst [vmem:[#allocation31_spill] sm:$0xff] %v6739_v56  ;;  %v6774_v57 = vadd.f32 %v647_v6, %v6771_v3 }
 0x1a3   :  { %v649_v7 = vpop.f32.mrf.mxu0 }
 0x1a4   :  { %10232 = vst [vmem:[#allocation38_spill] sm:$0xff] %v6774_v57 }
 0x1a5   :  { %v653_v8 = vpop.f32.mrf.mxu0  ;;  %v736_v10 = vpop.f32.mrf.mxu1 }
 0x1a6   :  { %v6742_v23 = vadd.f32 %v736_v10, %v6729_v9 }
 0x1a7   :  { %v655_v13 = vpop.f32.mrf.mxu0  ;;  %v738_v17 = vpop.f32.mrf.mxu1 }
 0x1a8   :  { %10226 = vst [vmem:[#allocation32_spill] sm:$0xff] %v6742_v23  ;;  %v6745_v50 = vadd.f32 %v738_v17, %v6729_v9 }
 0x1a9   :  { %v657_v14 = vpop.f32.mrf.mxu0  ;;  %v740_v33 = vpop.f32.mrf.mxu1 }
 0x1aa   :  { %10227 = vst [vmem:[#allocation33_spill] sm:$0xff] %v6745_v50 }
 0x1ab   :  { %v659_v18 = vpop.f32.mrf.mxu0  ;;  %v742_v54 = vpop.f32.mrf.mxu1 }
 0x1ac   :  { %v6792_v6 = vadd.f32 %v659_v18, %v6731_v26 }
 0x1ad   :  { %v663_v22 = vpop.f32.mrf.mxu0 }
 0x1ae   :  { %v6748_v51 = vadd.f32 %v663_v22, %v6733_v21  ;;  %v746_v22 = vpop.f32.mrf.mxu1  ;;  %10238 = vst [vmem:[#allocation44_spill] sm:$0xff] %v6792_v6 }
 0x1af   :  { %v665_v60 = vpop.f32.mrf.mxu0 }
 0x1b0   :  { %10228 = vst [vmem:[#allocation34_spill] sm:$0xff] %v6748_v51  ;;  %v876_v34 = vmul.f32 %v6748_v51, %v6736_v27  ;;  %v1172_v61 = vmul.f32 %v6748_v51, %v6739_v56  ;;  %v1468_v42 = vmul.f32 %v6742_v23, %v6748_v51  ;;  %v1764_v43 = vmul.f32 %v6745_v50, %v6748_v51 }
 0x1b1   :  { %v6761_v45 = vadd.f32 %v665_v60, %v6733_v21  ;;  %v667_v60 = vpop.f32.mrf.mxu0 }
 0x1b2   :  { %v880_v48 = vrot.slane %v876_v34, 4  ;;  %v1176_v52 = vrot.slane %v1172_v61, 4  ;;  %v1472_v55 = vrot.slane %v1468_v42, 4  ;;  %v1768_v58 = vrot.slane %v1764_v43, 4 }
 0x1b3   :  { %10230 = vst [vmem:[#allocation36_spill] sm:$0xff] %v6761_v45  ;;  %v904_v11 = vmul.f32 %v6761_v45, %v6736_v27  ;;  %v1200_v30 = vmul.f32 %v6761_v45, %v6739_v56  ;;  %v1496_v31 = vmul.f32 %v6742_v23, %v6761_v45  ;;  %v1792_v53 = vmul.f32 %v6745_v50, %v6761_v45 }
 0x1b4   :  { %v881_v40 = vadd.f32 %v880_v48, %v876_v34  ;;  %v1177_v41 = vadd.f32 %v1176_v52, %v1172_v61  ;;  %v1473_v16 = vadd.f32 %v1472_v55, %v1468_v42  ;;  %v1769_v5 = vadd.f32 %v1768_v58, %v1764_v43  ;;  %v748_v43 = vpop.f32.mrf.mxu1 }
 0x1b5   :  { %v908_v59 = vrot.slane %v904_v11, 4  ;;  %v1204_v62 = vrot.slane %v1200_v30, 4  ;;  %v1500_v63 = vrot.slane %v1496_v31, 4  ;;  %v1796_v1 = vrot.slane %v1792_v53, 4 }
 0x1b6   :  { %v882_v2 = vrot.slane %v881_v40, 2  ;;  %v1178_v19 = vrot.slane %v1177_v41, 2  ;;  %v6777_v34 = vadd.f32 %v649_v7, %v6771_v3  ;;  %v6780_v52 = vadd.f32 %v653_v8, %v6725_v0  ;;  %v669_v8 = vpop.f32.mrf.mxu0 }
 0x1b7   :  { %v909_v10 = vadd.f32 %v908_v59, %v904_v11  ;;  %v1205_v17 = vadd.f32 %v1204_v62, %v1200_v30  ;;  %v1501_v61 = vadd.f32 %v1500_v63, %v1496_v31  ;;  %v1797_v48 = vadd.f32 %v1796_v1, %v1792_v53  ;;  %v6797_v31 = vpop.permute.xlu1 %527 }
 0x1b8   :  { %10233 = vst [vmem:[#allocation39_spill] sm:$0xff] %v6777_v34  ;;  %10234 = vst [vmem:[#allocation40_spill] sm:$0xff] %v6780_v52  ;;  %v6783_v11 = vadd.f32 %v655_v13, %v6725_v0  ;;  %v6786_v62 = vadd.f32 %v657_v14, %v6731_v26  ;;  %v6789_v42 = vadd.f32 %v740_v33, %v6771_v3  ;;  %v1474_v55 = vrot.slane %v1473_v16, 2 }
 0x1b9   :  { %v910_v30 = vrot.slane %v909_v10, 2  ;;  %v1206_v59 = vrot.slane %v1205_v17, 2  ;;  %v6795_v7 = vadd.f32 %v742_v54, %v6771_v3  ;;  %10240 = vst [vmem:[#allocation46_spill] sm:$0xff] %v6797_v31  ;;  %v883_v13 = vadd.f32 %v882_v2, %v881_v40 }
 0x1ba   :  { %10235 = vst [vmem:[#allocation41_spill] sm:$0xff] %v6783_v11  ;;  %10236 = vst [vmem:[#allocation42_spill] sm:$0xff] %v6786_v62  ;;  %v1179_v53 = vadd.f32 %v1178_v19, %v1177_v41  ;;  %v1770_v58 = vrot.slane %v1769_v5, 2  ;;  %v6800_v14 = vadd.f32 %v746_v22, %v6725_v0  ;;  %v1502_v63 = vrot.slane %v1501_v61, 2 }
 0x1bb   :  { %10237 = vst [vmem:[#allocation43_spill] sm:$0xff] %v6789_v42  ;;  %10239 = vst [vmem:[#allocation45_spill] sm:$0xff] %v6795_v7  ;;  %v1798_v33 = vrot.slane %v1797_v48, 2  ;;  %v6803_v1 = vadd.f32 %v667_v60, %v6797_v31  ;;  %v911_v18 = vadd.f32 %v910_v30, %v909_v10  ;;  %v1207_v15 = vadd.f32 %v1206_v59, %v1205_v17 }
 0x1bc   :  { %10241 = vst [vmem:[#allocation47_spill] sm:$0xff] %v6800_v14  ;;  %v6806_v54 = vadd.f32 %v748_v43, %v6725_v0  ;;  %v6809_v12 = vadd.f32 %v669_v8, %v6797_v31  ;;  %v884_v10 = vrot.slane %v883_v13, 1  ;;  %v1180_v17 = vrot.slane %v1179_v53, 1 }
 0x1bd   :  { %10242 = vst [vmem:[#allocation48_spill] sm:$0xff] %v6803_v1  ;;  %v877_v2 = vmul.f32 %v6803_v1, %v6774_v57  ;;  %v1173_v19 = vmul.f32 %v6803_v1, %v6777_v34  ;;  %v1469_v40 = vmul.f32 %v6789_v42, %v6803_v1  ;;  %v1765_v41 = vmul.f32 %v6795_v7, %v6803_v1 }
 0x1be   :  { %10243 = vst [vmem:[#allocation49_spill] sm:$0xff] %v6806_v54  ;;  %10244 = vst [vmem:[#allocation50_spill] sm:$0xff] %v6809_v12  ;;  %v1475_v22 = vadd.f32 %v1474_v55, %v1473_v16  ;;  %v1771_v60 = vadd.f32 %v1770_v58, %v1769_v5  ;;  %v1503_v30 = vadd.f32 %v1502_v63, %v1501_v61  ;;  %v912_v38 = vrot.slane %v911_v18, 1  ;;  %v750_v61 = vpop.f32.mrf.mxu1 }
 0x1bf   :  { %v1799_v59 = vadd.f32 %v1798_v33, %v1797_v48  ;;  %v886_v43 = vrot.slane %v877_v2, 4  ;;  %v1182_v8 = vrot.slane %v1173_v19, 4  ;;  %v905_v29 = vmul.f32 %v6809_v12, %v6774_v57 }
 0x1c0   :  { %v1201_v35 = vmul.f32 %v6809_v12, %v6777_v34  ;;  %v1497_v39 = vmul.f32 %v6789_v42, %v6809_v12  ;;  %v1793_v37 = vmul.f32 %v6795_v7, %v6809_v12  ;;  %v1208_v49 = vrot.slane %v1207_v15, 1 }
 0x1c1   :  { %v1478_v16 = vrot.slane %v1469_v40, 4  ;;  %v1774_v5 = vrot.slane %v1765_v41, 4  ;;  %v887_v48 = vadd.f32 %v886_v43, %v877_v2  ;;  %v1183_v55 = vadd.f32 %v1182_v8, %v1173_v19  ;;  %v752_v2 = vpop.f32.mrf.mxu1 }
 0x1c2   :  { %v914_v58 = vrot.slane %v905_v29, 4  ;;  %v1210_v63 = vrot.slane %v1201_v35, 4  ;;  %v1476_v33 = vrot.slane %v1475_v22, 1  ;;  %v1504_v36 = vrot.slane %v1503_v30, 1 }
 0x1c3   :  { %v1506_v20 = vrot.slane %v1497_v39, 4  ;;  %v1802_v46 = vrot.slane %v1793_v37, 4  ;;  %v1772_v47 = vrot.slane %v1771_v60, 1  ;;  %v1800_v28 = vrot.slane %v1799_v59, 1 }
 0x1c4   :  { %v915_v24 = vadd.f32 %v914_v58, %v905_v29  ;;  %v1211_v32 = vadd.f32 %v1210_v63, %v1201_v35  ;;  %v6827_v25 = vadd.f32 %v884_v10, %v883_v13  ;;  %v6829_v12 = vadd.f32 %v1180_v17, %v1179_v53 }
 0x1c5   :  { %v6831_v1 = vadd.f32 %v912_v38, %v911_v18  ;;  %v6833_v3 = vadd.f32 %v1208_v49, %v1207_v15  ;;  %v888_v19 = vrot.slane %v887_v48, 2  ;;  %v1184_v43 = vrot.slane %v1183_v55, 2  ;;  %v673_v18 = vpop.f32.mrf.mxu0 }
 0x1c6   :  { %10245 = vst [vmem:[#allocation51_spill] sm:$0xff] %v6827_v25  ;;  %10246 = vst [vmem:[#allocation52_spill] sm:$0xff] %v6829_v12  ;;  %v1479_v8 = vadd.f32 %v1478_v16, %v1469_v40  ;;  %v1775_v45 = vadd.f32 %v1774_v5, %v1765_v41  ;;  %v6835_v51 = vadd.f32 %v1476_v33, %v1475_v22  ;;  %v916_v53 = vrot.slane %v915_v24, 2 }
 0x1c7   :  { %10247 = vst [vmem:[#allocation53_spill] sm:$0xff] %v6831_v1  ;;  %10248 = vst [vmem:[#allocation54_spill] sm:$0xff] %v6833_v3  ;;  %v6837_v9 = vadd.f32 %v1504_v36, %v1503_v30  ;;  %v1507_v0 = vadd.f32 %v1506_v20, %v1497_v39  ;;  %v1803_v29 = vadd.f32 %v1802_v46, %v1793_v37  ;;  %v1212_v38 = vrot.slane %v1211_v32, 2  ;;  %v756_v37 = vpop.f32.mrf.mxu1  ;;  %v675_v42 = vpop.f32.mrf.mxu0 }
 0x1c8   :  { %10249 = vst [vmem:[#allocation55_spill] sm:$0xff] %v6835_v51  ;;  %v6839_v35 = vadd.f32 %v1772_v47, %v1771_v60  ;;  %v6841_v13 = vadd.f32 %v1800_v28, %v1799_v59  ;;  %v6848_v40 = vadd.f32 %v750_v61, %v6731_v26  ;;  %v6851_v36 = vadd.f32 %v752_v2, %v6731_v26 }
 0x1c9   :  { %10250 = vst [vmem:[#allocation56_spill] sm:$0xff] %v6837_v9  ;;  %v889_v46 = vadd.f32 %v888_v19, %v887_v48  ;;  %v1185_v47 = vadd.f32 %v1184_v43, %v1183_v55  ;;  %v1480_v39 = vrot.slane %v1479_v8, 2  ;;  %v1776_v20 = vrot.slane %v1775_v45, 2 }
 0x1ca   :  { %10251 = vst [vmem:[#allocation57_spill] sm:$0xff] %v6839_v35  ;;  %10252 = vst [vmem:[#allocation58_spill] sm:$0xff] %v6841_v13  ;;  %v1508_v41 = vrot.slane %v1507_v0, 2  ;;  %v1804_v10 = vrot.slane %v1803_v29, 2  ;;  %v6856_v17 = vadd.f32 %v673_v18, %v6727_v4  ;;  %v917_v60 = vadd.f32 %v916_v53, %v915_v24 }
 0x1cb   :  { %10253 = vst [vmem:[#allocation59_spill] sm:$0xff] %v6848_v40  ;;  %10254 = vst [vmem:[#allocation60_spill] sm:$0xff] %v6851_v36  ;;  %v1213_v30 = vadd.f32 %v1212_v38, %v1211_v32  ;;  %v6861_v59 = vadd.f32 %v756_v37, %v6733_v21  ;;  %v890_v55 = vrot.slane %v889_v46, 1  ;;  %v1186_v58 = vrot.slane %v1185_v47, 1 }
 0x1cc   :  { %10255 = vst [vmem:[#allocation61_spill] sm:$0xff] %v6856_v17  ;;  %v878_v16 = vmul.f32 %v6856_v17, %v6780_v52  ;;  %v1174_v5 = vmul.f32 %v6856_v17, %v6783_v11  ;;  %v1470_v61 = vmul.f32 %v6800_v14, %v6856_v17  ;;  %v1766_v48 = vmul.f32 %v6806_v54, %v6856_v17 }
 0x1cd   :  { %10256 = vst [vmem:[#allocation62_spill] sm:$0xff] %v6861_v59  ;;  %v1481_v63 = vadd.f32 %v1480_v39, %v1479_v8  ;;  %v1777_v24 = vadd.f32 %v1776_v20, %v1775_v45  ;;  %v1509_v32 = vadd.f32 %v1508_v41, %v1507_v0  ;;  %v1805_v33 = vadd.f32 %v1804_v10, %v1803_v29 }
 0x1ce   :  { %v892_v2 = vrot.slane %v878_v16, 4  ;;  %v1188_v19 = vrot.slane %v1174_v5, 4  ;;  %v932_v43 = vmul.f32 %v6861_v59, %v6736_v27  ;;  %v1228_v53 = vmul.f32 %v6861_v59, %v6739_v56 }
 0x1cf   :  { %v1524_v38 = vmul.f32 %v6861_v59, %v6742_v23  ;;  %v1820_v18 = vmul.f32 %v6861_v59, %v6745_v50  ;;  %v918_v37 = vrot.slane %v917_v60, 1  ;;  %v1214_v22 = vrot.slane %v1213_v30, 1  ;;  %v758_v59 = vpop.f32.mrf.mxu1 }
 0x1d0   :  { %v1484_v8 = vrot.slane %v1470_v61, 4  ;;  %v1780_v45 = vrot.slane %v1766_v48, 4  ;;  %v936_v0 = vrot.slane %v932_v43, 4  ;;  %v1232_v29 = vrot.slane %v1228_v53, 4 }
 0x1d1   :  { %v1528_v39 = vrot.slane %v1524_v38, 4  ;;  %v1824_v20 = vrot.slane %v1820_v18, 4  ;;  %v6879_v41 = vadd.f32 %v890_v55, %v889_v46  ;;  %v6881_v10 = vadd.f32 %v1186_v58, %v1185_v47 }
 0x1d2   :  { %v1482_v28 = vrot.slane %v1481_v63, 1  ;;  %v1778_v15 = vrot.slane %v1777_v24, 1  ;;  %v1510_v49 = vrot.slane %v1509_v32, 1  ;;  %v1806_v26 = vrot.slane %v1805_v33, 1 }
 0x1d3   :  { %10257 = vst [vmem:[#allocation63_spill] sm:$0xff] %v6879_v41  ;;  %10258 = vst [vmem:[#allocation64_spill] sm:$0xff] %v6881_v10  ;;  %v893_v17 = vadd.f32 %v892_v2, %v878_v16  ;;  %v1189_v7 = vadd.f32 %v1188_v19, %v1174_v5  ;;  %v6883_v34 = vadd.f32 %v918_v37, %v917_v60 }
 0x1d4   :  { %v6885_v57 = vadd.f32 %v1214_v22, %v1213_v30  ;;  %v1485_v36 = vadd.f32 %v1484_v8, %v1470_v61  ;;  %v1781_v40 = vadd.f32 %v1780_v45, %v1766_v48  ;;  %v937_v6 = vadd.f32 %v936_v0, %v932_v43 }
 0x1d5   :  { %10259 = vst [vmem:[#allocation65_spill] sm:$0xff] %v6883_v34  ;;  %v1233_v62 = vadd.f32 %v1232_v29, %v1228_v53  ;;  %v1529_v46 = vadd.f32 %v1528_v39, %v1524_v38  ;;  %v1825_v55 = vadd.f32 %v1824_v20, %v1820_v18  ;;  %v6887_v47 = vadd.f32 %v1482_v28, %v1481_v63 }
 0x1d6   :  { %10260 = vst [vmem:[#allocation66_spill] sm:$0xff] %v6885_v57  ;;  %v6889_v58 = vadd.f32 %v1778_v15, %v1777_v24  ;;  %v6892_v31 = vadd.f32 %v675_v42, %v6727_v4  ;;  %v6895_v16 = vadd.f32 %v758_v59, %v6733_v21  ;;  %v6897_v60 = vadd.f32 %v1510_v49, %v1509_v32 }
 0x1d7   :  { %10261 = vst [vmem:[#allocation67_spill] sm:$0xff] %v6887_v47  ;;  %v6899_v22 = vadd.f32 %v1806_v26, %v1805_v33  ;;  %v894_v30 = vrot.slane %v893_v17, 2  ;;  %v1190_v5 = vrot.slane %v1189_v7, 2  ;;  %v1486_v15 = vrot.slane %v1485_v36, 2 }
 0x1d8   :  { %10262 = vst [vmem:[#allocation68_spill] sm:$0xff] %v6889_v58  ;;  %10263 = vst [vmem:[#allocation69_spill] sm:$0xff] %v6892_v31  ;;  %v1782_v48 = vrot.slane %v1781_v40, 2  ;;  %v938_v63 = vrot.slane %v937_v6, 2  ;;  %v1234_v42 = vrot.slane %v1233_v62, 2  ;;  %v1530_v24 = vrot.slane %v1529_v46, 2 }
 0x1d9   :  { %10264 = vst [vmem:[#allocation70_spill] sm:$0xff] %v6895_v16  ;;  %10265 = vst [vmem:[#allocation71_spill] sm:$0xff] %v6897_v60  ;;  %v1826_v2 = vrot.slane %v1825_v55, 2  ;;  %v906_v49 = vmul.f32 %v6892_v31, %v6780_v52  ;;  %v1202_v26 = vmul.f32 %v6892_v31, %v6783_v11  ;;  %v1498_v59 = vmul.f32 %v6800_v14, %v6892_v31 }
 0x1da   :  { %10266 = vst [vmem:[#allocation72_spill] sm:$0xff] %v6899_v22  ;;  %v1794_v32 = vmul.f32 %v6806_v54, %v6892_v31  ;;  %v895_v43 = vadd.f32 %v894_v30, %v893_v17  ;;  %v1191_v53 = vadd.f32 %v1190_v5, %v1189_v7  ;;  %v1487_v45 = vadd.f32 %v1486_v15, %v1485_v36 }
 0x1db   :  { %v920_v38 = vrot.slane %v906_v49, 4  ;;  %v1216_v18 = vrot.slane %v1202_v26, 4  ;;  %v1512_v37 = vrot.slane %v1498_v59, 4  ;;  %v1783_v0 = vadd.f32 %v1782_v48, %v1781_v40 }
 0x1dc   :  { %v1808_v8 = vrot.slane %v1794_v32, 4  ;;  %v939_v29 = vadd.f32 %v938_v63, %v937_v6  ;;  %v1235_v39 = vadd.f32 %v1234_v42, %v1233_v62  ;;  %v1531_v20 = vadd.f32 %v1530_v24, %v1529_v46 }
 0x1dd   :  { %v1827_v28 = vadd.f32 %v1826_v2, %v1825_v55  ;;  %v921_v61 = vadd.f32 %v920_v38, %v906_v49  ;;  %v1217_v21 = vadd.f32 %v1216_v18, %v1202_v26  ;;  %v960_v33 = vmul.f32 %v6895_v16, %v6736_v27 }
 0x1de   :  { %v1256_v19 = vmul.f32 %v6895_v16, %v6739_v56  ;;  %v1552_v7 = vmul.f32 %v6895_v16, %v6742_v23  ;;  %v1848_v17 = vmul.f32 %v6895_v16, %v6745_v50  ;;  %v1513_v6 = vadd.f32 %v1512_v37, %v1498_v59 }
 0x1df   :  { %v922_v36 = vrot.slane %v921_v61, 2  ;;  %v1218_v40 = vrot.slane %v1217_v21, 2  ;;  %v1809_v62 = vadd.f32 %v1808_v8, %v1794_v32  ;;  %v964_v46 = vrot.slane %v960_v33, 4 }
 0x1e0   :  { %v1260_v55 = vrot.slane %v1256_v19, 4  ;;  %v1556_v30 = vrot.slane %v1552_v7, 4  ;;  %v1852_v5 = vrot.slane %v1848_v17, 4  ;;  %v896_v15 = vrot.slane %v895_v43, 1 }
 0x1e1   :  { %v1192_v48 = vrot.slane %v1191_v53, 1  ;;  %v940_v63 = vrot.slane %v939_v29, 1  ;;  %v1236_v42 = vrot.slane %v1235_v39, 1  ;;  %v1532_v24 = vrot.slane %v1531_v20, 1 }
 0x1e2   :  { %v1828_v2 = vrot.slane %v1827_v28, 1  ;;  %v965_v49 = vadd.f32 %v964_v46, %v960_v33  ;;  %v1261_v26 = vadd.f32 %v1260_v55, %v1256_v19  ;;  %v1488_v38 = vrot.slane %v1487_v45, 1 }
 0x1e3   :  { %v1784_v18 = vrot.slane %v1783_v0, 1  ;;  %v1557_v23 = vadd.f32 %v1556_v30, %v1552_v7  ;;  %v1853_v50 = vadd.f32 %v1852_v5, %v1848_v17  ;;  %v923_v56 = vadd.f32 %v922_v36, %v921_v61  ;;  %v677_v7 = vpop.f32.mrf.mxu0  ;;  %v760_v36 = vpop.f32.mrf.mxu1  ;;  %v10284_v5 = vld [vmem:[#allocation46_spill] sm:$0xff] }
 0x1e4   :  { %v1219_v27 = vadd.f32 %v1218_v40, %v1217_v21  ;;  %v1514_v59 = vrot.slane %v1513_v6, 2  ;;  %v1810_v32 = vrot.slane %v1809_v62, 2  ;;  %v6925_v37 = vadd.f32 %v896_v15, %v895_v43 }
 0x1e5   :  { %v6927_v8 = vadd.f32 %v940_v63, %v939_v29  ;;  %v966_v16 = vrot.slane %v965_v49, 2  ;;  %v1262_v31 = vrot.slane %v1261_v26, 2  ;;  %v6929_v54 = vadd.f32 %v1192_v48, %v1191_v53  ;;  %v679_v52 = vpop.f32.mrf.mxu0  ;;  %v762_v4 = vpop.f32.mrf.mxu1 }
 0x1e6   :  { %10267 = vst [vmem:[#allocation73_spill] sm:$0xff] %v6925_v37  ;;  %v6931_v14 = vadd.f32 %v1236_v42, %v1235_v39  ;;  %v6933_v33 = vadd.f32 %v1532_v24, %v1531_v20  ;;  %v6935_v19 = vadd.f32 %v1828_v2, %v1827_v28  ;;  %v6937_v17 = vadd.f32 %v1488_v38, %v1487_v45  ;;  %v10286_v42 = vld [vmem:[#allocation42_spill] sm:$0xff]  ;;  %v10287_v2 = vld [vmem:[#allocation44_spill] sm:$0xff] }
 0x1e7   :  { %10268 = vst [vmem:[#allocation74_spill] sm:$0xff] %v6927_v8  ;;  %10269 = vst [vmem:[#allocation75_spill] sm:$0xff] %v6929_v54  ;;  %v6939_v21 = vadd.f32 %v1784_v18, %v1783_v0  ;;  %v1558_v61 = vrot.slane %v1557_v23, 2  ;;  %v1854_v43 = vrot.slane %v1853_v50, 2  ;;  %v924_v29 = vrot.slane %v923_v56, 1 }
 0x1e8   :  { %10270 = vst [vmem:[#allocation76_spill] sm:$0xff] %v6931_v14  ;;  %10271 = vst [vmem:[#allocation77_spill] sm:$0xff] %v6933_v33  ;;  %v1220_v40 = vrot.slane %v1219_v27, 1  ;;  %v1515_v46 = vadd.f32 %v1514_v59, %v1513_v6  ;;  %v1811_v55 = vadd.f32 %v1810_v32, %v1809_v62  ;;  %v10275_v53 = vmax.f32 %v6827_v25, %v6831_v1 }
 0x1e9   :  { %10272 = vst [vmem:[#allocation78_spill] sm:$0xff] %v6935_v19  ;;  %10273 = vst [vmem:[#allocation79_spill] sm:$0xff] %v6937_v17  ;;  %v967_v28 = vadd.f32 %v966_v16, %v965_v49  ;;  %v1263_v20 = vadd.f32 %v1262_v31, %v1261_v26  ;;  %v6948_v45 = vadd.f32 %v677_v7, %v6758_v44 }
 0x1ea   :  { %10274 = vst [vmem:[#allocation80_spill] sm:$0xff] %v6939_v21  ;;  %v6945_v39 = vmax.f32 %v10275_v53, %v6927_v8  ;;  %v10278_v0 = vmax.f32 %v6829_v12, %v6833_v3  ;;  %v10280_v6 = vmax.f32 %v6835_v51, %v6837_v9  ;;  %v10282_v16 = vmax.f32 %v6839_v35, %v6841_v13  ;;  %v10290_v53 = vld [vmem:[#allocation59_spill] sm:$0xff] }
 0x1eb   :  { %10277 = vst [vmem:[#allocation82_spill] sm:$0xff] %v6948_v45  ;;  %v6969_v15 = vadd.f32 %v760_v36, %v10284_v5  ;;  %v1559_v48 = vadd.f32 %v1558_v61, %v1557_v23  ;;  %v1855_v63 = vadd.f32 %v1854_v43, %v1853_v50  ;;  %v879_v24 = vmul.f32 %v6948_v45, %v10286_v42  ;;  %v10291_v23 = vld [vmem:[#allocation60_spill] sm:$0xff]  ;;  %v10292_v61 = vld [vmem:[#allocation38_spill] sm:$0xff] }
 0x1ec   :  { %10276 = vst [vmem:[#allocation81_spill] sm:$0xff] %v6945_v39  ;;  %v6954_v30 = vmax.f32 %v10278_v0, %v6931_v14  ;;  %v6960_v62 = vmax.f32 %v10280_v6, %v6933_v33  ;;  %v6966_v31 = vmax.f32 %v10282_v16, %v6935_v19  ;;  %v1175_v49 = vmul.f32 %v6948_v45, %v10287_v2  ;;  %v10293_v0 = vld [vmem:[#allocation39_spill] sm:$0xff] }
 0x1ed   :  { %10285 = vst [vmem:[#allocation86_spill] sm:$0xff] %v6969_v15  ;;  %v6975_v26 = vadd.f32 %v924_v29, %v923_v56  ;;  %v6977_v38 = vadd.f32 %v1220_v40, %v1219_v27  ;;  %v1516_v18 = vrot.slane %v1515_v46, 1  ;;  %v1812_v59 = vrot.slane %v1811_v55, 1  ;;  %v10294_v56 = vld [vmem:[#allocation43_spill] sm:$0xff]  ;;  %v10295_v29 = vld [vmem:[#allocation45_spill] sm:$0xff] }
 0x1ee   :  { %10279 = vst [vmem:[#allocation83_spill] sm:$0xff] %v6954_v30  ;;  %10281 = vst [vmem:[#allocation84_spill] sm:$0xff] %v6960_v62  ;;  %v968_v32 = vrot.slane %v967_v28, 1  ;;  %v1264_v7 = vrot.slane %v1263_v20, 1  ;;  %v1471_v36 = vmul.f32 %v10290_v53, %v6948_v45  ;;  %v1767_v50 = vmul.f32 %v10291_v23, %v6948_v45 }
 0x1ef   :  { %10283 = vst [vmem:[#allocation85_spill] sm:$0xff] %v6966_v31  ;;  %10288 = vst [vmem:[#allocation87_spill] sm:$0xff] %v6975_v26  ;;  %v933_v43 = vmul.f32 %v6969_v15, %v10292_v61  ;;  %v1229_v6 = vmul.f32 %v6969_v15, %v10293_v0  ;;  %v1525_v27 = vmul.f32 %v6969_v15, %v10294_v56  ;;  %v1560_v16 = vrot.slane %v1559_v48, 1 }
 0x1f0   :  { %10289 = vst [vmem:[#allocation88_spill] sm:$0xff] %v6977_v38  ;;  %v1821_v40 = vmul.f32 %v6969_v15, %v10295_v29  ;;  %v1856_v33 = vrot.slane %v1855_v63, 1  ;;  %v898_v19 = vrot.slane %v879_v24, 4  ;;  %v1194_v13 = vrot.slane %v1175_v49, 4 }
 0x1f1   :  { %v942_v35 = vrot.slane %v933_v43, 4  ;;  %v1238_v8 = vrot.slane %v1229_v6, 4  ;;  %v1534_v14 = vrot.slane %v1525_v27, 4  ;;  %v6995_v25 = vadd.f32 %v1516_v18, %v1515_v46 }
 0x1f2   :  { %v1830_v3 = vrot.slane %v1821_v40, 4  ;;  %v6997_v9 = vadd.f32 %v1812_v59, %v1811_v55  ;;  %v1490_v51 = vrot.slane %v1471_v36, 4  ;;  %v1786_v15 = vrot.slane %v1767_v50, 4 }
 0x1f3   :  { %10296 = vst [vmem:[#allocation89_spill] sm:$0xff] %v6995_v25  ;;  %v943_v45 = vadd.f32 %v942_v35, %v933_v43  ;;  %v1239_v11 = vadd.f32 %v1238_v8, %v1229_v6  ;;  %v6999_v22 = vadd.f32 %v968_v32, %v967_v28  ;;  %v7001_v58 = vadd.f32 %v1264_v7, %v1263_v20 }
 0x1f4   :  { %10297 = vst [vmem:[#allocation90_spill] sm:$0xff] %v6997_v9  ;;  %v7003_v60 = vadd.f32 %v1560_v16, %v1559_v48  ;;  %v7005_v12 = vadd.f32 %v1856_v33, %v1855_v63  ;;  %v899_v26 = vadd.f32 %v898_v19, %v879_v24  ;;  %v1195_v1 = vadd.f32 %v1194_v13, %v1175_v49 }
 0x1f5   :  { %10298 = vst [vmem:[#allocation91_spill] sm:$0xff] %v6999_v22  ;;  %10299 = vst [vmem:[#allocation92_spill] sm:$0xff] %v7001_v58  ;;  %v1535_v46 = vadd.f32 %v1534_v14, %v1525_v27  ;;  %v1831_v18 = vadd.f32 %v1830_v3, %v1821_v40  ;;  %v7012_v8 = vadd.f32 %v679_v52, %v6758_v44  ;;  %v944_v33 = vrot.slane %v943_v45, 2 }
 0x1f6   :  { %10300 = vst [vmem:[#allocation93_spill] sm:$0xff] %v7003_v60  ;;  %10301 = vst [vmem:[#allocation94_spill] sm:$0xff] %v7005_v12  ;;  %v7015_v28 = vadd.f32 %v762_v4, %v10284_v5  ;;  %v1491_v20 = vadd.f32 %v1490_v51, %v1471_v36  ;;  %v1787_v48 = vadd.f32 %v1786_v15, %v1767_v50  ;;  %v1240_v63 = vrot.slane %v1239_v11, 2 }
 0x1f7   :  { %10302 = vst [vmem:[#allocation95_spill] sm:$0xff] %v7012_v8  ;;  %v900_v19 = vrot.slane %v899_v26, 2  ;;  %v1196_v24 = vrot.slane %v1195_v1, 2  ;;  %v1536_v4 = vrot.slane %v1535_v46, 2  ;;  %v1832_v49 = vrot.slane %v1831_v18, 2 }
 0x1f8   :  { %10303 = vst [vmem:[#allocation96_spill] sm:$0xff] %v7015_v28  ;;  %v907_v51 = vmul.f32 %v7012_v8, %v10286_v42  ;;  %v1203_v15 = vmul.f32 %v7012_v8, %v10287_v2  ;;  %v1499_v59 = vmul.f32 %v10290_v53, %v7012_v8  ;;  %v1795_v32 = vmul.f32 %v10291_v23, %v7012_v8 }
 0x1f9   :  { %v1492_v7 = vrot.slane %v1491_v20, 2  ;;  %v1788_v36 = vrot.slane %v1787_v48, 2  ;;  %v945_v50 = vadd.f32 %v944_v33, %v943_v45  ;;  %v1241_v43 = vadd.f32 %v1240_v63, %v1239_v11 }
 0x1fa   :  { %v926_v6 = vrot.slane %v907_v51, 4  ;;  %v1222_v27 = vrot.slane %v1203_v15, 4  ;;  %v1518_v40 = vrot.slane %v1499_v59, 4  ;;  %v1814_v16 = vrot.slane %v1795_v32, 4 }
 0x1fb   :  { %v901_v52 = vadd.f32 %v900_v19, %v899_v26  ;;  %v1197_v3 = vadd.f32 %v1196_v24, %v1195_v1  ;;  %v1537_v13 = vadd.f32 %v1536_v4, %v1535_v46  ;;  %v1833_v14 = vadd.f32 %v1832_v49, %v1831_v18 }
 0x1fc   :  { %v927_v35 = vadd.f32 %v926_v6, %v907_v51  ;;  %v1223_v55 = vadd.f32 %v1222_v27, %v1203_v15  ;;  %v1519_v12 = vadd.f32 %v1518_v40, %v1499_v59  ;;  %v1815_v31 = vadd.f32 %v1814_v16, %v1795_v32 }
 0x1fd   :  { %v961_v58 = vmul.f32 %v7015_v28, %v10292_v61  ;;  %v1257_v30 = vmul.f32 %v7015_v28, %v10293_v0  ;;  %v1553_v11 = vmul.f32 %v7015_v28, %v10294_v56  ;;  %v1849_v45 = vmul.f32 %v7015_v28, %v10295_v29 }
 0x1fe   :  { %v1493_v26 = vadd.f32 %v1492_v7, %v1491_v20  ;;  %v1789_v1 = vadd.f32 %v1788_v36, %v1787_v48  ;;  %v946_v46 = vrot.slane %v945_v50, 1  ;;  %v1242_v18 = vrot.slane %v1241_v43, 1  ;;  %v766_v48 = vpop.f32.mrf.mxu1 }
 0x1ff   :  { %v928_v33 = vrot.slane %v927_v35, 2  ;;  %v1224_v63 = vrot.slane %v1223_v55, 2  ;;  %v1520_v19 = vrot.slane %v1519_v12, 2  ;;  %v1816_v24 = vrot.slane %v1815_v31, 2 }
 0x200   :  { %v902_v4 = vrot.slane %v901_v52, 1  ;;  %v1538_v49 = vrot.slane %v1537_v13, 1  ;;  %v1834_v51 = vrot.slane %v1833_v14, 1  ;;  %v970_v15 = vrot.slane %v961_v58, 4 }
 0x201   :  { %v1198_v59 = vrot.slane %v1197_v3, 1  ;;  %v1266_v32 = vrot.slane %v1257_v30, 4  ;;  %v1562_v6 = vrot.slane %v1553_v11, 4  ;;  %v1858_v27 = vrot.slane %v1849_v45, 4 }
 0x202   :  { %v1494_v40 = vrot.slane %v1493_v26, 1  ;;  %v1790_v16 = vrot.slane %v1789_v1, 1  ;;  %v7041_v56 = vadd.f32 %v946_v46, %v945_v50  ;;  %v7043_v20 = vadd.f32 %v1242_v18, %v1241_v43  ;;  %v10320_v18 = vld [vmem:[#allocation72_spill] sm:$0xff] }
 0x203   :  { %v929_v7 = vadd.f32 %v928_v33, %v927_v35  ;;  %v1225_v36 = vadd.f32 %v1224_v63, %v1223_v55  ;;  %v1521_v29 = vadd.f32 %v1520_v19, %v1519_v12  ;;  %v1817_v0 = vadd.f32 %v1816_v24, %v1815_v31  ;;  %v768_v35 = vpop.f32.mrf.mxu1  ;;  %v10323_v24 = vld [vmem:[#allocation26_spill] sm:$0xff] }
 0x204   :  { %10304 = vst [vmem:[#allocation97_spill] sm:$0xff] %v7041_v56  ;;  %10305 = vst [vmem:[#allocation98_spill] sm:$0xff] %v7043_v20  ;;  %v7045_v61 = vadd.f32 %v902_v4, %v901_v52  ;;  %v7047_v60 = vadd.f32 %v1538_v49, %v1537_v13  ;;  %v7049_v62 = vadd.f32 %v1834_v51, %v1833_v14  ;;  %v7069_v52 = vpop.f32.mrf.mxu0 }
 0x205   :  { %v971_v22 = vadd.f32 %v970_v15, %v961_v58  ;;  %v7051_v39 = vadd.f32 %v1198_v59, %v1197_v3  ;;  %v1267_v5 = vadd.f32 %v1266_v32, %v1257_v30  ;;  %v1563_v28 = vadd.f32 %v1562_v6, %v1553_v11  ;;  %v10316_v11 = vld [vmem:[#allocation71_spill] sm:$0xff]  ;;  %v10324_v32 = vld [vmem:[#allocation40_spill] sm:$0xff] }
 0x206   :  { %10306 = vst [vmem:[#allocation99_spill] sm:$0xff] %v7045_v61  ;;  %10307 = vst [vmem:[#allocation100_spill] sm:$0xff] %v7047_v60  ;;  %v1859_v50 = vadd.f32 %v1858_v27, %v1849_v45  ;;  %v7053_v46 = vadd.f32 %v1494_v40, %v1493_v26  ;;  %v7055_v43 = vadd.f32 %v1790_v16, %v1789_v1  ;;  %v930_v30 = vrot.slane %v929_v7, 1  ;;  %v10319_v1 = vld [vmem:[#allocation68_spill] sm:$0xff]  ;;  %v10325_v27 = vld [vmem:[#allocation41_spill] sm:$0xff] }
 0x207   :  { %10308 = vst [vmem:[#allocation101_spill] sm:$0xff] %v7049_v62  ;;  %10309 = vst [vmem:[#allocation102_spill] sm:$0xff] %v7051_v39  ;;  %v10312_v12 = vmax.f32 %v6879_v41, %v6883_v34  ;;  %v10314_v55 = vmax.f32 %v6881_v10, %v6885_v57  ;;  %v1226_v14 = vrot.slane %v1225_v36, 1  ;;  %v1522_v3 = vrot.slane %v1521_v29, 1  ;;  %v10326_v16 = vld [vmem:[#allocation47_spill] sm:$0xff] }
 0x208   :  { %10310 = vst [vmem:[#allocation103_spill] sm:$0xff] %v7053_v46  ;;  %10311 = vst [vmem:[#allocation104_spill] sm:$0xff] %v7055_v43  ;;  %v1818_v13 = vrot.slane %v1817_v0, 1  ;;  %v10317_v45 = vmax.f32 %v6887_v47, %v10316_v11  ;;  %v10321_v33 = vmax.f32 %v10319_v1, %v10320_v18  ;;  %v972_v19 = vrot.slane %v971_v22, 2  ;;  %v685_v18 = vpop.f32.mrf.mxu0 }
 0x209   :  { %v7061_v31 = vmax.f32 %v10312_v12, %v7041_v56  ;;  %v7067_v58 = vmax.f32 %v10314_v55, %v7043_v20  ;;  %v7084_v4 = vadd.f32 %v766_v48, %v10323_v24  ;;  %v1268_v49 = vrot.slane %v1267_v5, 2  ;;  %v10327_v55 = vld [vmem:[#allocation49_spill] sm:$0xff] }
 0x20a   :  { %v7075_v26 = vmax.f32 %v10317_v45, %v7047_v60  ;;  %v7081_v63 = vmax.f32 %v10321_v33, %v7049_v62  ;;  %v1564_v51 = vrot.slane %v1563_v28, 2  ;;  %v1860_v15 = vrot.slane %v1859_v50, 2 }
 0x20b   :  { %10313 = vst [vmem:[#allocation105_spill] sm:$0xff] %v7061_v31  ;;  %10315 = vst [vmem:[#allocation106_spill] sm:$0xff] %v7067_v58  ;;  %v7087_v59 = vadd.f32 %v768_v35, %v10323_v24  ;;  %v934_v6 = vmul.f32 %v7084_v4, %v10324_v32  ;;  %v1230_v40 = vmul.f32 %v7084_v4, %v10325_v27 }
 0x20c   :  { %10318 = vst [vmem:[#allocation107_spill] sm:$0xff] %v7075_v26  ;;  %10322 = vst [vmem:[#allocation108_spill] sm:$0xff] %v7081_v63  ;;  %v1526_v12 = vmul.f32 %v7084_v4, %v10326_v16  ;;  %v1822_v45 = vmul.f32 %v7084_v4, %v10327_v55  ;;  %v7097_v48 = vadd.f32 %v930_v30, %v929_v7 }
 0x20d   :  { %v7099_v33 = vadd.f32 %v1226_v14, %v1225_v36  ;;  %v7101_v62 = vadd.f32 %v1522_v3, %v1521_v29  ;;  %v7103_v35 = vadd.f32 %v1818_v13, %v1817_v0  ;;  %v973_v1 = vadd.f32 %v972_v19, %v971_v22  ;;  %v7119_v13 = vpop.permute.xlu0 %552 }
 0x20e   :  { %10328 = vst [vmem:[#allocation109_spill] sm:$0xff] %v7097_v48  ;;  %v948_v60 = vrot.slane %v934_v6, 4  ;;  %v1540_v63 = vrot.slane %v1526_v12, 4  ;;  %v1836_v56 = vrot.slane %v1822_v45, 4  ;;  %v7105_v20 = vadd.f32 %v1268_v49, %v1267_v5  ;;  %10332 = vst [vmem:[#allocation113_spill] sm:$0xff] %v7119_v13 }
 0x20f   :  { %10329 = vst [vmem:[#allocation110_spill] sm:$0xff] %v7099_v33  ;;  %10330 = vst [vmem:[#allocation111_spill] sm:$0xff] %v7101_v62  ;;  %v7107_v57 = vadd.f32 %v1564_v51, %v1563_v28  ;;  %v1554_v10 = vmul.f32 %v7087_v59, %v10326_v16  ;;  %v1850_v7 = vmul.f32 %v7087_v59, %v10327_v55  ;;  %v1244_v36 = vrot.slane %v1230_v40, 4  ;;  %v7117_v28 = vpop.f32.mrf.mxu0 }
 0x210   :  { %10331 = vst [vmem:[#allocation112_spill] sm:$0xff] %v7103_v35  ;;  %v1541_v29 = vadd.f32 %v1540_v63, %v1526_v12  ;;  %v1837_v30 = vadd.f32 %v1836_v56, %v1822_v45  ;;  %v962_v0 = vmul.f32 %v7087_v59, %v10324_v32  ;;  %v949_v22 = vadd.f32 %v948_v60, %v934_v6 }
 0x211   :  { %v1258_v14 = vmul.f32 %v7087_v59, %v10325_v27  ;;  %v1568_v5 = vrot.slane %v1554_v10, 4  ;;  %v1864_v3 = vrot.slane %v1850_v7, 4  ;;  %v7123_v49 = vadd.f32 %v1860_v15, %v1859_v50  ;;  %v770_v50 = vpop.f32.mrf.mxu1  ;;  %v7129_v15 = vpop.f32.mrf.mxu0 }
 0x212   :  { %v1542_v63 = vrot.slane %v1541_v29, 2  ;;  %v1838_v56 = vrot.slane %v1837_v30, 2  ;;  %v1245_v45 = vadd.f32 %v1244_v36, %v1230_v40  ;;  %v976_v11 = vrot.slane %v962_v0, 4 }
 0x213   :  { %v1569_v6 = vadd.f32 %v1568_v5, %v1554_v10  ;;  %v1865_v12 = vadd.f32 %v1864_v3, %v1850_v7  ;;  %v950_v47 = vrot.slane %v949_v22, 2  ;;  %v1272_v55 = vrot.slane %v1258_v14, 4  ;;  %v772_v13 = vpop.f32.mrf.mxu1  ;;  %v7141_v33 = vpop.f32.mrf.mxu0 }
 0x214   :  { %v1543_v34 = vadd.f32 %v1542_v63, %v1541_v29  ;;  %v1839_v41 = vadd.f32 %v1838_v56, %v1837_v30  ;;  %v974_v51 = vrot.slane %v973_v1, 1  ;;  %v7135_v29 = vpop.permute.xlu0 %542  ;;  %v1246_v30 = vrot.slane %v1245_v45, 2 }
 0x215   :  { %v1570_v16 = vrot.slane %v1569_v6, 2  ;;  %v1866_v19 = vrot.slane %v1865_v12, 2  ;;  %10333 = vst [vmem:[#allocation114_spill] sm:$0xff] %v7135_v29  ;;  %v977_v63 = vadd.f32 %v976_v11, %v962_v0  ;;  %v951_v56 = vadd.f32 %v950_v47, %v949_v22 }
 0x216   :  { %v1544_v32 = vrot.slane %v1543_v34, 1  ;;  %v1840_v24 = vrot.slane %v1839_v41, 1  ;;  %v1273_v60 = vadd.f32 %v1272_v55, %v1258_v14  ;;  %v10339_v47 = vmax.f32 %v6939_v21, %v6997_v9 }
 0x217   :  { %v1571_v7 = vadd.f32 %v1570_v16, %v1569_v6  ;;  %v1867_v36 = vadd.f32 %v1866_v19, %v1865_v12  ;;  %v7146_v16 = vadd.f32 %v7069_v52, %v7135_v29  ;;  %v1247_v0 = vadd.f32 %v1246_v30, %v1245_v45 }
 0x218   :  { %v7137_v5 = vadd.f32 %v1544_v32, %v1543_v34  ;;  %v7139_v3 = vadd.f32 %v1840_v24, %v1839_v41  ;;  %v10337_v34 = vmax.f32 %v6937_v17, %v6995_v25  ;;  %v7160_v24 = vadd.f32 %v974_v51, %v973_v1 }
 0x219   :  { %v1572_v27 = vrot.slane %v1571_v7, 1  ;;  %v1868_v8 = vrot.slane %v1867_v36, 1  ;;  %10336 = vst [vmem:[#allocation117_spill] sm:$0xff] %v7146_v16  ;;  %v7163_v32 = vadd.f32 %v685_v18, %v7135_v29  ;;  %v978_v22 = vrot.slane %v977_v63, 2 }
 0x21a   :  { %10334 = vst [vmem:[#allocation115_spill] sm:$0xff] %v7137_v5  ;;  %10335 = vst [vmem:[#allocation116_spill] sm:$0xff] %v7139_v3  ;;  %v7152_v41 = vmax.f32 %v10337_v34, %v7137_v5  ;;  %v7158_v11 = vmax.f32 %v10339_v47, %v7139_v3  ;;  %v7170_v14 = vadd.f32 %v770_v50, %v6758_v44  ;;  %v952_v6 = vrot.slane %v951_v56, 1 }
 0x21b   :  { %10341 = vst [vmem:[#allocation120_spill] sm:$0xff] %v7160_v24  ;;  %10342 = vst [vmem:[#allocation121_spill] sm:$0xff] %v7163_v32  ;;  %v7165_v55 = vadd.f32 %v1572_v27, %v1571_v7  ;;  %v7167_v52 = vadd.f32 %v1868_v8, %v1867_v36  ;;  %v7173_v19 = vadd.f32 %v772_v13, %v6758_v44  ;;  %v1274_v12 = vrot.slane %v1273_v60, 2  ;;  %v7179_v27 = vpop.f32.mrf.mxu0 }
 0x21c   :  { %10338 = vst [vmem:[#allocation118_spill] sm:$0xff] %v7152_v41  ;;  %10340 = vst [vmem:[#allocation119_spill] sm:$0xff] %v7158_v11  ;;  %v935_v8 = vmul.f32 %v7170_v14, %v10286_v42  ;;  %v1231_v51 = vmul.f32 %v7170_v14, %v10287_v2  ;;  %v1527_v13 = vmul.f32 %v7170_v14, %v10290_v53  ;;  %v1248_v3 = vrot.slane %v1247_v0, 1 }
 0x21d   :  { %10343 = vst [vmem:[#allocation122_spill] sm:$0xff] %v7165_v55  ;;  %10344 = vst [vmem:[#allocation123_spill] sm:$0xff] %v7167_v52  ;;  %v1823_v45 = vmul.f32 %v7170_v14, %v10291_v23  ;;  %v963_v50 = vmul.f32 %v7173_v19, %v10286_v42  ;;  %v1259_v7 = vmul.f32 %v7173_v19, %v10287_v2  ;;  %v7197_v5 = vpop.f32.mrf.mxu0 }
 0x21e   :  { %10345 = vst [vmem:[#allocation124_spill] sm:$0xff] %v7170_v14  ;;  %10346 = vst [vmem:[#allocation125_spill] sm:$0xff] %v7173_v19  ;;  %v1555_v36 = vmul.f32 %v7173_v19, %v10290_v53  ;;  %v1851_v30 = vmul.f32 %v7173_v19, %v10291_v23  ;;  %v954_v34 = vrot.slane %v935_v8, 4  ;;  %v1250_v47 = vrot.slane %v1231_v51, 4 }
 0x21f   :  { %10347 = vst [vmem:[#allocation126_spill] sm:$0xff] %v7179_v27  ;;  %v1546_v18 = vrot.slane %v1527_v13, 4  ;;  %v1842_v1 = vrot.slane %v1823_v45, 4  ;;  %v982_v10 = vrot.slane %v963_v50, 4  ;;  %v1278_v40 = vrot.slane %v1259_v7, 4  ;;  %10348 = vst [vmem:[#allocation127_spill] sm:$0xff] %v7197_v5  ;;  %v7199_v27 = vpop.f32.mrf.mxu0 }
 0x220   :  { %v1574_v32 = vrot.slane %v1555_v36, 4  ;;  %v1870_v16 = vrot.slane %v1851_v30, 4  ;;  %v955_v9 = vadd.f32 %v954_v34, %v935_v8  ;;  %v979_v42 = vadd.f32 %v978_v22, %v977_v63  ;;  %v7205_v22 = vpop.permute.xlu1 %557 }
 0x221   :  { %v1547_v21 = vadd.f32 %v1546_v18, %v1527_v13  ;;  %v1843_v2 = vadd.f32 %v1842_v1, %v1823_v45  ;;  %v1275_v44 = vadd.f32 %v1274_v12, %v1273_v60  ;;  %v1251_v17 = vadd.f32 %v1250_v47, %v1231_v51  ;;  %10351 = vst [vmem:[#allocation130_spill] sm:$0xff] %v7205_v22 }
 0x222   :  { %v1575_v53 = vadd.f32 %v1574_v32, %v1555_v36  ;;  %v1871_v25 = vadd.f32 %v1870_v16, %v1851_v30  ;;  %v983_v11 = vadd.f32 %v982_v10, %v963_v50  ;;  %v956_v55 = vrot.slane %v955_v9, 2 }
 0x223   :  { %v1548_v23 = vrot.slane %v1547_v21, 2  ;;  %v1844_v52 = vrot.slane %v1843_v2, 2  ;;  %v1279_v41 = vadd.f32 %v1278_v40, %v1259_v7  ;;  %v7201_v29 = vadd.f32 %v952_v6, %v951_v56  ;;  %v5633_v56 = vpop.f32.mrf.mxu0 }
 0x224   :  { %v1576_v19 = vrot.slane %v1575_v53, 2  ;;  %v1872_v14 = vrot.slane %v1871_v25, 2  ;;  %v7203_v5 = vadd.f32 %v1248_v3, %v1247_v0  ;;  %v980_v63 = vrot.slane %v979_v42, 1 }
 0x225   :  { %10349 = vst [vmem:[#allocation128_spill] sm:$0xff] %v7201_v29  ;;  %v1549_v18 = vadd.f32 %v1548_v23, %v1547_v21  ;;  %v1845_v1 = vadd.f32 %v1844_v52, %v1843_v2  ;;  %v1276_v60 = vrot.slane %v1275_v44, 1  ;;  %v1252_v12 = vrot.slane %v1251_v17, 2 }
 0x226   :  { %10350 = vst [vmem:[#allocation129_spill] sm:$0xff] %v7203_v5  ;;  %v1577_v32 = vadd.f32 %v1576_v19, %v1575_v53  ;;  %v1873_v16 = vadd.f32 %v1872_v14, %v1871_v25  ;;  %v984_v40 = vrot.slane %v983_v11, 2  ;;  %v957_v51 = vadd.f32 %v956_v55, %v955_v9  ;;  %v10358_v9 = vld [vmem:[#allocation87_spill] sm:$0xff] }
 0x227   :  { %v1550_v10 = vrot.slane %v1549_v18, 1  ;;  %v1846_v8 = vrot.slane %v1845_v1, 1  ;;  %v1280_v13 = vrot.slane %v1279_v41, 2  ;;  %v10352_v3 = vrot.slane %v7105_v20, 1 }
 0x228   :  { %v1578_v45 = vrot.slane %v1577_v32, 1  ;;  %v1874_v50 = vrot.slane %v1873_v16, 1  ;;  %v10354_v2 = vrot.slane %v7107_v57, 1  ;;  %v10359_v55 = vmax.f32 %v6925_v37, %v10358_v9 }
 0x229   :  { %v7210_v21 = vadd.f32 %v10352_v3, %v7105_v20  ;;  %v7217_v53 = vadd.f32 %v1550_v10, %v1549_v18  ;;  %v7219_v23 = vadd.f32 %v1846_v8, %v1845_v1  ;;  %v10360_v20 = vmax.f32 %v6929_v54, %v6977_v38 }
 0x22a   :  { %v7215_v25 = vadd.f32 %v10354_v2, %v7107_v57  ;;  %v7225_v52 = vmax.f32 %v10359_v55, %v7201_v29  ;;  %v7233_v14 = vadd.f32 %v1578_v45, %v1577_v32  ;;  %v7235_v57 = vadd.f32 %v1874_v50, %v1873_v16  ;;  %v10372_v50 = vld [vmem:[#allocation27_spill] sm:$0xff] }
 0x22b   :  { %10353 = vst [vmem:[#allocation131_spill] sm:$0xff] %v7210_v21  ;;  %10356 = vst [vmem:[#allocation133_spill] sm:$0xff] %v7217_v53  ;;  %v7231_v0 = vmax.f32 %v10360_v20, %v7203_v5  ;;  %v7237_v19 = vadd.f32 %v980_v63, %v979_v42  ;;  %v7239_v6 = vadd.f32 %v1276_v60, %v1275_v44  ;;  %v958_v47 = vrot.slane %v957_v51, 1  ;;  %v829_v42 = vpop.f32.mrf.mxu0  ;;  %v7253_v63 = vpop.permute.xlu1 %547  ;;  %v10379_v44 = vld [vmem:[#allocation70_spill] sm:$0xff] }
 0x22c   :  { %10355 = vst [vmem:[#allocation132_spill] sm:$0xff] %v7215_v25  ;;  %10357 = vst [vmem:[#allocation134_spill] sm:$0xff] %v7219_v23  ;;  %v10364_v7 = vmax.f32 %v7053_v46, %v7101_v62  ;;  %v10365_v30 = vmax.f32 %v7055_v43, %v7103_v35  ;;  %v1253_v18 = vadd.f32 %v1252_v12, %v1251_v17  ;;  %v10367_v60 = vrot.slane %v7123_v49, 1  ;;  %v776_v35 = vpop.f32.mrf.mxu1 }
 0x22d   :  { %10361 = vst [vmem:[#allocation135_spill] sm:$0xff] %v7233_v14  ;;  %10362 = vst [vmem:[#allocation136_spill] sm:$0xff] %v7235_v57  ;;  %v985_v1 = vadd.f32 %v984_v40, %v983_v11  ;;  %v1281_v32 = vadd.f32 %v1280_v13, %v1279_v41  ;;  %v7272_v11 = vadd.f32 %v7117_v28, %v7253_v63  ;;  %v10371_v13 = vld [vmem:[#allocation25_spill] sm:$0xff] }
 0x22e   :  { %10363 = vst [vmem:[#allocation137_spill] sm:$0xff] %v7237_v19  ;;  %v7245_v36 = vmax.f32 %v10364_v7, %v7217_v53  ;;  %v7251_v34 = vmax.f32 %v10365_v30, %v7219_v23  ;;  %10366 = vst [vmem:[#allocation138_spill] sm:$0xff] %v7253_v63  ;;  %v7260_v16 = vadd.f32 %v10367_v60, %v7123_v49  ;;  %v1254_v28 = vrot.slane %v1253_v18, 1  ;;  %v10374_v7 = vld [vmem:[#allocation61_spill] sm:$0xff]  ;;  %v5634_v23 = vpop.f32.mrf.mxu0 }
 0x22f   :  { %10369 = vst [vmem:[#allocation140_spill] sm:$0xff] %v7272_v11  ;;  %v7276_v49 = vadd.f32 %v7129_v15, %v7253_v63  ;;  %v7283_v45 = vadd.f32 %v5633_v56, %v10371_v13  ;;  %v7286_v3 = vadd.f32 %v829_v42, %v10372_v50  ;;  %v7288_v2 = vadd.f32 %v958_v47, %v957_v51  ;;  %v10375_v30 = vld [vmem:[#allocation69_spill] sm:$0xff]  ;;  %v10376_v13 = vld [vmem:[#allocation34_spill] sm:$0xff]  ;;  %v10377_v51 = vld [vmem:[#allocation36_spill] sm:$0xff] }
 0x230   :  { %10368 = vst [vmem:[#allocation139_spill] sm:$0xff] %v7260_v16  ;;  %v986_v55 = vrot.slane %v985_v1, 1  ;;  %v1282_v20 = vrot.slane %v1281_v32, 1  ;;  %v10378_v50 = vld [vmem:[#allocation62_spill] sm:$0xff]  ;;  %v10381_v5 = vmax.f32 %v7045_v61, %v7097_v48 }
 0x231   :  { %10370 = vst [vmem:[#allocation141_spill] sm:$0xff] %v7276_v49  ;;  %10373 = vst [vmem:[#allocation25_spill] sm:$0xff] %v7288_v2  ;;  %v2062_v15 = vmul.f32 %v7283_v45, %v10374_v7  ;;  %v2090_v60 = vmul.f32 %v7283_v45, %v10375_v30  ;;  %v2118_v41 = vmul.f32 %v7283_v45, %v7084_v4 }
 0x232   :  { %v2146_v56 = vmul.f32 %v7283_v45, %v7087_v59  ;;  %v2060_v42 = vmul.f32 %v7286_v3, %v10376_v13  ;;  %v2088_v47 = vmul.f32 %v7286_v3, %v10377_v51  ;;  %v2116_v17 = vmul.f32 %v7286_v3, %v10378_v50 }
 0x233   :  { %v2144_v7 = vmul.f32 %v7286_v3, %v10379_v44  ;;  %v2076_v8 = vrot.slane %v2062_v15, 4  ;;  %v2104_v30 = vrot.slane %v2090_v60, 4  ;;  %v2132_v10 = vrot.slane %v2118_v41, 4 }
 0x234   :  { %v2160_v40 = vrot.slane %v2146_v56, 4  ;;  %v2064_v4 = vrot.slane %v2060_v42, 4  ;;  %v2092_v12 = vrot.slane %v2088_v47, 4  ;;  %v2120_v16 = vrot.slane %v2116_v17, 4 }
 0x235   :  { %v2148_v59 = vrot.slane %v2144_v7, 4  ;;  %v2077_v49 = vadd.f32 %v2076_v8, %v2062_v15  ;;  %v2105_v11 = vadd.f32 %v2104_v30, %v2090_v60  ;;  %v2133_v13 = vadd.f32 %v2132_v10, %v2118_v41  ;;  %v10384_v30 = vld [vmem:[#allocation28_spill] sm:$0xff] }
 0x236   :  { %v2161_v53 = vadd.f32 %v2160_v40, %v2146_v56  ;;  %v7306_v51 = vadd.f32 %v1254_v28, %v1253_v18  ;;  %v2065_v50 = vadd.f32 %v2064_v4, %v2060_v42  ;;  %v2093_v43 = vadd.f32 %v2092_v12, %v2088_v47  ;;  %v10382_v42 = vld [vmem:[#allocation110_spill] sm:$0xff] }
 0x237   :  { %v2121_v29 = vadd.f32 %v2120_v16, %v2116_v17  ;;  %v7308_v44 = vadd.f32 %v986_v55, %v985_v1  ;;  %v2078_v9 = vrot.slane %v2077_v49, 2  ;;  %v2106_v25 = vrot.slane %v2105_v11, 2  ;;  %v832_v16 = vpop.f32.mrf.mxu0  ;;  %v778_v1 = vpop.f32.mrf.mxu1 }
 0x238   :  { %10380 = vst [vmem:[#allocation27_spill] sm:$0xff] %v7306_v51  ;;  %v2134_v26 = vrot.slane %v2133_v13, 2  ;;  %v7314_v8 = vmax.f32 %v10381_v5, %v7288_v2  ;;  %v7316_v10 = vadd.f32 %v1282_v20, %v1281_v32  ;;  %v2066_v41 = vrot.slane %v2065_v50, 2 }
 0x239   :  { %v2094_v18 = vrot.slane %v2093_v43, 2  ;;  %v2079_v40 = vadd.f32 %v2078_v9, %v2077_v49  ;;  %v2107_v28 = vadd.f32 %v2106_v25, %v2105_v11  ;;  %v2162_v15 = vrot.slane %v2161_v53, 2  ;;  %v10385_v25 = vld [vmem:[#allocation113_spill] sm:$0xff]  ;;  %v10387_v11 = vld [vmem:[#allocation114_spill] sm:$0xff] }
 0x23a   :  { %v2149_v12 = vadd.f32 %v2148_v59, %v2144_v7  ;;  %v2135_v17 = vadd.f32 %v2134_v26, %v2133_v13  ;;  %v2067_v55 = vadd.f32 %v2066_v41, %v2065_v50  ;;  %v2122_v56 = vrot.slane %v2121_v29, 2  ;;  %v10389_v49 = vld [vmem:[#allocation37_spill] sm:$0xff]  ;;  %v10391_v59 = vld [vmem:[#allocation126_spill] sm:$0xff] }
 0x23b   :  { %v2095_v60 = vadd.f32 %v2094_v18, %v2093_v43  ;;  %v10383_v47 = vmax.f32 %v7051_v39, %v10382_v42  ;;  %v2080_v32 = vrot.slane %v2079_v40, 1  ;;  %v2108_v20 = vrot.slane %v2107_v28, 1 }
 0x23c   :  { %v7325_v4 = vadd.f32 %v5634_v23, %v10384_v30  ;;  %v7329_v9 = vadd.f32 %v7141_v33, %v10385_v25  ;;  %v7332_v26 = vadd.f32 %v776_v35, %v10387_v11  ;;  %v2068_v43 = vrot.slane %v2067_v55, 1 }
 0x23d   :  { %v7322_v5 = vmax.f32 %v10383_v47, %v7306_v51  ;;  %v7335_v7 = vadd.f32 %v832_v16, %v10389_v49  ;;  %v7339_v13 = vadd.f32 %v10391_v59, %v10385_v25  ;;  %v7342_v50 = vadd.f32 %v778_v1, %v10387_v11  ;;  %v10397_v49 = vld [vmem:[#allocation95_spill] sm:$0xff]  ;;  %v10398_v59 = vld [vmem:[#allocation124_spill] sm:$0xff] }
 0x23e   :  { %10386 = vst [vmem:[#allocation61_spill] sm:$0xff] %v7329_v9  ;;  %10388 = vst [vmem:[#allocation69_spill] sm:$0xff] %v7332_v26  ;;  %v2096_v23 = vrot.slane %v2095_v60, 1  ;;  %v2150_v41 = vrot.slane %v2149_v12, 2  ;;  %v7344_v18 = vadd.f32 %v2080_v32, %v2079_v40  ;;  %v2136_v33 = vrot.slane %v2135_v17, 1  ;;  %v10396_v26 = vld [vmem:[#allocation82_spill] sm:$0xff] }
 0x23f   :  { %10390 = vst [vmem:[#allocation34_spill] sm:$0xff] %v7335_v7  ;;  %10392 = vst [vmem:[#allocation36_spill] sm:$0xff] %v7339_v13  ;;  %v2163_v47 = vadd.f32 %v2162_v15, %v2161_v53  ;;  %v2123_v30 = vadd.f32 %v2122_v56, %v2121_v29  ;;  %v7346_v35 = vadd.f32 %v2108_v20, %v2107_v28  ;;  %v10401_v32 = vld [vmem:[#allocation48_spill] sm:$0xff]  ;;  %v10402_v29 = vld [vmem:[#allocation50_spill] sm:$0xff]  ;;  %v780_v15 = vpop.f32.mrf.mxu1 }
 0x240   :  { %10393 = vst [vmem:[#allocation62_spill] sm:$0xff] %v7342_v50  ;;  %10394 = vst [vmem:[#allocation70_spill] sm:$0xff] %v7344_v18  ;;  %v2063_v16 = vmul.f32 %v7325_v4, %v10396_v26  ;;  %v2091_v9 = vmul.f32 %v7325_v4, %v10397_v49  ;;  %v2119_v13 = vmul.f32 %v7325_v4, %v10398_v59  ;;  %v10400_v50 = vld [vmem:[#allocation125_spill] sm:$0xff] }
 0x241   :  { %10395 = vst [vmem:[#allocation28_spill] sm:$0xff] %v7346_v35  ;;  %v7354_v1 = vadd.f32 %v2068_v43, %v2067_v55  ;;  %v2147_v40 = vmul.f32 %v7325_v4, %v10400_v50  ;;  %v2061_v53 = vmul.f32 %v7335_v7, %v10401_v32  ;;  %v2089_v28 = vmul.f32 %v7335_v7, %v10402_v29  ;;  %v782_v58 = vpop.f32.mrf.mxu1 }
 0x242   :  { %v7362_v56 = vadd.f32 %v2096_v23, %v2095_v60  ;;  %v2082_v20 = vrot.slane %v2063_v16, 4  ;;  %v2110_v26 = vrot.slane %v2091_v9, 4  ;;  %v2138_v49 = vrot.slane %v2119_v13, 4 }
 0x243   :  { %10399 = vst [vmem:[#allocation37_spill] sm:$0xff] %v7354_v1  ;;  %v2151_v2 = vadd.f32 %v2150_v41, %v2149_v12  ;;  %v2166_v11 = vrot.slane %v2147_v40, 4  ;;  %v2070_v59 = vrot.slane %v2061_v53, 4  ;;  %v2098_v55 = vrot.slane %v2089_v28, 4 }
 0x244   :  { %10403 = vst [vmem:[#allocation126_spill] sm:$0xff] %v7362_v56  ;;  %v2124_v43 = vrot.slane %v2123_v30, 1  ;;  %v2083_v48 = vadd.f32 %v2082_v20, %v2063_v16  ;;  %v2111_v61 = vadd.f32 %v2110_v26, %v2091_v9  ;;  %v2139_v50 = vadd.f32 %v2138_v49, %v2119_v13  ;;  %v10405_v16 = vld [vmem:[#allocation86_spill] sm:$0xff]  ;;  %v5637_v49 = vpop.f32.mrf.mxu0 }
 0x245   :  { %v2202_v32 = vmax.f32 %v7344_v18, %v7346_v35  ;;  %v2167_v51 = vadd.f32 %v2166_v11, %v2147_v40  ;;  %v2071_v21 = vadd.f32 %v2070_v59, %v2061_v53  ;;  %v2099_v29 = vadd.f32 %v2098_v55, %v2089_v28  ;;  %v786_v59 = vpop.f32.mrf.mxu1 }
 0x246   :  { %v7366_v60 = vadd.f32 %v2136_v33, %v2135_v17  ;;  %v2164_v23 = vrot.slane %v2163_v47, 1  ;;  %v2200_v12 = vmax.f32 %v7354_v1, %v7362_v56  ;;  %v2084_v41 = vrot.slane %v2083_v48, 2  ;;  %v10407_v33 = vld [vmem:[#allocation127_spill] sm:$0xff] }
 0x247   :  { %v2112_v42 = vrot.slane %v2111_v61, 2  ;;  %v2140_v38 = vrot.slane %v2139_v50, 2  ;;  %v2168_v39 = vrot.slane %v2167_v51, 2  ;;  %v2117_v9 = vmul.f32 %v7335_v7, %v10405_v16  ;;  %v10409_v16 = vld [vmem:[#allocation96_spill] sm:$0xff] }
 0x248   :  { %10404 = vst [vmem:[#allocation82_spill] sm:$0xff] %v7366_v60  ;;  %v7374_v11 = vadd.f32 %v2124_v43, %v2123_v30  ;;  %v2152_v40 = vrot.slane %v2151_v2, 1  ;;  %v2072_v53 = vrot.slane %v2071_v21, 2  ;;  %v7380_v28 = vadd.f32 %v10407_v33, %v7205_v22 }
 0x249   :  { %v7383_v20 = vmax.f32 %v2202_v32, %v7366_v60  ;;  %v2100_v26 = vrot.slane %v2099_v29, 2  ;;  %v7385_v55 = vadd.f32 %v2164_v23, %v2163_v47  ;;  %v2085_v43 = vadd.f32 %v2084_v41, %v2083_v48 }
 0x24a   :  { %10406 = vst [vmem:[#allocation95_spill] sm:$0xff] %v7374_v11  ;;  %10408 = vst [vmem:[#allocation124_spill] sm:$0xff] %v7380_v28  ;;  %v7388_v30 = vmax.f32 %v2200_v12, %v7374_v11  ;;  %v2145_v13 = vmul.f32 %v7335_v7, %v10409_v16  ;;  %v2113_v17 = vadd.f32 %v2112_v42, %v2111_v61  ;;  %v2126_v33 = vrot.slane %v2117_v9, 4  ;;  %v10417_v16 = vld [vmem:[#allocation29_spill] sm:$0xff] }
 0x24b   :  { %v2141_v56 = vadd.f32 %v2140_v38, %v2139_v50  ;;  %v7392_v1 = vadd.f32 %v2168_v39, %v2167_v51  ;;  %v7395_v32 = vadd.f32 %v780_v15, %v7253_v63  ;;  %v7399_v28 = vadd.f32 %v7199_v27, %v7205_v22  ;;  %v845_v51 = vpop.f32.mrf.mxu0  ;;  %v10414_v15 = vld [vmem:[#allocation26_spill] sm:$0xff] }
 0x24c   :  { %v7401_v47 = vadd.f32 %v2152_v40, %v2151_v2  ;;  %v7403_v23 = vadd.f32 %v2072_v53, %v2071_v21  ;;  %v7406_v48 = vadd.f32 %v782_v58, %v7253_v63  ;;  %v7409_v61 = vadd.f32 %v786_v59, %v10385_v25  ;;  %v10415_v53 = vld [vmem:[#allocation40_spill] sm:$0xff] }
 0x24d   :  { %10410 = vst [vmem:[#allocation125_spill] sm:$0xff] %v7395_v32  ;;  %10411 = vst [vmem:[#allocation48_spill] sm:$0xff] %v7399_v28  ;;  %v7413_v38 = vadd.f32 %v2100_v26, %v2099_v29  ;;  %v2086_v42 = vrot.slane %v2085_v43, 1  ;;  %v2154_v2 = vrot.slane %v2145_v13, 4  ;;  %v854_v21 = vadd.f32 %v5637_v49, %v10414_v15  ;;  %v10416_v29 = vld [vmem:[#allocation41_spill] sm:$0xff] }
 0x24e   :  { %10412 = vst [vmem:[#allocation50_spill] sm:$0xff] %v7406_v48  ;;  %10413 = vst [vmem:[#allocation86_spill] sm:$0xff] %v7409_v61  ;;  %v2114_v50 = vrot.slane %v2113_v17, 1  ;;  %v2142_v12 = vrot.slane %v2141_v56, 1  ;;  %v7419_v41 = vadd.f32 %v2126_v33, %v2117_v9  ;;  %v2074_v40 = vrot.slane %v7403_v23, 1  ;;  %v10418_v48 = vld [vmem:[#allocation47_spill] sm:$0xff] }
 0x24f   :  { %v990_v59 = vmul.f32 %v854_v21, %v10415_v53  ;;  %v1286_v26 = vmul.f32 %v854_v21, %v10416_v29  ;;  %v7425_v39 = vadd.f32 %v845_v51, %v10417_v16  ;;  %v2102_v27 = vrot.slane %v7413_v38, 1  ;;  %v10419_v49 = vld [vmem:[#allocation49_spill] sm:$0xff] }
 0x250   :  { %v1582_v32 = vmul.f32 %v854_v21, %v10418_v48  ;;  %v1878_v15 = vmul.f32 %v854_v21, %v10419_v49  ;;  %v2174_v61 = vmul.f32 %v854_v21, %v7283_v45  ;;  %v7431_v58 = vadd.f32 %v2086_v42, %v2085_v43  ;;  %v10420_v48 = vld [vmem:[#allocation30_spill] sm:$0xff]  ;;  %v10421_v42 = vld [vmem:[#allocation31_spill] sm:$0xff] }
 0x251   :  { %v7433_v9 = vadd.f32 %v2154_v2, %v2145_v13  ;;  %v1004_v33 = vrot.slane %v990_v59, 4  ;;  %v1300_v28 = vrot.slane %v1286_v26, 4  ;;  %v7435_v53 = vadd.f32 %v2114_v50, %v2113_v17 }
 0x252   :  { %v1596_v29 = vrot.slane %v1582_v32, 4  ;;  %v1892_v11 = vrot.slane %v1878_v15, 4  ;;  %v2188_v51 = vrot.slane %v2174_v61, 4  ;;  %v7437_v16 = vadd.f32 %v2142_v12, %v2141_v56 }
 0x253   :  { %v1005_v63 = vadd.f32 %v1004_v33, %v990_v59  ;;  %v1301_v60 = vadd.f32 %v1300_v28, %v1286_v26  ;;  %v988_v49 = vmul.f32 %v7425_v39, %v10420_v48  ;;  %v1284_v13 = vmul.f32 %v7425_v39, %v10421_v42  ;;  %v10422_v33 = vld [vmem:[#allocation32_spill] sm:$0xff] }
 0x254   :  { %v1597_v35 = vadd.f32 %v1596_v29, %v1582_v32  ;;  %v1893_v45 = vadd.f32 %v1892_v11, %v1878_v15  ;;  %v2189_v43 = vadd.f32 %v2188_v51, %v2174_v61  ;;  %v2128_v2 = vrot.slane %v7419_v41, 2 }
 0x255   :  { %v1006_v17 = vrot.slane %v1005_v63, 2  ;;  %v1302_v21 = vrot.slane %v1301_v60, 2  ;;  %v992_v50 = vrot.slane %v988_v49, 4  ;;  %v1288_v12 = vrot.slane %v1284_v13, 4 }
 0x256   :  { %v1598_v18 = vrot.slane %v1597_v35, 2  ;;  %v1894_v24 = vrot.slane %v1893_v45, 2  ;;  %v2190_v56 = vrot.slane %v2189_v43, 2  ;;  %v1580_v32 = vmul.f32 %v7425_v39, %v10422_v33 }
 0x257   :  { %v1007_v59 = vadd.f32 %v1006_v17, %v1005_v63  ;;  %v1303_v28 = vadd.f32 %v1302_v21, %v1301_v60  ;;  %v993_v26 = vadd.f32 %v992_v50, %v988_v49  ;;  %v1289_v29 = vadd.f32 %v1288_v12, %v1284_v13 }
 0x258   :  { %v1599_v11 = vadd.f32 %v1598_v18, %v1597_v35  ;;  %v1895_v61 = vadd.f32 %v1894_v24, %v1893_v45  ;;  %v2191_v15 = vadd.f32 %v2190_v56, %v2189_v43  ;;  %v1584_v31 = vrot.slane %v1580_v32, 4  ;;  %v5638_v35 = vpop.f32.mrf.mxu0 }
 0x259   :  { %v1008_v51 = vrot.slane %v1007_v59, 1  ;;  %v1304_v48 = vrot.slane %v1303_v28, 1  ;;  %v994_v42 = vrot.slane %v993_v26, 2  ;;  %v1290_v7 = vrot.slane %v1289_v29, 2 }
 0x25a   :  { %v1600_v54 = vrot.slane %v1599_v11, 1  ;;  %v1896_v37 = vrot.slane %v1895_v61, 1  ;;  %v2192_v22 = vrot.slane %v2191_v15, 1  ;;  %v1585_v60 = vadd.f32 %v1584_v31, %v1580_v32 }
 0x25b   :  { %v1009_v25 = vadd.f32 %v1008_v51, %v1007_v59  ;;  %v1305_v57 = vadd.f32 %v1304_v48, %v1303_v28  ;;  %v995_v63 = vadd.f32 %v994_v42, %v993_v26  ;;  %v7447_v49 = vadd.f32 %v2074_v40, %v7403_v23  ;;  %v10425_v23 = vld [vmem:[#allocation118_spill] sm:$0xff]  ;;  %v10429_v40 = vld [vmem:[#allocation119_spill] sm:$0xff]  ;;  %v848_v51 = vpop.f32.mrf.mxu0 }
 0x25c   :  { %v1601_v17 = vadd.f32 %v1600_v54, %v1599_v11  ;;  %v1897_v18 = vadd.f32 %v1896_v37, %v1895_v61  ;;  %v2193_v24 = vadd.f32 %v2192_v22, %v2191_v15  ;;  %v7450_v45 = vadd.f32 %v2102_v27, %v7413_v38  ;;  %v10426_v54 = vld [vmem:[#allocation122_spill] sm:$0xff]  ;;  %v10430_v38 = vld [vmem:[#allocation123_spill] sm:$0xff] }
 0x25d   :  { %v2156_v43 = vrot.slane %v7433_v9, 2  ;;  %v10423_v13 = vmax.f32 %v7225_v52, %v7237_v19  ;;  %v10424_v31 = vmax.f32 %v7231_v0, %v7239_v6  ;;  %v10427_v37 = vmax.f32 %v10425_v23, %v10426_v54 }
 0x25e   :  { %v10431_v27 = vmax.f32 %v10429_v40, %v10430_v38  ;;  %v1291_v12 = vadd.f32 %v1290_v7, %v1289_v29  ;;  %v1586_v59 = vrot.slane %v1585_v60, 2  ;;  %v2203_v52 = vmax.f32 %v7431_v58, %v7435_v53 }
 0x25f   :  { %v7456_v21 = vmax.f32 %v10423_v13, %v1009_v25  ;;  %v7461_v50 = vmax.f32 %v10424_v31, %v1305_v57  ;;  %v7466_v22 = vmax.f32 %v10427_v37, %v1601_v17  ;;  %v10433_v0 = vmax.f32 %v7383_v20, %v7385_v55  ;;  %v10450_v31 = vld [vmem:[#allocation83_spill] sm:$0xff] }
 0x260   :  { %v7471_v56 = vmax.f32 %v10431_v27, %v1897_v18  ;;  %v996_v33 = vrot.slane %v995_v63, 1  ;;  %v7493_v20 = vadd.f32 %v2128_v2, %v7419_v41  ;;  %v7496_v42 = vadd.f32 %v2156_v43, %v7433_v9  ;;  %v10439_v41 = vld [vmem:[#allocation46_spill] sm:$0xff] }
 0x261   :  { %10428 = vst [vmem:[#allocation127_spill] sm:$0xff] %v7466_v22  ;;  %v1082_v28 = vsub.f32 %v1009_v25, %v7456_v21  ;;  %v7479_v26 = vmax.f32 %v10433_v0, %v2193_v24  ;;  %v1674_v7 = vsub.f32 %v1601_v17, %v7466_v22  ;;  %v10436_v25 = vrot.slane %v7392_v1, 1 }
 0x262   :  { %10432 = vst [vmem:[#allocation96_spill] sm:$0xff] %v7471_v56  ;;  %v1970_v29 = vsub.f32 %v1897_v18, %v7471_v56  ;;  %v1378_v13 = vsub.f32 %v1305_v57, %v7461_v50  ;;  %v1292_v17 = vrot.slane %v1291_v12, 1  ;;  %v1587_v23 = vadd.f32 %v1586_v59, %v1585_v60  ;;  %v10437_v18 = vld [vmem:[#allocation35_spill] sm:$0xff] }
 0x263   :  { %v7490_v48 = vadd.f32 %v10436_v25, %v7392_v1  ;;  %v857_v37 = vadd.f32 %v5638_v35, %v10437_v18  ;;  %v1088_v40 = vmul.f32 1.442695, %v1082_v28  ;;  %v2266_v27 = vsub.f32 %v2193_v24, %v7479_v26  ;;  %v10438_v1 = vld [vmem:[#allocation33_spill] sm:$0xff]  ;;  %v10449_v59 = vld [vmem:[#allocation59_spill] sm:$0xff]  ;;  %v10451_v35 = vld [vmem:[#allocation92_spill] sm:$0xff] }
 0x264   :  { %v1876_v0 = vmul.f32 %v7425_v39, %v10438_v1  ;;  %v7506_v2 = vadd.f32 %v848_v51, %v10439_v41  ;;  %v7509_v9 = vmax.f32 %v2203_v52, %v7437_v16  ;;  %v7511_v57 = vadd.f32 %v996_v33, %v995_v63  ;;  %v10440_v1 = vld [vmem:[#allocation42_spill] sm:$0xff] }
 0x265   :  { %v1588_v43 = vrot.slane %v1587_v23, 1  ;;  %v2172_v60 = vmul.f32 %v7425_v39, %v7286_v3  ;;  %v1384_v24 = vmul.f32 1.442695, %v1378_v13  ;;  %v1680_v28 = vmul.f32 1.442695, %v1674_v7  ;;  %v10441_v3 = vld [vmem:[#allocation81_spill] sm:$0xff] }
 0x266   :  { %v7517_v25 = vmul.f32 1.442695, %v1970_v29  ;;  %v7519_v18 = vadd.f32 %v1292_v17, %v1291_v12  ;;  %v1880_v52 = vrot.slane %v1876_v0, 4  ;;  %5739 = vpow2.f32 %v1088_v40  ;;  %v10442_v39 = vld [vmem:[#allocation91_spill] sm:$0xff]  ;;  %v10444_v7 = vld [vmem:[#allocation84_spill] sm:$0xff]  ;;  %v10445_v29 = vld [vmem:[#allocation93_spill] sm:$0xff] }
 0x267   :  { %v7521_v51 = vadd.f32 %v1588_v43, %v1587_v23  ;;  %v7523_v63 = vmul.f32 1.442695, %v2266_v27  ;;  %v2176_v33 = vrot.slane %v2172_v60, 4  ;;  %v991_v41 = vmul.f32 %v857_v37, %v10440_v1  ;;  %v10448_v23 = vld [vmem:[#allocation44_spill] sm:$0xff] }
 0x268   :  { %v10443_v15 = vmax.f32 %v10441_v3, %v10442_v39  ;;  %v10446_v12 = vmax.f32 %v10444_v7, %v10445_v29  ;;  %v1881_v17 = vadd.f32 %v1880_v52, %v1876_v0  ;;  %v1287_v40 = vmul.f32 %v857_v37, %v10448_v23  ;;  %v10455_v23 = vld [vmem:[#allocation60_spill] sm:$0xff] }
 0x269   :  { %5741 = vpow2.f32 %v1384_v24  ;;  %v2177_v27 = vadd.f32 %v2176_v33, %v2172_v60  ;;  %v1010_v43 = vrot.slane %v991_v41, 4  ;;  %v1583_v1 = vmul.f32 %v857_v37, %v10449_v59 }
 0x26a   :  { %v7530_v11 = vmax.f32 %v10443_v15, %v7511_v57  ;;  %v7536_v13 = vmax.f32 %v10446_v12, %v7521_v51  ;;  %v10452_v3 = vmax.f32 %v10450_v31, %v10451_v35  ;;  %v1882_v24 = vrot.slane %v1881_v17, 2 }
 0x26b   :  { %v2178_v60 = vrot.slane %v2177_v27, 2  ;;  %v1011_v52 = vadd.f32 %v1010_v43, %v991_v41  ;;  %v1306_v33 = vrot.slane %v1287_v40, 4  ;;  %5743 = vpow2.f32 %v1680_v28 }
 0x26c   :  { %10447 = vst [vmem:[#allocation26_spill] sm:$0xff] %v7536_v13  ;;  %v7544_v15 = vmax.f32 %v10452_v3, %v7519_v18  ;;  %v1602_v59 = vrot.slane %v1583_v1, 4  ;;  %v1879_v29 = vmul.f32 %v857_v37, %v10455_v23  ;;  %v2175_v31 = vmul.f32 %v857_v37, %v7325_v4  ;;  %v10456_v23 = vld [vmem:[#allocation38_spill] sm:$0xff] }
 0x26d   :  { %v1883_v3 = vadd.f32 %v1882_v24, %v1881_v17  ;;  %v2179_v54 = vadd.f32 %v2178_v60, %v2177_v27  ;;  %v1012_v22 = vrot.slane %v1011_v52, 2  ;;  %v1307_v32 = vadd.f32 %v1306_v33, %v1287_v40 }
 0x26e   :  { %v1080_v12 = vsub.f32 %v7511_v57, %v7530_v11  ;;  %v1603_v7 = vadd.f32 %v1602_v59, %v1583_v1  ;;  %v1898_v61 = vrot.slane %v1879_v29, 4  ;;  %v2194_v0 = vrot.slane %v2175_v31, 4  ;;  %v10457_v59 = vld [vmem:[#allocation85_spill] sm:$0xff] }
 0x26f   :  { %v1884_v39 = vrot.slane %v1883_v3, 1  ;;  %v2180_v38 = vrot.slane %v2179_v54, 1  ;;  %v1013_v41 = vadd.f32 %v1012_v22, %v1011_v52  ;;  %v1308_v43 = vrot.slane %v1307_v32, 2  ;;  %v10458_v22 = vld [vmem:[#allocation94_spill] sm:$0xff] }
 0x270   :  { %v1604_v28 = vrot.slane %v1603_v7, 2  ;;  %v1899_v56 = vadd.f32 %v1898_v61, %v1879_v29  ;;  %v2195_v35 = vadd.f32 %v2194_v0, %v2175_v31  ;;  %v989_v4 = vmul.f32 %v7506_v2, %v10456_v23 }
 0x271   :  { %v1885_v37 = vadd.f32 %v1884_v39, %v1883_v3  ;;  %v2181_v17 = vadd.f32 %v2180_v38, %v2179_v54  ;;  %v1014_v27 = vrot.slane %v1013_v41, 1  ;;  %v1309_v40 = vadd.f32 %v1308_v43, %v1307_v32 }
 0x272   :  { %v1605_v24 = vadd.f32 %v1604_v28, %v1603_v7  ;;  %v1900_v60 = vrot.slane %v1899_v56, 2  ;;  %v2196_v57 = vrot.slane %v2195_v35, 2  ;;  %v998_v1 = vrot.slane %v989_v4, 4 }
 0x273   :  { %v1376_v33 = vsub.f32 %v7519_v18, %v7544_v15  ;;  %v10459_v52 = vmax.f32 %v10457_v59, %v10458_v22  ;;  %v1015_v61 = vadd.f32 %v1014_v27, %v1013_v41  ;;  %v1310_v29 = vrot.slane %v1309_v40, 1  ;;  %v7565_v0 = vpop.eup %5739  ;;  %v10493_v22 = vld [vmem:[#allocation131_spill] sm:$0xff] }
 0x274   :  { %v1606_v39 = vrot.slane %v1605_v24, 1  ;;  %v1901_v54 = vadd.f32 %v1900_v60, %v1899_v56  ;;  %v2197_v38 = vadd.f32 %v2196_v57, %v2195_v35  ;;  %v999_v32 = vadd.f32 %v998_v1, %v989_v4  ;;  %v788_v4 = vpop.f32.mrf.mxu1 }
 0x275   :  { %v7563_v19 = vmax.f32 %v10459_v52, %v1885_v37  ;;  %v1084_v7 = vmul.f32 1.442695, %v1080_v12  ;;  %v10461_v3 = vmax.f32 %v7388_v30, %v7401_v47  ;;  %v1311_v43 = vadd.f32 %v1310_v29, %v1309_v40 }
 0x276   :  { %v7573_v28 = vpop.eup %5741  ;;  %v10462_v41 = vmax.f32 %v7314_v8, %v7308_v44  ;;  %v1607_v27 = vadd.f32 %v1606_v39, %v1605_v24  ;;  %v1902_v56 = vrot.slane %v1901_v54, 1  ;;  %v1000_v35 = vrot.slane %v999_v32, 2 }
 0x277   :  { %10460 = vst [vmem:[#allocation40_spill] sm:$0xff] %v7563_v19  ;;  %v1968_v31 = vsub.f32 %v1885_v37, %v7563_v19  ;;  %v7571_v18 = vmax.f32 %v10461_v3, %v2181_v17  ;;  %v2211_v12 = vmax.f32 %v7509_v9, %v7490_v48  ;;  %v10463_v30 = vrot.slane %v7493_v20, 1 }
 0x278   :  { %v7578_v23 = vmax.f32 %v10462_v41, %v1015_v61  ;;  %5745 = vpow2.f32 %v7517_v25  ;;  %v1380_v40 = vmul.f32 1.442695, %v1376_v33  ;;  %v10464_v8 = vmax.f32 %v7322_v5, %v7316_v10  ;;  %v7598_v59 = vpop.eup %5743  ;;  %v10468_v33 = vld [vmem:[#allocation39_spill] sm:$0xff] }
 0x279   :  { %v7585_v37 = vadd.f32 %v10463_v30, %v7493_v20  ;;  %v10465_v24 = vmax.f32 %v7245_v36, %v7233_v14  ;;  %v1903_v1 = vadd.f32 %v1902_v56, %v1901_v54  ;;  %v2198_v9 = vrot.slane %v2197_v38, 1  ;;  %10467 = vst [vmem:[#allocation29_spill] sm:$0xff] %v7598_v59  ;;  %v790_v54 = vpop.f32.mrf.mxu1 }
 0x27a   :  { %v7591_v60 = vmax.f32 %v10464_v8, %v1311_v43  ;;  %5747 = vpow2.f32 %v7523_v63  ;;  %v2264_v20 = vsub.f32 %v2181_v17, %v7571_v18  ;;  %v1001_v25 = vadd.f32 %v1000_v35, %v999_v32  ;;  %v10470_v32 = vld [vmem:[#allocation136_spill] sm:$0xff]  ;;  %v10472_v8 = vld [vmem:[#allocation43_spill] sm:$0xff]  ;;  %v10477_v63 = vld [vmem:[#allocation34_spill] sm:$0xff] }
 0x27b   :  { %v7596_v57 = vmax.f32 %v10465_v24, %v1607_v27  ;;  %v1285_v52 = vmul.f32 %v7506_v2, %v10468_v33  ;;  %5749 = vpow2.f32 %v1084_v7  ;;  %v10469_v5 = vsub.f32 %v7521_v51, %v7536_v13 }
 0x27c   :  { %v1083_v36 = vsub.f32 %v1015_v61, %v7578_v23  ;;  %v1972_v3 = vmul.f32 1.442695, %v1968_v31  ;;  %v10471_v41 = vmax.f32 %v7251_v34, %v10470_v32  ;;  %5751 = vpow2.f32 %v1380_v40 }
 0x27d   :  { %10466 = vst [vmem:[#allocation41_spill] sm:$0xff] %v7596_v57  ;;  %v1676_v29 = vmul.f32 1.442695, %v10469_v5  ;;  %v1675_v17 = vsub.f32 %v1607_v27, %v7596_v57  ;;  %v1379_v51 = vsub.f32 %v1311_v43, %v7591_v60  ;;  %v7619_v56 = vadd.f32 %v2198_v9, %v2197_v38  ;;  %v10474_v43 = vld [vmem:[#allocation113_spill] sm:$0xff]  ;;  %v792_v9 = vpop.f32.mrf.mxu1  ;;  %v10500_v57 = vld [vmem:[#allocation132_spill] sm:$0xff] }
 0x27e   :  { %v7616_v7 = vmax.f32 %v10471_v41, %v1903_v1  ;;  %v1294_v61 = vrot.slane %v1285_v52, 4  ;;  %v2268_v35 = vmul.f32 1.442695, %v2264_v20  ;;  %v1002_v31 = vrot.slane %v1001_v25, 1 }
 0x27f   :  { %v1581_v24 = vmul.f32 %v7506_v2, %v10472_v8  ;;  %v10473_v27 = vmax.f32 %v7447_v49, %v7450_v45  ;;  %5753 = vpow2.f32 %v1676_v29  ;;  %v1090_v40 = vmul.f32 1.442695, %v1083_v36 }
 0x280   :  { %v1971_v30 = vsub.f32 %v1903_v1, %v7616_v7  ;;  %v1295_v33 = vadd.f32 %v1294_v61, %v1285_v52  ;;  %v7631_v38 = vadd.f32 %v788_v4, %v10474_v43  ;;  %v10476_v1 = vrot.slane %v7496_v42, 1  ;;  %v10478_v52 = vld [vmem:[#allocation130_spill] sm:$0xff] }
 0x281   :  { %v7628_v34 = vmax.f32 %v10473_v27, %v7585_v37  ;;  %5755 = vpow2.f32 %v1972_v3  ;;  %v1590_v5 = vrot.slane %v1581_v24, 4  ;;  %v1386_v41 = vmul.f32 1.442695, %v1379_v51  ;;  %v10481_v3 = vld [vmem:[#allocation73_spill] sm:$0xff] }
 0x282   :  { %10475 = vst [vmem:[#allocation47_spill] sm:$0xff] %v7631_v38  ;;  %v7636_v20 = vadd.f32 %v10476_v1, %v7496_v42  ;;  %v7639_v8 = vmax.f32 %v2211_v12, %v7619_v56  ;;  %v1296_v27 = vrot.slane %v1295_v33, 2  ;;  %v2173_v29 = vmul.f32 %v7506_v2, %v10477_v63  ;;  %v10487_v12 = vld [vmem:[#allocation45_spill] sm:$0xff] }
 0x283   :  { %v7644_v36 = vadd.f32 %v790_v54, %v10478_v52  ;;  %5757 = vpow2.f32 %v2268_v35  ;;  %v1003_v4 = vadd.f32 %v1002_v31, %v1001_v25  ;;  %v1591_v61 = vadd.f32 %v1590_v5, %v1581_v24  ;;  %v10483_v35 = vld [vmem:[#allocation75_spill] sm:$0xff]  ;;  %v10484_v24 = vld [vmem:[#allocation105_spill] sm:$0xff] }
 0x284   :  { %v7647_v39 = vadd.f32 %v792_v9, %v10478_v52  ;;  %5759 = vpow2.f32 %v1090_v40  ;;  %v1682_v51 = vmul.f32 1.442695, %v1675_v17  ;;  %v1297_v1 = vadd.f32 %v1296_v27, %v1295_v33  ;;  %v10485_v9 = vld [vmem:[#allocation120_spill] sm:$0xff] }
 0x285   :  { %10479 = vst [vmem:[#allocation49_spill] sm:$0xff] %v7644_v36  ;;  %v1592_v59 = vrot.slane %v1591_v61, 2  ;;  %v2182_v63 = vrot.slane %v2173_v29, 4  ;;  %v7653_v13 = vpop.eup %5745  ;;  %5761 = vpow2.f32 %v1386_v41  ;;  %v1978_v54 = vmul.f32 1.442695, %v1971_v30  ;;  %v10488_v30 = vld [vmem:[#allocation102_spill] sm:$0xff] }
 0x286   :  { %10480 = vst [vmem:[#allocation30_spill] sm:$0xff] %v7647_v39  ;;  %10482 = vst [vmem:[#allocation31_spill] sm:$0xff] %v7653_v13  ;;  %v2267_v25 = vsub.f32 %v7619_v56, %v7639_v8  ;;  %v1330_v31 = vsub.f32 %v10483_v35, %v7461_v50  ;;  %v10486_v5 = vmax.f32 %v10484_v24, %v10485_v9  ;;  %v1298_v40 = vrot.slane %v1297_v1, 1  ;;  %v10489_v35 = vld [vmem:[#allocation88_spill] sm:$0xff] }
 0x287   :  { %v1593_v17 = vadd.f32 %v1592_v59, %v1591_v61  ;;  %v2183_v33 = vadd.f32 %v2182_v63, %v2173_v29  ;;  %v7664_v27 = vpop.eup %5747  ;;  %v7668_v41 = vmul.f32 %v7506_v2, %v10487_v12  ;;  %v1331_v56 = vsub.f32 %v10488_v30, %v7591_v60  ;;  %v10491_v61 = vld [vmem:[#allocation110_spill] sm:$0xff] }
 0x288   :  { %v7662_v42 = vmax.f32 %v10486_v5, %v1003_v4  ;;  %v1336_v13 = vmul.f32 1.442695, %v1330_v31  ;;  %v1342_v62 = vsub.f32 %v10489_v35, %v7461_v50  ;;  %v7674_v46 = vpop.eup %5749  ;;  %5763 = vpow2.f32 %v1682_v51  ;;  %v10492_v31 = vld [vmem:[#allocation106_spill] sm:$0xff] }
 0x289   :  { %10490 = vst [vmem:[#allocation32_spill] sm:$0xff] %v7674_v46  ;;  %v1299_v24 = vadd.f32 %v1298_v40, %v1297_v1  ;;  %v1594_v5 = vrot.slane %v1593_v17, 1  ;;  %v2184_v59 = vrot.slane %v2183_v33, 2  ;;  %5765 = vpow2.f32 %v1978_v54  ;;  %v7678_v12 = vpop.eup %5751  ;;  %v10496_v54 = vld [vmem:[#allocation129_spill] sm:$0xff] }
 0x28a   :  { %v1338_v29 = vmul.f32 1.442695, %v1331_v56  ;;  %v1343_v63 = vsub.f32 %v10491_v61, %v7591_v60  ;;  %v1348_v2 = vmul.f32 1.442695, %v1342_v62  ;;  %v1081_v30 = vsub.f32 %v1003_v4, %v7662_v42  ;;  %v10497_v56 = vld [vmem:[#allocation27_spill] sm:$0xff] }
 0x28b   :  { %v10494_v19 = vmax.f32 %v10492_v31, %v10493_v22  ;;  %v7686_v46 = vadd.f32 %v1594_v5, %v1593_v17  ;;  %v2185_v51 = vadd.f32 %v2184_v59, %v2183_v33  ;;  %5767 = vpow2.f32 %v1336_v13  ;;  %v10499_v4 = vld [vmem:[#allocation107_spill] sm:$0xff] }
 0x28c   :  { %v1350_v1 = vmul.f32 1.442695, %v1343_v63  ;;  %v1354_v40 = vsub.f32 %v10496_v54, %v7461_v50  ;;  %v1355_v62 = vsub.f32 %v10497_v56, %v7591_v60  ;;  %v7692_v61 = vpop.eup %5753  ;;  %v2274_v14 = vmul.f32 1.442695, %v2267_v25 }
 0x28d   :  { %v7684_v35 = vmax.f32 %v10494_v19, %v1299_v24  ;;  %10495 = vst [vmem:[#allocation118_spill] sm:$0xff] %v7686_v46  ;;  %10498 = vst [vmem:[#allocation119_spill] sm:$0xff] %v7692_v61  ;;  %v10501_v31 = vmax.f32 %v10499_v4, %v10500_v57  ;;  %v2186_v17 = vrot.slane %v2185_v51, 1  ;;  %5769 = vpow2.f32 %v1338_v29  ;;  %v5641_v29 = vpop.f32.mrf.mxu0  ;;  %v10508_v4 = vld [vmem:[#allocation70_spill] sm:$0xff] }
 0x28e   :  { %v7700_v33 = vpop.eup %5755  ;;  %5771 = vpow2.f32 %v1348_v2  ;;  %v1360_v5 = vmul.f32 1.442695, %v1354_v40  ;;  %v1366_v59 = vsub.f32 %v7239_v6, %v7461_v50  ;;  %v1086_v63 = vmul.f32 1.442695, %v1081_v30  ;;  %v10507_v50 = vld [vmem:[#allocation87_spill] sm:$0xff] }
 0x28f   :  { %v7698_v19 = vmax.f32 %v10501_v31, %v7686_v46  ;;  %10503 = vst [vmem:[#allocation33_spill] sm:$0xff] %v7700_v33  ;;  %v1377_v13 = vsub.f32 %v1299_v24, %v7684_v35  ;;  %v2187_v33 = vadd.f32 %v2186_v17, %v2185_v51  ;;  %5773 = vpow2.f32 %v1350_v1  ;;  %v10510_v17 = vld [vmem:[#allocation28_spill] sm:$0xff] }
 0x290   :  { %v7711_v61 = vpop.eup %5757  ;;  %v1362_v24 = vmul.f32 1.442695, %v1355_v62  ;;  %v1367_v2 = vsub.f32 %v7316_v10, %v7591_v60  ;;  %5775 = vpow2.f32 %v2274_v14  ;;  %v1372_v40 = vmul.f32 1.442695, %v1366_v59  ;;  %v861_v60 = vpop.f32.mrf.mxu0 }
 0x291   :  { %10502 = vst [vmem:[#allocation35_spill] sm:$0xff] %v7698_v19  ;;  %10506 = vst [vmem:[#allocation46_spill] sm:$0xff] %v7711_v61  ;;  %v7715_v6 = vpop.eup %5759  ;;  %v2218_v54 = vsub.f32 %v10508_v4, %v7479_v26  ;;  %v1382_v31 = vmul.f32 1.442695, %v1377_v13  ;;  %v1886_v46 = vrot.slane %v7668_v41, 4  ;;  %v10509_v51 = vmax.f32 %v7628_v34, %v7636_v20  ;;  %v10511_v13 = vld [vmem:[#allocation51_spill] sm:$0xff] }
 0x292   :  { %5777 = vpow2.f32 %v1360_v5  ;;  %v7727_v10 = vpop.eup %5761  ;;  %v1374_v62 = vmul.f32 1.442695, %v1367_v2  ;;  %v2219_v14 = vsub.f32 %v7431_v58, %v7639_v8  ;;  %v2230_v59 = vsub.f32 %v10510_v17, %v7479_v26  ;;  %v10512_v5 = vld [vmem:[#allocation53_spill] sm:$0xff]  ;;  %v5642_v4 = vpop.f32.mrf.mxu0 }
 0x293   :  { %v7725_v1 = vmax.f32 %v10509_v51, %v2187_v33  ;;  %5779 = vpow2.f32 %v1086_v63  ;;  %v2231_v34 = vsub.f32 %v7435_v53, %v7639_v8  ;;  %v2224_v2 = vmul.f32 1.442695, %v2218_v54  ;;  %v10513_v51 = vld [vmem:[#allocation82_spill] sm:$0xff] }
 0x294   :  { %5781 = vpow2.f32 %v1362_v24  ;;  %v2242_v58 = vsub.f32 %v10513_v51, %v7479_v26  ;;  %v2226_v25 = vmul.f32 1.442695, %v2219_v14  ;;  %v1887_v53 = vadd.f32 %v1886_v46, %v7668_v41 }
 0x295   :  { %v2265_v30 = vsub.f32 %v2187_v33, %v7725_v1  ;;  %5783 = vpow2.f32 %v1372_v40  ;;  %v7742_v56 = vpop.eup %5763  ;;  %v2243_v33 = vsub.f32 %v7437_v16, %v7639_v8  ;;  %v2236_v63 = vmul.f32 1.442695, %v2230_v59  ;;  %v10516_v40 = vld [vmem:[#allocation99_spill] sm:$0xff]  ;;  %v10517_v16 = vld [vmem:[#allocation109_spill] sm:$0xff]  ;;  %v10520_v59 = vld [vmem:[#allocation114_spill] sm:$0xff] }
 0x296   :  { %10514 = vst [vmem:[#allocation42_spill] sm:$0xff] %v7742_v56  ;;  %5785 = vpow2.f32 %v1382_v31  ;;  %v7746_v24 = vpop.eup %5765  ;;  %v2254_v54 = vsub.f32 %v7385_v55, %v7479_v26  ;;  %v1035_v51 = vsub.f32 %v10516_v40, %v7578_v23  ;;  %v2238_v31 = vmul.f32 1.442695, %v2231_v34  ;;  %v10519_v55 = vld [vmem:[#allocation63_spill] sm:$0xff]  ;;  %v10526_v26 = vld [vmem:[#allocation25_spill] sm:$0xff] }
 0x297   :  { %v2270_v17 = vmul.f32 1.442695, %v2265_v30  ;;  %10515 = vst [vmem:[#allocation81_spill] sm:$0xff] %v7746_v24  ;;  %5787 = vpow2.f32 %v1374_v62  ;;  %v2255_v30 = vsub.f32 %v7490_v48, %v7639_v8  ;;  %v1047_v56 = vsub.f32 %v10517_v16, %v7578_v23 }
 0x298   :  { %v7755_v14 = vpop.eup %5767  ;;  %v7760_v46 = vadd.f32 %v5641_v29, %v10474_v43  ;;  %v2248_v41 = vmul.f32 1.442695, %v2242_v58  ;;  %v7767_v34 = vadd.f32 %v861_v60, %v10520_v59  ;;  %v2250_v48 = vmul.f32 1.442695, %v2243_v33  ;;  %v864_v43 = vpop.f32.mrf.mxu0 }
 0x299   :  { %5789 = vpow2.f32 %v2270_v17  ;;  %v10522_v17 = vld [vmem:[#allocation65_spill] sm:$0xff]  ;;  %v1888_v16 = vrot.slane %v1887_v53, 2  ;;  %v2260_v29 = vmul.f32 1.442695, %v2254_v54  ;;  %v7777_v58 = vadd.f32 %v5642_v4, %v10478_v52  ;;  %v10525_v54 = vld [vmem:[#allocation128_spill] sm:$0xff]  ;;  %v10527_v4 = vld [vmem:[#allocation138_spill] sm:$0xff] }
 0x29a   :  { %10518 = vst [vmem:[#allocation84_spill] sm:$0xff] %v7760_v46  ;;  %5791 = vpow2.f32 %v2224_v2  ;;  %v7762_v62 = vpop.eup %5769  ;;  %10521 = vst [vmem:[#allocation44_spill] sm:$0xff] %v7767_v34  ;;  %v5717_v2 = vld [vmem:[%s9903_s2 + $0x30] sm:$0xff]   ;;  %v2262_v60 = vmul.f32 1.442695, %v2255_v30  ;;  %v10524_v59 = vsub.f32 %v10481_v3, %v7456_v21  ;;  %v1058_v40 = vsub.f32 %v10525_v54, %v7456_v21 }
 0x29b   :  { %5793 = vpow2.f32 %v2226_v25  ;;  %v7769_v8 = vpop.eup %5771  ;;  %10523 = vst [vmem:[#allocation59_spill] sm:$0xff] %v7777_v58  ;;  %v1059_v24 = vsub.f32 %v10526_v26, %v7578_v23  ;;  %5647 = vmatprep.mubr.msk.bf16.mxu0 %vm590_vm1, %v5717_v2  ;;  %v10530_v26 = vsub.f32 %v10507_v50, %v7456_v21  ;;  %v10531_v2 = vld [vmem:[#allocation137_spill] sm:$0xff]  ;;  %v10533_v50 = vld [vmem:[#allocation52_spill] sm:$0xff] }
 0x29c   :  { %5795 = vpow2.f32 %v2236_v63  ;;  %v1390_v25 = vadd.f32 %v7769_v8, %v7755_v14  ;;  %v7781_v33 = vpop.eup %5773  ;;  %v1040_v63 = vmul.f32 1.442695, %v10524_v59  ;;  %v7800_v59 = vadd.f32 %v1888_v16, %v1887_v53 }
 0x29d   :  { %5797 = vpow2.f32 %v2238_v31  ;;  %v7791_v52 = vpop.eup %5775  ;;  %v7794_v31 = vadd.f32 %v864_v43, %v10527_v4  ;;  %v1391_v30 = vadd.f32 %v7781_v33, %v7762_v62  ;;  %v1052_v54 = vmul.f32 1.442695, %v10530_v26 }
 0x29e   :  { %5799 = vpow2.f32 %v2248_v41  ;;  %v1042_v41 = vmul.f32 1.442695, %v1035_v51  ;;  %10529 = vst [vmem:[#allocation60_spill] sm:$0xff] %v7800_v59  ;;  %v1070_v57 = vsub.f32 %v10531_v2, %v7456_v21  ;;  %v1054_v4 = vmul.f32 1.442695, %v1047_v56  ;;  %v10535_v56 = vld [vmem:[#allocation54_spill] sm:$0xff] }
 0x29f   :  { %10528 = vst [vmem:[#allocation83_spill] sm:$0xff] %v7794_v31  ;;  %5801 = vpow2.f32 %v2250_v48  ;;  %v7798_v3 = vpop.eup %5777  ;;  %v1071_v51 = vsub.f32 %v7308_v44, %v7578_v23  ;;  %v1064_v53 = vmul.f32 1.442695, %v1058_v40  ;;  %v1066_v16 = vmul.f32 1.442695, %v1059_v24 }
 0x2a0   :  { %5803 = vpow2.f32 %v2260_v29  ;;  %v7807_v19 = vpop.eup %5779  ;;  %v1394_v43 = vadd.f32 %v7798_v3, %v1390_v25  ;;  %v1328_v29 = vsub.f32 %v10533_v50, %v7544_v15  ;;  %v10534_v25 = vld [vmem:[#allocation64_spill] sm:$0xff]  ;;  %v1340_v2 = vsub.f32 %v10535_v56, %v7544_v15 }
 0x2a1   :  { %10532 = vst [vmem:[#allocation38_spill] sm:$0xff] %v7807_v19  ;;  %5805 = vpow2.f32 %v2262_v60  ;;  %v7812_v48 = vpop.eup %5781  ;;  %v1329_v60 = vsub.f32 %v10534_v25, %v7684_v35  ;;  %v1076_v40 = vmul.f32 1.442695, %v1070_v57  ;;  %v10537_v50 = vld [vmem:[#allocation76_spill] sm:$0xff]  ;;  %v10538_v19 = vld [vmem:[#allocation98_spill] sm:$0xff] }
 0x2a2   :  { %5807 = vpow2.f32 %v1040_v63  ;;  %v7816_v26 = vpop.eup %5783  ;;  %v1395_v21 = vadd.f32 %v7812_v48, %v1391_v30  ;;  %v10536_v30 = vld [vmem:[#allocation66_spill] sm:$0xff]  ;;  %v1352_v25 = vsub.f32 %v10537_v50, %v7544_v15  ;;  %v1353_v56 = vsub.f32 %v10538_v19, %v7684_v35  ;;  %v10540_v19 = vld [vmem:[#allocation92_spill] sm:$0xff] }
 0x2a3   :  { %5809 = vpow2.f32 %v1042_v41  ;;  %v7823_v44 = vpop.eup %5785  ;;  %v1398_v24 = vadd.f32 %v7816_v26, %v1394_v43  ;;  %v1341_v41 = vsub.f32 %v10536_v30, %v7684_v35  ;;  %v1078_v57 = vmul.f32 1.442695, %v1071_v51 }
 0x2a4   :  { %5811 = vpow2.f32 %v1052_v54  ;;  %v7827_v63 = vpop.eup %5787  ;;  %v1334_v59 = vmul.f32 1.442695, %v1329_v60  ;;  %v1344_v30 = vmul.f32 1.442695, %v1340_v2  ;;  %v10541_v2 = vld [vmem:[#allocation37_spill] sm:$0xff] }
 0x2a5   :  { %5813 = vpow2.f32 %v1054_v4  ;;  %v1399_v23 = vadd.f32 %v7827_v63, %v1395_v21  ;;  %v1402_v43 = vadd.f32 %v7573_v28, %v1398_v24  ;;  %v1332_v4 = vmul.f32 1.442695, %v1328_v29 }
 0x2a6   :  { %v7835_v61 = vpop.eup %5789  ;;  %5815 = vpow2.f32 %v1064_v53  ;;  %v1365_v21 = vsub.f32 %v10493_v22, %v7684_v35  ;;  %v1346_v51 = vmul.f32 1.442695, %v1341_v41  ;;  %v1356_v53 = vmul.f32 1.442695, %v1352_v25  ;;  %v10542_v35 = vld [vmem:[#allocation126_spill] sm:$0xff] }
 0x2a7   :  { %10539 = vst [vmem:[#allocation85_spill] sm:$0xff] %v7835_v61  ;;  %v7839_v54 = vpop.eup %5791  ;;  %5817 = vpow2.f32 %v1066_v16  ;;  %v1403_v50 = vadd.f32 %v7727_v10, %v1399_v23  ;;  %v1364_v61 = vsub.f32 %v10540_v19, %v7544_v15  ;;  %v1358_v16 = vmul.f32 1.442695, %v1353_v56 }
 0x2a8   :  { %v7841_v31 = vpop.eup %5793  ;;  %5819 = vrcp.f32 %v1402_v43  ;;  %v2216_v23 = vsub.f32 %v10541_v2, %v7571_v18  ;;  %v2217_v15 = vsub.f32 %v7447_v49, %v7725_v1  ;;  %v2229_v41 = vsub.f32 %v7450_v45, %v7725_v1 }
 0x2a9   :  { %v7848_v24 = vpop.eup %5795  ;;  %5821 = vpow2.f32 %v1076_v40  ;;  %v2228_v40 = vsub.f32 %v10542_v35, %v7571_v18  ;;  %v1370_v19 = vmul.f32 1.442695, %v1365_v21  ;;  %v2241_v35 = vsub.f32 %v7585_v37, %v7725_v1 }
 0x2aa   :  { %v7850_v29 = vpop.eup %5797  ;;  %5823 = vrcp.f32 %v1403_v50  ;;  %v2278_v60 = vadd.f32 %v7848_v24, %v7839_v54  ;;  %v1368_v50 = vmul.f32 1.442695, %v1364_v61 }
 0x2ab   :  { %v7858_v43 = vpop.eup %5799  ;;  %v2279_v22 = vadd.f32 %v7850_v29, %v7841_v31  ;;  %5825 = vpow2.f32 %v1078_v57  ;;  %v10543_v57 = vld [vmem:[#allocation95_spill] sm:$0xff] }
 0x2ac   :  { %v7866_v25 = vpop.eup %5801  ;;  %v2282_v56 = vadd.f32 %v7858_v43, %v2278_v60  ;;  %5827 = vpow2.f32 %v1332_v4  ;;  %v2240_v34 = vsub.f32 %v10543_v57, %v7571_v18  ;;  %v2220_v60 = vmul.f32 1.442695, %v2216_v23 }
 0x2ad   :  { %v7869_v49 = vpop.eup %5803  ;;  %v2283_v2 = vadd.f32 %v7866_v25, %v2279_v22  ;;  %5829 = vpow2.f32 %v1334_v59  ;;  %v7879_v4 = vmul.f32 1.442695, %v2217_v15  ;;  %v7884_v59 = vmul.f32 1.442695, %v2228_v40 }
 0x2ae   :  { %v7876_v9 = vpop.eup %5805  ;;  %v2286_v45 = vadd.f32 %v7869_v49, %v2282_v56  ;;  %5831 = vpow2.f32 %v1344_v30  ;;  %v7886_v22 = vmul.f32 1.442695, %v2229_v41  ;;  %v2252_v30 = vsub.f32 %v7401_v47, %v7571_v18 }
 0x2af   :  { %v7881_v61 = vpop.eup %5807  ;;  %v2287_v21 = vadd.f32 %v7876_v9, %v2283_v2  ;;  %5833 = vpow2.f32 %v1346_v51  ;;  %v2253_v23 = vsub.f32 %v7636_v20, %v7725_v1  ;;  %v7898_v51 = vmul.f32 1.442695, %v2240_v34  ;;  %v10548_v2 = vld [vmem:[#allocation96_spill] sm:$0xff] }
 0x2b0   :  { %v7888_v57 = vpop.eup %5809  ;;  %v2290_v37 = vadd.f32 %v7664_v27, %v2286_v45  ;;  %5835 = vpow2.f32 %v1356_v53  ;;  %v7900_v40 = vmul.f32 1.442695, %v2241_v35  ;;  %v7921_v18 = vmul.f32 1.442695, %v2252_v30  ;;  %v10563_v30 = vld [vmem:[#allocation74_spill] sm:$0xff] }
 0x2b1   :  { %10544 = vst [vmem:[#allocation39_spill] sm:$0xff] %v7888_v57  ;;  %v7895_v15 = vpop.eup %5811  ;;  %v2291_v56 = vadd.f32 %v7791_v52, %v2287_v21  ;;  %5837 = vpow2.f32 %v1358_v16  ;;  %10545 = vst [vmem:[#allocation136_spill] sm:$0xff] %v7898_v51  ;;  %v7923_v47 = vmul.f32 1.442695, %v2253_v23  ;;  %v10559_v35 = vsub.f32 %v10519_v55, %v7662_v42 }
 0x2b2   :  { %10546 = vst [vmem:[#allocation43_spill] sm:$0xff] %v7900_v40  ;;  %v7902_v41 = vpop.eup %5813  ;;  %5839 = vrcp.f32 %v2290_v37  ;;  %v1094_v53 = vadd.f32 %v7895_v15, %v7881_v61  ;;  %10555 = vst [vmem:[#allocation73_spill] sm:$0xff] %v7921_v18  ;;  %v10561_v37 = vsub.f32 %v10512_v5, %v7530_v11 }
 0x2b3   :  { %10547 = vst [vmem:[#allocation113_spill] sm:$0xff] %v7902_v41  ;;  %v7910_v45 = vpop.eup %5815  ;;  %5841 = vrcp.f32 %v2291_v56  ;;  %v1095_v34 = vadd.f32 %v7902_v41, %v7888_v57  ;;  %10556 = vst [vmem:[#allocation75_spill] sm:$0xff] %v7923_v47  ;;  %v10557_v56 = vsub.f32 %v10511_v13, %v7530_v11  ;;  %v7933_v16 = vmul.f32 1.442695, %v10559_v35  ;;  %v10570_v41 = vld [vmem:[#allocation86_spill] sm:$0xff] }
 0x2b4   :  { %10551 = vst [vmem:[#allocation34_spill] sm:$0xff] %v7910_v45  ;;  %v7918_v40 = vpop.eup %5817  ;;  %v1098_v51 = vadd.f32 %v7910_v45, %v1094_v53  ;;  %5843 = vpow2.f32 %v1368_v50  ;;  %v7938_v53 = vmul.f32 1.442695, %v10561_v37  ;;  %v10568_v37 = vld [vmem:[#allocation124_spill] sm:$0xff] }
 0x2b5   :  { %10554 = vst [vmem:[#allocation130_spill] sm:$0xff] %v7918_v40  ;;  %v7928_v1 = vmul.f32 1.442695, %v10557_v56  ;;  %v5820_v20 = vpop.eup %5819  ;;  %10560 = vst [vmem:[#allocation45_spill] sm:$0xff] %v7933_v16  ;;  %v1099_v55 = vadd.f32 %v7918_v40, %v1095_v34  ;;  %5845 = vpow2.f32 %v1370_v19 }
 0x2b6   :  { %10562 = vst [vmem:[#allocation102_spill] sm:$0xff] %v7938_v53  ;;  %v7942_v21 = vpop.eup %5821  ;;  %v1410_v13 = vmul.f32 %v5820_v20, %v7755_v14  ;;  %v1422_v56 = vmul.f32 %v5820_v20, %v7769_v8  ;;  %v1434_v50 = vmul.f32 %v5820_v20, %v7798_v3  ;;  %v1446_v16 = vmul.f32 %v5820_v20, %v7816_v26  ;;  %v10566_v14 = vld [vmem:[#allocation61_spill] sm:$0xff]  ;;  %v10567_v3 = vld [vmem:[#allocation36_spill] sm:$0xff] }
 0x2b7   :  { %10558 = vst [vmem:[#allocation105_spill] sm:$0xff] %v7928_v1  ;;  %10564 = vst [vmem:[#allocation88_spill] sm:$0xff] %v7942_v21  ;;  %v5824_v35 = vpop.eup %5823  ;;  %v1102_v5 = vadd.f32 %v7942_v21, %v1098_v51  ;;  %v1458_v19 = vmul.f32 %v5820_v20, %v7573_v28  ;;  %5847 = vpow2.f32 %v2220_v60 }
 0x2b8   :  { %v7952_v23 = vpop.eup %5825  ;;  %v1411_v1 = vmul.f32 %v5824_v35, %v7762_v62  ;;  %v1414_v47 = vmul.f32 %v1410_v13, %v10566_v14  ;;  %v1423_v8 = vmul.f32 %v5824_v35, %v7781_v33  ;;  %v1426_v18 = vmul.f32 %v1422_v56, %v10567_v3  ;;  %v10569_v62 = vld [vmem:[#allocation48_spill] sm:$0xff] }
 0x2b9   :  { %v7958_v34 = vpop.eup %5827  ;;  %v1435_v26 = vmul.f32 %v5824_v35, %v7812_v48  ;;  %v1447_v51 = vmul.f32 %v5824_v35, %v7827_v63  ;;  %v1438_v33 = vmul.f32 %v1434_v50, %v10570_v41  ;;  %v1450_v48 = vmul.f32 %v1446_v16, %v7631_v38 }
 0x2ba   :  { %v7963_v53 = vpop.eup %5829  ;;  %v1415_v21 = vmul.f32 %v1411_v1, %v10568_v37  ;;  %v1427_v40 = vmul.f32 %v1423_v8, %v10569_v62  ;;  %v1430_v13 = vadd.f32 %v1426_v18, %v1414_v47  ;;  %v1459_v63 = vmul.f32 %v5824_v35, %v7727_v10  ;;  %v10573_v35 = vld [vmem:[#allocation134_spill] sm:$0xff] }
 0x2bb   :  { %v7968_v57 = vpop.eup %5831  ;;  %v1439_v56 = vmul.f32 %v1435_v26, %v7644_v36  ;;  %v1103_v28 = vadd.f32 %v7952_v23, %v1099_v55  ;;  %v1451_v1 = vmul.f32 %v1447_v51, %v7647_v39  ;;  %v1106_v47 = vadd.f32 %v7565_v0, %v1102_v5 }
 0x2bc   :  { %10571 = vst [vmem:[#allocation110_spill] sm:$0xff] %v7968_v57  ;;  %v7974_v60 = vpop.eup %5833  ;;  %v1431_v20 = vadd.f32 %v1427_v40, %v1415_v21  ;;  %v1442_v45 = vadd.f32 %v1438_v33, %v1430_v13  ;;  %v1462_v50 = vmul.f32 %v1458_v19, %v7760_v46  ;;  %v1388_v16 = vadd.f32 %v7968_v57, %v7958_v34 }
 0x2bd   :  { %10572 = vst [vmem:[#allocation106_spill] sm:$0xff] %v7974_v60  ;;  %v7978_v18 = vpop.eup %5835  ;;  %v1107_v8 = vadd.f32 %v7715_v6, %v1103_v28  ;;  %v1389_v10 = vadd.f32 %v7974_v60, %v7963_v53  ;;  %5849 = vrcp.f32 %v1106_v47  ;;  %v1463_v51 = vmul.f32 %v1459_v63, %v7777_v58 }
 0x2be   :  { %v7986_v55 = vpop.eup %5837  ;;  %v1443_v40 = vadd.f32 %v1439_v56, %v1431_v20  ;;  %v1454_v21 = vadd.f32 %v1450_v48, %v1442_v45  ;;  %v1392_v19 = vadd.f32 %v7978_v18, %v1388_v16 }
 0x2bf   :  { %v5840_v26 = vpop.eup %5839  ;;  %5851 = vrcp.f32 %v1107_v8  ;;  %v1393_v13 = vadd.f32 %v7986_v55, %v1389_v10 }
 0x2c0   :  { %v5842_v33 = vpop.eup %5841  ;;  %v1455_v28 = vadd.f32 %v1451_v1, %v1443_v40  ;;  %v1466_v57 = vadd.f32 %v1462_v50, %v1454_v21  ;;  %v2298_v60 = vmul.f32 %v5840_v26, %v7839_v54  ;;  %v2310_v56 = vmul.f32 %v5840_v26, %v7848_v24 }
 0x2c1   :  { %v2299_v45 = vmul.f32 %v5842_v33, %v7841_v31  ;;  %v2311_v48 = vmul.f32 %v5842_v33, %v7850_v29  ;;  %v2322_v20 = vmul.f32 %v5840_v26, %v7858_v43  ;;  %v2323_v63 = vmul.f32 %v5842_v33, %v7866_v25  ;;  %v7999_v47 = vpop.eup %5843 }
 0x2c2   :  { %v1467_v8 = vadd.f32 %v1463_v51, %v1455_v28  ;;  %v2302_v16 = vmul.f32 %v2298_v60, %v10566_v14  ;;  %v2314_v1 = vmul.f32 %v2310_v56, %v10567_v3  ;;  %v2334_v50 = vmul.f32 %v5840_v26, %v7869_v49  ;;  %v8008_v29 = vpop.eup %5845 }
 0x2c3   :  { %v2303_v54 = vmul.f32 %v2299_v45, %v10568_v37  ;;  %v2315_v24 = vmul.f32 %v2311_v48, %v10569_v62  ;;  %v2326_v31 = vmul.f32 %v2322_v20, %v10570_v41  ;;  %5853 = vpow2.f32 %v7879_v4 }
 0x2c4   :  { %v2362_v43 = vpack.c.bf16 %v1467_v8, %v1466_v57  ;;  %v2318_v25 = vadd.f32 %v2314_v1, %v2302_v16  ;;  %v2327_v10 = vmul.f32 %v2323_v63, %v7644_v36  ;;  %v2335_v60 = vmul.f32 %v5842_v33, %v7876_v9  ;;  %v8015_v28 = vpop.eup %5847  ;;  %v10576_v16 = vld [vmem:[#allocation97_spill] sm:$0xff] }
 0x2c5   :  { %v2319_v40 = vadd.f32 %v2315_v24, %v2303_v54  ;;  %v2346_v21 = vmul.f32 %v5840_v26, %v7664_v27  ;;  %v2347_v49 = vmul.f32 %v5842_v33, %v7791_v52  ;;  %v1396_v51 = vadd.f32 %v7999_v47, %v1392_v19 }
 0x2c6   :  { %2418 = vmatprep.subr.bf16.mxu1 %v2362_v43  ;;  %v2330_v56 = vadd.f32 %v2326_v31, %v2318_v25  ;;  %v2338_v4 = vmul.f32 %v2334_v50, %v7631_v38  ;;  %v1397_v57 = vadd.f32 %v8008_v29, %v1393_v13  ;;  %5855 = vpow2.f32 %v7884_v59  ;;  %v10574_v13 = vld [vmem:[#allocation123_spill] sm:$0xff] }
 0x2c7   :  { %v2331_v45 = vadd.f32 %v2327_v10, %v2319_v40  ;;  %v2339_v9 = vmul.f32 %v2335_v60, %v7647_v39  ;;  %v2350_v48 = vmul.f32 %v2346_v21, %v7760_v46  ;;  %v1400_v27 = vadd.f32 %v7678_v12, %v1396_v51  ;;  %v10577_v50 = vld [vmem:[#allocation91_spill] sm:$0xff]  ;;  %v10579_v10 = vld [vmem:[#allocation120_spill] sm:$0xff] }
 0x2c8   :  { %v2342_v52 = vadd.f32 %v2338_v4, %v2330_v56  ;;  %v2351_v26 = vmul.f32 %v2347_v49, %v7777_v58  ;;  %v1401_v19 = vadd.f32 %v7823_v44, %v1397_v57  ;;  %5857 = vpow2.f32 %v7886_v22  ;;  %v10580_v49 = vld [vmem:[#allocation34_spill] sm:$0xff]  ;;  %v10581_v56 = vld [vmem:[#allocation136_spill] sm:$0xff]  ;;  %v10582_v57 = vld [vmem:[#allocation39_spill] sm:$0xff] }
 0x2c9   :  { %v2343_v33 = vadd.f32 %v2339_v9, %v2331_v45  ;;  %5859 = vrcp.f32 %v1400_v27  ;;  %v10575_v63 = vsub.f32 %v10522_v17, %v7662_v42  ;;  %v1057_v1 = vsub.f32 %v10576_v16, %v7662_v42  ;;  %v10583_v9 = vld [vmem:[#allocation113_spill] sm:$0xff] }
 0x2ca   :  { %5861 = vrcp.f32 %v1401_v19  ;;  %v1068_v22 = vsub.f32 %v10577_v50, %v7530_v11  ;;  %v5850_v54 = vpop.eup %5849  ;;  %v2354_v24 = vadd.f32 %v2350_v48, %v2342_v52  ;;  %v10578_v43 = vsub.f32 %v10563_v30, %v7530_v11  ;;  %v10584_v11 = vld [vmem:[#allocation130_spill] sm:$0xff]  ;;  %v10585_v52 = vld [vmem:[#allocation88_spill] sm:$0xff] }
 0x2cb   :  { %v8033_v8 = vmul.f32 1.442695, %v10575_v63  ;;  %v2355_v31 = vadd.f32 %v2351_v26, %v2343_v33  ;;  %v1069_v60 = vsub.f32 %v10579_v10, %v7662_v42  ;;  %v1114_v40 = vmul.f32 %v5850_v54, %v7881_v61 }
 0x2cc   :  { %v8042_v25 = vmul.f32 1.442695, %v10578_v43  ;;  %v5852_v17 = vpop.eup %5851  ;;  %v1126_v21 = vmul.f32 %v5850_v54, %v7895_v15  ;;  %v1138_v51 = vmul.f32 %v5850_v54, %v10580_v49  ;;  %5863 = vpow2.f32 %v10581_v56  ;;  %v10587_v56 = vld [vmem:[#allocation73_spill] sm:$0xff] }
 0x2cd   :  { %v2365_v4 = vpack.c.bf16 %v2355_v31, %v2354_v24  ;;  %v1115_v45 = vmul.f32 %v5852_v17, %v10582_v57  ;;  %v1127_v48 = vmul.f32 %v5852_v17, %v10583_v9  ;;  %v1139_v30 = vmul.f32 %v5852_v17, %v10584_v11  ;;  %v10592_v9 = vld [vmem:[#allocation133_spill] sm:$0xff]  ;;  %v10593_v11 = vld [vmem:[#allocation80_spill] sm:$0xff] }
 0x2ce   :  { %v1118_v27 = vmul.f32 %v1114_v40, %v10566_v14  ;;  %v1130_v42 = vmul.f32 %v1126_v21, %v10567_v3  ;;  %v1150_v26 = vmul.f32 %v5850_v54, %v10585_v52  ;;  %v1151_v61 = vmul.f32 %v5852_v17, %v7952_v23  ;;  %v10586_v21 = vld [vmem:[#allocation43_spill] sm:$0xff] }
 0x2cf   :  { %5643 = vmatprep.subr.bf16.mxu0 %v2365_v4  ;;  %v1119_v15 = vmul.f32 %v1115_v45, %v10568_v37  ;;  %v1131_v19 = vmul.f32 %v1127_v48, %v10569_v62  ;;  %v8059_v33 = vmul.f32 1.442695, %v1057_v1  ;;  %v8061_v63 = vmul.f32 1.442695, %v1068_v22  ;;  %v10591_v45 = vld [vmem:[#allocation41_spill] sm:$0xff] }
 0x2d0   :  { %v8063_v16 = vpop.eup %5853  ;;  %v1134_v50 = vadd.f32 %v1130_v42, %v1118_v27  ;;  %v1142_v24 = vmul.f32 %v1138_v51, %v10570_v41  ;;  %v1162_v31 = vmul.f32 %v5850_v54, %v7565_v0  ;;  %5644 = vmatpush3.bf16.msra.mxu0 %v2365_v4  ;;  %v8067_v43 = vmul.f32 1.442695, %v1069_v60  ;;  %v10588_v54 = vld [vmem:[#allocation75_spill] sm:$0xff]  ;;  %v10595_v42 = vld [vmem:[#allocation122_spill] sm:$0xff] }
 0x2d1   :  { %v1135_v23 = vadd.f32 %v1131_v19, %v1119_v15  ;;  %v1143_v10 = vmul.f32 %v1139_v30, %v7644_v36  ;;  %v1163_v40 = vmul.f32 %v5852_v17, %v7715_v6  ;;  %5865 = vpow2.f32 %v10586_v21  ;;  %v10589_v60 = vld [vmem:[#allocation127_spill] sm:$0xff]  ;;  %v10596_v19 = vld [vmem:[#allocation105_spill] sm:$0xff] }
 0x2d2   :  { %v1146_v1 = vadd.f32 %v1142_v24, %v1134_v50  ;;  %v1154_v22 = vmul.f32 %v1150_v26, %v7631_v38  ;;  %v1155_v49 = vmul.f32 %v1151_v61, %v7647_v39  ;;  %5867 = vpow2.f32 %v10587_v56  ;;  %v10590_v4 = vld [vmem:[#allocation115_spill] sm:$0xff]  ;;  %v10597_v50 = vld [vmem:[#allocation104_spill] sm:$0xff]  ;;  %v10604_v56 = vld [vmem:[#allocation117_spill] sm:$0xff] }
 0x2d3   :  { %v8075_v51 = vpop.eup %5855  ;;  %v1147_v0 = vadd.f32 %v1143_v10, %v1135_v23  ;;  %5869 = vpow2.f32 %v10588_v54  ;;  %v1166_v48 = vmul.f32 %v1162_v31, %v7760_v46  ;;  %v10594_v30 = vsub.f32 %v10593_v11, %v10548_v2  ;;  %v10643_v39 = vld [vmem:[#allocation77_spill] sm:$0xff] }
 0x2d4   :  { %v1158_v17 = vadd.f32 %v1154_v22, %v1146_v1  ;;  %v1167_v15 = vmul.f32 %v1163_v40, %v7777_v58  ;;  %5871 = vpow2.f32 %v10596_v19  ;;  %v10598_v24 = vsub.f32 %v10597_v50, %v7616_v7  ;;  %v10599_v1 = vld [vmem:[#allocation102_spill] sm:$0xff]  ;;  %v10600_v22 = vld [vmem:[#allocation135_spill] sm:$0xff] }
 0x2d5   :  { %v1928_v27 = vmul.f32 1.442695, %v10594_v30  ;;  %v8088_v26 = vpop.eup %5857  ;;  %v1159_v61 = vadd.f32 %v1155_v49, %v1147_v0  ;;  %v2276_v21 = vadd.f32 %v8075_v51, %v8015_v28  ;;  %5873 = vpow2.f32 %v10599_v1  ;;  %v10601_v0 = vld [vmem:[#allocation110_spill] sm:$0xff] }
 0x2d6   :  { %v1930_v23 = vmul.f32 1.442695, %v10598_v24  ;;  %v5860_v10 = vpop.eup %5859  ;;  %v1170_v31 = vadd.f32 %v1166_v48, %v1158_v17  ;;  %v10602_v50 = vld [vmem:[#allocation106_spill] sm:$0xff]  ;;  %v10603_v24 = vld [vmem:[#allocation45_spill] sm:$0xff]  ;;  %v10648_v46 = vsub.f32 %v10590_v4, %v10589_v60 }
 0x2d7   :  { %v5862_v54 = vpop.eup %5861  ;;  %v1171_v49 = vadd.f32 %v1167_v15, %v1159_v61  ;;  %v1408_v40 = vmul.f32 %v5860_v10, %v7958_v34  ;;  %v1420_v11 = vmul.f32 %v5860_v10, %v10601_v0  ;;  %v1432_v30 = vmul.f32 %v5860_v10, %v7978_v18  ;;  %v10605_v61 = vld [vmem:[#allocation121_spill] sm:$0xff]  ;;  %v10606_v0 = vld [vmem:[#allocation140_spill] sm:$0xff] }
 0x2d8   :  { %v1409_v19 = vmul.f32 %v5862_v54, %v7963_v53  ;;  %v1421_v17 = vmul.f32 %v5862_v54, %v10602_v50  ;;  %v1433_v48 = vmul.f32 %v5862_v54, %v7986_v55  ;;  %5875 = vpow2.f32 %v10603_v24  ;;  %v10607_v18 = vld [vmem:[#allocation141_spill] sm:$0xff] }
 0x2d9   :  { %v8107_v1 = vpop.eup %5863  ;;  %v2361_v52 = vpack.c.bf16 %v1171_v49, %v1170_v31  ;;  %v1412_v6 = vmul.f32 %v1408_v40, %v10604_v56  ;;  %v1424_v15 = vmul.f32 %v1420_v11, %v10605_v61  ;;  %v1444_v34 = vmul.f32 %v5860_v10, %v7999_v47  ;;  %v10608_v24 = vld [vmem:[#allocation69_spill] sm:$0xff] }
 0x2da   :  { %v1413_v57 = vmul.f32 %v1409_v19, %v10606_v0  ;;  %v1425_v59 = vmul.f32 %v1421_v17, %v10607_v18  ;;  %v1445_v53 = vmul.f32 %v5862_v54, %v8008_v29  ;;  %v2277_v55 = vadd.f32 %v8088_v26, %v8063_v16  ;;  %v10609_v31 = vld [vmem:[#allocation125_spill] sm:$0xff]  ;;  %v10610_v29 = vld [vmem:[#allocation62_spill] sm:$0xff] }
 0x2db   :  { %2419 = vmatpush1.bf16.msra.mxu1 %v2361_v52  ;;  %v1428_v50 = vadd.f32 %v1424_v15, %v1412_v6  ;;  %v1436_v20 = vmul.f32 %v1432_v30, %v10608_v24  ;;  %v1437_v49 = vmul.f32 %v1433_v48, %v10609_v31  ;;  %v1456_v40 = vmul.f32 %v5860_v10, %v7678_v12  ;;  %v10611_v52 = vld [vmem:[#allocation90_spill] sm:$0xff] }
 0x2dc   :  { %v1429_v11 = vadd.f32 %v1425_v59, %v1413_v57  ;;  %v1457_v47 = vmul.f32 %v5862_v54, %v7823_v44  ;;  %v2280_v19 = vadd.f32 %v8107_v1, %v2276_v21  ;;  %5877 = vpow2.f32 %v8033_v8  ;;  %v10613_v12 = vld [vmem:[#allocation50_spill] sm:$0xff]  ;;  %v10614_v57 = vld [vmem:[#allocation44_spill] sm:$0xff]  ;;  %v10616_v21 = vld [vmem:[#allocation57_spill] sm:$0xff] }
 0x2dd   :  { %v1440_v17 = vadd.f32 %v1436_v20, %v1428_v50  ;;  %v1448_v5 = vmul.f32 %v1444_v34, %v10610_v29  ;;  %5879 = vpow2.f32 %v8042_v25  ;;  %v10612_v6 = vsub.f32 %v10611_v52, %v10548_v2  ;;  %v10615_v25 = vld [vmem:[#allocation40_spill] sm:$0xff] }
 0x2de   :  { %v8128_v15 = vpop.eup %5865  ;;  %v1441_v48 = vadd.f32 %v1437_v49, %v1429_v11  ;;  %v1449_v59 = vmul.f32 %v1445_v53, %v10613_v12  ;;  %v1460_v44 = vmul.f32 %v1456_v40, %v10614_v57  ;;  %5881 = vpow2.f32 %v8059_v33  ;;  %v10617_v49 = vld [vmem:[#allocation83_spill] sm:$0xff]  ;;  %v10618_v33 = vld [vmem:[#allocation60_spill] sm:$0xff] }
 0x2df   :  { %v1940_v30 = vmul.f32 1.442695, %v10612_v6  ;;  %v8133_v10 = vpop.eup %5867  ;;  %v1452_v20 = vadd.f32 %v1448_v5, %v1440_v17  ;;  %v2281_v8 = vadd.f32 %v8128_v15, %v2277_v55  ;;  %5883 = vpow2.f32 %v8061_v63  ;;  %v10620_v63 = vld [vmem:[#allocation112_spill] sm:$0xff] }
 0x2e0   :  { %v8139_v34 = vpop.eup %5869  ;;  %v1453_v50 = vadd.f32 %v1449_v59, %v1441_v48  ;;  %v1461_v11 = vmul.f32 %v1457_v47, %v10617_v49  ;;  %v2284_v53 = vadd.f32 %v8133_v10, %v2280_v19  ;;  %5885 = vpow2.f32 %v8067_v43  ;;  %v10622_v47 = vld [vmem:[#allocation46_spill] sm:$0xff]  ;;  %v10623_v43 = vld [vmem:[#allocation85_spill] sm:$0xff] }
 0x2e1   :  { %v10619_v40 = vrot.slane %v10618_v33, 1  ;;  %v2285_v55 = vadd.f32 %v8139_v34, %v2281_v8  ;;  %5887 = vpow2.f32 %v1928_v27  ;;  %v10621_v17 = vsub.f32 %v10620_v63, %v7616_v7  ;;  %v8151_v6 = vpop.eup %5871 }
 0x2e2   :  { %v1464_v48 = vadd.f32 %v1460_v44, %v1452_v20  ;;  %v1465_v59 = vadd.f32 %v1461_v11, %v1453_v50  ;;  %v2288_v54 = vadd.f32 %v10622_v47, %v2284_v53  ;;  %5889 = vpow2.f32 %v1930_v23  ;;  %v8154_v19 = vpop.eup %5873  ;;  %v10628_v23 = vld [vmem:[#allocation78_spill] sm:$0xff]  ;;  %v10629_v53 = vld [vmem:[#allocation139_spill] sm:$0xff] }
 0x2e3   :  { %v1891_v5 = vadd.f32 %v10619_v40, %v10618_v33  ;;  %v1942_v52 = vmul.f32 1.442695, %v10621_v17  ;;  %v2289_v58 = vadd.f32 %v10623_v43, %v2285_v55  ;;  %5891 = vpow2.f32 %v1940_v30  ;;  %v10624_v33 = vld [vmem:[#allocation116_spill] sm:$0xff]  ;;  %v10626_v40 = vld [vmem:[#allocation58_spill] sm:$0xff] }
 0x2e4   :  { %v10625_v8 = vsub.f32 %v10624_v33, %v10548_v2  ;;  %v1932_v63 = vsub.f32 %v10626_v40, %v10615_v25  ;;  %v2357_v17 = vpack.c.bf16 %v1465_v59, %v1464_v48  ;;  %5893 = vrcp.f32 %v2288_v54  ;;  %v10630_v30 = vld [vmem:[#allocation108_spill] sm:$0xff]  ;;  %v10633_v48 = vld [vmem:[#allocation94_spill] sm:$0xff] }
 0x2e5   :  { %v10627_v44 = vsub.f32 %v10573_v35, %v7616_v7  ;;  %v8167_v11 = vpop.eup %5875  ;;  %v1913_v55 = vmax.f32 %v10630_v30, %v10629_v53  ;;  %5895 = vrcp.f32 %v2289_v58  ;;  %v10631_v33 = vsub.f32 %v10574_v13, %v10548_v2  ;;  %v10634_v58 = vld [vmem:[#allocation79_spill] sm:$0xff]  ;;  %v10642_v50 = vld [vmem:[#allocation26_spill] sm:$0xff] }
 0x2e6   :  { %v1952_v27 = vmul.f32 1.442695, %v10625_v8  ;;  %2420 = vmatprep.subr.bf16.mxu1 %v2357_v17  ;;  %5897 = vpow2.f32 %v1942_v52  ;;  %v10632_v54 = vsub.f32 %v10470_v32, %v7616_v7  ;;  %v10635_v30 = vsub.f32 %v10634_v58, %v10589_v60  ;;  %v10636_v13 = vld [vmem:[#allocation103_spill] sm:$0xff]  ;;  %v10638_v32 = vld [vmem:[#allocation89_spill] sm:$0xff] }
 0x2e7   :  { %v1954_v20 = vmul.f32 1.442695, %v10627_v44  ;;  %v1964_v8 = vmul.f32 1.442695, %v10631_v33  ;;  %v8179_v40 = vmax.f32 %v1913_v55, %v1891_v5  ;;  %v1092_v44 = vadd.f32 %v8154_v19, %v8151_v6  ;;  %v10640_v55 = vld [vmem:[#allocation111_spill] sm:$0xff] }
 0x2e8   :  { %v1966_v35 = vmul.f32 1.442695, %v10632_v54  ;;  %5899 = vpow2.f32 %v1952_v27  ;;  %v1632_v2 = vmul.f32 1.442695, %v10635_v30  ;;  %v10637_v52 = vsub.f32 %v10636_v13, %v10591_v45  ;;  %v10644_v30 = vld [vmem:[#allocation35_spill] sm:$0xff] }
 0x2e9   :  { %5901 = vpow2.f32 %v1954_v20  ;;  %v10639_v7 = vsub.f32 %v10638_v32, %v10589_v60  ;;  %v8192_v54 = vpop.eup %5877  ;;  %v10641_v59 = vsub.f32 %v10640_v55, %v10591_v45  ;;  %v1656_v38 = vmul.f32 1.442695, %v10648_v46 }
 0x2ea   :  { %v1634_v17 = vmul.f32 1.442695, %v10637_v52  ;;  %5903 = vpow2.f32 %v1964_v8  ;;  %v8201_v36 = vpop.eup %5879  ;;  %v1093_v13 = vadd.f32 %v8192_v54, %v8167_v11  ;;  %v10649_v32 = vsub.f32 %v10592_v9, %v10591_v45 }
 0x2eb   :  { %v1644_v33 = vmul.f32 1.442695, %v10639_v7  ;;  %v1646_v27 = vmul.f32 1.442695, %v10641_v59  ;;  %5905 = vpow2.f32 %v1966_v35  ;;  %v8209_v55 = vpop.eup %5881  ;;  %v1969_v59 = vsub.f32 %v1891_v5, %v8179_v40 }
 0x2ec   :  { %v1096_v58 = vadd.f32 %v8201_v36, %v1092_v44  ;;  %5907 = vpow2.f32 %v1632_v2  ;;  %v8216_v62 = vpop.eup %5883  ;;  %v1097_v35 = vadd.f32 %v8209_v55, %v1093_v13  ;;  %v1658_v7 = vmul.f32 1.442695, %v10649_v32  ;;  %v10650_v44 = vld [vmem:[#allocation68_spill] sm:$0xff] }
 0x2ed   :  { %5909 = vpow2.f32 %v1634_v17  ;;  %v8222_v8 = vpop.eup %5885  ;;  %v1921_v2 = vsub.f32 %v10650_v44, %v8179_v40  ;;  %v8232_v17 = vmul.f32 1.442695, %v1969_v59  ;;  %v10652_v13 = vld [vmem:[#allocation32_spill] sm:$0xff]  ;;  %v10657_v59 = vsub.f32 %v10616_v21, %v10615_v25 }
 0x2ee   :  { %v1100_v5 = vadd.f32 %v8216_v62, %v1096_v58  ;;  %5911 = vpow2.f32 %v1644_v33  ;;  %v8227_v37 = vpop.eup %5887  ;;  %v1101_v46 = vadd.f32 %v8222_v8, %v1097_v35  ;;  %v10653_v32 = vld [vmem:[#allocation72_spill] sm:$0xff]  ;;  %v10655_v33 = vsub.f32 %v10595_v42, %v10589_v60 }
 0x2ef   :  { %10651 = vst [vmem:[#allocation131_spill] sm:$0xff] %v8227_v37  ;;  %5913 = vpow2.f32 %v1646_v27  ;;  %v8230_v4 = vpop.eup %5889  ;;  %v1933_v41 = vsub.f32 %v10653_v32, %v8179_v40  ;;  %v10656_v27 = vsub.f32 %v10600_v22, %v10591_v45  ;;  %v1924_v3 = vmul.f32 1.442695, %v10657_v59  ;;  %v10658_v45 = vld [vmem:[#allocation38_spill] sm:$0xff] }
 0x2f0   :  { %v1104_v9 = vadd.f32 %v10652_v13, %v1100_v5  ;;  %5915 = vpow2.f32 %v1656_v38  ;;  %v8237_v58 = vpop.eup %5891  ;;  %v1668_v44 = vmul.f32 1.442695, %v10655_v33  ;;  %v1926_v32 = vmul.f32 1.442695, %v1921_v2 }
 0x2f1   :  { %10654 = vst [vmem:[#allocation129_spill] sm:$0xff] %v8237_v58  ;;  %5917 = vpow2.f32 %v1658_v7  ;;  %v1670_v35 = vmul.f32 1.442695, %v10656_v27  ;;  %v5894_v5 = vpop.eup %5893  ;;  %v1982_v38 = vadd.f32 %v8237_v58, %v8227_v37  ;;  %v1936_v14 = vmul.f32 1.442695, %v1932_v63 }
 0x2f2   :  { %5919 = vrcp.f32 %v1104_v9  ;;  %v5896_v7 = vpop.eup %5895  ;;  %v2296_v52 = vmul.f32 %v5894_v5, %v8015_v28  ;;  %v2308_v60 = vmul.f32 %v5894_v5, %v8075_v51  ;;  %v2320_v42 = vmul.f32 %v5894_v5, %v8107_v1 }
 0x2f3   :  { %v1105_v22 = vadd.f32 %v10658_v45, %v1101_v46  ;;  %v8254_v33 = vpop.eup %5897  ;;  %v2297_v21 = vmul.f32 %v5896_v7, %v8063_v16  ;;  %v2309_v9 = vmul.f32 %v5896_v7, %v8088_v26  ;;  %v2321_v27 = vmul.f32 %v5896_v7, %v8128_v15 }
 0x2f4   :  { %v1938_v59 = vmul.f32 1.442695, %v1933_v41  ;;  %v2300_v63 = vmul.f32 %v2296_v52, %v10604_v56  ;;  %v2312_v28 = vmul.f32 %v2308_v60, %v10605_v61  ;;  %v2332_v51 = vmul.f32 %v5894_v5, %v8133_v10 }
 0x2f5   :  { %v8259_v2 = vpop.eup %5899  ;;  %v2333_v1 = vmul.f32 %v5896_v7, %v8139_v34  ;;  %v2301_v58 = vmul.f32 %v2297_v21, %v10606_v0  ;;  %v2313_v16 = vmul.f32 %v2309_v9, %v10607_v18  ;;  %v2324_v26 = vmul.f32 %v2320_v42, %v10608_v24 }
 0x2f6   :  { %v8265_v46 = vpop.eup %5901  ;;  %v2325_v41 = vmul.f32 %v2321_v27, %v10609_v31  ;;  %v2316_v37 = vadd.f32 %v2312_v28, %v2300_v63  ;;  %v2344_v52 = vmul.f32 %v5894_v5, %v10622_v47  ;;  %v2345_v60 = vmul.f32 %v5896_v7, %v10623_v43 }
 0x2f7   :  { %v8271_v15 = vpop.eup %5903  ;;  %5921 = vrcp.f32 %v1105_v22  ;;  %v2317_v34 = vadd.f32 %v2313_v16, %v2301_v58  ;;  %v1983_v21 = vadd.f32 %v8254_v33, %v8230_v4  ;;  %v1986_v9 = vadd.f32 %v8259_v2, %v1982_v38 }
 0x2f8   :  { %v8275_v10 = vpop.eup %5905  ;;  %5923 = vpow2.f32 %v1668_v44  ;;  %v2328_v27 = vadd.f32 %v2324_v26, %v2316_v37  ;;  %v2336_v20 = vmul.f32 %v2332_v51, %v10610_v29  ;;  %v2337_v63 = vmul.f32 %v2333_v1, %v10613_v12  ;;  %v10659_v51 = vld [vmem:[#allocation31_spill] sm:$0xff] }
 0x2f9   :  { %v8280_v42 = vpop.eup %5907  ;;  %5925 = vpow2.f32 %v1670_v35  ;;  %v2329_v43 = vadd.f32 %v2325_v41, %v2317_v34  ;;  %v1987_v5 = vadd.f32 %v8265_v46, %v1983_v21  ;;  %v1990_v58 = vadd.f32 %v8271_v15, %v1986_v9  ;;  %v10660_v41 = vld [vmem:[#allocation101_spill] sm:$0xff] }
 0x2fa   :  { %v8284_v47 = vpop.eup %5909  ;;  %5927 = vpow2.f32 %v1924_v3  ;;  %v2340_v38 = vadd.f32 %v2336_v20, %v2328_v27  ;;  %v2348_v44 = vmul.f32 %v2344_v52, %v10614_v57  ;;  %v2349_v37 = vmul.f32 %v2345_v60, %v10617_v49  ;;  %v10661_v34 = vld [vmem:[#allocation81_spill] sm:$0xff] }
 0x2fb   :  { %v8288_v7 = vpop.eup %5911  ;;  %5929 = vpow2.f32 %v1926_v32  ;;  %v2341_v28 = vadd.f32 %v2337_v63, %v2329_v43  ;;  %v1991_v35 = vadd.f32 %v8275_v10, %v1987_v5  ;;  %v1994_v1 = vadd.f32 %v10659_v51, %v1990_v58 }
 0x2fc   :  { %v8292_v22 = vpop.eup %5913  ;;  %v1686_v16 = vadd.f32 %v8288_v7, %v8280_v42  ;;  %v2352_v3 = vadd.f32 %v2348_v44, %v2340_v38  ;;  %5931 = vpow2.f32 %v1936_v14  ;;  %v1945_v32 = vsub.f32 %v10660_v41, %v8179_v40  ;;  %v10668_v41 = vld [vmem:[#allocation56_spill] sm:$0xff] }
 0x2fd   :  { %v8298_v26 = vpop.eup %5915  ;;  %v1687_v20 = vadd.f32 %v8292_v22, %v8284_v47  ;;  %v2353_v60 = vadd.f32 %v2349_v37, %v2341_v28  ;;  %v1995_v21 = vadd.f32 %v10661_v34, %v1991_v35  ;;  %5933 = vrcp.f32 %v1994_v1  ;;  %v10663_v35 = vld [vmem:[#allocation55_spill] sm:$0xff] }
 0x2fe   :  { %v8304_v52 = vpop.eup %5917  ;;  %v1690_v9 = vadd.f32 %v8298_v26, %v1686_v16  ;;  %5935 = vpow2.f32 %v1938_v59  ;;  %v10662_v43 = vsub.f32 %v10628_v23, %v10615_v25  ;;  %v1957_v14 = vsub.f32 %v10629_v53, %v8179_v40  ;;  %v10666_v53 = vld [vmem:[#allocation67_spill] sm:$0xff] }
 0x2ff   :  { %v5920_v27 = vpop.eup %5919  ;;  %v1691_v63 = vadd.f32 %v8304_v52, %v1687_v20  ;;  %v2360_v58 = vpack.c.bf16 %v2353_v60, %v2352_v3  ;;  %5937 = vrcp.f32 %v1995_v21  ;;  %v1950_v28 = vmul.f32 1.442695, %v1945_v32  ;;  %v10670_v21 = vld [vmem:[#allocation71_spill] sm:$0xff] }
 0x300   :  { %v1948_v5 = vmul.f32 1.442695, %v10662_v43  ;;  %v1112_v38 = vmul.f32 %v5920_v27, %v8151_v6  ;;  %v1124_v44 = vmul.f32 %v5920_v27, %v8154_v19  ;;  %v1136_v37 = vmul.f32 %v5920_v27, %v8201_v36  ;;  %v8327_v6 = vld [vmem:[%s9903_s2 + $0x38] sm:$0xff]  }
 0x301   :  { %v10664_v1 = vsub.f32 %v10663_v35, %v10642_v50  ;;  %5645 = vmatprep.subr.bf16.mxu0 %v2360_v58  ;;  %v10665_v36 = vsub.f32 %v10633_v48, %v10615_v25  ;;  %v10667_v40 = vsub.f32 %v10666_v53, %v10644_v30  ;;  %5939 = vpow2.f32 %v8232_v17 }
 0x302   :  { %v1116_v23 = vmul.f32 %v1112_v38, %v10604_v56  ;;  %v1128_v16 = vmul.f32 %v1124_v44, %v10605_v61  ;;  %5646 = vmatpush3.bf16.msra.mxu0 %v2360_v58  ;;  %v1962_v20 = vmul.f32 1.442695, %v1957_v14  ;;  %v10669_v32 = vsub.f32 %v10668_v41, %v10642_v50 }
 0x303   :  { %v8320_v59 = vmul.f32 1.442695, %v10664_v1  ;;  %v1960_v19 = vmul.f32 1.442695, %v10665_v36  ;;  %v8335_v3 = vmul.f32 1.442695, %v10667_v40  ;;  %v10671_v43 = vsub.f32 %v10670_v21, %v10644_v30 }
 0x304   :  { %v8341_v60 = vmul.f32 1.442695, %v10669_v32  ;;  %v5922_v25 = vpop.eup %5921  ;;  %v1132_v48 = vadd.f32 %v1128_v16, %v1116_v23  ;;  %v1140_v44 = vmul.f32 %v1136_v37, %v10608_v24  ;;  %v1148_v35 = vmul.f32 %v5920_v27, %v8216_v62  ;;  %v10673_v23 = vld [vmem:[#allocation29_spill] sm:$0xff] }
 0x305   :  { %v8346_v38 = vmul.f32 1.442695, %v10671_v43  ;;  %5941 = vpow2.f32 %v1948_v5  ;;  %v8350_v17 = vpop.eup %5923  ;;  %v1113_v14 = vmul.f32 %v5922_v25, %v8167_v11  ;;  %v1125_v58 = vmul.f32 %v5922_v25, %v8192_v54  ;;  %5648 = vmatmul.mubr.msk.bf16.vlgmr.msra.gmra.mxu0 %vm590_vm1, %v8327_v6 }
 0x306   :  { %v1137_v1 = vmul.f32 %v5922_v25, %v8209_v55  ;;  %5943 = vpow2.f32 %v1950_v28  ;;  %v8355_v36 = vpop.eup %5925  ;;  %v1144_v53 = vadd.f32 %v1140_v44, %v1132_v48  ;;  %v1160_v40 = vmul.f32 %v5920_v27, %v10652_v13 }
 0x307   :  { %v1694_v62 = vadd.f32 %v8350_v17, %v1690_v9  ;;  %5945 = vpow2.f32 %v1960_v19  ;;  %v8361_v5 = vpop.eup %5927  ;;  %v1117_v11 = vmul.f32 %v1113_v14, %v10606_v0  ;;  %v1129_v54 = vmul.f32 %v1125_v58, %v10607_v18  ;;  %v10678_v14 = vld [vmem:[#allocation93_spill] sm:$0xff] }
 0x308   :  { %v1149_v55 = vmul.f32 %v5922_v25, %v8222_v8  ;;  %5947 = vpow2.f32 %v1962_v20  ;;  %v10672_v37 = vmov 0   ;;  %v8367_v28 = vpop.eup %5929  ;;  %v1152_v13 = vmul.f32 %v1148_v35, %v10610_v29  ;;  %v10675_v20 = vld [vmem:[#allocation100_spill] sm:$0xff] }
 0x309   :  { %2962 = vmatprep.mubr.bf16.mxu0 %v10672_v37  ;;  %v1695_v27 = vadd.f32 %v8355_v36, %v1691_v63  ;;  %v1698_v9 = vadd.f32 %v10673_v23, %v1694_v62  ;;  %v10674_v16 = vsub.f32 %v10643_v39, %v10642_v50  ;;  %v1133_v41 = vadd.f32 %v1129_v54, %v1117_v11  ;;  %v8382_v48 = vpop.eup %5931  ;;  %v10677_v63 = vld [vmem:[#allocation42_spill] sm:$0xff] }
 0x30a   :  { %v1141_v32 = vmul.f32 %v1137_v1, %v10609_v31  ;;  %v1161_v8 = vmul.f32 %v5922_v25, %v10658_v45  ;;  %v10676_v21 = vsub.f32 %v10675_v20, %v10644_v30  ;;  %v1156_v44 = vadd.f32 %v1152_v13, %v1144_v53  ;;  %v5934_v62 = vpop.eup %5933  ;;  %v10681_v13 = vld [vmem:[#allocation129_spill] sm:$0xff] }
 0x30b   :  { %v1652_v19 = vmul.f32 1.442695, %v10674_v16  ;;  %v1699_v35 = vadd.f32 %v10677_v63, %v1695_v27  ;;  %5949 = vrcp.f32 %v1698_v9  ;;  %v10679_v39 = vsub.f32 %v10678_v14, %v10642_v50  ;;  %v8392_v54 = vpop.eup %5935  ;;  %v10680_v16 = vld [vmem:[#allocation131_spill] sm:$0xff] }
 0x30c   :  { %v8380_v43 = vmul.f32 1.442695, %v10676_v21  ;;  %v1145_v11 = vadd.f32 %v1141_v32, %v1133_v41  ;;  %v1153_v1 = vmul.f32 %v1149_v55, %v10613_v12  ;;  %v1164_v45 = vmul.f32 %v1160_v40, %v10614_v57  ;;  %v5938_v40 = vpop.eup %5937  ;;  %v10682_v21 = vld [vmem:[#allocation61_spill] sm:$0xff] }
 0x30d   :  { %v1664_v58 = vmul.f32 1.442695, %v10679_v39  ;;  %v1980_v25 = vadd.f32 %v8382_v48, %v8361_v5  ;;  %v2002_v53 = vmul.f32 %v5934_v62, %v10680_v16  ;;  %v2014_v27 = vmul.f32 %v5934_v62, %v10681_v13  ;;  %v10683_v39 = vld [vmem:[#allocation36_spill] sm:$0xff] }
 0x30e   :  { %v2026_v9 = vmul.f32 %v5934_v62, %v8259_v2  ;;  %v2038_v50 = vmul.f32 %v5934_v62, %v8271_v15  ;;  %v1157_v20 = vadd.f32 %v1153_v1, %v1145_v11  ;;  %v1165_v41 = vmul.f32 %v1161_v8, %v10617_v49  ;;  %v8407_v8 = vpop.eup %5939  ;;  %v10687_v49 = vld [vmem:[#allocation47_spill] sm:$0xff] }
 0x30f   :  { %v2050_v55 = vmul.f32 %v5934_v62, %v10659_v51  ;;  %5951 = vrcp.f32 %v1699_v35  ;;  %v1168_v32 = vadd.f32 %v1164_v45, %v1156_v44  ;;  %v2006_v14 = vmul.f32 %v2002_v53, %v10682_v21  ;;  %v10684_v35 = vld [vmem:[#allocation86_spill] sm:$0xff] }
 0x310   :  { %v2018_v12 = vmul.f32 %v2014_v27, %v10683_v39  ;;  %v1981_v16 = vadd.f32 %v8392_v54, %v8367_v28  ;;  %v1169_v13 = vadd.f32 %v1165_v41, %v1157_v20  ;;  %v2003_v2 = vmul.f32 %v5938_v40, %v8230_v4  ;;  %v10685_v27 = vld [vmem:[#allocation124_spill] sm:$0xff] }
 0x311   :  { %v2015_v15 = vmul.f32 %v5938_v40, %v8254_v33  ;;  %v2027_v11 = vmul.f32 %v5938_v40, %v8265_v46  ;;  %v2030_v62 = vmul.f32 %v2026_v9, %v10684_v35  ;;  %v2039_v44 = vmul.f32 %v5938_v40, %v8275_v10  ;;  %v10686_v41 = vld [vmem:[#allocation48_spill] sm:$0xff] }
 0x312   :  { %v2022_v51 = vadd.f32 %v2018_v12, %v2006_v14  ;;  %v2051_v1 = vmul.f32 %v5938_v40, %v10661_v34  ;;  %v8412_v45 = vpop.eup %5941  ;;  %v2356_v53 = vpack.c.bf16 %v1169_v13, %v1168_v32  ;;  %v2007_v20 = vmul.f32 %v2003_v2, %v10685_v27  ;;  %v10688_v40 = vld [vmem:[#allocation49_spill] sm:$0xff]  ;;  %v10689_v2 = vld [vmem:[#allocation84_spill] sm:$0xff] }
 0x313   :  { %v2019_v4 = vmul.f32 %v2015_v15, %v10686_v41  ;;  %5953 = vpow2.f32 %v8320_v59  ;;  %v8417_v33 = vpop.eup %5943  ;;  %v2042_v12 = vmul.f32 %v2038_v50, %v10687_v49  ;;  %v1984_v9 = vadd.f32 %v8412_v45, %v1980_v25  ;;  %v10690_v25 = vld [vmem:[#allocation30_spill] sm:$0xff] }
 0x314   :  { %v2034_v46 = vadd.f32 %v2030_v62, %v2022_v51  ;;  %5955 = vpow2.f32 %v8335_v3  ;;  %v8422_v10 = vpop.eup %5945  ;;  %2421 = vmatpush1.bf16.msra.mxu1 %v2356_v53  ;;  %v2031_v32 = vmul.f32 %v2027_v11, %v10688_v40  ;;  %v1985_v14 = vadd.f32 %v8417_v33, %v1981_v16 }
 0x315   :  { %v2023_v34 = vadd.f32 %v2019_v4, %v2007_v20  ;;  %5957 = vpow2.f32 %v8341_v60  ;;  %v8427_v59 = vpop.eup %5947  ;;  %v2054_v15 = vmul.f32 %v2050_v55, %v10689_v2  ;;  %v1988_v50 = vadd.f32 %v8422_v10, %v1984_v9  ;;  %v8437_v60 = vld [vmem:[%s9903_s2 + $0x30] sm:$0xff]   ;;  %v10691_v55 = vld [vmem:[#allocation33_spill] sm:$0xff] }
 0x316   :  { %v2046_v13 = vadd.f32 %v2042_v12, %v2034_v46  ;;  %5959 = vpow2.f32 %v8346_v38  ;;  %v2043_v51 = vmul.f32 %v2039_v44, %v10690_v25  ;;  %v1989_v62 = vadd.f32 %v8427_v59, %v1985_v14  ;;  %v10692_v20 = vld [vmem:[#allocation59_spill] sm:$0xff]  ;;  %v10693_v14 = vld [vmem:[#allocation118_spill] sm:$0xff] }
 0x317   :  { %v2035_v3 = vadd.f32 %v2031_v32, %v2023_v34  ;;  %5961 = vpow2.f32 %v1652_v19  ;;  %5485 = vmatmul.mubr.msk.bf16.vlgmr.msra.gmra.mxu1 %vm590_vm1, %v8437_v60  ;;  %v1992_v16 = vadd.f32 %v10691_v55, %v1988_v50  ;;  %v2055_v44 = vmul.f32 %v2051_v1, %v10692_v20 }
 0x318   :  { %v2058_v11 = vadd.f32 %v2054_v15, %v2046_v13  ;;  %5963 = vpow2.f32 %v8380_v43  ;;  %v5950_v38 = vpop.eup %5949  ;;  %2448 = vmatprep.mubr.bf16.mxu1 %v10672_v37  ;;  %v1993_v43 = vadd.f32 %v8407_v8, %v1989_v62 }
 0x319   :  { %v2047_v53 = vadd.f32 %v2043_v51, %v2035_v3  ;;  %5965 = vpow2.f32 %v1664_v58  ;;  %v1706_v19 = vmul.f32 %v5950_v38, %v8280_v42  ;;  %v1718_v4 = vmul.f32 %v5950_v38, %v8288_v7  ;;  %v10695_v7 = vld [vmem:[#allocation132_spill] sm:$0xff] }
 0x31a   :  { %v1730_v46 = vmul.f32 %v5950_v38, %v8298_v26  ;;  %v1742_v12 = vmul.f32 %v5950_v38, %v8350_v17  ;;  %v1754_v34 = vmul.f32 %v5950_v38, %v10673_v23  ;;  %5967 = vrcp.f32 %v1992_v16 }
 0x31b   :  { %v2059_v9 = vadd.f32 %v2055_v44, %v2047_v53  ;;  %v10694_v58 = vsub.f32 %v10693_v14, %v10644_v30  ;;  %v1710_v13 = vmul.f32 %v1706_v19, %v10682_v21  ;;  %v1722_v42 = vmul.f32 %v1718_v4, %v10683_v39 }
 0x31c   :  { %v5952_v32 = vpop.eup %5951  ;;  %v10696_v26 = vsub.f32 %v10695_v7, %v10644_v30  ;;  %v1734_v62 = vmul.f32 %v1730_v46, %v10684_v35  ;;  %5969 = vrcp.f32 %v1993_v43 }
 0x31d   :  { %v1678_v1 = vmul.f32 1.442695, %v10694_v58  ;;  %v2364_v17 = vpack.c.bf16 %v2059_v9, %v2058_v11  ;;  %v1707_v50 = vmul.f32 %v5952_v32, %v8284_v47  ;;  %v1719_v23 = vmul.f32 %v5952_v32, %v8292_v22 }
 0x31e   :  { %v1666_v15 = vmul.f32 1.442695, %v10696_v26  ;;  %v1731_v3 = vmul.f32 %v5952_v32, %v8304_v52  ;;  %v1726_v51 = vadd.f32 %v1722_v42, %v1710_v13  ;;  %v1743_v16 = vmul.f32 %v5952_v32, %v8355_v36 }
 0x31f   :  { %v1755_v21 = vmul.f32 %v5952_v32, %v10677_v63  ;;  %2471 = vmatprep.subr.bf16.mxu1 %v2364_v17  ;;  %v1711_v39 = vmul.f32 %v1707_v50, %v10685_v27  ;;  %v1723_v30 = vmul.f32 %v1719_v23, %v10686_v41  ;;  %v1746_v22 = vmul.f32 %v1742_v12, %v10687_v49 }
 0x320   :  { %v8467_v11 = vpop.eup %5953  ;;  %v1738_v47 = vadd.f32 %v1734_v62, %v1726_v51  ;;  %5971 = vpow2.f32 %v1666_v15  ;;  %5486 = vmatmul.mubr.msk.bf16.gmra.mxu1 %vm590_vm1, %v8327_v6  ;;  %v1735_v63 = vmul.f32 %v1731_v3, %v10688_v40  ;;  %v1758_v41 = vmul.f32 %v1754_v34, %v10689_v2  ;;  %v10697_v15 = vld [vmem:[#allocation119_spill] sm:$0xff] }
 0x321   :  { %v8472_v52 = vpop.eup %5955  ;;  %v1727_v36 = vadd.f32 %v1723_v30, %v1711_v39  ;;  %2491 = vmatprep.mubr.bf16.mxu1 %v10672_v37  ;;  %5973 = vpow2.f32 %v1678_v1  ;;  %v1747_v49 = vmul.f32 %v1743_v16, %v10690_v25  ;;  %v1759_v9 = vmul.f32 %v1755_v21, %v10692_v20 }
 0x322   :  { %v5958_v35 = vpop.eup %5957  ;;  %v1750_v27 = vadd.f32 %v1746_v22, %v1738_v47 }
 0x323   :  { %v8477_v38 = vpop.eup %5959  ;;  %v1739_v53 = vadd.f32 %v1735_v63, %v1727_v36  ;;  %v1684_v44 = vadd.f32 %v5958_v35, %v8467_v11 }
 0x324   :  { %v5962_v19 = vpop.eup %5961  ;;  %v1762_v4 = vadd.f32 %v1758_v41, %v1750_v27  ;;  %v1685_v46 = vadd.f32 %v8477_v38, %v8472_v52  ;;  %v10698_v41 = vld [vmem:[#allocation50_spill] sm:$0xff] }
 0x325   :  { %v8483_v40 = vpop.eup %5963  ;;  %v1751_v12 = vadd.f32 %v1747_v49, %v1739_v53  ;;  %v1688_v43 = vadd.f32 %v5962_v19, %v1684_v44 }
 0x326   :  { %v5966_v32 = vpop.eup %5965  ;;  %v1689_v2 = vadd.f32 %v8483_v40, %v1685_v46 }
 0x327   :  { %v1763_v34 = vadd.f32 %v1759_v9, %v1751_v12  ;;  %v1692_v14 = vadd.f32 %v5966_v32, %v1688_v43  ;;  %v5968_v58 = vpop.eup %5967 }
 0x328   :  { %v2000_v1 = vmul.f32 %v5968_v58, %v8361_v5  ;;  %v2012_v13 = vmul.f32 %v5968_v58, %v8382_v48  ;;  %v2024_v42 = vmul.f32 %v5968_v58, %v8412_v45  ;;  %v2036_v7 = vmul.f32 %v5968_v58, %v8422_v10 }
 0x329   :  { %v2363_v25 = vpack.c.bf16 %v1763_v34, %v1762_v4  ;;  %v2048_v26 = vmul.f32 %v5968_v58, %v10691_v55  ;;  %v1696_v20 = vadd.f32 %v10697_v15, %v1692_v14  ;;  %v5970_v23 = vpop.eup %5969  ;;  %v10699_v4 = vld [vmem:[#allocation83_spill] sm:$0xff] }
 0x32a   :  { %v2004_v17 = vmul.f32 %v2000_v1, %v10604_v56  ;;  %v2016_v50 = vmul.f32 %v2012_v13, %v10605_v61  ;;  %v2028_v3 = vmul.f32 %v2024_v42, %v10608_v24  ;;  %v2001_v48 = vmul.f32 %v5970_v23, %v8367_v28 }
 0x32b   :  { %2472 = vmatpush1.bf16.msra.mxu1 %v2363_v25  ;;  %5975 = vrcp.f32 %v1696_v20  ;;  %v2013_v45 = vmul.f32 %v5970_v23, %v8392_v54  ;;  %v2025_v10 = vmul.f32 %v5970_v23, %v8417_v33  ;;  %v2040_v55 = vmul.f32 %v2036_v7, %v10610_v29 }
 0x32c   :  { %v2020_v51 = vadd.f32 %v2016_v50, %v2004_v17  ;;  %v2005_v21 = vmul.f32 %v2001_v48, %v10606_v0  ;;  %v2037_v47 = vmul.f32 %v5970_v23, %v8427_v59  ;;  %v2052_v22 = vmul.f32 %v2048_v26, %v10614_v57 }
 0x32d   :  { %v5972_v5 = vpop.eup %5971  ;;  %v2017_v39 = vmul.f32 %v2013_v45, %v10607_v18  ;;  %v2029_v54 = vmul.f32 %v2025_v10, %v10609_v31  ;;  %v2049_v33 = vmul.f32 %v5970_v23, %v8407_v8 }
 0x32e   :  { %v1693_v62 = vadd.f32 %v5972_v5, %v1689_v2  ;;  %v5974_v16 = vpop.eup %5973  ;;  %v2032_v30 = vadd.f32 %v2028_v3, %v2020_v51  ;;  %v2041_v53 = vmul.f32 %v2037_v47, %v10698_v41  ;;  %v10702_v47 = vld [vmem:[#allocation17_spill] sm:$0xff] }
 0x32f   :  { %v2021_v28 = vadd.f32 %v2017_v39, %v2005_v21  ;;  %v2053_v46 = vmul.f32 %v2049_v33, %v10699_v4  ;;  %v10701_v39 = vld [vmem:[#allocation22_spill] sm:$0xff] }
 0x330   :  { %v1697_v36 = vadd.f32 %v5974_v16, %v1693_v62  ;;  %v2044_v63 = vadd.f32 %v2040_v55, %v2032_v30 }
 0x331   :  { %v2033_v27 = vadd.f32 %v2029_v54, %v2021_v28  ;;  %v10703_v28 = vld [vmem:[#allocation20_spill] sm:$0xff] }
 0x332   :  { %5977 = vrcp.f32 %v1697_v36  ;;  %v2056_v49 = vadd.f32 %v2052_v22, %v2044_v63 }
 0x333   :  { %v2045_v44 = vadd.f32 %v2041_v53, %v2033_v27 }
 0x335   :  { %v2057_v12 = vadd.f32 %v2053_v46, %v2045_v44 }
 0x337   :  { %v2359_v59 = vpack.c.bf16 %v2057_v12, %v2056_v49 }
 0x338   :  { %v5976_v9 = vpop.eup %5975 }
 0x339   :  { %v1704_v43 = vmul.f32 %v5976_v9, %v8467_v11  ;;  %v1716_v2 = vmul.f32 %v5976_v9, %v5958_v35  ;;  %v1728_v34 = vmul.f32 %v5976_v9, %v5962_v19  ;;  %v1740_v14 = vmul.f32 %v5976_v9, %v5966_v32  ;;  %2473 = vmatprep.subr.bf16.mxu1 %v2359_v59 }
 0x33a   :  { %v1752_v58 = vmul.f32 %v5976_v9, %v10697_v15 }
 0x33b   :  { %v1708_v8 = vmul.f32 %v1704_v43, %v10604_v56  ;;  %v1720_v25 = vmul.f32 %v1716_v2, %v10605_v61  ;;  %v1732_v13 = vmul.f32 %v1728_v34, %v10608_v24  ;;  %v1744_v7 = vmul.f32 %v1740_v14, %v10610_v29 }
 0x33c   :  { %v1756_v17 = vmul.f32 %v1752_v58, %v10614_v57 }
 0x33d   :  { %v1724_v1 = vadd.f32 %v1720_v25, %v1708_v8  ;;  %v10704_v8 = vld [vmem:[#allocation8_spill] sm:$0xff] }
 0x33f   :  { %v5978_v42 = vpop.eup %5977  ;;  %v1736_v19 = vadd.f32 %v1732_v13, %v1724_v1 }
 0x340   :  { %v1705_v26 = vmul.f32 %v5978_v42, %v8472_v52  ;;  %v1717_v11 = vmul.f32 %v5978_v42, %v8477_v38  ;;  %v1729_v35 = vmul.f32 %v5978_v42, %v8483_v40  ;;  %v1741_v32 = vmul.f32 %v5978_v42, %v5972_v5 }
 0x341   :  { %v1753_v20 = vmul.f32 %v5978_v42, %v5974_v16  ;;  %v1748_v61 = vadd.f32 %v1744_v7, %v1736_v19  ;;  %v10705_v7 = vld [vmem:[#allocation7_spill] sm:$0xff]  ;;  %v10707_v19 = vld [vmem:[#allocation5_spill] sm:$0xff] }
 0x342   :  { %v1709_v15 = vmul.f32 %v1705_v26, %v10606_v0  ;;  %v1721_v56 = vmul.f32 %v1717_v11, %v10607_v18  ;;  %v1733_v50 = vmul.f32 %v1729_v35, %v10609_v31  ;;  %v1745_v52 = vmul.f32 %v1741_v32, %v10698_v41  ;;  %v8529_v0 = vpop.permute.xlu0 %2372  ;;  %v8531_v31 = vpop.permute.xlu1 %2377  ;;  %v10706_v11 = vld [vmem:[#allocation12_spill] sm:$0xff] }
 0x343   :  { %v1760_v29 = vadd.f32 %v1756_v17, %v1748_v61  ;;  %v1757_v40 = vmul.f32 %v1753_v20, %v10699_v4  ;;  %v10708_v61 = vld [vmem:[#allocation11_spill] sm:$0xff] }
 0x344   :  { %v1725_v24 = vadd.f32 %v1721_v56, %v1709_v15 }
 0x346   :  { %v1737_v23 = vadd.f32 %v1733_v50, %v1725_v24  ;;  %v8534_v51 = vpop.permute.xlu0 %2382  ;;  %v8538_v62 = vpop.permute.xlu1 %2387  ;;  %v10709_v50 = vld [vmem:[#allocation9_spill] sm:$0xff] }
 0x348   :  { %v1749_v38 = vadd.f32 %v1745_v52, %v1737_v23 }
 0x34a   :  { %v1761_v3 = vadd.f32 %v1757_v40, %v1749_v38 }
 0x34c   :  { %v2358_v5 = vpack.c.bf16 %v1761_v3, %v1760_v29 }
 0x34e   :  { %2474 = vmatpush1.bf16.msra.mxu1 %v2358_v5 }
 0x351   :  { %5487 = vmatmul.mubr.msk.bf16.vlgmr.msra.gmra.mxu1 %vm590_vm1, %v8437_v60 }
 0x352   :  { %2501 = vmatprep.mubr.bf16.mxu1 %v10672_v37 }
 0x359   :  { %5488 = vmatmul.mubr.msk.bf16.gmra.mxu1 %vm590_vm1, %v8327_v6  ;;  %v10700_v6 = vld [vmem:[#allocation19_spill] sm:$0xff] }
 0x35a   :  { %3035 = vmatprep.mubr.bf16.mxu1 %v10672_v37 }
 0x3c5   :  { %v5649_v18 = vpop.f32.mrf.mxu0 }
 0x3c6   :  { %v2555_v60 = vadd.f32 %v5649_v18, %v8534_v51  ;;  %v10710_v18 = vld [vmem:[#allocation6_spill] sm:$0xff] }
 0x3c7   :  { %v2546_v57 = vpop.f32.mrf.mxu0 }
 0x3c8   :  { %v2547_v45 = vadd.f32 %v2546_v57, %v8529_v0  ;;  %v2575_v22 = vadd.f32 %v2555_v60, %v10702_v47 }
 0x3c9   :  { %v5650_v48 = vpop.f32.mrf.mxu0 }
 0x3ca   :  { %v2565_v16 = vadd.f32 %v2547_v45, %v10700_v6  ;;  %v2558_v21 = vadd.f32 %v5650_v48, %v8538_v62 }
 0x3cb   :  { %v2549_v10 = vpop.f32.mrf.mxu0 }
 0x3cc   :  { %v2550_v55 = vadd.f32 %v2549_v10, %v8531_v31  ;;  %v2580_v54 = vadd.f32 %v2558_v21, %v10703_v28 }
 0x3ce   :  { %v2570_v30 = vadd.f32 %v2550_v55, %v10701_v39 }
 0x3d0   :  { %v2625_v36 = vadd.f32 %v2570_v30, %v2565_v16 }
 0x3d2   :  { %v2626_v63 = vadd.f32 %v2625_v36, %v2575_v22 }
 0x3d4   :  { %v2627_v33 = vadd.f32 %v2626_v63, %v2580_v54 }
 0x3d6   :  { %v2628_v41 = vrot.slane %v2627_v33, 4 }
 0x3d7   :  { %v2440_v27 = vpop.f32.mrf.mxu1 }
 0x3d8   :  { %v2629_v49 = vadd.f32 %v2628_v41, %v2627_v33  ;;  %v2441_v59 = vadd.f32 %v2440_v27, %v8529_v0 }
 0x3d9   :  { %v2442_v53 = vpop.f32.mrf.mxu1 }
 0x3da   :  { %v2630_v4 = vrot.slane %v2629_v49, 2  ;;  %v2443_v58 = vadd.f32 %v2442_v53, %v8529_v0  ;;  %v2561_v26 = vadd.f32 %v2441_v59, %v10705_v7 }
 0x3db   :  { %v2444_v44 = vpop.f32.mrf.mxu1 }
 0x3dc   :  { %v2445_v46 = vadd.f32 %v2444_v44, %v8531_v31  ;;  %v2631_v9 = vadd.f32 %v2630_v4, %v2629_v49  ;;  %v2562_v17 = vadd.f32 %v2443_v58, %v10708_v61 }
 0x3dd   :  { %v2446_v12 = vpop.f32.mrf.mxu1 }
 0x3de   :  { %v2447_v43 = vadd.f32 %v2446_v12, %v8531_v31  ;;  %v2632_v34 = vrot.slane %v2631_v9, 1  ;;  %v2566_v25 = vadd.f32 %v2445_v46, %v10704_v8 }
 0x3e0   :  { %v2450_v2 = vpop.f32.mrf.mxu1  ;;  %v2633_v13 = vadd.f32 %v2632_v34, %v2631_v9  ;;  %v2567_v35 = vadd.f32 %v2447_v43, %v10706_v11  ;;  %v2589_v24 = vadd.f32 %v2566_v25, %v2561_v26 }
 0x3e1   :  { %v2451_v14 = vadd.f32 %v2450_v2, %v8534_v51 }
 0x3e2   :  { %v2452_v1 = vpop.f32.mrf.mxu1  ;;  %v2639_v15 = vmul.f32 0.03125, %v2633_v13  ;;  %v2598_v3 = vadd.f32 %v2567_v35, %v2562_v17 }
 0x3e3   :  { %v2453_v42 = vadd.f32 %v2452_v1, %v8534_v51  ;;  %v2571_v32 = vadd.f32 %v2451_v14, %v10707_v19 }
 0x3e4   :  { %v2454_v20 = vpop.f32.mrf.mxu1  ;;  %v8558_v52 = vsub.f32 %v2565_v16, %v2639_v15  ;;  %v8560_v38 = vsub.f32 %v2570_v30, %v2639_v15  ;;  %v8562_v40 = vsub.f32 %v2575_v22, %v2639_v15  ;;  %v8566_v45 = vsub.f32 %v2580_v54, %v2639_v15  ;;  %v10711_v16 = vld [vmem:[#allocation10_spill] sm:$0xff] }
 0x3e5   :  { %v2455_v56 = vadd.f32 %v2454_v20, %v8538_v62  ;;  %v2572_v29 = vadd.f32 %v2453_v42, %v10709_v50  ;;  %v2590_v5 = vadd.f32 %v2589_v24, %v2571_v32 }
 0x3e6   :  { %v2456_v23 = vpop.f32.mrf.mxu1  ;;  %v2664_v10 = vmul.f32 %v8558_v52, %v8558_v52  ;;  %v2669_v60 = vmul.f32 %v8560_v38, %v8560_v38  ;;  %v2674_v39 = vmul.f32 %v8562_v40, %v8562_v40  ;;  %v2679_v36 = vmul.f32 %v8566_v45, %v8566_v45 }
 0x3e7   :  { %v2576_v57 = vadd.f32 %v2455_v56, %v10710_v18  ;;  %v2457_v48 = vadd.f32 %v2456_v23, %v8538_v62  ;;  %v2599_v55 = vadd.f32 %v2598_v3, %v2572_v29 }
 0x3e8   :  { %v2716_v30 = vadd.f32 %v2669_v60, %v2664_v10 }
 0x3e9   :  { %v2591_v6 = vadd.f32 %v2590_v5, %v2576_v57  ;;  %v2577_v21 = vadd.f32 %v2457_v48, %v10711_v16 }
 0x3ea   :  { %v2717_v28 = vadd.f32 %v2716_v30, %v2674_v39 }
 0x3eb   :  { %v2592_v47 = vrot.slane %v2591_v6, 4  ;;  %v2600_v22 = vadd.f32 %v2599_v55, %v2577_v21 }
 0x3ec   :  { %v2718_v33 = vadd.f32 %v2717_v28, %v2679_v36 }
 0x3ed   :  { %v2593_v54 = vadd.f32 %v2592_v47, %v2591_v6  ;;  %v2601_v63 = vrot.slane %v2600_v22, 4 }
 0x3ee   :  { %v2719_v53 = vrot.slane %v2718_v33, 4 }
 0x3ef   :  { %v2594_v27 = vrot.slane %v2593_v54, 2  ;;  %v2602_v41 = vadd.f32 %v2601_v63, %v2600_v22 }
 0x3f0   :  { %v2720_v4 = vadd.f32 %v2719_v53, %v2718_v33 }
 0x3f1   :  { %v2595_v49 = vadd.f32 %v2594_v27, %v2593_v54  ;;  %v2603_v44 = vrot.slane %v2602_v41, 2 }
 0x3f2   :  { %v2721_v43 = vrot.slane %v2720_v4, 2 }
 0x3f3   :  { %v2596_v46 = vrot.slane %v2595_v49, 1  ;;  %v2604_v12 = vadd.f32 %v2603_v44, %v2602_v41 }
 0x3f4   :  { %v2722_v1 = vadd.f32 %v2721_v43, %v2720_v4  ;;  %v8609_v4 = vpop.permute.xlu0 %2772 }
 0x3f5   :  { %v2597_v9 = vadd.f32 %v2596_v46, %v2595_v49  ;;  %v2605_v59 = vrot.slane %v2604_v12, 1  ;;  %v8611_v46 = vpop.permute.xlu1 %2777 }
 0x3f6   :  { %v2723_v15 = vrot.slane %v2722_v1, 1 }
 0x3f7   :  { %v2635_v2 = vmul.f32 0.03125, %v2597_v9  ;;  %v2606_v34 = vadd.f32 %v2605_v59, %v2604_v12 }
 0x3f8   :  { %v2724_v3 = vadd.f32 %v2723_v15, %v2722_v1  ;;  %v10712_v1 = vld [vmem:[#allocation23_spill] sm:$0xff] }
 0x3f9   :  { %v8577_v14 = vsub.f32 %v2561_v26, %v2635_v2  ;;  %v8579_v58 = vsub.f32 %v2566_v25, %v2635_v2  ;;  %v8581_v8 = vsub.f32 %v2571_v32, %v2635_v2  ;;  %v2636_v13 = vmul.f32 0.03125, %v2606_v34 }
 0x3fa   :  { %v8583_v42 = vsub.f32 %v2576_v57, %v2635_v2  ;;  %v2729_v60 = vmul.f32 0.03125, %v2724_v3 }
 0x3fb   :  { %v2660_v7 = vmul.f32 %v8577_v14, %v8577_v14  ;;  %v2665_v11 = vmul.f32 %v8579_v58, %v8579_v58  ;;  %v8589_v19 = vsub.f32 %v2562_v17, %v2636_v13  ;;  %v8591_v20 = vsub.f32 %v2567_v35, %v2636_v13 }
 0x3fc   :  { %v8593_v26 = vsub.f32 %v2572_v29, %v2636_v13  ;;  %v2670_v25 = vmul.f32 %v8581_v8, %v8581_v8  ;;  %v8597_v56 = vsub.f32 %v2577_v21, %v2636_v13  ;;  %v2675_v17 = vmul.f32 %v8583_v42, %v8583_v42 }
 0x3fd   :  { %v2680_v32 = vadd.f32 %v2665_v11, %v2660_v7  ;;  %v2661_v61 = vmul.f32 %v8589_v19, %v8589_v19  ;;  %v2666_v24 = vmul.f32 %v8591_v20, %v8591_v20  ;;  %v2734_v39 = vadd.f32 1e-05, %v2729_v60  ;;  %v10713_v11 = vld [vmem:[#allocation21_spill] sm:$0xff] }
 0x3fe   :  { %v2671_v50 = vmul.f32 %v8593_v26, %v8593_v26  ;;  %v2676_v5 = vmul.f32 %v8597_v56, %v8597_v56 }
 0x3ff   :  { %v2681_v35 = vadd.f32 %v2680_v32, %v2670_v25  ;;  %v2689_v29 = vadd.f32 %v2666_v24, %v2661_v61  ;;  %5979 = vrsqrt.f32 %v2734_v39  ;;  %v8624_v61 = vpop.permute.xlu0 %2812  ;;  %v8626_v24 = vpop.permute.xlu1 %2817 }
 0x401   :  { %v2682_v23 = vadd.f32 %v2681_v35, %v2675_v17  ;;  %v2690_v18 = vadd.f32 %v2689_v29, %v2671_v50  ;;  %v10714_v17 = vld [vmem:[#allocation24_spill] sm:$0xff]  ;;  %v10716_v29 = vld [vmem:[#allocation18_spill] sm:$0xff] }
 0x403   :  { %v2683_v57 = vrot.slane %v2682_v23, 4  ;;  %v2691_v48 = vadd.f32 %v2690_v18, %v2676_v5  ;;  %v10717_v18 = vld [vmem:[#allocation15_spill] sm:$0xff] }
 0x405   :  { %v2684_v10 = vadd.f32 %v2683_v57, %v2682_v23  ;;  %v2692_v55 = vrot.slane %v2691_v48, 4 }
 0x407   :  { %v2685_v6 = vrot.slane %v2684_v10, 2  ;;  %v2693_v16 = vadd.f32 %v2692_v55, %v2691_v48 }
 0x409   :  { %v2686_v21 = vadd.f32 %v2685_v6, %v2684_v10  ;;  %v2694_v30 = vrot.slane %v2693_v16, 2  ;;  %v10718_v6 = vld [vmem:[#allocation14_spill] sm:$0xff] }
 0x40b   :  { %v2687_v47 = vrot.slane %v2686_v21, 1  ;;  %v2695_v22 = vadd.f32 %v2694_v30, %v2693_v16 }
 0x40c   :  { %v5980_v15 = vpop.eup %5979 }
 0x40d   :  { %v2688_v36 = vadd.f32 %v2687_v47, %v2686_v21  ;;  %v2696_v28 = vrot.slane %v2695_v22, 1  ;;  %v2754_v55 = vmul.f32 %v5980_v15, %v8562_v40  ;;  %v2749_v30 = vmul.f32 %v5980_v15, %v8560_v38 }
 0x40f   :  { %v2725_v54 = vmul.f32 0.03125, %v2688_v36  ;;  %v2697_v63 = vadd.f32 %v2696_v28, %v2695_v22  ;;  %v2759_v22 = vmul.f32 %v5980_v15, %v8566_v45  ;;  %v8655_v36 = vpop.permute.xlu0 %2762  ;;  %v8657_v28 = vpop.permute.xlu1 %2767  ;;  %v2744_v45 = vmul.f32 %v5980_v15, %v8558_v52 }
 0x411   :  { %v2493_v33 = vpop.f32.mrf.mxu1  ;;  %v2730_v27 = vadd.f32 1e-05, %v2725_v54  ;;  %v2726_v41 = vmul.f32 0.03125, %v2697_v63  ;;  %v10719_v63 = vld [vmem:[#allocation16_spill] sm:$0xff]  ;;  %v2799_v15 = vmul.f32 %v8611_v46, %v2759_v22 }
 0x412   :  { %v2494_v59 = vadd.f32 %v2493_v33, %v8529_v0 }
 0x413   :  { %v2495_v53 = vpop.f32.mrf.mxu1  ;;  %5981 = vrsqrt.f32 %v2730_v27  ;;  %v2731_v49 = vadd.f32 1e-05, %v2726_v41  ;;  %v2794_v41 = vmul.f32 %v8609_v4, %v2754_v55  ;;  %v8722_v22 = vadd.f32 %v8626_v24, %v2799_v15 }
 0x414   :  { %v2496_v2 = vadd.f32 %v2495_v53, %v8529_v0  ;;  %v8629_v35 = vadd.f32 %v2494_v59, %v10714_v17 }
 0x415   :  { %v2497_v44 = vpop.f32.mrf.mxu1  ;;  %5983 = vrsqrt.f32 %v2731_v49 }
 0x416   :  { %v2498_v12 = vadd.f32 %v2497_v44, %v8531_v31  ;;  %v8636_v23 = vadd.f32 %v2496_v2, %v10716_v29 }
 0x417   :  { %v2499_v9 = vpop.f32.mrf.mxu1 }
 0x418   :  { %v2500_v43 = vadd.f32 %v2499_v9, %v8531_v31  ;;  %v8618_v13 = vadd.f32 %v2498_v12, %v10712_v1  ;;  %v10715_v31 = vld [vmem:[#allocation13_spill] sm:$0xff] }
 0x419   :  { %v2503_v34 = vpop.f32.mrf.mxu1 }
 0x41a   :  { %v2504_v7 = vadd.f32 %v2503_v34, %v8534_v51  ;;  %v8622_v25 = vadd.f32 %v2500_v43, %v10713_v11  ;;  %v2607_v5 = vadd.f32 %v8618_v13, %v8629_v35 }
 0x41b   :  { %v2505_v32 = vpop.f32.mrf.mxu1 }
 0x41c   :  { %v8632_v0 = vadd.f32 %v2504_v7, %v10715_v31  ;;  %v2506_v50 = vadd.f32 %v2505_v32, %v8534_v51  ;;  %v2616_v10 = vadd.f32 %v8622_v25, %v8636_v23  ;;  %v8686_v7 = vpop.permute.xlu0 %2802 }
 0x41d   :  { %v2507_v3 = vpop.f32.mrf.mxu1 }
 0x41e   :  { %v8641_v57 = vadd.f32 %v2506_v50, %v10717_v18  ;;  %v2508_v48 = vadd.f32 %v2507_v3, %v8538_v62  ;;  %v2608_v51 = vadd.f32 %v2607_v5, %v8632_v0 }
 0x41f   :  { %v2509_v60 = vpop.f32.mrf.mxu1 }
 0x420   :  { %v8649_v16 = vadd.f32 %v2508_v48, %v10718_v6  ;;  %v2510_v21 = vadd.f32 %v2509_v60, %v8538_v62  ;;  %v5982_v39 = vpop.eup %5981  ;;  %v2617_v47 = vadd.f32 %v2616_v10, %v8641_v57  ;;  %v2789_v60 = vmul.f32 %v8657_v28, %v2749_v30 }
 0x421   :  { %v2755_v40 = vmul.f32 %v5982_v39, %v8583_v42  ;;  %v2750_v62 = vmul.f32 %v5982_v39, %v8581_v8  ;;  %v2740_v27 = vmul.f32 %v5982_v39, %v8577_v14  ;;  %v2745_v38 = vmul.f32 %v5982_v39, %v8579_v58 }
 0x422   :  { %v2609_v54 = vadd.f32 %v2608_v51, %v8649_v16  ;;  %v8662_v33 = vadd.f32 %v2510_v21, %v10719_v63  ;;  %v5984_v53 = vpop.eup %5983  ;;  %v2784_v30 = vmul.f32 %v8655_v36, %v2744_v45 }
 0x423   :  { %v2795_v49 = vmul.f32 %v8611_v46, %v2755_v40  ;;  %v2790_v12 = vmul.f32 %v8609_v4, %v2750_v62  ;;  %v2756_v9 = vmul.f32 %v5984_v53, %v8597_v56  ;;  %v2751_v8 = vmul.f32 %v5984_v53, %v8593_v26 }
 0x424   :  { %v2610_v44 = vrot.slane %v2609_v54, 4  ;;  %v2618_v42 = vadd.f32 %v2617_v47, %v8662_v33  ;;  %v2741_v14 = vmul.f32 %v5984_v53, %v8589_v19  ;;  %v2746_v58 = vmul.f32 %v5984_v53, %v8591_v20  ;;  %v8688_v19 = vpop.permute.xlu1 %2807 }
 0x425   :  { %v8677_v52 = vadd.f32 %v8624_v61, %v2790_v12  ;;  %v8680_v2 = vadd.f32 %v8626_v24, %v2795_v49  ;;  %v2791_v34 = vmul.f32 %v8609_v4, %v2751_v8  ;;  %v2796_v1 = vmul.f32 %v8611_v46, %v2756_v9 }
 0x426   :  { %v2611_v59 = vadd.f32 %v2610_v44, %v2609_v54  ;;  %v2619_v43 = vrot.slane %v2618_v42, 4  ;;  %v2781_v56 = vmul.f32 %v8655_v36, %v2741_v14  ;;  %v2786_v26 = vmul.f32 %v8657_v28, %v2746_v58 }
 0x427   :  { %v2780_v32 = vmul.f32 %v8655_v36, %v2740_v27  ;;  %v8693_v17 = vadd.f32 %v8624_v61, %v2791_v34  ;;  %v8696_v31 = vadd.f32 %v8626_v24, %v2796_v1  ;;  %v2785_v18 = vmul.f32 %v8657_v28, %v2745_v38 }
 0x428   :  { %v2612_v20 = vrot.slane %v2611_v59, 2  ;;  %v2620_v11 = vadd.f32 %v2619_v43, %v2618_v42  ;;  %v8699_v50 = vadd.f32 %v8686_v7, %v2781_v56  ;;  %v8702_v29 = vadd.f32 %v8688_v19, %v2786_v26  ;;  %v8764_v26 = vld [vmem:[%s9903_s2 + $0x48] sm:$0xff]  }
 0x429   :  { %v2846_v48 = vpack.c.bf16 %v8696_v31, %v8693_v17  ;;  %v2845_v10 = vpack.c.bf16 %v8680_v2, %v8677_v52  ;;  %v8711_v6 = vadd.f32 %v8686_v7, %v2780_v32  ;;  %v8714_v21 = vadd.f32 %v8688_v19, %v2785_v18 }
 0x42a   :  { %v2613_v3 = vadd.f32 %v2612_v20, %v2611_v59  ;;  %v2621_v5 = vrot.slane %v2620_v11, 2  ;;  %v2841_v39 = vpack.c.bf16 %v8702_v29, %v8699_v50  ;;  %v8719_v47 = vadd.f32 %v8624_v61, %v2794_v41  ;;  %v8732_v41 = vld [vmem:[%s9903_s2 + $0x40] sm:$0xff]  }
 0x42b   :  { %2942 = vmatprep.subr.bf16.mxu0 %v2846_v48  ;;  %v2840_v27 = vpack.c.bf16 %v8714_v21, %v8711_v6  ;;  %v8735_v53 = vadd.f32 %v8686_v7, %v2784_v30  ;;  %v8738_v45 = vadd.f32 %v8688_v19, %v2789_v60 }
 0x42c   :  { %v2614_v55 = vrot.slane %v2613_v3, 1  ;;  %v2622_v51 = vadd.f32 %v2621_v5, %v2620_v11  ;;  %2943 = vmatpush1.bf16.msra.mxu0 %v2845_v10  ;;  %v2849_v38 = vpack.c.bf16 %v8722_v22, %v8719_v47  ;;  %v5721_v10 = vld [vmem:[%s9903_s2 + $0x50] sm:$0xff]  }
 0x42d   :  { %2944 = vmatprep.subr.bf16.mxu0 %v2841_v39 }
 0x42e   :  { %v2615_v40 = vadd.f32 %v2614_v55, %v2613_v3  ;;  %v2623_v54 = vrot.slane %v2622_v51, 1 }
 0x430   :  { %v2637_v63 = vmul.f32 0.03125, %v2615_v40  ;;  %v2624_v62 = vadd.f32 %v2623_v54, %v2622_v51  ;;  %2945 = vmatpush1.bf16.msra.mxu0 %v2840_v27 }
 0x431   :  { %5651 = vmatprep.subr.bf16.mxu0 %v2849_v38 }
 0x432   :  { %v8741_v49 = vsub.f32 %v8629_v35, %v2637_v63  ;;  %v8744_v44 = vsub.f32 %v8618_v13, %v2637_v63  ;;  %v2652_v42 = vsub.f32 %v8632_v0, %v2637_v63  ;;  %v2638_v12 = vmul.f32 0.03125, %v2624_v62  ;;  %v5722_v62 = vld [vmem:[%s9903_s2 + $0x58] sm:$0xff]  }
 0x433   :  { %v2657_v9 = vsub.f32 %v8649_v16, %v2637_v63  ;;  %5495 = vmatmul.mubr.msk.bf16.vlgmr.msra.gmra.mxu0 %vm590_vm1, %v8732_v41  ;;  %v2844_v0 = vpack.c.bf16 %v8738_v45, %v8735_v53 }
 0x434   :  { %v2662_v8 = vmul.f32 %v8741_v49, %v8741_v49  ;;  %v2667_v14 = vmul.f32 %v8744_v44, %v8744_v44  ;;  %v2643_v58 = vsub.f32 %v8636_v23, %v2638_v12  ;;  %v2648_v35 = vsub.f32 %v8622_v25, %v2638_v12  ;;  %5652 = vmatpush3.bf16.msra.mxu0 %v2849_v38 }
 0x435   :  { %v2653_v13 = vsub.f32 %v8641_v57, %v2638_v12  ;;  %v2672_v59 = vmul.f32 %v2652_v42, %v2652_v42  ;;  %2972 = vmatprep.mubr.bf16.mxu0 %v10672_v37  ;;  %v2658_v43 = vsub.f32 %v8662_v33, %v2638_v12  ;;  %5653 = vmatprep.subr.bf16.mxu0 %v2844_v0 }
 0x436   :  { %v2698_v16 = vadd.f32 %v2667_v14, %v2662_v8  ;;  %v2663_v34 = vmul.f32 %v2643_v58, %v2643_v58  ;;  %v2668_v1 = vmul.f32 %v2648_v35, %v2648_v35  ;;  %v2677_v23 = vmul.f32 %v2657_v9, %v2657_v9 }
 0x437   :  { %v2673_v56 = vmul.f32 %v2653_v13, %v2653_v13  ;;  %v2678_v11 = vmul.f32 %v2658_v43, %v2658_v43 }
 0x438   :  { %v2699_v25 = vadd.f32 %v2698_v16, %v2672_v59  ;;  %v2707_v57 = vadd.f32 %v2668_v1, %v2663_v34  ;;  %5654 = vmatpush3.bf16.msra.mxu0 %v2844_v0 }
 0x43a   :  { %v2700_v20 = vadd.f32 %v2699_v25, %v2677_v23  ;;  %v2708_v32 = vadd.f32 %v2707_v57, %v2673_v56 }
 0x43b   :  { %5496 = vmatmul.mubr.msk.bf16.gmra.mxu0 %vm590_vm1, %v8764_v26 }
 0x43c   :  { %v2701_v15 = vrot.slane %v2700_v20, 4  ;;  %v2709_v3 = vadd.f32 %v2708_v32, %v2678_v11  ;;  %2982 = vmatprep.mubr.bf16.mxu0 %v10672_v37 }
 0x43e   :  { %v2702_v33 = vadd.f32 %v2701_v15, %v2700_v20  ;;  %v2710_v5 = vrot.slane %v2709_v3, 4 }
 0x440   :  { %v2703_v18 = vrot.slane %v2702_v33, 2  ;;  %v2711_v48 = vadd.f32 %v2710_v5, %v2709_v3 }
 0x442   :  { %v2704_v60 = vadd.f32 %v2703_v18, %v2702_v33  ;;  %v2712_v55 = vrot.slane %v2711_v48, 2 }
 0x443   :  { %5497 = vmatmul.mubr.msk.bf16.gmra.mxu0 %vm590_vm1, %v5721_v10 }
 0x444   :  { %v2705_v51 = vrot.slane %v2704_v60, 1  ;;  %v2713_v39 = vadd.f32 %v2712_v55, %v2711_v48  ;;  %2992 = vmatprep.mubr.bf16.mxu0 %v10672_v37  ;;  %v8839_v55 = vpop.permute.xlu1 %2895 }
 0x446   :  { %v2706_v30 = vadd.f32 %v2705_v51, %v2704_v60  ;;  %v2714_v40 = vrot.slane %v2713_v39, 1 }
 0x448   :  { %v2727_v54 = vmul.f32 0.03125, %v2706_v30  ;;  %v2715_v63 = vadd.f32 %v2714_v40, %v2713_v39  ;;  %v8843_v40 = vpop.permute.xlu1 %2885 }
 0x44a   :  { %v2732_v27 = vadd.f32 1e-05, %v2727_v54  ;;  %v2728_v38 = vmul.f32 0.03125, %v2715_v63 }
 0x44b   :  { %5498 = vmatmul.mubr.msk.bf16.gmra.mxu0 %vm590_vm1, %v5722_v62 }
 0x44c   :  { %5985 = vrsqrt.f32 %v2732_v27  ;;  %v2733_v12 = vadd.f32 1e-05, %v2728_v38  ;;  %5655 = vmatprep.mubr.msk.bf16.mxu0 %vm590_vm1, %v8732_v41 }
 0x44e   :  { %5987 = vrsqrt.f32 %v2733_v12 }
 0x453   :  { %5656 = vmatmul.mubr.msk.bf16.vlgmr.msra.gmra.mxu0 %vm590_vm1, %v8764_v26 }
 0x454   :  { %5659 = vmatprep.mubr.msk.bf16.mxu0 %vm590_vm1, %v5721_v10 }
 0x459   :  { %v5986_v8 = vpop.eup %5985 }
 0x45a   :  { %v2757_v14 = vmul.f32 %v5986_v8, %v2657_v9  ;;  %v2752_v0 = vmul.f32 %v5986_v8, %v2652_v42  ;;  %v2742_v1 = vmul.f32 %v5986_v8, %v8741_v49  ;;  %v2747_v23 = vmul.f32 %v5986_v8, %v8744_v44 }
 0x45b   :  { %v5988_v59 = vpop.eup %5987  ;;  %5660 = vmatmul.mubr.msk.bf16.gmra.mxu0 %vm590_vm1, %v5722_v62 }
 0x45c   :  { %v2797_v16 = vmul.f32 %v8611_v46, %v2757_v14  ;;  %v2792_v34 = vmul.f32 %v8609_v4, %v2752_v0  ;;  %v2758_v25 = vmul.f32 %v5988_v59, %v2658_v43  ;;  %v2753_v56 = vmul.f32 %v5988_v59, %v2653_v13  ;;  %3327 = vmatprep.mubr.bf16.mxu0 %v10672_v37  ;;  %v8850_v14 = vpop.permute.xlu1 %2875 }
 0x45d   :  { %v2743_v57 = vmul.f32 %v5988_v59, %v2643_v58  ;;  %v2748_v20 = vmul.f32 %v5988_v59, %v2648_v35  ;;  %v2782_v58 = vmul.f32 %v8655_v36, %v2742_v1  ;;  %v2787_v35 = vmul.f32 %v8657_v28, %v2747_v23 }
 0x45e   :  { %v2793_v9 = vmul.f32 %v8609_v4, %v2753_v56  ;;  %v2798_v42 = vmul.f32 %v8611_v46, %v2758_v25  ;;  %v8794_v49 = vadd.f32 %v8624_v61, %v2792_v34  ;;  %v8797_v44 = vadd.f32 %v8626_v24, %v2797_v16 }
 0x45f   :  { %v2783_v11 = vmul.f32 %v8655_v36, %v2743_v57  ;;  %v2788_v32 = vmul.f32 %v8657_v28, %v2748_v20  ;;  %v8818_v28 = vadd.f32 %v8686_v7, %v2782_v58 }
 0x460   :  { %v8802_v13 = vadd.f32 %v8624_v61, %v2793_v9  ;;  %v8805_v4 = vadd.f32 %v8626_v24, %v2798_v42  ;;  %v2847_v36 = vpack.c.bf16 %v8797_v44, %v8794_v49  ;;  %v8821_v61 = vadd.f32 %v8688_v19, %v2787_v35 }
 0x461   :  { %v8808_v46 = vadd.f32 %v8686_v7, %v2783_v11  ;;  %v8811_v43 = vadd.f32 %v8688_v19, %v2788_v32 }
 0x462   :  { %v2848_v15 = vpack.c.bf16 %v8805_v4, %v8802_v13  ;;  %v2842_v3 = vpack.c.bf16 %v8821_v61, %v8818_v28 }
 0x463   :  { %v2843_v24 = vpack.c.bf16 %v8811_v43, %v8808_v46 }
 0x464   :  { %3015 = vmatprep.subr.bf16.mxu1 %v2848_v15 }
 0x465   :  { %3016 = vmatpush1.bf16.msra.mxu1 %v2847_v36 }
 0x466   :  { %3017 = vmatprep.subr.bf16.mxu1 %v2843_v24  ;;  %v8863_v24 = vpop.permute.xlu1 %2865 }
 0x469   :  { %3018 = vmatpush1.bf16.msra.mxu1 %v2842_v3 }
 0x46c   :  { %5499 = vmatmul.mubr.msk.bf16.vlgmr.msra.gmra.mxu1 %vm590_vm1, %v8732_v41 }
 0x46d   :  { %3045 = vmatprep.mubr.bf16.mxu1 %v10672_v37 }
 0x474   :  { %5500 = vmatmul.mubr.msk.bf16.gmra.mxu1 %vm590_vm1, %v8764_v26 }
 0x475   :  { %3055 = vmatprep.mubr.bf16.mxu1 %v10672_v37 }
 0x47c   :  { %5501 = vmatmul.mubr.msk.bf16.gmra.mxu1 %vm590_vm1, %v5721_v10  ;;  %v8841_v10 = vpop.permute.xlu0 %2890 }
 0x47d   :  { %3065 = vmatprep.mubr.bf16.mxu1 %v10672_v37 }
 0x480   :  { %v8845_v63 = vpop.permute.xlu0 %2880 }
 0x484   :  { %5502 = vmatmul.mubr.msk.bf16.gmra.mxu1 %vm590_vm1, %v5722_v62  ;;  %v8855_v1 = vpop.permute.xlu0 %2870 }
 0x485   :  { %3274 = vmatprep.mubr.bf16.mxu1 %v10672_v37 }
 0x4f3   :  { %v8837_v7 = vpop.f32.mrf.mxu0 }
 0x4f5   :  { %v2966_v19 = vpop.f32.mrf.mxu0 }
 0x4f7   :  { %v2968_v33 = vpop.f32.mrf.mxu0 }
 0x4f9   :  { %v2970_v41 = vpop.f32.mrf.mxu0 }
 0x4fb   :  { %v2974_v5 = vpop.f32.mrf.mxu0 }
 0x4fd   :  { %v2976_v18 = vpop.f32.mrf.mxu0 }
 0x4fe   :  { %v2977_v35 = vadd.f32 %v2976_v18, %v8855_v1 }
 0x4ff   :  { %v2978_v48 = vpop.f32.mrf.mxu0 }
 0x500   :  { %v2979_v3 = vadd.f32 %v2978_v48, %v8850_v14  ;;  %v2969_v48 = vadd.f32 %v2968_v33, %v8863_v24 }
 0x501   :  { %v2980_v60 = vpop.f32.mrf.mxu0 }
 0x502   :  { %v2981_v57 = vadd.f32 %v2980_v60, %v8850_v14  ;;  %v2971_v60 = vadd.f32 %v2970_v41, %v8863_v24 }
 0x503   :  { %v2984_v26 = vpop.f32.mrf.mxu0 }
 0x504   :  { %v2985_v11 = vadd.f32 %v2984_v26, %v8845_v63  ;;  %v8867_v26 = vpop.permute.xlu0 %2860  ;;  %v3147_v41 = vmax.f32 %v2971_v60, 0.0 }
 0x505   :  { %v2986_v51 = vpop.f32.mrf.mxu0 }
 0x506   :  { %v2987_v16 = vadd.f32 %v2986_v51, %v8845_v63 }
 0x507   :  { %v2988_v39 = vpop.f32.mrf.mxu0 }
 0x508   :  { %v2989_v23 = vadd.f32 %v2988_v39, %v8843_v40  ;;  %v3162_v15 = vmax.f32 %v2987_v16, 0.0 }
 0x509   :  { %v2990_v30 = vpop.f32.mrf.mxu0 }
 0x50a   :  { %v2991_v38 = vadd.f32 %v2990_v30, %v8843_v40  ;;  %v3166_v51 = vmax.f32 %v2989_v23, 0.0  ;;  %v2965_v23 = vadd.f32 %v8837_v7, %v8867_v26 }
 0x50b   :  { %v2994_v54 = vpop.f32.mrf.mxu0 }
 0x50c   :  { %v2995_v0 = vadd.f32 %v2994_v54, %v8841_v10  ;;  %v3167_v20 = vmax.f32 %v2991_v38, 0.0  ;;  %v3157_v54 = vmax.f32 %v2981_v57, 0.0  ;;  %v3161_v38 = vmax.f32 %v2985_v11, 0.0 }
 0x50d   :  { %v2996_v62 = vpop.f32.mrf.mxu0 }
 0x50e   :  { %v2997_v12 = vadd.f32 %v2996_v62, %v8841_v10  ;;  %v3171_v32 = vmax.f32 %v2995_v0, 0.0  ;;  %v3192_v62 = vpack.c.bf16 %v3167_v20, %v3162_v15  ;;  %v3156_v0 = vmax.f32 %v2979_v3, 0.0 }
 0x50f   :  { %v2998_v27 = vpop.f32.mrf.mxu0 }
 0x510   :  { %v2999_v8 = vadd.f32 %v2998_v27, %v8839_v55  ;;  %v3172_v9 = vmax.f32 %v2997_v12, 0.0  ;;  %v2975_v27 = vadd.f32 %v2974_v5, %v8855_v1  ;;  %v2967_v12 = vadd.f32 %v2966_v19, %v8867_v26 }
 0x511   :  { %v3000_v59 = vpop.f32.mrf.mxu0  ;;  %v3146_v19 = vmax.f32 %v2969_v48, 0.0 }
 0x512   :  { %v3001_v34 = vadd.f32 %v3000_v59, %v8839_v55  ;;  %v3176_v25 = vmax.f32 %v2999_v8, 0.0  ;;  %v3152_v8 = vmax.f32 %v2977_v35, 0.0  ;;  %v3191_v59 = vpack.c.bf16 %v3166_v51, %v3161_v38 }
 0x513   :  { %v5657_v56 = vpop.f32.mrf.mxu0  ;;  %v3142_v5 = vmax.f32 %v2967_v12, 0.0 }
 0x514   :  { %v3177_v42 = vmax.f32 %v3001_v34, 0.0  ;;  %v3196_v39 = vpack.c.bf16 %v3176_v25, %v3171_v32  ;;  %v3187_v34 = vpack.c.bf16 %v3157_v54, %v3152_v8  ;;  %v3151_v25 = vmax.f32 %v2975_v27, 0.0 }
 0x515   :  { %v8860_v58 = vpop.f32.mrf.mxu0  ;;  %v3182_v11 = vpack.c.bf16 %v3147_v41, %v3142_v5  ;;  %v3141_v32 = vmax.f32 %v2965_v23, 0.0  ;;  %v3119_v27 = vadd.f32 %v5657_v56, %v8855_v1 }
 0x516   :  { %v3197_v36 = vpack.c.bf16 %v3177_v42, %v3172_v9  ;;  %v3186_v9 = vpack.c.bf16 %v3156_v0, %v3151_v25  ;;  %v3111_v0 = vadd.f32 %v8860_v58, %v8867_v26 }
 0x517   :  { %v5658_v30 = vpop.f32.mrf.mxu0  ;;  %v3181_v51 = vpack.c.bf16 %v3146_v19, %v3141_v32 }
 0x518   :  { %3250 = vmatprep.subr.bf16.mxu1 %v3197_v36 }
 0x519   :  { %v3113_v18 = vpop.f32.mrf.mxu0  ;;  %3251 = vmatpush1.bf16.msra.mxu1 %v3196_v39  ;;  %v3122_v39 = vadd.f32 %v5658_v30, %v8850_v14  ;;  %v3155_v30 = vmax.f32 %v3119_v27, 0.0 }
 0x51a   :  { %3252 = vmatprep.subr.bf16.mxu1 %v3192_v62  ;;  %v8882_v62 = vld [vmem:[%s9904_s3] sm:$0xff]   ;;  %v3114_v8 = vadd.f32 %v3113_v18, %v8863_v24  ;;  %v8896_v18 = vld [vmem:[%s9904_s3 + $0x8] sm:$0xff]  }
 0x51b   :  { %v5661_v16 = vpop.f32.mrf.mxu0  ;;  %v3160_v12 = vmax.f32 %v3122_v39, 0.0 }
 0x51c   :  { %v3135_v20 = vadd.f32 %v5661_v16, %v8841_v10  ;;  %v3150_v16 = vmax.f32 %v3114_v8, 0.0 }
 0x51d   :  { %v3126_v57 = vpop.f32.mrf.mxu0  ;;  %3253 = vmatpush1.bf16.msra.mxu1 %v3191_v59  ;;  %v3190_v56 = vpack.c.bf16 %v3160_v12, %v3155_v30 }
 0x51e   :  { %3254 = vmatprep.subr.bf16.mxu1 %v3187_v34  ;;  %v3175_v15 = vmax.f32 %v3135_v20, 0.0  ;;  %v3127_v36 = vadd.f32 %v3126_v57, %v8845_v63  ;;  %v3145_v34 = vmax.f32 %v3111_v0, 0.0 }
 0x51f   :  { %v5662_v42 = vpop.f32.mrf.mxu0 }
 0x520   :  { %v3138_v33 = vadd.f32 %v5662_v42, %v8839_v55  ;;  %v3165_v38 = vmax.f32 %v3127_v36, 0.0  ;;  %v3185_v25 = vpack.c.bf16 %v3150_v16, %v3145_v34 }
 0x521   :  { %v3129_v35 = vpop.f32.mrf.mxu0  ;;  %3255 = vmatpush1.bf16.msra.mxu1 %v3186_v9 }
 0x522   :  { %v3180_v7 = vmax.f32 %v3138_v33, 0.0  ;;  %v3130_v3 = vadd.f32 %v3129_v35, %v8843_v40  ;;  %3256 = vmatprep.subr.bf16.mxu1 %v3182_v11 }
 0x524   :  { %v3200_v60 = vpack.c.bf16 %v3180_v7, %v3175_v15  ;;  %v3170_v54 = vmax.f32 %v3130_v3, 0.0 }
 0x525   :  { %3257 = vmatpush1.bf16.msra.mxu1 %v3181_v51 }
 0x526   :  { %5663 = vmatprep.subr.bf16.mxu1 %v3200_v60  ;;  %v3195_v48 = vpack.c.bf16 %v3170_v54, %v3165_v38 }
 0x528   :  { %5509 = vmatmul.mubr.msk.bf16.vlgmr.msra.gmra.mxu1 %vm3235_vm2, %v8882_v62 }
 0x529   :  { %5664 = vmatpush3.bf16.msra.mxu1 %v3200_v60  ;;  %3284 = vmatprep.mubr.bf16.mxu1 %v10672_v37 }
 0x52a   :  { %5665 = vmatprep.subr.bf16.mxu1 %v3195_v48 }
 0x52c   :  { %v8891_v59 = vpop.f32.mrf.mxu1 }
 0x52d   :  { %5666 = vmatpush3.bf16.msra.mxu1 %v3195_v48 }
 0x52e   :  { %v3039_v41 = vpop.f32.mrf.mxu1  ;;  %5667 = vmatprep.subr.bf16.mxu1 %v3190_v56 }
 0x530   :  { %v3041_v23 = vpop.f32.mrf.mxu1  ;;  %5510 = vmatmul.mubr.msk.bf16.gmra.mxu1 %vm3235_vm2, %v8896_v18 }
 0x531   :  { %5668 = vmatpush3.bf16.msra.mxu1 %v3190_v56  ;;  %5671 = vmatprep.mubr.msk.bf16.mxu1 %vm3235_vm2, %v8882_v62 }
 0x532   :  { %v3043_v58 = vpop.f32.mrf.mxu1  ;;  %5669 = vmatprep.subr.bf16.mxu1 %v3185_v25 }
 0x534   :  { %v3047_v57 = vpop.f32.mrf.mxu1 }
 0x535   :  { %5670 = vmatpush3.bf16.msra.mxu1 %v3185_v25 }
 0x536   :  { %v3049_v5 = vpop.f32.mrf.mxu1 }
 0x537   :  { %v3050_v16 = vadd.f32 %v3049_v5, %v8855_v1  ;;  %v3042_v5 = vadd.f32 %v3041_v23, %v8863_v24  ;;  %v8930_v23 = vpop.permute.xlu1 %3212 }
 0x538   :  { %v3051_v20 = vpop.f32.mrf.mxu1  ;;  %5672 = vmatmul.mubr.msk.bf16.vlgmr.msra.gmra.mxu1 %vm3235_vm2, %v8896_v18 }
 0x539   :  { %3865 = vmatprep.mubr.bf16.mxu1 %v10672_v37  ;;  %v3052_v25 = vadd.f32 %v3051_v20, %v8850_v14 }
 0x53a   :  { %v3053_v19 = vpop.f32.mrf.mxu1 }
 0x53b   :  { %v3054_v12 = vadd.f32 %v3053_v19, %v8850_v14  ;;  %v3048_v19 = vadd.f32 %v3047_v57, %v8855_v1  ;;  %v3148_v1 = vmax.f32 %v3042_v5, 0.0 }
 0x53c   :  { %v3057_v9 = vpop.f32.mrf.mxu1 }
 0x53d   :  { %v3058_v0 = vadd.f32 %v3057_v9, %v8845_v63  ;;  %v3154_v9 = vmax.f32 %v3050_v16, 0.0 }
 0x53e   :  { %v3059_v42 = vpop.f32.mrf.mxu1 }
 0x53f   :  { %v3060_v60 = vadd.f32 %v3059_v42, %v8845_v63  ;;  %v3040_v63 = vadd.f32 %v3039_v41, %v8867_v26 }
 0x540   :  { %v3061_v11 = vpop.f32.mrf.mxu1 }
 0x541   :  { %v3062_v27 = vadd.f32 %v3061_v11, %v8843_v40  ;;  %v3164_v34 = vmax.f32 %v3060_v60, 0.0 }
 0x542   :  { %v3063_v33 = vpop.f32.mrf.mxu1 }
 0x543   :  { %v3064_v36 = vadd.f32 %v3063_v33, %v8843_v40  ;;  %v3168_v42 = vmax.f32 %v3062_v27, 0.0  ;;  %v3159_v40 = vmax.f32 %v3054_v12, 0.0 }
 0x544   :  { %v3067_v32 = vpop.f32.mrf.mxu1 }
 0x545   :  { %v3068_v51 = vadd.f32 %v3067_v32, %v8841_v10  ;;  %v3169_v8 = vmax.f32 %v3064_v36, 0.0  ;;  %v3163_v32 = vmax.f32 %v3058_v0, 0.0  ;;  %v3189_v20 = vpack.c.bf16 %v3159_v40, %v3154_v9 }
 0x546   :  { %v3069_v35 = vpop.f32.mrf.mxu1  ;;  %v3153_v36 = vmax.f32 %v3048_v19, 0.0 }
 0x547   :  { %v3070_v7 = vadd.f32 %v3069_v35, %v8841_v10  ;;  %v3173_v56 = vmax.f32 %v3068_v51, 0.0  ;;  %v3194_v11 = vpack.c.bf16 %v3169_v8, %v3164_v34  ;;  %v3158_v35 = vmax.f32 %v3052_v25, 0.0 }
 0x548   :  { %v3071_v15 = vpop.f32.mrf.mxu1 }
 0x549   :  { %v3072_v3 = vadd.f32 %v3071_v15, %v8839_v55  ;;  %v3174_v48 = vmax.f32 %v3070_v7, 0.0  ;;  %v3193_v15 = vpack.c.bf16 %v3168_v42, %v3163_v32  ;;  %v3144_v7 = vmax.f32 %v3040_v63, 0.0 }
 0x54a   :  { %v3073_v39 = vpop.f32.mrf.mxu1  ;;  %v3188_v57 = vpack.c.bf16 %v3158_v35, %v3153_v36 }
 0x54b   :  { %v3074_v54 = vadd.f32 %v3073_v39, %v8839_v55  ;;  %v3178_v38 = vmax.f32 %v3072_v3, 0.0  ;;  %v3044_v55 = vadd.f32 %v3043_v58, %v8863_v24  ;;  %v3038_v58 = vadd.f32 %v8891_v59, %v8867_v26  ;;  %v8928_v26 = vpop.permute.xlu0 %3207 }
 0x54d   :  { %v3179_v30 = vmax.f32 %v3074_v54, 0.0  ;;  %v3198_v33 = vpack.c.bf16 %v3178_v38, %v3173_v56  ;;  %v3149_v14 = vmax.f32 %v3044_v55, 0.0  ;;  %v3143_v51 = vmax.f32 %v3038_v58, 0.0 }
 0x54f   :  { %v3199_v10 = vpack.c.bf16 %v3179_v30, %v3174_v48  ;;  %v3184_v3 = vpack.c.bf16 %v3149_v14, %v3144_v7  ;;  %v3183_v41 = vpack.c.bf16 %v3148_v1, %v3143_v51  ;;  %v8935_v38 = vpop.permute.xlu0 %3217 }
 0x551   :  { %3303 = vmatprep.subr.bf16.mxu0 %v3199_v10  ;;  %v8944_v10 = vpop.permute.xlu1 %3222 }
 0x552   :  { %3304 = vmatpush1.bf16.msra.mxu0 %v3198_v33 }
 0x553   :  { %3305 = vmatprep.subr.bf16.mxu0 %v3194_v11 }
 0x556   :  { %3306 = vmatpush1.bf16.msra.mxu0 %v3193_v15 }
 0x557   :  { %3307 = vmatprep.subr.bf16.mxu0 %v3189_v20 }
 0x55a   :  { %3308 = vmatpush1.bf16.msra.mxu0 %v3188_v57 }
 0x55b   :  { %3309 = vmatprep.subr.bf16.mxu0 %v3184_v3 }
 0x55e   :  { %3310 = vmatpush1.bf16.msra.mxu0 %v3183_v41 }
 0x561   :  { %5511 = vmatmul.mubr.msk.bf16.vlgmr.msra.gmra.mxu0 %vm3235_vm2, %v8882_v62 }
 0x562   :  { %3337 = vmatprep.mubr.bf16.mxu0 %v10672_v37 }
 0x569   :  { %5512 = vmatmul.mubr.msk.bf16.gmra.mxu0 %vm3235_vm2, %v8896_v18 }
 0x56a   :  { %3958 = vmatprep.mubr.bf16.mxu0 %v10672_v37 }
 0x5e8   :  { %v3276_v24 = vpop.f32.mrf.mxu1 }
 0x5e9   :  { %v3277_v27 = vadd.f32 %v3276_v24, %v8928_v26 }
 0x5ea   :  { %v3278_v59 = vpop.f32.mrf.mxu1 }
 0x5eb   :  { %v3279_v18 = vadd.f32 %v3278_v59, %v8928_v26  ;;  %v3397_v0 = vadd.f32 %v3277_v27, %v8711_v6 }
 0x5ec   :  { %v3280_v39 = vpop.f32.mrf.mxu1 }
 0x5ed   :  { %v3281_v60 = vadd.f32 %v3280_v39, %v8930_v23  ;;  %v3398_v42 = vadd.f32 %v3279_v18, %v8699_v50 }
 0x5ee   :  { %v3282_v54 = vpop.f32.mrf.mxu1 }
 0x5ef   :  { %v3283_v62 = vadd.f32 %v3282_v54, %v8930_v23  ;;  %v3402_v8 = vadd.f32 %v3281_v60, %v8714_v21 }
 0x5f0   :  { %v3286_v12 = vpop.f32.mrf.mxu1 }
 0x5f1   :  { %v3287_v48 = vadd.f32 %v3286_v12, %v8935_v38  ;;  %v3403_v56 = vadd.f32 %v3283_v62, %v8702_v29  ;;  %v3425_v33 = vadd.f32 %v3402_v8, %v3397_v0 }
 0x5f2   :  { %v3288_v30 = vpop.f32.mrf.mxu1 }
 0x5f3   :  { %v3407_v16 = vadd.f32 %v3287_v48, %v8677_v52  ;;  %v3289_v34 = vadd.f32 %v3288_v30, %v8935_v38  ;;  %v3434_v11 = vadd.f32 %v3403_v56, %v3398_v42 }
 0x5f4   :  { %v3290_v25 = vpop.f32.mrf.mxu1 }
 0x5f5   :  { %v3408_v55 = vadd.f32 %v3289_v34, %v8693_v17  ;;  %v3291_v21 = vadd.f32 %v3290_v25, %v8944_v10  ;;  %v3426_v19 = vadd.f32 %v3425_v33, %v3407_v16 }
 0x5f6   :  { %v3292_v40 = vpop.f32.mrf.mxu1 }
 0x5f7   :  { %v3412_v6 = vadd.f32 %v3291_v21, %v8680_v2  ;;  %v3293_v29 = vadd.f32 %v3292_v40, %v8944_v10  ;;  %v3435_v32 = vadd.f32 %v3434_v11, %v3408_v55 }
 0x5f8   :  { %v5673_v52 = vpop.f32.mrf.mxu1 }
 0x5f9   :  { %v3427_v63 = vadd.f32 %v3426_v19, %v3412_v6  ;;  %v3413_v9 = vadd.f32 %v3293_v29, %v8696_v31  ;;  %v3391_v2 = vadd.f32 %v5673_v52, %v8935_v38 }
 0x5fa   :  { %v3382_v5 = vpop.f32.mrf.mxu1 }
 0x5fb   :  { %v3428_v35 = vrot.slane %v3427_v63, 4  ;;  %v3436_v50 = vadd.f32 %v3435_v32, %v3413_v9  ;;  %v3383_v15 = vadd.f32 %v3382_v5, %v8928_v26  ;;  %v3411_v39 = vadd.f32 %v3391_v2, %v8719_v47 }
 0x5fc   :  { %v5674_v17 = vpop.f32.mrf.mxu1 }
 0x5fd   :  { %v3429_v14 = vadd.f32 %v3428_v35, %v3427_v63  ;;  %v3437_v20 = vrot.slane %v3436_v50, 4  ;;  %v3401_v57 = vadd.f32 %v3383_v15, %v8735_v53  ;;  %v3394_v31 = vadd.f32 %v5674_v17, %v8944_v10 }
 0x5fe   :  { %v3385_v58 = vpop.f32.mrf.mxu1 }
 0x5ff   :  { %v3430_v36 = vrot.slane %v3429_v14, 2  ;;  %v3438_v7 = vadd.f32 %v3437_v20, %v3436_v50  ;;  %v3386_v1 = vadd.f32 %v3385_v58, %v8930_v23  ;;  %v3416_v62 = vadd.f32 %v3394_v31, %v8722_v22 }
 0x601   :  { %v3431_v3 = vadd.f32 %v3430_v36, %v3429_v14  ;;  %v3439_v51 = vrot.slane %v3438_v7, 2  ;;  %v3406_v41 = vadd.f32 %v3386_v1, %v8738_v45 }
 0x603   :  { %v3432_v24 = vrot.slane %v3431_v3, 1  ;;  %v3440_v59 = vadd.f32 %v3439_v51, %v3438_v7  ;;  %v3461_v60 = vadd.f32 %v3406_v41, %v3401_v57 }
 0x605   :  { %v3433_v54 = vadd.f32 %v3432_v24, %v3431_v3  ;;  %v3441_v27 = vrot.slane %v3440_v59, 1  ;;  %v3462_v12 = vadd.f32 %v3461_v60, %v3411_v39 }
 0x607   :  { %v3470_v18 = vmul.f32 0.03125, %v3433_v54  ;;  %v3442_v48 = vadd.f32 %v3441_v27, %v3440_v59  ;;  %v3463_v30 = vadd.f32 %v3462_v12, %v3416_v62 }
 0x609   :  { %v8960_v53 = vsub.f32 %v3397_v0, %v3470_v18  ;;  %v8962_v34 = vsub.f32 %v3402_v8, %v3470_v18  ;;  %v8964_v25 = vsub.f32 %v3407_v16, %v3470_v18  ;;  %v3471_v45 = vmul.f32 0.03125, %v3442_v48 }
 0x60a   :  { %v3464_v33 = vrot.slane %v3463_v30, 4  ;;  %v8966_v21 = vsub.f32 %v3412_v6, %v3470_v18 }
 0x60b   :  { %v3495_v47 = vmul.f32 %v8960_v53, %v8960_v53  ;;  %v3500_v22 = vmul.f32 %v8962_v34, %v8962_v34  ;;  %v8972_v40 = vsub.f32 %v3398_v42, %v3471_v45  ;;  %v8974_v11 = vsub.f32 %v3403_v56, %v3471_v45 }
 0x60c   :  { %v8976_v0 = vsub.f32 %v3408_v55, %v3471_v45  ;;  %v3505_v8 = vmul.f32 %v8964_v25, %v8964_v25  ;;  %v3465_v19 = vadd.f32 %v3464_v33, %v3463_v30  ;;  %v8980_v29 = vsub.f32 %v3413_v9, %v3471_v45 }
 0x60d   :  { %v3515_v16 = vadd.f32 %v3500_v22, %v3495_v47  ;;  %v3496_v6 = vmul.f32 %v8972_v40, %v8972_v40  ;;  %v3501_v52 = vmul.f32 %v8974_v11, %v8974_v11  ;;  %v3510_v42 = vmul.f32 %v8966_v21, %v8966_v21 }
 0x60e   :  { %v3466_v32 = vrot.slane %v3465_v19, 2  ;;  %v3506_v55 = vmul.f32 %v8976_v0, %v8976_v0  ;;  %v3511_v9 = vmul.f32 %v8980_v29, %v8980_v29 }
 0x60f   :  { %v3516_v56 = vadd.f32 %v3515_v16, %v3505_v8  ;;  %v3524_v63 = vadd.f32 %v3501_v52, %v3496_v6 }
 0x610   :  { %v3467_v35 = vadd.f32 %v3466_v32, %v3465_v19 }
 0x611   :  { %v3517_v5 = vadd.f32 %v3516_v56, %v3510_v42  ;;  %v3525_v50 = vadd.f32 %v3524_v63, %v3506_v55  ;;  %v9008_v56 = vpop.permute.xlu0 %3607  ;;  %v9011_v63 = vpop.permute.xlu1 %3612 }
 0x612   :  { %v3468_v17 = vrot.slane %v3467_v35, 1 }
 0x613   :  { %v3518_v15 = vrot.slane %v3517_v5, 4  ;;  %v3526_v14 = vadd.f32 %v3525_v50, %v3511_v9 }
 0x614   :  { %v3469_v58 = vadd.f32 %v3468_v17, %v3467_v35 }
 0x615   :  { %v3519_v20 = vadd.f32 %v3518_v15, %v3517_v5  ;;  %v3527_v36 = vrot.slane %v3526_v14, 4 }
 0x616   :  { %v3474_v2 = vmul.f32 0.03125, %v3469_v58 }
 0x617   :  { %v3520_v7 = vrot.slane %v3519_v20, 2  ;;  %v3528_v1 = vadd.f32 %v3527_v36, %v3526_v14 }
 0x618   :  { %v8992_v51 = vsub.f32 %v3401_v57, %v3474_v2  ;;  %v8994_v31 = vsub.f32 %v3406_v41, %v3474_v2  ;;  %v8996_v24 = vsub.f32 %v3411_v39, %v3474_v2  ;;  %v8998_v54 = vsub.f32 %v3416_v62, %v3474_v2  ;;  %v9023_v2 = vpop.permute.xlu0 %3647 }
 0x619   :  { %v3521_v3 = vadd.f32 %v3520_v7, %v3519_v20  ;;  %v3529_v59 = vrot.slane %v3528_v1, 2 }
 0x61a   :  { %v3499_v27 = vmul.f32 %v8992_v51, %v8992_v51  ;;  %v3504_v12 = vmul.f32 %v8994_v31, %v8994_v31  ;;  %v3509_v57 = vmul.f32 %v8996_v24, %v8996_v24  ;;  %v3514_v39 = vmul.f32 %v8998_v54, %v8998_v54 }
 0x61b   :  { %v3522_v60 = vrot.slane %v3521_v3, 1  ;;  %v3530_v18 = vadd.f32 %v3529_v59, %v3528_v1 }
 0x61c   :  { %v3551_v30 = vadd.f32 %v3504_v12, %v3499_v27 }
 0x61d   :  { %v3523_v48 = vadd.f32 %v3522_v60, %v3521_v3  ;;  %v3531_v41 = vrot.slane %v3530_v18, 1 }
 0x61e   :  { %v3552_v33 = vadd.f32 %v3551_v30, %v3509_v57 }
 0x61f   :  { %v3560_v45 = vmul.f32 0.03125, %v3523_v48  ;;  %v3532_v62 = vadd.f32 %v3531_v41, %v3530_v18 }
 0x620   :  { %v3553_v8 = vadd.f32 %v3552_v33, %v3514_v39 }
 0x621   :  { %v3329_v47 = vpop.f32.mrf.mxu0  ;;  %v3565_v22 = vadd.f32 1e-05, %v3560_v45  ;;  %v3561_v16 = vmul.f32 0.03125, %v3532_v62  ;;  %v9051_v45 = vpop.permute.xlu0 %3597 }
 0x622   :  { %v3554_v6 = vrot.slane %v3553_v8, 4  ;;  %v3330_v35 = vadd.f32 %v3329_v47, %v8928_v26 }
 0x623   :  { %v3331_v19 = vpop.f32.mrf.mxu0  ;;  %5989 = vrsqrt.f32 %v3565_v22  ;;  %v3566_v52 = vadd.f32 1e-05, %v3561_v16 }
 0x624   :  { %v3555_v55 = vadd.f32 %v3554_v6, %v3553_v8  ;;  %v3332_v15 = vadd.f32 %v3331_v19, %v8928_v26  ;;  %v9026_v1 = vadd.f32 %v3330_v35, %v8818_v28 }
 0x625   :  { %v3333_v42 = vpop.f32.mrf.mxu0  ;;  %5991 = vrsqrt.f32 %v3566_v52 }
 0x626   :  { %v3334_v32 = vadd.f32 %v3333_v42, %v8930_v23  ;;  %v3556_v50 = vrot.slane %v3555_v55, 2  ;;  %v9035_v59 = vadd.f32 %v3332_v15, %v8808_v46 }
 0x627   :  { %v3335_v5 = vpop.f32.mrf.mxu0 }
 0x628   :  { %v3336_v9 = vadd.f32 %v3335_v5, %v8930_v23  ;;  %v9017_v14 = vadd.f32 %v3334_v32, %v8821_v61  ;;  %v3557_v20 = vadd.f32 %v3556_v50, %v3555_v55  ;;  %v9032_v61 = vpop.permute.xlu1 %3652 }
 0x629   :  { %v3339_v17 = vpop.f32.mrf.mxu0 }
 0x62a   :  { %v3340_v58 = vadd.f32 %v3339_v17, %v8935_v38  ;;  %v9021_v36 = vadd.f32 %v3336_v9, %v8811_v43  ;;  %v3558_v23 = vrot.slane %v3557_v20, 1  ;;  %v3443_v43 = vadd.f32 %v9017_v14, %v9026_v1 }
 0x62b   :  { %v3341_v7 = vpop.f32.mrf.mxu0 }
 0x62c   :  { %v9029_v3 = vadd.f32 %v3340_v58, %v8794_v49  ;;  %v3342_v26 = vadd.f32 %v3341_v7, %v8935_v38  ;;  %v3559_v27 = vadd.f32 %v3558_v23, %v3557_v20  ;;  %v3452_v49 = vadd.f32 %v9021_v36, %v9035_v59  ;;  %v9058_v47 = vpop.permute.xlu1 %3602 }
 0x62d   :  { %v3343_v60 = vpop.f32.mrf.mxu0 }
 0x62e   :  { %v9040_v12 = vadd.f32 %v3342_v26, %v8802_v13  ;;  %v3344_v28 = vadd.f32 %v3343_v60, %v8944_v10  ;;  %v3564_v38 = vmul.f32 0.03125, %v3559_v27  ;;  %v3444_v48 = vadd.f32 %v3443_v43, %v9029_v3 }
 0x62f   :  { %v3345_v18 = vpop.f32.mrf.mxu0 }
 0x630   :  { %v9047_v46 = vadd.f32 %v3344_v28, %v8797_v44  ;;  %v3346_v57 = vadd.f32 %v3345_v18, %v8944_v10  ;;  %v5990_v30 = vpop.eup %5989  ;;  %v3453_v41 = vadd.f32 %v3452_v49, %v9040_v12  ;;  %v3569_v39 = vadd.f32 1e-05, %v3564_v38  ;;  %v9083_v17 = vpop.permute.xlu1 %3642 }
 0x631   :  { %v3590_v13 = vmul.f32 %v5990_v30, %v8966_v21  ;;  %v3585_v44 = vmul.f32 %v5990_v30, %v8964_v25  ;;  %v3575_v22 = vmul.f32 %v5990_v30, %v8960_v53  ;;  %v3580_v10 = vmul.f32 %v5990_v30, %v8962_v34 }
 0x632   :  { %v3445_v33 = vadd.f32 %v3444_v48, %v9047_v46  ;;  %v9056_v62 = vadd.f32 %v3346_v57, %v8805_v4  ;;  %v5992_v8 = vpop.eup %5991  ;;  %5993 = vrsqrt.f32 %v3569_v39 }
 0x633   :  { %v3630_v16 = vmul.f32 %v9011_v63, %v3590_v13  ;;  %v3591_v6 = vmul.f32 %v5992_v8, %v8980_v29  ;;  %v3586_v4 = vmul.f32 %v5992_v8, %v8976_v0  ;;  %v3625_v52 = vmul.f32 %v9008_v56, %v3585_v44  ;;  %v9079_v29 = vpop.permute.xlu0 %3637  ;;  %v9115_v44 = vld [vmem:[%s9903_s2 + $0x60] sm:$0xff]  }
 0x634   :  { %v3446_v19 = vrot.slane %v3445_v33, 4  ;;  %v3454_v21 = vadd.f32 %v3453_v41, %v9056_v62  ;;  %v3576_v42 = vmul.f32 %v5992_v8, %v8972_v40  ;;  %v3581_v34 = vmul.f32 %v5992_v8, %v8974_v11 }
 0x635   :  { %v9070_v53 = vadd.f32 %v9032_v61, %v3630_v16  ;;  %v3626_v55 = vmul.f32 %v9008_v56, %v3586_v4  ;;  %v3631_v5 = vmul.f32 %v9011_v63, %v3591_v6  ;;  %v9076_v35 = vadd.f32 %v9023_v2, %v3625_v52 }
 0x636   :  { %v3447_v25 = vadd.f32 %v3446_v19, %v3445_v33  ;;  %v3455_v32 = vrot.slane %v3454_v21, 4  ;;  %v3616_v0 = vmul.f32 %v9051_v45, %v3576_v42  ;;  %v3621_v50 = vmul.f32 %v9058_v47, %v3581_v34 }
 0x637   :  { %10720 = vst [vmem:[#allocation27_spill] sm:$0xff] %v9070_v53  ;;  %10721 = vst [vmem:[#allocation107_spill] sm:$0xff] %v9076_v35  ;;  %v3615_v15 = vmul.f32 %v9051_v45, %v3575_v22  ;;  %v9086_v11 = vadd.f32 %v9023_v2, %v3626_v55  ;;  %v9089_v20 = vadd.f32 %v9032_v61, %v3631_v5 }
 0x638   :  { %v3448_v9 = vrot.slane %v3447_v25, 2  ;;  %v3456_v40 = vadd.f32 %v3455_v32, %v3454_v21  ;;  %v9092_v58 = vadd.f32 %v9079_v29, %v3616_v0  ;;  %v9095_v26 = vadd.f32 %v9083_v17, %v3621_v50 }
 0x639   :  { %10722 = vst [vmem:[#allocation87_spill] sm:$0xff] %v9086_v11  ;;  %10723 = vst [vmem:[#allocation70_spill] sm:$0xff] %v9089_v20  ;;  %v3620_v60 = vmul.f32 %v9058_v47, %v3580_v10  ;;  %v3709_v43 = vpack.c.bf16 %v9089_v20, %v9086_v11  ;;  %v3708_v27 = vpack.c.bf16 %v9070_v53, %v9076_v35 }
 0x63a   :  { %10724 = vst [vmem:[#allocation28_spill] sm:$0xff] %v9092_v58  ;;  %v3449_v7 = vadd.f32 %v3448_v9, %v3447_v25  ;;  %v3457_v23 = vrot.slane %v3456_v40, 2  ;;  %10725 = vst [vmem:[#allocation51_spill] sm:$0xff] %v9095_v26  ;;  %v9103_v18 = vadd.f32 %v9079_v29, %v3615_v15  ;;  %v3704_v48 = vpack.c.bf16 %v9095_v26, %v9092_v58 }
 0x63b   :  { %v9106_v38 = vadd.f32 %v9083_v17, %v3620_v60  ;;  %3845 = vmatprep.subr.bf16.mxu1 %v3709_v43 }
 0x63c   :  { %v3450_v28 = vrot.slane %v3449_v7, 1  ;;  %v3458_v49 = vadd.f32 %v3457_v23, %v3456_v40  ;;  %10726 = vst [vmem:[#allocation53_spill] sm:$0xff] %v9103_v18  ;;  %3846 = vmatpush1.bf16.msra.mxu1 %v3708_v27 }
 0x63d   :  { %10727 = vst [vmem:[#allocation82_spill] sm:$0xff] %v9106_v38  ;;  %3847 = vmatprep.subr.bf16.mxu1 %v3704_v48  ;;  %v3703_v39 = vpack.c.bf16 %v9106_v38, %v9103_v18 }
 0x63e   :  { %v3451_v57 = vadd.f32 %v3450_v28, %v3449_v7  ;;  %v3459_v30 = vrot.slane %v3458_v49, 1  ;;  %v9170_v7 = vld [vmem:[%s9903_s2 + $0x68] sm:$0xff]  }
 0x63f   :  { %v5994_v33 = vpop.eup %5993 }
 0x640   :  { %v3472_v41 = vmul.f32 0.03125, %v3451_v57  ;;  %v3460_v13 = vadd.f32 %v3459_v30, %v3458_v49  ;;  %3848 = vmatpush1.bf16.msra.mxu1 %v3703_v39  ;;  %v3589_v19 = vmul.f32 %v5994_v33, %v8996_v24  ;;  %v3594_v21 = vmul.f32 %v5994_v33, %v8998_v54  ;;  %v9179_v39 = vld [vmem:[%s9903_s2 + $0x70] sm:$0xff]  }
 0x642   :  { %v9118_v22 = vsub.f32 %v9026_v1, %v3472_v41  ;;  %v9121_v10 = vsub.f32 %v9017_v14, %v3472_v41  ;;  %v9124_v8 = vsub.f32 %v9029_v3, %v3472_v41  ;;  %v3473_v16 = vmul.f32 0.03125, %v3460_v13 }
 0x643   :  { %v9129_v6 = vsub.f32 %v9047_v46, %v3472_v41  ;;  %v3579_v14 = vmul.f32 %v5994_v33, %v8992_v51  ;;  %v3584_v3 = vmul.f32 %v5994_v33, %v8994_v31  ;;  %5521 = vmatmul.mubr.msk.bf16.vlgmr.msra.gmra.mxu1 %vm590_vm1, %v9115_v44  ;;  %v3629_v51 = vmul.f32 %v9008_v56, %v3589_v19 }
 0x644   :  { %v3497_v4 = vmul.f32 %v9118_v22, %v9118_v22  ;;  %v3502_v1 = vmul.f32 %v9121_v10, %v9121_v10  ;;  %v9138_v52 = vsub.f32 %v9035_v59, %v3473_v16  ;;  %v9141_v24 = vsub.f32 %v9021_v36, %v3473_v16  ;;  %3875 = vmatprep.mubr.bf16.mxu1 %v10672_v37 }
 0x645   :  { %v9144_v54 = vsub.f32 %v9040_v12, %v3473_v16  ;;  %v3507_v46 = vmul.f32 %v9124_v8, %v9124_v8  ;;  %v3634_v31 = vmul.f32 %v9011_v63, %v3594_v21  ;;  %v3493_v59 = vsub.f32 %v9056_v62, %v3473_v16 }
 0x646   :  { %v3533_v42 = vadd.f32 %v3502_v1, %v3497_v4  ;;  %v3498_v36 = vmul.f32 %v9138_v52, %v9138_v52  ;;  %v3503_v12 = vmul.f32 %v9141_v24, %v9141_v24  ;;  %v3619_v25 = vmul.f32 %v9051_v45, %v3579_v14 }
 0x647   :  { %v3512_v32 = vmul.f32 %v9129_v6, %v9129_v6  ;;  %v3669_v55 = vadd.f32 %v9023_v2, %v3629_v51  ;;  %v3674_v5 = vadd.f32 %v9032_v61, %v3634_v31  ;;  %v3508_v0 = vmul.f32 %v9144_v54, %v9144_v54  ;;  %v5729_v31 = vld [vmem:[%s9903_s2 + $0x80] sm:$0xff]  }
 0x648   :  { %v3534_v34 = vadd.f32 %v3533_v42, %v3507_v46  ;;  %v3542_v62 = vadd.f32 %v3503_v12, %v3498_v36  ;;  %v3624_v9 = vmul.f32 %v9058_v47, %v3584_v3  ;;  %v3659_v40 = vadd.f32 %v9079_v29, %v3619_v25  ;;  %v5728_v46 = vld [vmem:[%s9903_s2 + $0x78] sm:$0xff]  }
 0x649   :  { %v3712_v15 = vpack.c.bf16 %v3674_v5, %v3669_v55  ;;  %v3513_v23 = vmul.f32 %v3493_v59, %v3493_v59 }
 0x64a   :  { %v3535_v50 = vadd.f32 %v3534_v34, %v3512_v32  ;;  %v3543_v60 = vadd.f32 %v3542_v62, %v3508_v0  ;;  %v3664_v43 = vadd.f32 %v9083_v17, %v3624_v9  ;;  %v5730_v32 = vld [vmem:[%s9903_s2 + $0x88] sm:$0xff]  }
 0x64b   :  { %5675 = vmatprep.subr.bf16.mxu1 %v3712_v15  ;;  %5522 = vmatmul.mubr.msk.bf16.gmra.mxu1 %vm590_vm1, %v9170_v7 }
 0x64c   :  { %v3536_v27 = vrot.slane %v3535_v50, 4  ;;  %v3544_v28 = vadd.f32 %v3543_v60, %v3513_v23  ;;  %5676 = vmatpush3.bf16.msra.mxu1 %v3712_v15  ;;  %v3707_v49 = vpack.c.bf16 %v3664_v43, %v3659_v40  ;;  %3885 = vmatprep.mubr.bf16.mxu1 %v10672_v37 }
 0x64e   :  { %v3537_v48 = vadd.f32 %v3536_v27, %v3535_v50  ;;  %v3545_v57 = vrot.slane %v3544_v28, 4  ;;  %5677 = vmatprep.subr.bf16.mxu1 %v3707_v49 }
 0x650   :  { %v3538_v30 = vrot.slane %v3537_v48, 2  ;;  %v3546_v41 = vadd.f32 %v3545_v57, %v3544_v28  ;;  %5678 = vmatpush3.bf16.msra.mxu1 %v3707_v49 }
 0x652   :  { %v3539_v13 = vadd.f32 %v3538_v30, %v3537_v48  ;;  %v3547_v33 = vrot.slane %v3546_v41, 2 }
 0x653   :  { %5523 = vmatmul.mubr.msk.bf16.gmra.mxu1 %vm590_vm1, %v9179_v39 }
 0x654   :  { %v3540_v16 = vrot.slane %v3539_v13, 1  ;;  %v3548_v19 = vadd.f32 %v3547_v33, %v3546_v41  ;;  %3895 = vmatprep.mubr.bf16.mxu1 %v10672_v37 }
 0x656   :  { %v3541_v21 = vadd.f32 %v3540_v16, %v3539_v13  ;;  %v3549_v4 = vrot.slane %v3548_v19, 1 }
 0x658   :  { %v3562_v1 = vmul.f32 0.03125, %v3541_v21  ;;  %v3550_v14 = vadd.f32 %v3549_v4, %v3548_v19 }
 0x65a   :  { %v3567_v3 = vadd.f32 1e-05, %v3562_v1  ;;  %v3563_v42 = vmul.f32 0.03125, %v3550_v14 }
 0x65b   :  { %5524 = vmatmul.mubr.msk.bf16.gmra.mxu1 %vm590_vm1, %v5728_v46 }
 0x65c   :  { %5995 = vrsqrt.f32 %v3567_v3  ;;  %v3568_v51 = vadd.f32 1e-05, %v3563_v42  ;;  %3905 = vmatprep.mubr.bf16.mxu1 %v10672_v37 }
 0x65e   :  { %5997 = vrsqrt.f32 %v3568_v51 }
 0x663   :  { %5525 = vmatmul.mubr.msk.bf16.gmra.mxu1 %vm590_vm1, %v5729_v31 }
 0x664   :  { %3915 = vmatprep.mubr.bf16.mxu1 %v10672_v37 }
 0x669   :  { %v5996_v36 = vpop.eup %5995 }
 0x66a   :  { %v3592_v12 = vmul.f32 %v5996_v36, %v9129_v6  ;;  %v3587_v25 = vmul.f32 %v5996_v36, %v9124_v8  ;;  %v3577_v0 = vmul.f32 %v5996_v36, %v9118_v22  ;;  %v3582_v62 = vmul.f32 %v5996_v36, %v9121_v10 }
 0x66b   :  { %v5998_v34 = vpop.eup %5997  ;;  %5526 = vmatmul.mubr.msk.bf16.gmra.mxu1 %vm590_vm1, %v5730_v32 }
 0x66c   :  { %v3632_v55 = vmul.f32 %v9011_v63, %v3592_v12  ;;  %v3627_v5 = vmul.f32 %v9008_v56, %v3587_v25  ;;  %v3593_v9 = vmul.f32 %v5998_v34, %v3493_v59  ;;  %v3588_v40 = vmul.f32 %v5998_v34, %v9144_v54  ;;  %5679 = vmatprep.mubr.msk.bf16.mxu1 %vm590_vm1, %v9115_v44 }
 0x66d   :  { %v3578_v6 = vmul.f32 %v5998_v34, %v9138_v52  ;;  %v3583_v8 = vmul.f32 %v5998_v34, %v9141_v24  ;;  %v3617_v24 = vmul.f32 %v9051_v45, %v3577_v0  ;;  %v3622_v54 = vmul.f32 %v9058_v47, %v3582_v62 }
 0x66e   :  { %v3667_v50 = vadd.f32 %v9023_v2, %v3627_v5  ;;  %v3672_v15 = vadd.f32 %v9032_v61, %v3632_v55  ;;  %v3628_v23 = vmul.f32 %v9008_v56, %v3588_v40  ;;  %v3633_v60 = vmul.f32 %v9011_v63, %v3593_v9 }
 0x66f   :  { %v3618_v22 = vmul.f32 %v9051_v45, %v3578_v6  ;;  %v3623_v10 = vmul.f32 %v9058_v47, %v3583_v8  ;;  %v3657_v28 = vadd.f32 %v9079_v29, %v3617_v24  ;;  %v3662_v49 = vadd.f32 %v9083_v17, %v3622_v54 }
 0x670   :  { %v3710_v52 = vpack.c.bf16 %v3672_v15, %v3667_v50  ;;  %v3668_v59 = vadd.f32 %v9023_v2, %v3628_v23  ;;  %v3673_v43 = vadd.f32 %v9032_v61, %v3633_v60  ;;  %v3738_v61 = vpop.permute.xlu0 %3737 }
 0x671   :  { %v3658_v56 = vadd.f32 %v9079_v29, %v3618_v22  ;;  %v3663_v63 = vadd.f32 %v9083_v17, %v3623_v10  ;;  %v3705_v2 = vpack.c.bf16 %v3662_v49, %v3657_v28  ;;  %v3743_v29 = vpop.permute.xlu1 %3742 }
 0x672   :  { %v3711_v27 = vpack.c.bf16 %v3673_v43, %v3668_v59 }
 0x673   :  { %v3706_v48 = vpack.c.bf16 %v3663_v63, %v3658_v56  ;;  %5680 = vmatmul.mubr.msk.bf16.vlgmr.msra.gmra.mxu1 %vm590_vm1, %v9170_v7 }
 0x674   :  { %3938 = vmatprep.subr.bf16.mxu0 %v3711_v27  ;;  %5683 = vmatprep.mubr.msk.bf16.mxu1 %vm590_vm1, %v9179_v39 }
 0x675   :  { %3939 = vmatpush1.bf16.msra.mxu0 %v3710_v52  ;;  %v9248_v30 = vpop.permute.xlu1 %3762 }
 0x676   :  { %3940 = vmatprep.subr.bf16.mxu0 %v3706_v48 }
 0x679   :  { %3941 = vmatpush1.bf16.msra.mxu0 %v3705_v2  ;;  %v3733_v16 = vpop.permute.xlu1 %3732 }
 0x67b   :  { %5684 = vmatmul.mubr.msk.bf16.gmra.mxu1 %vm590_vm1, %v5728_v46 }
 0x67c   :  { %5527 = vmatmul.mubr.msk.bf16.vlgmr.msra.gmra.mxu0 %vm590_vm1, %v9115_v44  ;;  %5687 = vmatprep.mubr.msk.bf16.mxu1 %vm590_vm1, %v5729_v31  ;;  %v9246_v44 = vpop.permute.xlu0 %3757 }
 0x67d   :  { %3964 = vmatprep.mubr.bf16.mxu0 %v10672_v37  ;;  %v9264_v25 = vpop.permute.xlu1 %3752 }
 0x680   :  { %v3728_v41 = vpop.permute.xlu0 %3727 }
 0x683   :  { %5688 = vmatmul.mubr.msk.bf16.gmra.mxu1 %vm590_vm1, %v5730_v32 }
 0x684   :  { %5528 = vmatmul.mubr.msk.bf16.gmra.mxu0 %vm590_vm1, %v9170_v7  ;;  %5170 = vmatprep.mubr.bf16.mxu1 %v10672_v37  ;;  %v9250_v19 = vpop.permute.xlu0 %3747 }
 0x685   :  { %3970 = vmatprep.mubr.bf16.mxu0 %v10672_v37 }
 0x68c   :  { %5529 = vmatmul.mubr.msk.bf16.gmra.mxu0 %vm590_vm1, %v9179_v39 }
 0x68d   :  { %3980 = vmatprep.mubr.bf16.mxu0 %v10672_v37 }
 0x694   :  { %5530 = vmatmul.mubr.msk.bf16.gmra.mxu0 %vm590_vm1, %v5728_v46 }
 0x695   :  { %3990 = vmatprep.mubr.bf16.mxu0 %v10672_v37 }
 0x69c   :  { %5531 = vmatmul.mubr.msk.bf16.gmra.mxu0 %vm590_vm1, %v5729_v31 }
 0x69d   :  { %4000 = vmatprep.mubr.bf16.mxu0 %v10672_v37 }
 0x6a4   :  { %5532 = vmatmul.mubr.msk.bf16.gmra.mxu0 %vm590_vm1, %v5730_v32 }
 0x6a5   :  { %4756 = vmatprep.mubr.bf16.mxu0 %v10672_v37 }
 0x703   :  { %v3867_v45 = vpop.f32.mrf.mxu1 }
 0x704   :  { %v9252_v4 = vadd.f32 %v3867_v45, %v3728_v41 }
 0x705   :  { %v3869_v47 = vpop.f32.mrf.mxu1 }
 0x706   :  { %v9254_v1 = vadd.f32 %v3869_v47, %v3728_v41 }
 0x707   :  { %v3871_v17 = vpop.f32.mrf.mxu1 }
 0x708   :  { %v9260_v31 = vadd.f32 %v3871_v17, %v3733_v16 }
 0x709   :  { %v3873_v7 = vpop.f32.mrf.mxu1 }
 0x70a   :  { %v9262_v36 = vadd.f32 %v3873_v7, %v3733_v16 }
 0x70b   :  { %v3877_v57 = vpop.f32.mrf.mxu1 }
 0x70c   :  { %v9268_v0 = vadd.f32 %v3877_v57, %v3738_v61 }
 0x70d   :  { %v3879_v13 = vpop.f32.mrf.mxu1 }
 0x70e   :  { %v9270_v62 = vadd.f32 %v3879_v13, %v3738_v61 }
 0x70f   :  { %v3881_v39 = vpop.f32.mrf.mxu1 }
 0x710   :  { %v9272_v9 = vadd.f32 %v3881_v39, %v3743_v29 }
 0x711   :  { %v3883_v33 = vpop.f32.mrf.mxu1 }
 0x712   :  { %v9275_v60 = vadd.f32 %v3883_v33, %v3743_v29 }
 0x713   :  { %v3887_v21 = vpop.f32.mrf.mxu1 }
 0x714   :  { %v3888_v14 = vadd.f32 %v3887_v21, %v9250_v19 }
 0x715   :  { %v3889_v3 = vpop.f32.mrf.mxu1 }
 0x716   :  { %v4088_v46 = vmul.f32 %v3888_v14, %v9252_v4  ;;  %v4384_v42 = vmul.f32 %v3888_v14, %v9254_v1  ;;  %v3890_v51 = vadd.f32 %v3889_v3, %v9250_v19 }
 0x717   :  { %v3891_v12 = vpop.f32.mrf.mxu1 }
 0x718   :  { %v4092_v32 = vrot.slane %v4088_v46, 4  ;;  %v4388_v34 = vrot.slane %v4384_v42, 4  ;;  %v4116_v55 = vmul.f32 %v3890_v51, %v9252_v4  ;;  %v4412_v5 = vmul.f32 %v3890_v51, %v9254_v1 }
 0x719   :  { %v3892_v40 = vadd.f32 %v3891_v12, %v9264_v25  ;;  %v3893_v6 = vpop.f32.mrf.mxu1 }
 0x71a   :  { %v4093_v8 = vadd.f32 %v4092_v32, %v4088_v46  ;;  %v4389_v50 = vadd.f32 %v4388_v34, %v4384_v42  ;;  %v4120_v15 = vrot.slane %v4116_v55, 4  ;;  %v4416_v23 = vrot.slane %v4412_v5, 4 }
 0x71b   :  { %v4089_v22 = vmul.f32 %v3892_v40, %v9260_v31  ;;  %v4385_v10 = vmul.f32 %v3892_v40, %v9262_v36  ;;  %v3894_v52 = vadd.f32 %v3893_v6, %v9264_v25  ;;  %v3897_v24 = vpop.f32.mrf.mxu1 }
 0x71c   :  { %v4094_v54 = vrot.slane %v4093_v8, 2  ;;  %v4390_v59 = vrot.slane %v4389_v50, 2  ;;  %v4121_v43 = vadd.f32 %v4120_v15, %v4116_v55  ;;  %v4417_v56 = vadd.f32 %v4416_v23, %v4412_v5 }
 0x71d   :  { %v4098_v63 = vrot.slane %v4089_v22, 4  ;;  %v4394_v27 = vrot.slane %v4385_v10, 4  ;;  %v4117_v28 = vmul.f32 %v3894_v52, %v9260_v31  ;;  %v4413_v49 = vmul.f32 %v3894_v52, %v9262_v36  ;;  %v3899_v48 = vpop.f32.mrf.mxu1 }
 0x71e   :  { %v4095_v2 = vadd.f32 %v4094_v54, %v4093_v8  ;;  %v4391_v61 = vadd.f32 %v4390_v59, %v4389_v50  ;;  %v4122_v45 = vrot.slane %v4121_v43, 2  ;;  %v4418_v47 = vrot.slane %v4417_v56, 2 }
 0x71f   :  { %v4099_v29 = vadd.f32 %v4098_v63, %v4089_v22  ;;  %v4395_v17 = vadd.f32 %v4394_v27, %v4385_v10  ;;  %v4126_v7 = vrot.slane %v4117_v28, 4  ;;  %v4422_v57 = vrot.slane %v4413_v49, 4  ;;  %v3901_v41 = vpop.f32.mrf.mxu1 }
 0x720   :  { %v4096_v13 = vrot.slane %v4095_v2, 1  ;;  %v4392_v39 = vrot.slane %v4391_v61, 1  ;;  %v4123_v33 = vadd.f32 %v4122_v45, %v4121_v43  ;;  %v4419_v16 = vadd.f32 %v4418_v47, %v4417_v56 }
 0x721   :  { %v4100_v21 = vrot.slane %v4099_v29, 2  ;;  %v4396_v14 = vrot.slane %v4395_v17, 2  ;;  %v4127_v3 = vadd.f32 %v4126_v7, %v4117_v28  ;;  %v4423_v46 = vadd.f32 %v4422_v57, %v4413_v49  ;;  %v3903_v42 = vpop.f32.mrf.mxu1 }
 0x722   :  { %v9282_v51 = vadd.f32 %v4096_v13, %v4095_v2  ;;  %v9284_v12 = vadd.f32 %v4392_v39, %v4391_v61  ;;  %v4124_v32 = vrot.slane %v4123_v33, 1  ;;  %v4420_v34 = vrot.slane %v4419_v16, 1 }
 0x723   :  { %v4101_v55 = vadd.f32 %v4100_v21, %v4099_v29  ;;  %v4397_v5 = vadd.f32 %v4396_v14, %v4395_v17  ;;  %v4128_v40 = vrot.slane %v4127_v3, 2  ;;  %v4424_v6 = vrot.slane %v4423_v46, 2  ;;  %v9286_v8 = vpop.f32.mrf.mxu1 }
 0x724   :  { %10728 = vst [vmem:[#allocation99_spill] sm:$0xff] %v9286_v8  ;;  %v9288_v50 = vadd.f32 %v4124_v32, %v4123_v33  ;;  %v9290_v15 = vadd.f32 %v4420_v34, %v4419_v16  ;;  %v3898_v23 = vadd.f32 %v3897_v24, %v9246_v44  ;;  %v3900_v22 = vadd.f32 %v3899_v48, %v9246_v44 }
 0x725   :  { %v4102_v10 = vrot.slane %v4101_v55, 1  ;;  %v4398_v52 = vrot.slane %v4397_v5, 1  ;;  %v4129_v54 = vadd.f32 %v4128_v40, %v4127_v3  ;;  %v4425_v59 = vadd.f32 %v4424_v6, %v4423_v46  ;;  %v9294_v43 = vpop.f32.mrf.mxu1 }
 0x726   :  { %10729 = vst [vmem:[#allocation109_spill] sm:$0xff] %v9294_v43  ;;  %v4090_v27 = vmul.f32 %v3898_v23, %v9268_v0  ;;  %v4386_v28 = vmul.f32 %v3898_v23, %v9270_v62  ;;  %v4118_v29 = vmul.f32 %v3900_v22, %v9268_v0  ;;  %v4414_v17 = vmul.f32 %v3900_v22, %v9270_v62 }
 0x727   :  { %v9302_v49 = vadd.f32 %v4102_v10, %v4101_v55  ;;  %v9304_v24 = vadd.f32 %v4398_v52, %v4397_v5  ;;  %v4130_v48 = vrot.slane %v4129_v54, 1  ;;  %v4426_v2 = vrot.slane %v4425_v59, 1  ;;  %v9306_v61 = vpop.f32.mrf.mxu1 }
 0x728   :  { %10731 = vst [vmem:[#allocation114_spill] sm:$0xff] %v9306_v61  ;;  %v4104_v45 = vrot.slane %v4090_v27, 4  ;;  %v4400_v47 = vrot.slane %v4386_v28, 4  ;;  %v3902_v13 = vadd.f32 %v3901_v41, %v9248_v30  ;;  %v3904_v39 = vadd.f32 %v3903_v42, %v9248_v30 }
 0x729   :  { %10730 = vst [vmem:[#allocation63_spill] sm:$0xff] %v9304_v24  ;;  %v9310_v7 = vadd.f32 %v4130_v48, %v4129_v54  ;;  %v9312_v57 = vadd.f32 %v4426_v2, %v4425_v59  ;;  %v9316_v33 = vpop.f32.mrf.mxu1  ;;  %v4132_v14 = vrot.slane %v4118_v29, 4  ;;  %v4428_v3 = vrot.slane %v4414_v17, 4 }
 0x72a   :  { %10734 = vst [vmem:[#allocation25_spill] sm:$0xff] %v9316_v33  ;;  %v4105_v16 = vadd.f32 %v4104_v45, %v4090_v27  ;;  %v4401_v21 = vadd.f32 %v4400_v47, %v4386_v28  ;;  %v4091_v34 = vmul.f32 %v3902_v13, %v9272_v9  ;;  %v4387_v55 = vmul.f32 %v3902_v13, %v9275_v60 }
 0x72b   :  { %10732 = vst [vmem:[#allocation65_spill] sm:$0xff] %v9310_v7  ;;  %10733 = vst [vmem:[#allocation128_spill] sm:$0xff] %v9312_v57  ;;  %v9324_v5 = vpop.f32.mrf.mxu1  ;;  %v4133_v40 = vadd.f32 %v4132_v14, %v4118_v29  ;;  %v4429_v6 = vadd.f32 %v4428_v3, %v4414_v17  ;;  %v4119_v10 = vmul.f32 %v3904_v39, %v9272_v9 }
 0x72c   :  { %10735 = vst [vmem:[#allocation138_spill] sm:$0xff] %v9324_v5  ;;  %v4106_v41 = vrot.slane %v4105_v16, 2  ;;  %v4402_v42 = vrot.slane %v4401_v21, 2  ;;  %v4110_v23 = vrot.slane %v4091_v34, 4  ;;  %v4406_v22 = vrot.slane %v4387_v55, 4 }
 0x72d   :  { %v4415_v52 = vmul.f32 %v3904_v39, %v9275_v60  ;;  %v9328_v54 = vpop.f32.mrf.mxu1  ;;  %v4134_v28 = vrot.slane %v4133_v40, 2  ;;  %v4430_v48 = vrot.slane %v4429_v6, 2  ;;  %v4138_v47 = vrot.slane %v4119_v10, 4 }
 0x72e   :  { %10736 = vst [vmem:[#allocation137_spill] sm:$0xff] %v9328_v54  ;;  %v4107_v59 = vadd.f32 %v4106_v41, %v4105_v16  ;;  %v4403_v27 = vadd.f32 %v4402_v42, %v4401_v21  ;;  %v4111_v2 = vadd.f32 %v4110_v23, %v4091_v34  ;;  %v4407_v45 = vadd.f32 %v4406_v22, %v4387_v55 }
 0x72f   :  { %v4434_v13 = vrot.slane %v4415_v52, 4  ;;  %v9330_v32 = vpop.f32.mrf.mxu1  ;;  %v4135_v14 = vadd.f32 %v4134_v28, %v4133_v40  ;;  %v4431_v3 = vadd.f32 %v4430_v48, %v4429_v6  ;;  %v4139_v56 = vadd.f32 %v4138_v47, %v4119_v10 }
 0x730   :  { %10737 = vst [vmem:[#allocation52_spill] sm:$0xff] %v9330_v32  ;;  %v4108_v29 = vrot.slane %v4107_v59, 1  ;;  %v4404_v17 = vrot.slane %v4403_v27, 1  ;;  %v4112_v46 = vrot.slane %v4111_v2, 2  ;;  %v4408_v63 = vrot.slane %v4407_v45, 2 }
 0x731   :  { %v4435_v39 = vadd.f32 %v4434_v13, %v4415_v52  ;;  %v9332_v20 = vpop.f32.mrf.mxu1  ;;  %v4136_v16 = vrot.slane %v4135_v14, 1  ;;  %v4432_v21 = vrot.slane %v4431_v3, 1  ;;  %v4140_v34 = vrot.slane %v4139_v56, 2 }
 0x732   :  { %10738 = vst [vmem:[#allocation64_spill] sm:$0xff] %v9332_v20  ;;  %v4113_v41 = vadd.f32 %v4112_v46, %v4111_v2  ;;  %v4409_v42 = vadd.f32 %v4408_v63, %v4407_v45  ;;  %v9334_v22 = vadd.f32 %v4108_v29, %v4107_v59  ;;  %v9336_v53 = vadd.f32 %v4404_v17, %v4403_v27 }
 0x733   :  { %v4436_v55 = vrot.slane %v4435_v39, 2  ;;  %v5681_v23 = vpop.f32.mrf.mxu1  ;;  %v9338_v11 = vadd.f32 %v4136_v16, %v4135_v14  ;;  %v9340_v40 = vadd.f32 %v4432_v21, %v4431_v3  ;;  %v4141_v52 = vadd.f32 %v4140_v34, %v4139_v56 }
 0x734   :  { %v4114_v6 = vrot.slane %v4113_v41, 1  ;;  %v4410_v10 = vrot.slane %v4409_v42, 1 }
 0x735   :  { %v4437_v28 = vadd.f32 %v4436_v55, %v4435_v39  ;;  %v4045_v48 = vpop.f32.mrf.mxu1  ;;  %v4142_v2 = vrot.slane %v4141_v52, 1 }
 0x736   :  { %v9346_v27 = vadd.f32 %v4114_v6, %v4113_v41  ;;  %v9348_v47 = vadd.f32 %v4410_v10, %v4409_v42 }
 0x737   :  { %v4438_v59 = vrot.slane %v4437_v28, 1  ;;  %v5682_v45 = vpop.f32.mrf.mxu1  ;;  %v9350_v13 = vadd.f32 %v4142_v2, %v4141_v52 }
 0x739   :  { %v9352_v29 = vadd.f32 %v4438_v59, %v4437_v28  ;;  %v4047_v56 = vpop.f32.mrf.mxu1 }
 0x73b   :  { %v5685_v39 = vpop.f32.mrf.mxu1 }
 0x73c   :  { %v3960_v17 = vpop.f32.mrf.mxu0  ;;  %v4066_v21 = vadd.f32 %v5685_v39, %v9246_v44 }
 0x73d   :  { %v4057_v41 = vpop.f32.mrf.mxu1 }
 0x73e   :  { %v3961_v16 = vpop.f32.mrf.mxu0  ;;  %v4202_v42 = vmul.f32 %v4066_v21, %v9268_v0  ;;  %v4498_v55 = vmul.f32 %v4066_v21, %v9270_v62  ;;  %v4058_v23 = vadd.f32 %v4057_v41, %v9250_v19 }
 0x73f   :  { %v5686_v6 = vpop.f32.mrf.mxu1 }
 0x740   :  { %v3962_v34 = vpop.f32.mrf.mxu0  ;;  %v4216_v52 = vrot.slane %v4202_v42, 4  ;;  %v4512_v28 = vrot.slane %v4498_v55, 4  ;;  %v4200_v48 = vmul.f32 %v4058_v23, %v9252_v4  ;;  %v4496_v2 = vmul.f32 %v4058_v23, %v9254_v1 }
 0x741   :  { %v4069_v59 = vadd.f32 %v5686_v6, %v9248_v30  ;;  %v4060_v45 = vpop.f32.mrf.mxu1 }
 0x742   :  { %v3963_v10 = vpop.f32.mrf.mxu0  ;;  %v4217_v17 = vadd.f32 %v4216_v52, %v4202_v42  ;;  %v4513_v39 = vadd.f32 %v4512_v28, %v4498_v55  ;;  %v4204_v16 = vrot.slane %v4200_v48, 4  ;;  %v4500_v34 = vrot.slane %v4496_v2, 4 }
 0x743   :  { %v4203_v21 = vmul.f32 %v4069_v59, %v9272_v9  ;;  %v4499_v41 = vmul.f32 %v4069_v59, %v9275_v60  ;;  %v4061_v10 = vadd.f32 %v4060_v45, %v9264_v25 }
 0x744   :  { %v3966_v56 = vpop.f32.mrf.mxu0  ;;  %v4218_v14 = vrot.slane %v4217_v17, 2  ;;  %v4514_v63 = vrot.slane %v4513_v39, 2  ;;  %v4205_v46 = vadd.f32 %v4204_v16, %v4200_v48  ;;  %v4501_v58 = vadd.f32 %v4500_v34, %v4496_v2 }
 0x745   :  { %v4222_v23 = vrot.slane %v4203_v21, 4  ;;  %v4518_v56 = vrot.slane %v4499_v41, 4  ;;  %v4201_v42 = vmul.f32 %v4061_v10, %v9260_v31  ;;  %v9378_v16 = vmul.f32 %v4061_v10, %v9262_v36 }
 0x746   :  { %v3967_v3 = vpop.f32.mrf.mxu0  ;;  %v4219_v6 = vadd.f32 %v4218_v14, %v4217_v17  ;;  %v4515_v26 = vadd.f32 %v4514_v63, %v4513_v39  ;;  %v4206_v52 = vrot.slane %v4205_v46, 2  ;;  %v4502_v28 = vrot.slane %v4501_v58, 2 }
 0x747   :  { %v4223_v18 = vadd.f32 %v4222_v23, %v4203_v21  ;;  %v4519_v45 = vadd.f32 %v4518_v56, %v4499_v41  ;;  %v4210_v3 = vrot.slane %v4201_v42, 4 }
 0x748   :  { %v3968_v35 = vpop.f32.mrf.mxu0  ;;  %v4220_v59 = vrot.slane %v4219_v6, 1  ;;  %v4516_v37 = vrot.slane %v4515_v26, 1  ;;  %v9370_v2 = vadd.f32 %v4206_v52, %v4205_v46 }
 0x749   :  { %v9372_v35 = vadd.f32 %v4502_v28, %v4501_v58  ;;  %v4224_v63 = vrot.slane %v4223_v18, 2  ;;  %v9384_v46 = vadd.f32 %v4210_v3, %v4201_v42 }
 0x74a   :  { %v3969_v55 = vpop.f32.mrf.mxu0  ;;  %v9380_v21 = vadd.f32 %v4220_v59, %v4219_v6  ;;  %v9382_v41 = vadd.f32 %v4516_v37, %v4515_v26 }
 0x74b   :  { %v9391_v6 = vadd.f32 %v4224_v63, %v4223_v18 }
 0x74c   :  { %v3972_v38 = vpop.f32.mrf.mxu0 }
 0x74d   :  { %v3973_v33 = vadd.f32 %v3972_v38, %v9250_v19  ;;  %v4520_v38 = vrot.slane %v4519_v45, 2 }
 0x74e   :  { %v3974_v48 = vpop.f32.mrf.mxu0 }
 0x74f   :  { %v4144_v14 = vmul.f32 %v3973_v33, %v9252_v4  ;;  %v4440_v17 = vmul.f32 %v3973_v33, %v9254_v1  ;;  %v3975_v39 = vadd.f32 %v3974_v48, %v9250_v19 }
 0x750   :  { %v3976_v34 = vpop.f32.mrf.mxu0 }
 0x751   :  { %v4148_v58 = vrot.slane %v4144_v14, 4  ;;  %v4444_v23 = vrot.slane %v4440_v17, 4  ;;  %v4172_v56 = vmul.f32 %v3975_v39, %v9252_v4  ;;  %v4468_v55 = vmul.f32 %v3975_v39, %v9254_v1 }
 0x752   :  { %v3977_v33 = vadd.f32 %v3976_v34, %v9264_v25  ;;  %v3978_v19 = vpop.f32.mrf.mxu0  ;;  %v9396_v1 = vadd.f32 %v4520_v38, %v4519_v45 }
 0x753   :  { %v4149_v37 = vadd.f32 %v4148_v58, %v4144_v14  ;;  %v4445_v26 = vadd.f32 %v4444_v23, %v4440_v17  ;;  %v4176_v28 = vrot.slane %v4172_v56, 4  ;;  %v4472_v42 = vrot.slane %v4468_v55, 4 }
 0x754   :  { %v4145_v59 = vmul.f32 %v3977_v33, %v9260_v31  ;;  %v4441_v3 = vmul.f32 %v3977_v33, %v9262_v36  ;;  %v3979_v4 = vadd.f32 %v3978_v19, %v9264_v25  ;;  %v3982_v61 = vpop.f32.mrf.mxu0 }
 0x755   :  { %v4150_v48 = vrot.slane %v4149_v37, 2  ;;  %v4446_v39 = vrot.slane %v4445_v26, 2  ;;  %v4177_v34 = vadd.f32 %v4176_v28, %v4172_v56  ;;  %v4473_v10 = vadd.f32 %v4472_v42, %v4468_v55 }
 0x756   :  { %v4154_v52 = vrot.slane %v4145_v59, 4  ;;  %v4450_v18 = vrot.slane %v4441_v3, 4  ;;  %v4173_v63 = vmul.f32 %v3979_v4, %v9260_v31  ;;  %v4469_v14 = vmul.f32 %v3979_v4, %v9262_v36  ;;  %v3984_v55 = vpop.f32.mrf.mxu0 }
 0x757   :  { %v4151_v17 = vadd.f32 %v4150_v48, %v4149_v37  ;;  %v4447_v58 = vadd.f32 %v4446_v39, %v4445_v26  ;;  %v4178_v23 = vrot.slane %v4177_v34, 2  ;;  %v4474_v20 = vrot.slane %v4473_v10, 2 }
 0x758   :  { %v4155_v33 = vadd.f32 %v4154_v52, %v4145_v59  ;;  %v4451_v32 = vadd.f32 %v4450_v18, %v4441_v3  ;;  %v4182_v25 = vrot.slane %v4173_v63, 4  ;;  %v4478_v45 = vrot.slane %v4469_v14, 4 }
 0x759   :  { %v4152_v38 = vrot.slane %v4151_v17, 1  ;;  %v4448_v19 = vrot.slane %v4447_v58, 1  ;;  %v4179_v54 = vadd.f32 %v4178_v23, %v4177_v34  ;;  %v4475_v56 = vadd.f32 %v4474_v20, %v4473_v10 }
 0x75a   :  { %v4156_v28 = vrot.slane %v4155_v33, 2  ;;  %v4452_v42 = vrot.slane %v4451_v32, 2  ;;  %v4183_v5 = vadd.f32 %v4182_v25, %v4173_v63  ;;  %v4479_v43 = vadd.f32 %v4478_v45, %v4469_v14  ;;  %v3986_v63 = vpop.f32.mrf.mxu0 }
 0x75b   :  { %v9400_v31 = vadd.f32 %v4152_v38, %v4151_v17  ;;  %v9402_v36 = vadd.f32 %v4448_v19, %v4447_v58  ;;  %v4180_v37 = vrot.slane %v4179_v54, 1  ;;  %v4476_v26 = vrot.slane %v4475_v56, 1 }
 0x75c   :  { %v4157_v4 = vadd.f32 %v4156_v28, %v4155_v33  ;;  %v4453_v52 = vadd.f32 %v4452_v42, %v4451_v32  ;;  %v4184_v59 = vrot.slane %v4183_v5, 2  ;;  %v4480_v3 = vrot.slane %v4479_v43, 2 }
 0x75d   :  { %v10739_v48 = vmax.f32 %v9282_v51, %v9288_v50  ;;  %v10740_v10 = vmax.f32 %v9284_v12, %v9290_v15  ;;  %v9416_v34 = vadd.f32 %v4180_v37, %v4179_v54  ;;  %v9418_v18 = vadd.f32 %v4476_v26, %v4475_v56  ;;  %v3988_v37 = vpop.f32.mrf.mxu0 }
 0x75e   :  { %v4158_v32 = vrot.slane %v4157_v4, 1  ;;  %v4454_v14 = vrot.slane %v4453_v52, 1  ;;  %v4185_v17 = vadd.f32 %v4184_v59, %v4183_v5  ;;  %v4481_v58 = vadd.f32 %v4480_v3, %v4479_v43 }
 0x75f   :  { %v9408_v20 = vmax.f32 %v10739_v48, %v9400_v31  ;;  %v9414_v39 = vmax.f32 %v10740_v10, %v9402_v36  ;;  %v3983_v25 = vadd.f32 %v3982_v61, %v9246_v44  ;;  %v3985_v45 = vadd.f32 %v3984_v55, %v9246_v44 }
 0x760   :  { %v9426_v38 = vadd.f32 %v4158_v32, %v4157_v4  ;;  %v9428_v54 = vadd.f32 %v4454_v14, %v4453_v52  ;;  %v4186_v19 = vrot.slane %v4185_v17, 1  ;;  %v4482_v56 = vrot.slane %v4481_v58, 1 }
 0x761   :  { %v4146_v28 = vmul.f32 %v3983_v25, %v9268_v0  ;;  %v4442_v43 = vmul.f32 %v3983_v25, %v9270_v62  ;;  %v4174_v5 = vmul.f32 %v3985_v45, %v9268_v0  ;;  %v4470_v42 = vmul.f32 %v3985_v45, %v9270_v62 }
 0x762   :  { %10741 = vst [vmem:[#allocation54_spill] sm:$0xff] %v9426_v38  ;;  %10742 = vst [vmem:[#allocation66_spill] sm:$0xff] %v9428_v54  ;;  %v10743_v61 = vmax.f32 %v9302_v49, %v9310_v7  ;;  %v10744_v55 = vmax.f32 %v9304_v24, %v9312_v57  ;;  %v9446_v4 = vadd.f32 %v4186_v19, %v4185_v17 }
 0x763   :  { %v9448_v52 = vadd.f32 %v4482_v56, %v4481_v58  ;;  %v4160_v0 = vrot.slane %v4146_v28, 4  ;;  %v4456_v59 = vrot.slane %v4442_v43, 4  ;;  %v4188_v62 = vrot.slane %v4174_v5, 4 }
 0x764   :  { %v9438_v44 = vmax.f32 %v10743_v61, %v9426_v38  ;;  %v9444_v26 = vmax.f32 %v10744_v55, %v9428_v54  ;;  %v4484_v3 = vrot.slane %v4470_v42, 4  ;;  %v3987_v32 = vadd.f32 %v3986_v63, %v9248_v30 }
 0x765   :  { %10746 = vst [vmem:[#allocation98_spill] sm:$0xff] %v9448_v52  ;;  %v3989_v14 = vadd.f32 %v3988_v37, %v9248_v30  ;;  %v4161_v25 = vadd.f32 %v4160_v0, %v4146_v28  ;;  %v4457_v45 = vadd.f32 %v4456_v59, %v4442_v43  ;;  %v4189_v17 = vadd.f32 %v4188_v62, %v4174_v5 }
 0x766   :  { %10745 = vst [vmem:[#allocation76_spill] sm:$0xff] %v9444_v26  ;;  %v4485_v19 = vadd.f32 %v4484_v3, %v4470_v42  ;;  %v4147_v58 = vmul.f32 %v3987_v32, %v9272_v9  ;;  %v4443_v56 = vmul.f32 %v3987_v32, %v9275_v60 }
 0x767   :  { %v4175_v61 = vmul.f32 %v3989_v14, %v9272_v9  ;;  %v4471_v55 = vmul.f32 %v3989_v14, %v9275_v60  ;;  %v4162_v48 = vrot.slane %v4161_v25, 2  ;;  %v4458_v33 = vrot.slane %v4457_v45, 2 }
 0x768   :  { %v4190_v23 = vrot.slane %v4189_v17, 2  ;;  %v4486_v10 = vrot.slane %v4485_v19, 2  ;;  %v4166_v8 = vrot.slane %v4147_v58, 4  ;;  %v4462_v63 = vrot.slane %v4443_v56, 4 }
 0x769   :  { %v4194_v54 = vrot.slane %v4175_v61, 4  ;;  %v4490_v30 = vrot.slane %v4471_v55, 4  ;;  %v4163_v28 = vadd.f32 %v4162_v48, %v4161_v25  ;;  %v4459_v43 = vadd.f32 %v4458_v33, %v4457_v45 }
 0x76a   :  { %v4191_v5 = vadd.f32 %v4190_v23, %v4189_v17  ;;  %v4487_v42 = vadd.f32 %v4486_v10, %v4485_v19  ;;  %v4167_v37 = vadd.f32 %v4166_v8, %v4147_v58  ;;  %v4463_v0 = vadd.f32 %v4462_v63, %v4443_v56 }
 0x76b   :  { %v4195_v59 = vadd.f32 %v4194_v54, %v4175_v61  ;;  %v4491_v62 = vadd.f32 %v4490_v30, %v4471_v55  ;;  %v4164_v3 = vrot.slane %v4163_v28, 1  ;;  %v4460_v9 = vrot.slane %v4459_v43, 1 }
 0x76c   :  { %v4192_v32 = vrot.slane %v4191_v5, 1  ;;  %v4488_v60 = vrot.slane %v4487_v42, 1  ;;  %v4168_v14 = vrot.slane %v4167_v37, 2  ;;  %v4464_v57 = vrot.slane %v4463_v0, 2 }
 0x76d   :  { %v4196_v24 = vrot.slane %v4195_v59, 2  ;;  %v4492_v52 = vrot.slane %v4491_v62, 2  ;;  %v4165_v26 = vadd.f32 %v4164_v3, %v4163_v28  ;;  %v4461_v38 = vadd.f32 %v4460_v9, %v4459_v43 }
 0x76e   :  { %v9460_v7 = vadd.f32 %v4192_v32, %v4191_v5  ;;  %v9462_v48 = vadd.f32 %v4488_v60, %v4487_v42  ;;  %v4169_v23 = vadd.f32 %v4168_v14, %v4167_v37  ;;  %v4465_v33 = vadd.f32 %v4464_v57, %v4463_v0 }
 0x76f   :  { %v4197_v8 = vadd.f32 %v4196_v24, %v4195_v59  ;;  %v4493_v10 = vadd.f32 %v4492_v52, %v4491_v62  ;;  %v10747_v54 = vmax.f32 %v9334_v22, %v9338_v11  ;;  %v10748_v45 = vmax.f32 %v9336_v53, %v9340_v40 }
 0x770   :  { %v10749_v19 = vrot.slane %v9370_v2, 1  ;;  %v10750_v56 = vrot.slane %v9372_v35, 1  ;;  %v4170_v24 = vrot.slane %v4169_v23, 1  ;;  %v4466_v57 = vrot.slane %v4465_v33, 1 }
 0x771   :  { %v4234_v25 = vmax.f32 %v10747_v54, %v4165_v26  ;;  %v4530_v17 = vmax.f32 %v10748_v45, %v4461_v38  ;;  %v4198_v52 = vrot.slane %v4197_v8, 1  ;;  %v4494_v55 = vrot.slane %v4493_v10, 1 }
 0x772   :  { %v9473_v58 = vadd.f32 %v10749_v19, %v9370_v2  ;;  %v9478_v61 = vadd.f32 %v10750_v56, %v9372_v35  ;;  %v4212_v28 = vrot.slane %v9384_v46, 2  ;;  %v4506_v43 = vrot.slane %v9378_v16, 4 }
 0x773   :  { %v4238_v63 = vmax.f32 %v4234_v25, %v9460_v7  ;;  %v4534_v30 = vmax.f32 %v4530_v17, %v9462_v48  ;;  %v9484_v5 = vadd.f32 %v4170_v24, %v4169_v23  ;;  %v9486_v2 = vadd.f32 %v4466_v57, %v4465_v33 }
 0x774   :  { %v9488_v42 = vadd.f32 %v4198_v52, %v4197_v8  ;;  %v9490_v35 = vadd.f32 %v4494_v55, %v4493_v10  ;;  %v4226_v59 = vrot.slane %v9391_v6, 1  ;;  %v4522_v62 = vrot.slane %v9396_v1, 1 }
 0x775   :  { %v4242_v37 = vmax.f32 %v4238_v63, %v9380_v21  ;;  %v4538_v0 = vmax.f32 %v4534_v30, %v9382_v41  ;;  %v10751_v3 = vmax.f32 %v9346_v27, %v9350_v13  ;;  %v10752_v32 = vmax.f32 %v9348_v47, %v9352_v29 }
 0x776   :  { %v10753_v14 = vmax.f32 %v9408_v20, %v9416_v34  ;;  %v10754_v33 = vmax.f32 %v9414_v39, %v9418_v18 }
 0x777   :  { %v4235_v9 = vmax.f32 %v10751_v3, %v9484_v5  ;;  %v4531_v60 = vmax.f32 %v10752_v32, %v9486_v2  ;;  %v4246_v10 = vsub.f32 %v9334_v22, %v4242_v37  ;;  %v4258_v54 = vsub.f32 %v9338_v11, %v4242_v37 }
 0x778   :  { %v4240_v23 = vmax.f32 %v10753_v14, %v9473_v58  ;;  %v9512_v8 = vmax.f32 %v10754_v33, %v9478_v61  ;;  %v4270_v25 = vsub.f32 %v4165_v26, %v4242_v37  ;;  %v4294_v45 = vsub.f32 %v9380_v21, %v4242_v37 }
 0x779   :  { %v4239_v17 = vmax.f32 %v4235_v9, %v9488_v42  ;;  %v4535_v19 = vmax.f32 %v4531_v60, %v9490_v35  ;;  %v4542_v20 = vsub.f32 %v9336_v53, %v4538_v0  ;;  %v4554_v56 = vsub.f32 %v9340_v40, %v4538_v0 }
 0x77a   :  { %v4252_v24 = vmul.f32 1.442695, %v4246_v10  ;;  %v4264_v57 = vmul.f32 1.442695, %v4258_v54  ;;  %v4276_v39 = vmul.f32 1.442695, %v4270_v25  ;;  %v4566_v52 = vsub.f32 %v4461_v38, %v4538_v0 }
 0x77b   :  { %v4300_v55 = vmul.f32 1.442695, %v4294_v45  ;;  %v4590_v22 = vsub.f32 %v9382_v41, %v4538_v0  ;;  %v9523_v11 = vadd.f32 %v4226_v59, %v9391_v6  ;;  %v4213_v21 = vadd.f32 %v4212_v28, %v9384_v46  ;;  %v9571_v45 = vpop.f32.mrf.mxu0 }
 0x77c   :  { %5999 = vpow2.f32 %v4252_v24  ;;  %v4548_v26 = vmul.f32 1.442695, %v4542_v20  ;;  %v4282_v63 = vsub.f32 %v9460_v7, %v4242_v37  ;;  %v4578_v53 = vsub.f32 %v9462_v48, %v4538_v0 }
 0x77d   :  { %6001 = vpow2.f32 %v4264_v57  ;;  %v4560_v40 = vmul.f32 1.442695, %v4554_v56  ;;  %v4244_v30 = vsub.f32 %v9282_v51, %v4240_v23  ;;  %v4256_v38 = vsub.f32 %v9288_v50, %v4240_v23 }
 0x77e   :  { %6003 = vpow2.f32 %v4276_v39  ;;  %v4572_v3 = vmul.f32 1.442695, %v4566_v52  ;;  %v4268_v41 = vsub.f32 %v9400_v31, %v4240_v23  ;;  %v9532_v6 = vadd.f32 %v4522_v62, %v9396_v1 }
 0x77f   :  { %6005 = vpow2.f32 %v4300_v55  ;;  %v4596_v46 = vmul.f32 1.442695, %v4590_v22  ;;  %v4280_v28 = vsub.f32 %v9416_v34, %v4240_v23  ;;  %v4214_v7 = vrot.slane %v4213_v21, 1 }
 0x780   :  { %6007 = vpow2.f32 %v4548_v26  ;;  %v4288_v48 = vmul.f32 1.442695, %v4282_v63  ;;  %v4292_v37 = vsub.f32 %v9473_v58, %v4240_v23  ;;  %v4540_v51 = vsub.f32 %v9284_v12, %v9512_v8  ;;  %v10756_v26 = vld [vmem:[#allocation65_spill] sm:$0xff] }
 0x781   :  { %6009 = vpow2.f32 %v4560_v40  ;;  %v4584_v50 = vmul.f32 1.442695, %v4578_v53  ;;  %v4552_v31 = vsub.f32 %v9290_v15, %v9512_v8  ;;  %v4564_v1 = vsub.f32 %v9402_v36, %v9512_v8  ;;  %v10757_v53 = vld [vmem:[#allocation54_spill] sm:$0xff] }
 0x782   :  { %6011 = vpow2.f32 %v4572_v3  ;;  %v4248_v0 = vmul.f32 1.442695, %v4244_v30  ;;  %v4576_v34 = vsub.f32 %v9418_v18, %v9512_v8  ;;  %v4507_v59 = vadd.f32 %v4506_v43, %v9378_v16 }
 0x783   :  { %6013 = vpow2.f32 %v4596_v46  ;;  %v4260_v58 = vmul.f32 1.442695, %v4256_v38  ;;  %v4588_v12 = vsub.f32 %v9478_v61, %v9512_v8  ;;  %v9547_v62 = vadd.f32 %v4214_v7, %v4213_v21 }
 0x784   :  { %6015 = vpow2.f32 %v4288_v48  ;;  %v4272_v9 = vmul.f32 1.442695, %v4268_v41  ;;  %v4284_v15 = vmul.f32 1.442695, %v4280_v28  ;;  %v9550_v32 = vmax.f32 %v4239_v17, %v9523_v11 }
 0x785   :  { %6017 = vpow2.f32 %v4584_v50  ;;  %v4296_v36 = vmul.f32 1.442695, %v4292_v37  ;;  %v4544_v60 = vmul.f32 1.442695, %v4540_v51  ;;  %v9553_v18 = vmax.f32 %v4535_v19, %v9532_v6 }
 0x786   :  { %6019 = vpow2.f32 %v4248_v0  ;;  %v4247_v16 = vsub.f32 %v9346_v27, %v9550_v32  ;;  %v4259_v61 = vsub.f32 %v9350_v13, %v9550_v32  ;;  %v4271_v43 = vsub.f32 %v9484_v5, %v9550_v32 }
 0x787   :  { %6021 = vpow2.f32 %v4260_v58  ;;  %v4295_v14 = vsub.f32 %v9523_v11, %v9550_v32  ;;  %v4543_v23 = vsub.f32 %v9348_v47, %v9553_v18  ;;  %v4555_v33 = vsub.f32 %v9352_v29, %v9553_v18 }
 0x788   :  { %6023 = vpow2.f32 %v4272_v9  ;;  %v4556_v8 = vmul.f32 1.442695, %v4552_v31  ;;  %v4508_v10 = vrot.slane %v4507_v59, 2  ;;  %v4568_v13 = vmul.f32 1.442695, %v4564_v1 }
 0x789   :  { %v9567_v27 = vpop.eup %5999  ;;  %6025 = vpow2.f32 %v4284_v15  ;;  %v4580_v54 = vmul.f32 1.442695, %v4576_v34  ;;  %v4592_v25 = vmul.f32 1.442695, %v4588_v12  ;;  %v4567_v47 = vsub.f32 %v9486_v2, %v9553_v18 }
 0x78a   :  { %v9569_v5 = vpop.eup %6001  ;;  %6027 = vpow2.f32 %v4296_v36  ;;  %v4591_v29 = vsub.f32 %v9532_v6, %v9553_v18  ;;  %v4283_v17 = vsub.f32 %v9488_v42, %v9550_v32  ;;  %v4579_v56 = vsub.f32 %v9490_v35, %v9553_v18  ;;  %v10759_v18 = vld [vmem:[#allocation98_spill] sm:$0xff] }
 0x78b   :  { %v9579_v19 = vpop.eup %6003  ;;  %v4306_v20 = vadd.f32 %v9569_v5, %v9567_v27  ;;  %6029 = vpow2.f32 %v4544_v60  ;;  %v10755_v24 = vmax.f32 %v9438_v44, %v9446_v4  ;;  %v4254_v39 = vmul.f32 1.442695, %v4247_v16  ;;  %v9600_v44 = vpop.f32.mrf.mxu0  ;;  %v10758_v60 = vld [vmem:[#allocation76_spill] sm:$0xff] }
 0x78c   :  { %v9591_v57 = vpop.eup %6005  ;;  %6031 = vpow2.f32 %v4556_v8  ;;  %v4266_v42 = vmul.f32 1.442695, %v4259_v61  ;;  %v4509_v52 = vadd.f32 %v4508_v10, %v4507_v59  ;;  %v4278_v11 = vmul.f32 1.442695, %v4271_v43 }
 0x78d   :  { %v9589_v2 = vmax.f32 %v10755_v24, %v9547_v62  ;;  %v9593_v55 = vpop.eup %6007  ;;  %v4310_v22 = vadd.f32 %v9579_v19, %v4306_v20  ;;  %6033 = vpow2.f32 %v4568_v13  ;;  %v4550_v46 = vmul.f32 1.442695, %v4543_v23  ;;  %v9621_v50 = vpop.f32.mrf.mxu0 }
 0x78e   :  { %v9598_v21 = vpop.eup %6009  ;;  %6035 = vpow2.f32 %v4580_v54  ;;  %v4562_v48 = vmul.f32 1.442695, %v4555_v33  ;;  %v4510_v37 = vrot.slane %v4509_v52, 1  ;;  %v4574_v12 = vmul.f32 1.442695, %v4567_v47 }
 0x78f   :  { %v4245_v35 = vsub.f32 %v9302_v49, %v9589_v2  ;;  %v4257_v63 = vsub.f32 %v10756_v26, %v9589_v2  ;;  %v4269_v40 = vsub.f32 %v10757_v53, %v9589_v2  ;;  %v4281_v30 = vsub.f32 %v9446_v4, %v9589_v2  ;;  %v9608_v38 = vpop.eup %6011  ;;  %v9645_v23 = vpop.f32.mrf.mxu0  ;;  %v10766_v53 = vld [vmem:[#allocation138_spill] sm:$0xff] }
 0x790   :  { %v4602_v3 = vadd.f32 %v9598_v21, %v9593_v55  ;;  %6037 = vpow2.f32 %v4592_v25  ;;  %v4302_v49 = vmul.f32 1.442695, %v4295_v14  ;;  %v4293_v41 = vsub.f32 %v9547_v62, %v9589_v2  ;;  %v9614_v6 = vpop.eup %6013  ;;  %v3778_v14 = vpop.permute.xlu0 %3777  ;;  %v10761_v25 = vld [vmem:[#allocation63_spill] sm:$0xff] }
 0x791   :  { %6039 = vpow2.f32 %v4254_v39  ;;  %v9616_v28 = vpop.eup %6015  ;;  %v9627_v34 = vadd.f32 %v4510_v37, %v4509_v52  ;;  %v4598_v9 = vmul.f32 1.442695, %v4591_v29  ;;  %v10760_v16 = vmax.f32 %v10758_v60, %v10759_v18  ;;  %v10762_v29 = vld [vmem:[#allocation128_spill] sm:$0xff]  ;;  %v10763_v39 = vld [vmem:[#allocation66_spill] sm:$0xff] }
 0x792   :  { %v4606_v7 = vadd.f32 %v9608_v38, %v4602_v3  ;;  %6041 = vpow2.f32 %v4266_v42  ;;  %v9619_v51 = vpop.eup %6017  ;;  %v4314_v31 = vadd.f32 %v9616_v28, %v4310_v22  ;;  %v4290_v33 = vmul.f32 1.442695, %v4283_v17 }
 0x793   :  { %6043 = vpow2.f32 %v4278_v11  ;;  %v9624_v1 = vpop.eup %6019  ;;  %v9641_v61 = vmax.f32 %v10760_v16, %v9627_v34  ;;  %v4586_v8 = vmul.f32 1.442695, %v4579_v56  ;;  %v4250_v10 = vmul.f32 1.442695, %v4245_v35  ;;  %v4002_v35 = vpop.f32.mrf.mxu0 }
 0x794   :  { %v4610_v0 = vadd.f32 %v9619_v51, %v4606_v7  ;;  %6045 = vpow2.f32 %v4302_v49  ;;  %v9629_v59 = vpop.eup %6021  ;;  %v4318_v58 = vadd.f32 %v9591_v57, %v4314_v31  ;;  %v4262_v3 = vmul.f32 1.442695, %v4257_v63  ;;  %v10764_v63 = vld [vmem:[#allocation99_spill] sm:$0xff] }
 0x795   :  { %6047 = vpow2.f32 %v4550_v46  ;;  %v9632_v15 = vpop.eup %6023  ;;  %v4304_v36 = vadd.f32 %v9629_v59, %v9624_v1  ;;  %v4541_v47 = vsub.f32 %v10761_v25, %v9641_v61  ;;  %v4553_v20 = vsub.f32 %v10762_v29, %v9641_v61  ;;  %v4004_v60 = vpop.f32.mrf.mxu0 }
 0x796   :  { %v4614_v32 = vadd.f32 %v9614_v6, %v4610_v0  ;;  %6049 = vpow2.f32 %v4562_v48  ;;  %v9643_v43 = vpop.eup %6025  ;;  %v4565_v42 = vsub.f32 %v10763_v39, %v9641_v61  ;;  %v4577_v17 = vsub.f32 %v10759_v18, %v9641_v61  ;;  %v9674_v48 = vpop.permute.xlu0 %3767 }
 0x797   :  { %6051 = vrcp.f32 %v4318_v58  ;;  %v9647_v13 = vpop.eup %6027  ;;  %v4308_v54 = vadd.f32 %v9632_v15, %v4304_v36  ;;  %v4589_v56 = vsub.f32 %v9627_v34, %v9641_v61  ;;  %v4274_v31 = vmul.f32 1.442695, %v4269_v40  ;;  %v5689_v0 = vpop.f32.mrf.mxu1  ;;  %v10767_v61 = vld [vmem:[#allocation137_spill] sm:$0xff] }
 0x798   :  { %6053 = vrcp.f32 %v4614_v32  ;;  %v9654_v24 = vpop.eup %6029  ;;  %v9684_v58 = vadd.f32 %v10764_v63, %v9674_v48  ;;  %v10765_v32 = vld [vmem:[#allocation109_spill] sm:$0xff]  ;;  %v3918_v40 = vadd.f32 %v10766_v53, %v3778_v14  ;;  %v9713_v25 = vadd.f32 %v9600_v44, %v9674_v48 }
 0x799   :  { %6055 = vpow2.f32 %v4574_v12  ;;  %v9662_v52 = vpop.eup %6031  ;;  %v4312_v22 = vadd.f32 %v9643_v43, %v4308_v54  ;;  %v4286_v12 = vmul.f32 1.442695, %v4281_v30  ;;  %v9693_v36 = vadd.f32 %v10765_v32, %v9674_v48 }
 0x79a   :  { %6057 = vpow2.f32 %v4598_v9  ;;  %v9665_v11 = vpop.eup %6033  ;;  %v4600_v26 = vadd.f32 %v9662_v52, %v9654_v24  ;;  %v4298_v30 = vmul.f32 1.442695, %v4293_v41  ;;  %v9709_v54 = vadd.f32 %v9571_v45, %v9674_v48 }
 0x79b   :  { %6059 = vpow2.f32 %v4290_v33  ;;  %v9669_v49 = vpop.eup %6035  ;;  %v4316_v46 = vadd.f32 %v9647_v13, %v4312_v22  ;;  %v3920_v33 = vadd.f32 %v10767_v61, %v3778_v14  ;;  %v4003_v22 = vadd.f32 %v4002_v35, %v3778_v14 }
 0x79c   :  { %6061 = vpow2.f32 %v4586_v8  ;;  %v4604_v37 = vadd.f32 %v9665_v11, %v4600_v26  ;;  %v4082_v8 = vadd.f32 %v5689_v0, %v3778_v14  ;;  %v4005_v26 = vadd.f32 %v4004_v60, %v3778_v14 }
 0x79d   :  { %v9672_v7 = vpop.eup %6037  ;;  %6063 = vpow2.f32 %v4250_v10  ;;  %v4546_v41 = vmul.f32 1.442695, %v4541_v47  ;;  %v4558_v45 = vmul.f32 1.442695, %v4553_v20 }
 0x79e   :  { %v9680_v34 = vpop.eup %6039  ;;  %6065 = vrcp.f32 %v4316_v46  ;;  %v4608_v18 = vadd.f32 %v9669_v49, %v4604_v37  ;;  %v4582_v37 = vmul.f32 1.442695, %v4577_v17 }
 0x79f   :  { %v9689_v9 = vpop.eup %6041  ;;  %6067 = vpow2.f32 %v4262_v3  ;;  %v4570_v3 = vmul.f32 1.442695, %v4565_v42 }
 0x7a0   :  { %v9697_v16 = vpop.eup %6043  ;;  %v4307_v4 = vadd.f32 %v9689_v9, %v9680_v34  ;;  %v4612_v29 = vadd.f32 %v9672_v7, %v4608_v18  ;;  %6069 = vpow2.f32 %v4274_v31  ;;  %v4594_v31 = vmul.f32 1.442695, %v4589_v56 }
 0x7a1   :  { %v9705_v10 = vpop.eup %6045  ;;  %6071 = vpow2.f32 %v4286_v12 }
 0x7a2   :  { %v9716_v39 = vpop.eup %6047  ;;  %v4311_v62 = vadd.f32 %v9697_v16, %v4307_v4  ;;  %6073 = vrcp.f32 %v4612_v29 }
 0x7a3   :  { %v9719_v2 = vpop.eup %6049  ;;  %6075 = vpow2.f32 %v4298_v30 }
 0x7a4   :  { %v6052_v46 = vpop.eup %6051  ;;  %v4603_v44 = vadd.f32 %v9719_v2, %v9716_v39  ;;  %6077 = vpow2.f32 %v4546_v41 }
 0x7a5   :  { %v6054_v0 = vpop.eup %6053  ;;  %v4326_v35 = vmul.f32 %v6052_v46, %v9567_v27  ;;  %v4338_v14 = vmul.f32 %v6052_v46, %v9569_v5  ;;  %v4350_v63 = vmul.f32 %v6052_v46, %v9579_v19  ;;  %v4362_v12 = vmul.f32 %v6052_v46, %v9616_v28 }
 0x7a6   :  { %v9727_v32 = vpop.eup %6055  ;;  %v4622_v47 = vmul.f32 %v6054_v0, %v9593_v55  ;;  %v4634_v20 = vmul.f32 %v6054_v0, %v9598_v21  ;;  %v4646_v42 = vmul.f32 %v6054_v0, %v9608_v38  ;;  %v4658_v17 = vmul.f32 %v6054_v0, %v9619_v51 }
 0x7a7   :  { %v9733_v56 = vpop.eup %6057  ;;  %v4330_v53 = vmul.f32 %v4326_v35, %v3918_v40  ;;  %v4342_v27 = vmul.f32 %v4338_v14, %v3920_v33  ;;  %v4354_v60 = vmul.f32 %v4350_v63, %v4003_v22  ;;  %v4366_v19 = vmul.f32 %v4362_v12, %v4005_v26 }
 0x7a8   :  { %v9735_v5 = vpop.eup %6059  ;;  %v4626_v28 = vmul.f32 %v4622_v47, %v3918_v40  ;;  %v4638_v18 = vmul.f32 %v4634_v20, %v3920_v33  ;;  %v4650_v61 = vmul.f32 %v4646_v42, %v4003_v22  ;;  %v4607_v38 = vadd.f32 %v9727_v32, %v4603_v44 }
 0x7a9   :  { %v9737_v4 = vpop.eup %6061  ;;  %v4346_v55 = vadd.f32 %v4342_v27, %v4330_v53  ;;  %v4315_v21 = vadd.f32 %v9735_v5, %v4311_v62  ;;  %6079 = vpow2.f32 %v4558_v45  ;;  %v4662_v29 = vmul.f32 %v4658_v17, %v4005_v26 }
 0x7aa   :  { %v9741_v51 = vpop.eup %6063  ;;  %v4642_v30 = vadd.f32 %v4638_v18, %v4626_v28  ;;  %v4374_v41 = vmul.f32 %v6052_v46, %v9591_v57  ;;  %v4670_v35 = vmul.f32 %v6054_v0, %v9614_v6  ;;  %v4611_v22 = vadd.f32 %v9737_v4, %v4607_v38 }
 0x7ab   :  { %v6066_v14 = vpop.eup %6065  ;;  %v4358_v40 = vadd.f32 %v4354_v60, %v4346_v55  ;;  %v4319_v33 = vadd.f32 %v9705_v10, %v4315_v21  ;;  %6081 = vpow2.f32 %v4570_v3  ;;  %v4073_v60 = vpop.f32.mrf.mxu1 }
 0x7ac   :  { %v9747_v63 = vpop.eup %6067  ;;  %v4654_v62 = vadd.f32 %v4650_v61, %v4642_v30  ;;  %6083 = vpow2.f32 %v4582_v37  ;;  %v4378_v45 = vmul.f32 %v4374_v41, %v4082_v8  ;;  %v4674_v44 = vmul.f32 %v4670_v35, %v4082_v8 }
 0x7ad   :  { %v4370_v12 = vadd.f32 %v4366_v19, %v4358_v40  ;;  %6085 = vrcp.f32 %v4319_v33  ;;  %v4615_v26 = vadd.f32 %v9733_v56, %v4611_v22  ;;  %v4305_v57 = vadd.f32 %v9747_v63, %v9741_v51  ;;  %v9752_v6 = vpop.eup %6069 }
 0x7ae   :  { %v4666_v46 = vadd.f32 %v4662_v29, %v4654_v62  ;;  %v4324_v0 = vmul.f32 %v6066_v14, %v9624_v1  ;;  %v4336_v3 = vmul.f32 %v6066_v14, %v9629_v59  ;;  %v4348_v47 = vmul.f32 %v6066_v14, %v9632_v15  ;;  %v9757_v20 = vpop.eup %6071 }
 0x7af   :  { %6087 = vrcp.f32 %v4615_v26  ;;  %v4309_v8 = vadd.f32 %v9752_v6, %v4305_v57  ;;  %v9760_v37 = vadd.f32 %v4378_v45, %v4370_v12  ;;  %v4360_v42 = vmul.f32 %v6066_v14, %v9643_v43  ;;  %v6074_v17 = vpop.eup %6073  ;;  %v3783_v45 = vpop.permute.xlu1 %3782  ;;  %v10768_v26 = vld [vmem:[#allocation52_spill] sm:$0xff] }
 0x7b0   :  { %6089 = vpow2.f32 %v4594_v31  ;;  %v9763_v53 = vadd.f32 %v4674_v44, %v4666_v46  ;;  %v4328_v27 = vmul.f32 %v4324_v0, %v9684_v58  ;;  %v4340_v1 = vmul.f32 %v4336_v3, %v9693_v36  ;;  %v9767_v59 = vpop.eup %6075  ;;  %v10769_v46 = vld [vmem:[#allocation64_spill] sm:$0xff] }
 0x7b1   :  { %v4313_v15 = vadd.f32 %v9757_v20, %v4309_v8  ;;  %v4352_v19 = vmul.f32 %v4348_v47, %v9709_v54  ;;  %v4372_v28 = vmul.f32 %v6066_v14, %v9647_v13  ;;  %v4620_v18 = vmul.f32 %v6074_v17, %v9654_v24  ;;  %v9779_v29 = vpop.eup %6077 }
 0x7b2   :  { %v4344_v43 = vadd.f32 %v4340_v1, %v4328_v27  ;;  %v4632_v31 = vmul.f32 %v6074_v17, %v9662_v52  ;;  %v4644_v61 = vmul.f32 %v6074_v17, %v9665_v11  ;;  %v4656_v55 = vmul.f32 %v6074_v17, %v9669_v49  ;;  %v4006_v11 = vpop.f32.mrf.mxu0 }
 0x7b3   :  { %v4317_v21 = vadd.f32 %v9767_v59, %v4313_v15  ;;  %v4624_v38 = vmul.f32 %v4620_v18, %v9684_v58  ;;  %v4668_v30 = vmul.f32 %v6074_v17, %v9672_v7  ;;  %v4074_v41 = vadd.f32 %v4073_v60, %v9674_v48 }
 0x7b4   :  { %v4356_v13 = vadd.f32 %v4352_v19, %v4344_v43  ;;  %v4364_v24 = vmul.f32 %v4360_v42, %v9713_v25  ;;  %v4636_v35 = vmul.f32 %v4632_v31, %v9693_v36  ;;  %v4648_v58 = vmul.f32 %v4644_v61, %v9709_v54  ;;  %v4008_v0 = vpop.f32.mrf.mxu0  ;;  %v5690_v61 = vpop.f32.mrf.mxu1 }
 0x7b5   :  { %6091 = vrcp.f32 %v4317_v21  ;;  %v4376_v14 = vmul.f32 %v4372_v28, %v4074_v41  ;;  %v4660_v62 = vmul.f32 %v4656_v55, %v9713_v25  ;;  %v3922_v57 = vadd.f32 %v10768_v26, %v3783_v45 }
 0x7b6   :  { %v9784_v52 = vpop.eup %6079  ;;  %v4368_v49 = vadd.f32 %v4364_v24, %v4356_v13  ;;  %v4640_v40 = vadd.f32 %v4636_v35, %v4624_v38  ;;  %v3924_v54 = vadd.f32 %v10769_v46, %v3783_v45  ;;  %v4672_v47 = vmul.f32 %v4668_v30, %v4074_v41  ;;  %v10770_v35 = vld [vmem:[#allocation114_spill] sm:$0xff] }
 0x7b7   :  { %v4601_v7 = vadd.f32 %v9784_v52, %v9779_v29  ;;  %v4007_v28 = vadd.f32 %v4006_v11, %v3783_v45  ;;  %v4009_v18 = vadd.f32 %v4008_v0, %v3783_v45  ;;  %v4085_v24 = vadd.f32 %v5690_v61, %v3783_v45 }
 0x7b8   :  { %v9789_v33 = vpop.eup %6081  ;;  %v9791_v48 = vadd.f32 %v4376_v14, %v4368_v49  ;;  %v4652_v22 = vadd.f32 %v4648_v58, %v4640_v40 }
 0x7b9   :  { %v9794_v36 = vpop.eup %6083  ;;  %v4605_v44 = vadd.f32 %v9789_v33, %v4601_v7 }
 0x7ba   :  { %v6086_v12 = vpop.eup %6085  ;;  %v4664_v3 = vadd.f32 %v4660_v62, %v4652_v22 }
 0x7bb   :  { %v4327_v8 = vmul.f32 %v6086_v12, %v9680_v34  ;;  %v4339_v42 = vmul.f32 %v6086_v12, %v9689_v9  ;;  %v4351_v17 = vmul.f32 %v6086_v12, %v9697_v16  ;;  %v4363_v25 = vmul.f32 %v6086_v12, %v9735_v5 }
 0x7bc   :  { %v6088_v27 = vpop.eup %6087  ;;  %v4609_v1 = vadd.f32 %v9794_v36, %v4605_v44  ;;  %v9804_v15 = vadd.f32 %v4672_v47, %v4664_v3  ;;  %v4375_v60 = vmul.f32 %v6086_v12, %v9705_v10  ;;  %v3773_v10 = vpop.permute.xlu1 %3772 }
 0x7bd   :  { %v6090_v19 = vpop.eup %6089  ;;  %v4331_v43 = vmul.f32 %v4327_v8, %v3922_v57  ;;  %v4343_v31 = vmul.f32 %v4339_v42, %v3924_v54  ;;  %v4623_v34 = vmul.f32 %v6088_v27, %v9716_v39  ;;  %v4635_v9 = vmul.f32 %v6088_v27, %v9719_v2  ;;  %v10771_v2 = vld [vmem:[#allocation25_spill] sm:$0xff]  ;;  %v4076_v8 = vpop.f32.mrf.mxu1 }
 0x7be   :  { %v4647_v16 = vmul.f32 %v6088_v27, %v9727_v32  ;;  %v4659_v5 = vmul.f32 %v6088_v27, %v9737_v4  ;;  %v4355_v21 = vmul.f32 %v4351_v17, %v4007_v28  ;;  %v4613_v38 = vadd.f32 %v6090_v19, %v4609_v1 }
 0x7bf   :  { %v4347_v55 = vadd.f32 %v4343_v31, %v4331_v43  ;;  %v4671_v30 = vmul.f32 %v6088_v27, %v9733_v56  ;;  %v4627_v41 = vmul.f32 %v4623_v34, %v3922_v57  ;;  %v4639_v13 = vmul.f32 %v4635_v9, %v3924_v54 }
 0x7c0   :  { %v3912_v11 = vadd.f32 %v10770_v35, %v3773_v10  ;;  %v4367_v14 = vmul.f32 %v4363_v25, %v4009_v18  ;;  %6093 = vrcp.f32 %v4613_v38  ;;  %v3914_v40 = vadd.f32 %v10771_v2, %v3773_v10  ;;  %v10773_v2 = vld [vmem:[#allocation82_spill] sm:$0xff] }
 0x7c1   :  { %v4359_v49 = vadd.f32 %v4355_v21, %v4347_v55  ;;  %v4643_v32 = vadd.f32 %v4639_v13, %v4627_v41  ;;  %v4651_v58 = vmul.f32 %v4647_v16, %v4007_v28  ;;  %v4379_v4 = vmul.f32 %v4375_v60, %v4085_v24 }
 0x7c2   :  { %v6092_v39 = vpop.eup %6091  ;;  %v4663_v45 = vmul.f32 %v4659_v5, %v4009_v18  ;;  %v3997_v57 = vadd.f32 %v9621_v50, %v3773_v10  ;;  %v4675_v47 = vmul.f32 %v4671_v30, %v4085_v24  ;;  %v4077_v25 = vadd.f32 %v4076_v8, %v3773_v10 }
 0x7c3   :  { %v4371_v7 = vadd.f32 %v4367_v14, %v4359_v49  ;;  %v4325_v22 = vmul.f32 %v6092_v39, %v9741_v51  ;;  %v4337_v56 = vmul.f32 %v6092_v39, %v9747_v63  ;;  %v4349_v62 = vmul.f32 %v6092_v39, %v9752_v6 }
 0x7c4   :  { %v4655_v44 = vadd.f32 %v4651_v58, %v4643_v32  ;;  %v4361_v12 = vmul.f32 %v6092_v39, %v9757_v20  ;;  %v4373_v26 = vmul.f32 %v6092_v39, %v9767_v59  ;;  %v3999_v51 = vadd.f32 %v9645_v23, %v3773_v10  ;;  %v4696_v10 = vpop.permute.xlu1 %4695 }
 0x7c5   :  { %v4383_v46 = vadd.f32 %v4379_v4, %v4371_v7  ;;  %v4329_v54 = vmul.f32 %v4325_v22, %v3912_v11  ;;  %v4341_v0 = vmul.f32 %v4337_v56, %v3914_v40  ;;  %v4353_v6 = vmul.f32 %v4349_v62, %v3997_v57  ;;  %v10774_v4 = vld [vmem:[#allocation53_spill] sm:$0xff]  ;;  %v10775_v22 = vld [vmem:[#allocation51_spill] sm:$0xff] }
 0x7c6   :  { %v4667_v3 = vadd.f32 %v4663_v45, %v4655_v44  ;;  %v4365_v20 = vmul.f32 %v4361_v12, %v3999_v51  ;;  %v4377_v50 = vmul.f32 %v4373_v26, %v4077_v25  ;;  %v10776_v62 = vld [vmem:[#allocation107_spill] sm:$0xff] }
 0x7c7   :  { %v4682_v63 = vpack.c.bf16 %v4383_v46, %v9760_v37  ;;  %v4345_v42 = vadd.f32 %v4341_v0, %v4329_v54  ;;  %v10778_v0 = vld [vmem:[#allocation87_spill] sm:$0xff] }
 0x7c8   :  { %v4679_v17 = vadd.f32 %v4675_v47, %v4667_v3  ;;  %v4706_v12 = vpop.permute.xlu1 %4705 }
 0x7c9   :  { %v4357_v27 = vadd.f32 %v4353_v6, %v4345_v42  ;;  %v10779_v42 = vld [vmem:[#allocation27_spill] sm:$0xff] }
 0x7ca   :  { %v4683_v59 = vpack.c.bf16 %v4679_v17, %v9763_v53 }
 0x7cb   :  { %v4369_v1 = vadd.f32 %v4365_v20, %v4357_v27  ;;  %v10780_v20 = vld [vmem:[#allocation70_spill] sm:$0xff] }
 0x7cc   :  { %4736 = vmatprep.subr.bf16.mxu0 %v4683_v59 }
 0x7cd   :  { %v4381_v60 = vadd.f32 %v4377_v50, %v4369_v1  ;;  %4737 = vmatpush1.bf16.msra.mxu0 %v4682_v63  ;;  %v6094_v28 = vpop.eup %6093 }
 0x7ce   :  { %v4621_v18 = vmul.f32 %v6094_v28, %v9779_v29  ;;  %v4633_v23 = vmul.f32 %v6094_v28, %v9784_v52  ;;  %v4645_v37 = vmul.f32 %v6094_v28, %v9789_v33  ;;  %v4657_v43 = vmul.f32 %v6094_v28, %v9794_v36  ;;  %v5731_v52 = vld [vmem:[%s9903_s2 + $0x90] sm:$0xff]  }
 0x7cf   :  { %v4669_v31 = vmul.f32 %v6094_v28, %v6090_v19  ;;  %v4680_v61 = vpack.c.bf16 %v4381_v60, %v9791_v48  ;;  %v10772_v33 = vmov 0   ;;  %v5732_v48 = vld [vmem:[%s9903_s2 + $0x98] sm:$0xff]  }
 0x7d0   :  { %v4625_v34 = vmul.f32 %v4621_v18, %v3912_v11  ;;  %v4637_v9 = vmul.f32 %v4633_v23, %v3914_v40  ;;  %v4649_v16 = vmul.f32 %v4645_v37, %v3997_v57  ;;  %v4661_v55 = vmul.f32 %v4657_v43, %v3999_v51  ;;  %v10777_v57 = vld [vmem:[#allocation28_spill] sm:$0xff] }
 0x7d1   :  { %v4673_v38 = vmul.f32 %v4669_v31, %v4077_v25 }
 0x7d2   :  { %v4641_v53 = vadd.f32 %v4637_v9, %v4625_v34 }
 0x7d4   :  { %v4653_v5 = vadd.f32 %v4649_v16, %v4641_v53 }
 0x7d6   :  { %v4665_v21 = vadd.f32 %v4661_v55, %v4653_v5 }
 0x7d8   :  { %v4677_v30 = vadd.f32 %v4673_v38, %v4665_v21 }
 0x7da   :  { %v4681_v29 = vpack.c.bf16 %v4677_v30, %v9804_v15  ;;  %v4691_v15 = vpop.permute.xlu0 %4690 }
 0x7dc   :  { %4738 = vmatprep.subr.bf16.mxu0 %v4681_v29 }
 0x7dd   :  { %4739 = vmatpush1.bf16.msra.mxu0 %v4680_v61 }
 0x7de   :  { %v4701_v49 = vpop.permute.xlu0 %4700 }
 0x7e0   :  { %5541 = vmatmul.mubr.msk.bf16.vlgmr.msra.gmra.mxu0 %vm590_vm1, %v5731_v52 }
 0x7e1   :  { %4766 = vmatprep.mubr.bf16.mxu0 %v10772_v33 }
 0x7e8   :  { %5542 = vmatmul.mubr.msk.bf16.gmra.mxu0 %vm590_vm1, %v5732_v48 }
 0x7e9   :  { %5033 = vmatprep.mubr.bf16.mxu0 %v10772_v33 }
 0x8a0   :  { %v4758_v36 = vpop.f32.mrf.mxu0 }
 0x8a1   :  { %v4759_v35 = vadd.f32 %v4758_v36, %v4691_v15 }
 0x8a2   :  { %v4760_v19 = vpop.f32.mrf.mxu0 }
 0x8a3   :  { %v4761_v39 = vadd.f32 %v4760_v19, %v4691_v15  ;;  %v4777_v7 = vadd.f32 %v4759_v35, %v10774_v4 }
 0x8a4   :  { %v4762_v41 = vpop.f32.mrf.mxu0 }
 0x8a5   :  { %v4763_v13 = vadd.f32 %v4762_v41, %v4696_v10  ;;  %v4778_v46 = vadd.f32 %v4761_v39, %v10777_v57 }
 0x8a6   :  { %v4764_v24 = vpop.f32.mrf.mxu0 }
 0x8a7   :  { %v4765_v11 = vadd.f32 %v4764_v24, %v4696_v10  ;;  %v4779_v40 = vadd.f32 %v4763_v13, %v10773_v2 }
 0x8a8   :  { %v4768_v14 = vpop.f32.mrf.mxu0 }
 0x8a9   :  { %v4769_v32 = vadd.f32 %v4768_v14, %v4701_v49  ;;  %v4780_v56 = vadd.f32 %v4765_v11, %v10775_v22  ;;  %v4793_v54 = vadd.f32 %v4779_v40, %v4777_v7 }
 0x8aa   :  { %v4770_v58 = vpop.f32.mrf.mxu0 }
 0x8ab   :  { %v4781_v44 = vadd.f32 %v4769_v32, %v10776_v62  ;;  %v4771_v45 = vadd.f32 %v4770_v58, %v4701_v49  ;;  %v4802_v51 = vadd.f32 %v4780_v56, %v4778_v46 }
 0x8ac   :  { %v4772_v26 = vpop.f32.mrf.mxu0 }
 0x8ad   :  { %v4782_v3 = vadd.f32 %v4771_v45, %v10778_v0  ;;  %v4773_v47 = vadd.f32 %v4772_v26, %v4706_v12  ;;  %v4794_v63 = vadd.f32 %v4793_v54, %v4781_v44 }
 0x8ae   :  { %v4774_v8 = vpop.f32.mrf.mxu0 }
 0x8af   :  { %v4783_v6 = vadd.f32 %v4773_v47, %v10779_v42  ;;  %v4775_v17 = vadd.f32 %v4774_v8, %v4706_v12  ;;  %v4803_v25 = vadd.f32 %v4802_v51, %v4782_v3  ;;  %v4874_v8 = vpop.permute.xlu0 %4873  ;;  %v4879_v51 = vpop.permute.xlu1 %4878 }
 0x8b1   :  { %v4795_v27 = vadd.f32 %v4794_v63, %v4783_v6  ;;  %v4784_v59 = vadd.f32 %v4775_v17, %v10780_v20 }
 0x8b3   :  { %v4796_v1 = vrot.slane %v4795_v27, 4  ;;  %v4804_v50 = vadd.f32 %v4803_v25, %v4784_v59  ;;  %v4902_v63 = vpop.permute.xlu0 %4901  ;;  %v4907_v42 = vpop.permute.xlu1 %4906 }
 0x8b5   :  { %v4797_v60 = vadd.f32 %v4796_v1, %v4795_v27  ;;  %v4805_v28 = vrot.slane %v4804_v50, 4 }
 0x8b7   :  { %v4798_v18 = vrot.slane %v4797_v60, 2  ;;  %v4806_v23 = vadd.f32 %v4805_v28, %v4804_v50  ;;  %v4864_v17 = vpop.permute.xlu0 %4863  ;;  %v4869_v25 = vpop.permute.xlu1 %4868 }
 0x8b9   :  { %v4799_v37 = vadd.f32 %v4798_v18, %v4797_v60  ;;  %v4807_v43 = vrot.slane %v4806_v23, 2 }
 0x8bb   :  { %v4800_v31 = vrot.slane %v4799_v37, 1  ;;  %v4808_v61 = vadd.f32 %v4807_v43, %v4806_v23 }
 0x8bd   :  { %v4801_v34 = vadd.f32 %v4800_v31, %v4799_v37  ;;  %v4809_v9 = vrot.slane %v4808_v61, 1 }
 0x8bf   :  { %v4811_v53 = vmul.f32 0.03125, %v4801_v34  ;;  %v4810_v16 = vadd.f32 %v4809_v9, %v4808_v61 }
 0x8c1   :  { %v4813_v5 = vsub.f32 %v4777_v7, %v4811_v53  ;;  %v4815_v55 = vsub.f32 %v4779_v40, %v4811_v53  ;;  %v4817_v21 = vsub.f32 %v4781_v44, %v4811_v53  ;;  %v4812_v38 = vmul.f32 0.03125, %v4810_v16  ;;  %v4897_v16 = vpop.permute.xlu1 %4896 }
 0x8c2   :  { %v4819_v30 = vsub.f32 %v4783_v6, %v4811_v53  ;;  %v4892_v53 = vpop.permute.xlu0 %4891 }
 0x8c3   :  { %v4821_v29 = vmul.f32 %v4813_v5, %v4813_v5  ;;  %v4823_v52 = vmul.f32 %v4815_v55, %v4815_v55  ;;  %v4814_v48 = vsub.f32 %v4778_v46, %v4812_v38  ;;  %v4816_v36 = vsub.f32 %v4780_v56, %v4812_v38 }
 0x8c4   :  { %v4818_v15 = vsub.f32 %v4782_v3, %v4812_v38  ;;  %v4825_v19 = vmul.f32 %v4817_v21, %v4817_v21  ;;  %v4820_v41 = vsub.f32 %v4784_v59, %v4812_v38  ;;  %v4827_v35 = vmul.f32 %v4819_v30, %v4819_v30 }
 0x8c5   :  { %v4829_v10 = vadd.f32 %v4823_v52, %v4821_v29  ;;  %v4822_v13 = vmul.f32 %v4814_v48, %v4814_v48  ;;  %v4824_v24 = vmul.f32 %v4816_v36, %v4816_v36 }
 0x8c6   :  { %v4826_v49 = vmul.f32 %v4818_v15, %v4818_v15  ;;  %v4828_v2 = vmul.f32 %v4820_v41, %v4820_v41 }
 0x8c7   :  { %v4830_v11 = vadd.f32 %v4829_v10, %v4825_v19  ;;  %v4838_v14 = vadd.f32 %v4824_v24, %v4822_v13  ;;  %v5733_v24 = vld [vmem:[%s9903_s2 + $0xa0] sm:$0xff]  }
 0x8c9   :  { %v4831_v39 = vadd.f32 %v4830_v11, %v4827_v35  ;;  %v4839_v40 = vadd.f32 %v4838_v14, %v4826_v49  ;;  %v5734_v35 = vld [vmem:[%s9903_s2 + $0xa8] sm:$0xff]   ;;  %v5735_v11 = vld [vmem:[%s9903_s2 + $0xb0] sm:$0xff]   ;;  %v5736_v49 = vld [vmem:[%s9903_s2 + $0xb8] sm:$0xff]  }
 0x8cb   :  { %v4832_v32 = vrot.slane %v4831_v39, 4  ;;  %v4840_v58 = vadd.f32 %v4839_v40, %v4828_v2 }
 0x8cd   :  { %v4833_v4 = vadd.f32 %v4832_v32, %v4831_v39  ;;  %v4841_v7 = vrot.slane %v4840_v58, 4 }
 0x8cf   :  { %v4834_v22 = vrot.slane %v4833_v4, 2  ;;  %v4842_v62 = vadd.f32 %v4841_v7, %v4840_v58 }
 0x8d1   :  { %v4835_v56 = vadd.f32 %v4834_v22, %v4833_v4  ;;  %v4843_v44 = vrot.slane %v4842_v62, 2 }
 0x8d3   :  { %v4836_v45 = vrot.slane %v4835_v56, 1  ;;  %v4844_v12 = vadd.f32 %v4843_v44, %v4842_v62  ;;  %v4967_v62 = vpop.permute.xlu1 %4966  ;;  %v4962_v44 = vpop.permute.xlu0 %4961 }
 0x8d5   :  { %v4837_v26 = vadd.f32 %v4836_v45, %v4835_v56  ;;  %v4845_v57 = vrot.slane %v4844_v12, 1 }
 0x8d7   :  { %v4847_v46 = vmul.f32 0.03125, %v4837_v26  ;;  %v4846_v54 = vadd.f32 %v4845_v57, %v4844_v12  ;;  %v4957_v26 = vpop.permute.xlu1 %4956 }
 0x8d9   :  { %v4849_v0 = vadd.f32 1e-05, %v4847_v46  ;;  %v4848_v3 = vmul.f32 0.03125, %v4846_v54  ;;  %v4952_v46 = vpop.permute.xlu0 %4951 }
 0x8db   :  { %6095 = vrsqrt.f32 %v4849_v0  ;;  %v4850_v47 = vadd.f32 1e-05, %v4848_v3 }
 0x8dd   :  { %6097 = vrsqrt.f32 %v4850_v47 }
 0x8e8   :  { %v6096_v6 = vpop.eup %6095 }
 0x8e9   :  { %v4859_v27 = vmul.f32 %v6096_v6, %v4819_v30  ;;  %v4857_v20 = vmul.f32 %v6096_v6, %v4817_v21  ;;  %v4853_v60 = vmul.f32 %v6096_v6, %v4813_v5  ;;  %v4855_v28 = vmul.f32 %v6096_v6, %v4815_v55 }
 0x8ea   :  { %v6098_v59 = vpop.eup %6097 }
 0x8eb   :  { %v4887_v1 = vmul.f32 %v4879_v51, %v4859_v27  ;;  %v4885_v50 = vmul.f32 %v4874_v8, %v4857_v20  ;;  %v4860_v18 = vmul.f32 %v6098_v59, %v4820_v41  ;;  %v4858_v23 = vmul.f32 %v6098_v59, %v4818_v15 }
 0x8ec   :  { %v4854_v37 = vmul.f32 %v6098_v59, %v4814_v48  ;;  %v4856_v43 = vmul.f32 %v6098_v59, %v4816_v36  ;;  %v4881_v21 = vmul.f32 %v4864_v17, %v4853_v60  ;;  %v4883_v30 = vmul.f32 %v4869_v25, %v4855_v28 }
 0x8ed   :  { %v4886_v31 = vmul.f32 %v4874_v8, %v4858_v23  ;;  %v4888_v61 = vmul.f32 %v4879_v51, %v4860_v18  ;;  %v9847_v38 = vadd.f32 %v4902_v63, %v4885_v50  ;;  %v9849_v29 = vadd.f32 %v4907_v42, %v4887_v1  ;;  %v4947_v51 = vpop.permute.xlu1 %4946 }
 0x8ee   :  { %v4882_v34 = vmul.f32 %v4864_v17, %v4854_v37  ;;  %v4884_v9 = vmul.f32 %v4869_v25, %v4856_v43  ;;  %v9853_v36 = vadd.f32 %v4892_v53, %v4881_v21  ;;  %v9855_v15 = vadd.f32 %v4897_v16, %v4883_v30  ;;  %v4942_v25 = vpop.permute.xlu0 %4941 }
 0x8ef   :  { %v4914_v52 = vadd.f32 %v4902_v63, %v4886_v31  ;;  %v4916_v19 = vadd.f32 %v4907_v42, %v4888_v61  ;;  %v4919_v48 = vpack.c.bf16 %v9849_v29, %v9847_v38 }
 0x8f0   :  { %v4910_v5 = vadd.f32 %v4892_v53, %v4882_v34  ;;  %v4912_v55 = vadd.f32 %v4897_v16, %v4884_v9  ;;  %v4917_v13 = vpack.c.bf16 %v9855_v15, %v9853_v36 }
 0x8f1   :  { %v4920_v10 = vpack.c.bf16 %v4916_v19, %v4914_v52  ;;  %v4937_v31 = vpop.permute.xlu1 %4936 }
 0x8f2   :  { %v4918_v41 = vpack.c.bf16 %v4912_v55, %v4910_v5  ;;  %v4932_v30 = vpop.permute.xlu0 %4931 }
 0x8f3   :  { %5013 = vmatprep.subr.bf16.mxu0 %v4920_v10 }
 0x8f4   :  { %5014 = vmatpush1.bf16.msra.mxu0 %v4919_v48 }
 0x8f5   :  { %5015 = vmatprep.subr.bf16.mxu0 %v4918_v41 }
 0x8f8   :  { %5016 = vmatpush1.bf16.msra.mxu0 %v4917_v13 }
 0x8fb   :  { %5547 = vmatmul.mubr.msk.bf16.vlgmr.msra.gmra.mxu0 %vm590_vm1, %v5733_v24 }
 0x8fc   :  { %5043 = vmatprep.mubr.bf16.mxu0 %v10772_v33 }
 0x903   :  { %5548 = vmatmul.mubr.msk.bf16.gmra.mxu0 %vm590_vm1, %v5734_v35 }
 0x904   :  { %5053 = vmatprep.mubr.bf16.mxu0 %v10772_v33 }
 0x90b   :  { %5549 = vmatmul.mubr.msk.bf16.gmra.mxu0 %vm590_vm1, %v5735_v11 }
 0x90c   :  { %5063 = vmatprep.mubr.bf16.mxu0 %v10772_v33 }
 0x913   :  { %5550 = vmatmul.mubr.msk.bf16.gmra.mxu0 %vm590_vm1, %v5736_v49 }
 0x9bb   :  { %v5035_v14 = vpop.f32.mrf.mxu0 }
 0x9bc   :  { %v5036_v35 = vadd.f32 %v5035_v14, %v4932_v30  ;;  %v5738_v14 = vld [vmem:[%s9904_s3 + $0x18] sm:$0xff]  }
 0x9bd   :  { %v5037_v39 = vpop.f32.mrf.mxu0 }
 0x9be   :  { %v5038_v5 = vadd.f32 %v5037_v39, %v4932_v30  ;;  %v5737_v39 = vld [vmem:[%s9904_s3 + $0x10] sm:$0xff]  }
 0x9bf   :  { %v5039_v2 = vpop.f32.mrf.mxu0 }
 0x9c0   :  { %v5040_v10 = vadd.f32 %v5039_v2, %v4937_v31  ;;  %v5075_v49 = vmax.f32 %v5038_v5, 0.0  ;;  %v6127_v2 = vmov 0.0  }
 0x9c1   :  { %v5041_v40 = vpop.f32.mrf.mxu0 }
 0x9c2   :  { %v5042_v53 = vadd.f32 %v5041_v40, %v4937_v31  ;;  %v5076_v40 = vmax.f32 %v5040_v10, 0.0 }
 0x9c3   :  { %v5045_v32 = vpop.f32.mrf.mxu0 }
 0x9c4   :  { %v5046_v52 = vadd.f32 %v5045_v32, %v4942_v25  ;;  %v5077_v13 = vmax.f32 %v5042_v53, 0.0 }
 0x9c5   :  { %v5047_v58 = vpop.f32.mrf.mxu0 }
 0x9c6   :  { %v5048_v23 = vadd.f32 %v5047_v58, %v4942_v25  ;;  %v5078_v11 = vmax.f32 %v5046_v52, 0.0 }
 0x9c7   :  { %v5049_v4 = vpop.f32.mrf.mxu0 }
 0x9c8   :  { %v5050_v61 = vadd.f32 %v5049_v4, %v4947_v51  ;;  %v5079_v55 = vmax.f32 %v5048_v23, 0.0  ;;  %v5091_v4 = vpack.c.bf16 %v5077_v13, %v5075_v49 }
 0x9c9   :  { %v5051_v7 = vpop.f32.mrf.mxu0 }
 0x9ca   :  { %v5052_v59 = vadd.f32 %v5051_v7, %v4947_v51  ;;  %v5080_v48 = vmax.f32 %v5050_v61, 0.0  ;;  %v5074_v7 = vmax.f32 %v5036_v35, 0.0 }
 0x9cb   :  { %v5055_v22 = vpop.f32.mrf.mxu0 }
 0x9cc   :  { %v5056_v28 = vadd.f32 %v5055_v22, %v4952_v46  ;;  %v5081_v16 = vmax.f32 %v5052_v59, 0.0  ;;  %v5092_v58 = vpack.c.bf16 %v5080_v48, %v5078_v11  ;;  %v5090_v32 = vpack.c.bf16 %v5076_v40, %v5074_v7 }
 0x9cd   :  { %v5057_v56 = vpop.f32.mrf.mxu0 }
 0x9ce   :  { %v5058_v6 = vadd.f32 %v5057_v56, %v4952_v46  ;;  %v5082_v19 = vmax.f32 %v5056_v28, 0.0  ;;  %v5093_v24 = vpack.c.bf16 %v5081_v16, %v5079_v55 }
 0x9cf   :  { %v5059_v45 = vpop.f32.mrf.mxu0 }
 0x9d0   :  { %v5060_v27 = vadd.f32 %v5059_v45, %v4957_v26  ;;  %v5083_v37 = vmax.f32 %v5058_v6, 0.0 }
 0x9d1   :  { %v5061_v12 = vpop.f32.mrf.mxu0 }
 0x9d2   :  { %v5062_v3 = vadd.f32 %v5061_v12, %v4957_v26  ;;  %v5084_v34 = vmax.f32 %v5060_v27, 0.0 }
 0x9d3   :  { %v5065_v57 = vpop.f32.mrf.mxu0 }
 0x9d4   :  { %v5066_v63 = vadd.f32 %v5065_v57, %v4962_v44  ;;  %v5085_v1 = vmax.f32 %v5062_v3, 0.0  ;;  %v5094_v41 = vpack.c.bf16 %v5084_v34, %v5082_v19 }
 0x9d5   :  { %v5067_v54 = vpop.f32.mrf.mxu0 }
 0x9d6   :  { %v5068_v47 = vadd.f32 %v5067_v54, %v4962_v44  ;;  %v5086_v18 = vmax.f32 %v5066_v63, 0.0  ;;  %v5095_v21 = vpack.c.bf16 %v5085_v1, %v5083_v37  ;;  %v5110_v44 = vpop.permute.xlu1 %5109 }
 0x9d7   :  { %v5069_v0 = vpop.f32.mrf.mxu0 }
 0x9d8   :  { %v5070_v8 = vadd.f32 %v5069_v0, %v4967_v62  ;;  %v5087_v50 = vmax.f32 %v5068_v47, 0.0 }
 0x9d9   :  { %v5071_v42 = vpop.f32.mrf.mxu0 }
 0x9da   :  { %v5072_v17 = vadd.f32 %v5071_v42, %v4967_v62  ;;  %v5088_v20 = vmax.f32 %v5070_v8, 0.0  ;;  %v5105_v62 = vpop.permute.xlu0 %5104  ;;  %v5120_v51 = vpop.permute.xlu1 %5119 }
 0x9dc   :  { %v5089_v60 = vmax.f32 %v5072_v17, 0.0  ;;  %v5096_v9 = vpack.c.bf16 %v5088_v20, %v5086_v18 }
 0x9de   :  { %v5097_v43 = vpack.c.bf16 %v5089_v60, %v5087_v50  ;;  %v5115_v46 = vpop.permute.xlu0 %5114 }
 0x9e0   :  { %5146 = vmatprep.subr.bf16.mxu1 %v5097_v43 }
 0x9e1   :  { %5147 = vmatpush1.bf16.msra.mxu1 %v5096_v9 }
 0x9e2   :  { %5148 = vmatprep.subr.bf16.mxu1 %v5095_v21  ;;  %v5236_v48 = vpop.permute.xlu0 %5235 }
 0x9e5   :  { %5149 = vmatpush1.bf16.msra.mxu1 %v5094_v41  ;;  %v5241_v41 = vpop.permute.xlu1 %5240 }
 0x9e6   :  { %5150 = vmatprep.subr.bf16.mxu1 %v5093_v24  ;;  %v5246_v13 = vpop.permute.xlu0 %5245 }
 0x9e9   :  { %5151 = vmatpush1.bf16.msra.mxu1 %v5092_v58  ;;  %v5260_v24 = vpop.permute.xlu1 %5259 }
 0x9ea   :  { %5152 = vmatprep.subr.bf16.mxu1 %v5091_v4  ;;  %v5265_v11 = vpop.permute.xlu0 %5264 }
 0x9ed   :  { %5153 = vmatpush1.bf16.msra.mxu1 %v5090_v32  ;;  %v5251_v7 = vpop.permute.xlu1 %5250 }
 0x9ee   :  { %5691 = vmatprep.subr.bf16.mxu1 %v6127_v2 }
 0x9f0   :  { %5553 = vmatmul.mubr.msk.bf16.vlgmr.msra.gmra.mxu1 %vm3235_vm2, %v5737_v39 }
 0x9f1   :  { %5178 = vmatprep.mubr.bf16.mxu1 %v10772_v33 }
 0x9f8   :  { %5554 = vmatmul.mubr.msk.bf16.gmra.mxu1 %vm3235_vm2, %v5738_v14 }
 0x9f9   :  { %5695 = vmatprep.mubr.msk.bf16.mxu1 %vm6128_vm3, %v6127_v2 }
 0xab0   :  { %v5172_v22 = vpop.f32.mrf.mxu1 }
 0xab1   :  { %v5173_v57 = vadd.f32 %v5172_v22, %v5105_v62 }
 0xab2   :  { %v5174_v56 = vpop.f32.mrf.mxu1 }
 0xab3   :  { %v5187_v47 = vadd.f32 %v5173_v57, %v9853_v36 }
 0xab4   :  { %v5175_v45 = vpop.f32.mrf.mxu1 }
 0xab5   :  { %v5176_v12 = vadd.f32 %v5175_v45, %v5110_v44  ;;  %v5270_v44 = vpop.permute.xlu0 %5269 }
 0xab6   :  { %v5177_v26 = vpop.f32.mrf.mxu1 }
 0xab7   :  { %v5188_v33 = vadd.f32 %v5176_v12, %v9855_v15  ;;  %v5275_v26 = vpop.permute.xlu1 %5274 }
 0xab8   :  { %v5180_v54 = vpop.f32.mrf.mxu1 }
 0xab9   :  { %v5181_v0 = vadd.f32 %v5180_v54, %v5115_v46  ;;  %v5199_v42 = vadd.f32 %v5188_v33, %v5187_v47 }
 0xaba   :  { %v5182_v3 = vpop.f32.mrf.mxu1 }
 0xabb   :  { %v5189_v8 = vadd.f32 %v5181_v0, %v9847_v38 }
 0xabc   :  { %v5183_v63 = vpop.f32.mrf.mxu1 }
 0xabd   :  { %v5184_v6 = vadd.f32 %v5183_v63, %v5120_v51  ;;  %v5200_v25 = vadd.f32 %v5199_v42, %v5189_v8 }
 0xabe   :  { %v5185_v17 = vpop.f32.mrf.mxu1 }
 0xabf   :  { %v5190_v27 = vadd.f32 %v5184_v6, %v9849_v29 }
 0xac1   :  { %v5201_v20 = vadd.f32 %v5200_v25, %v5190_v27 }
 0xac3   :  { %v5202_v59 = vrot.slane %v5201_v20, 4 }
 0xac5   :  { %v5203_v1 = vadd.f32 %v5202_v59, %v5201_v20 }
 0xac7   :  { %v5204_v50 = vrot.slane %v5203_v1, 2 }
 0xac9   :  { %v5205_v15 = vadd.f32 %v5204_v50, %v5203_v1 }
 0xacb   :  { %v5206_v60 = vrot.slane %v5205_v15, 1 }
 0xacd   :  { %v5207_v36 = vadd.f32 %v5206_v60, %v5205_v15 }
 0xacf   :  { %v5208_v28 = vmul.f32 0.03125, %v5207_v36 }
 0xad1   :  { %v5209_v38 = vsub.f32 %v5187_v47, %v5208_v28  ;;  %v5210_v18 = vsub.f32 %v5188_v33, %v5208_v28  ;;  %v5211_v23 = vsub.f32 %v5189_v8, %v5208_v28  ;;  %v5212_v37 = vsub.f32 %v5190_v27, %v5208_v28 }
 0xad3   :  { %v5213_v43 = vmul.f32 %v5209_v38, %v5209_v38  ;;  %v5214_v31 = vmul.f32 %v5210_v18, %v5210_v18  ;;  %v5215_v61 = vmul.f32 %v5211_v23, %v5211_v23  ;;  %v5216_v29 = vmul.f32 %v5212_v37, %v5212_v37 }
 0xad5   :  { %v5217_v34 = vadd.f32 %v5214_v31, %v5213_v43 }
 0xad7   :  { %v5218_v9 = vadd.f32 %v5217_v34, %v5215_v61  ;;  %v5336_v61 = vpop.permute.xlu0 %5335  ;;  %v5341_v34 = vpop.permute.xlu1 %5340 }
 0xad9   :  { %v5219_v53 = vadd.f32 %v5218_v9, %v5216_v29 }
 0xadb   :  { %v5220_v16 = vrot.slane %v5219_v53, 4  ;;  %v5360_v29 = vpop.permute.xlu0 %5359  ;;  %v5365_v9 = vpop.permute.xlu1 %5364 }
 0xadd   :  { %v5221_v21 = vadd.f32 %v5220_v16, %v5219_v53 }
 0xadf   :  { %v5222_v30 = vrot.slane %v5221_v21, 2  ;;  %v5326_v16 = vpop.permute.xlu0 %5325 }
 0xae1   :  { %v5223_v52 = vadd.f32 %v5222_v30, %v5221_v21  ;;  %v5331_v21 = vpop.permute.xlu1 %5330 }
 0xae3   :  { %v5224_v19 = vrot.slane %v5223_v52, 1 }
 0xae5   :  { %v5225_v5 = vadd.f32 %v5224_v19, %v5223_v52 }
 0xae7   :  { %v5226_v55 = vmul.f32 0.03125, %v5225_v5 }
 0xae9   :  { %v5227_v10 = vadd.f32 1e-05, %v5226_v55 }
 0xaeb   :  { %6099 = vrsqrt.f32 %v5227_v10 }
 0xaf8   :  { %v6100_v35 = vpop.eup %6099 }
 0xaf9   :  { %v5229_v49 = vmul.f32 %v6100_v35, %v5209_v38  ;;  %v5230_v40 = vmul.f32 %v6100_v35, %v5210_v18  ;;  %v5231_v58 = vmul.f32 %v6100_v35, %v5211_v23  ;;  %v5232_v4 = vmul.f32 %v6100_v35, %v5212_v37  ;;  %v5350_v35 = vpop.permute.xlu0 %5349 }
 0xafb   :  { %v5253_v32 = vmul.f32 %v5236_v48, %v5229_v49  ;;  %v5254_v39 = vmul.f32 %v5241_v41, %v5230_v40  ;;  %v5255_v14 = vmul.f32 %v5246_v13, %v5231_v58  ;;  %v5256_v22 = vmul.f32 %v5251_v7, %v5232_v4  ;;  %v5371_v7 = vld [vmem:[%s9903_s2 + $0xc0] sm:$0xf] }
 0xafd   :  { %v5277_v62 = vadd.f32 %v5260_v24, %v5253_v32  ;;  %v5278_v56 = vadd.f32 %v5265_v11, %v5254_v39  ;;  %v5279_v45 = vadd.f32 %v5270_v44, %v5255_v14  ;;  %v5280_v57 = vadd.f32 %v5275_v26, %v5256_v22  ;;  %v5355_v11 = vpop.permute.xlu1 %5354  ;;  %v5421_v32 = vpop.permute.xlu0 %5420 }
 0xaff   :  { %v5289_v12 = vadd.f32 %v5278_v56, %v5277_v62 }
 0xb01   :  { %v5290_v46 = vadd.f32 %v5289_v12, %v5279_v45 }
 0xb03   :  { %v5291_v54 = vadd.f32 %v5290_v46, %v5280_v57 }
 0xb05   :  { %v5292_v33 = vrot.slane %v5291_v54, 4 }
 0xb07   :  { %v5293_v0 = vadd.f32 %v5292_v33, %v5291_v54 }
 0xb09   :  { %v5294_v3 = vrot.slane %v5293_v0, 2 }
 0xb0b   :  { %v5295_v47 = vadd.f32 %v5294_v3, %v5293_v0 }
 0xb0d   :  { %v5296_v8 = vrot.slane %v5295_v47, 1 }
 0xb0f   :  { %v5297_v51 = vadd.f32 %v5296_v8, %v5295_v47 }
 0xb11   :  { %v5298_v63 = vmul.f32 0.03125, %v5297_v51 }
 0xb13   :  { %v5299_v42 = vsub.f32 %v5277_v62, %v5298_v63  ;;  %v5300_v6 = vsub.f32 %v5278_v56, %v5298_v63  ;;  %v5301_v17 = vsub.f32 %v5279_v45, %v5298_v63  ;;  %v5302_v25 = vsub.f32 %v5280_v57, %v5298_v63 }
 0xb15   :  { %v5303_v27 = vmul.f32 %v5299_v42, %v5299_v42  ;;  %v5304_v20 = vmul.f32 %v5300_v6, %v5300_v6  ;;  %v5305_v59 = vmul.f32 %v5301_v17, %v5301_v17  ;;  %v5306_v50 = vmul.f32 %v5302_v25, %v5302_v25 }
 0xb17   :  { %v5307_v1 = vadd.f32 %v5304_v20, %v5303_v27 }
 0xb19   :  { %v5308_v15 = vadd.f32 %v5307_v1, %v5305_v59 }
 0xb1b   :  { %v5309_v60 = vadd.f32 %v5308_v15, %v5306_v50 }
 0xb1d   :  { %v5310_v36 = vrot.slane %v5309_v60, 4 }
 0xb1f   :  { %v5311_v28 = vadd.f32 %v5310_v36, %v5309_v60 }
 0xb21   :  { %v5312_v38 = vrot.slane %v5311_v28, 2 }
 0xb23   :  { %v5313_v18 = vadd.f32 %v5312_v38, %v5311_v28 }
 0xb25   :  { %v5314_v23 = vrot.slane %v5313_v18, 1 }
 0xb27   :  { %v5315_v37 = vadd.f32 %v5314_v23, %v5313_v18 }
 0xb29   :  { %v5316_v43 = vmul.f32 0.03125, %v5315_v37 }
 0xb2b   :  { %v5317_v31 = vadd.f32 1e-05, %v5316_v43 }
 0xb2d   :  { %6101 = vrsqrt.f32 %v5317_v31 }
 0xb3a   :  { %v6102_v53 = vpop.eup %6101 }
 0xb3b   :  { %v5321_v30 = vmul.f32 %v6102_v53, %v5301_v17  ;;  %v5322_v52 = vmul.f32 %v6102_v53, %v5302_v25  ;;  %v5319_v19 = vmul.f32 %v6102_v53, %v5299_v42  ;;  %v5320_v5 = vmul.f32 %v6102_v53, %v5300_v6 }
 0xb3d   :  { %v5345_v55 = vmul.f32 %v5336_v61, %v5321_v30  ;;  %v5346_v10 = vmul.f32 %v5341_v34, %v5322_v52  ;;  %v5343_v48 = vmul.f32 %v5326_v16, %v5319_v19  ;;  %v5344_v41 = vmul.f32 %v5331_v21, %v5320_v5 }
 0xb3f   :  { %v5369_v13 = vadd.f32 %v5360_v29, %v5345_v55  ;;  %v5370_v24 = vadd.f32 %v5365_v9, %v5346_v10  ;;  %v5367_v40 = vadd.f32 %v5350_v35, %v5343_v48  ;;  %v5368_v58 = vadd.f32 %v5355_v11, %v5344_v41 }
 0xb41   :  { %v5373_v49 = vpack.c.bf16 %v5370_v24, %v5369_v13  ;;  %v5372_v4 = vpack.c.bf16 %v5368_v58, %v5367_v40 }
 0xb43   :  { %5692 = vmatpush3.bf16.msra.mxu1 %v5373_v49 }
 0xb44   :  { %5693 = vmatprep.subr.bf16.mxu1 %v6127_v2 }
 0xb47   :  { %5694 = vmatpush3.bf16.msra.mxu1 %v5372_v4 }
 0xb4a   :  { %5696 = vmatmul.mubr.msk.bf16.vlgmr.msra.gmra.mxu1 %vm590_vm1, %v5371_v7 }
 0xc0a   :  { %v5411_v39 = vpop.f32.mrf.mxu1 }
 0xc0b   :  { %v5423_v14 = vadd.f32 %v5421_v32, %v5411_v39 }
 0xc0c   :  { %v5697_v22 = vpop.f32.mrf.mxu1 }
 0xc0d   :  { %5424 = vst [vmem:[#allocation2] sm:$0x1] %v5423_v14 }
 0xc0e   :  { %v5414_v62 = vpop.f32.mrf.mxu1 }
 0xc0f   :  { %6115 = shalt.err (!%p6112_p4)
}
 0xc10   :  { %5434 = dma.vmem_to_hbm [thread:$0]  %s5432_s8, 16, %s9906_s5, [#allocation3]   ;;  %v5698_v2 = vpop.f32.mrf.mxu1 }
 0xc11   :  { %6124 = dma.done.wait [#allocation3], 16  }
 0xc12   :  { %6125 = vsyncadd [#allocation3], 4294967280 }
 0xc13   :  { %5438 = vsyncpa [#allocation3], 1 }

</bundles_post_ra>
